<compile_context>
chip_gen: v5e
topology: v5e:2x2
jax: 0.10.0
libtpu: 0.0.40
codegen_flags: <defaults>
</compile_context>

<pallas_src>
import jax
import jax.numpy as jnp
from jax import lax
from jax.experimental import pallas as pl
from jax.experimental.pallas import tpu as pltpu


# --------------------------------------------------------------------------
# Pallas kernels
# --------------------------------------------------------------------------
def _conv1_kernel(p_ref, w_ref, b_ref, o_ref):
    # p_ref: [1, 676, 9] bf16 ; w_ref: [9, 32] bf16 ; b_ref: [1, 32] f32
    acc = jnp.dot(p_ref[0], w_ref[...], preferred_element_type=jnp.float32)
    acc = jnp.maximum(acc + b_ref[...], 0.0)
    o_ref[0] = acc.astype(o_ref.dtype)


def conv1_relu(p, w, b):
    """conv1 as im2col matmul + bias + relu, grid over batch (parallel)."""
    N = p.shape[0]
    return pl.pallas_call(
        _conv1_kernel,
        out_shape=jax.ShapeDtypeStruct((N, 676, 32), jnp.bfloat16),
        grid=(N,),
        in_specs=[
            pl.BlockSpec((1, 676, 9), lambda n: (n, 0, 0)),
            pl.BlockSpec((9, 32), lambda n: (0, 0)),
            pl.BlockSpec((1, 32), lambda n: (0, 0)),
        ],
        out_specs=pl.BlockSpec((1, 676, 32), lambda n: (n, 0, 0)),
        compiler_params=pltpu.CompilerParams(
            dimension_semantics=("parallel",)),
    )(p, w, b)


def _conv2_relu_pool_kernel(p_ref, w_ref, b_ref, o_ref):
    # p_ref: [1, 4, 144, 288] bf16 (4 pool-quad groups) ; w: [288, 64] bf16
    p = p_ref[0]                                           # [4, 144, 288]
    w = w_ref[...]
    b = b_ref[...]

    def branch(i):
        acc = jnp.dot(p[i], w, preferred_element_type=jnp.float32)  # [144, 64]
        return jnp.maximum(acc + b, 0.0)

    # 2x2 max-pool == elementwise max over the 4 (dh, dw) groups.
    r = jnp.maximum(jnp.maximum(branch(0), branch(1)),
                    jnp.maximum(branch(2), branch(3)))
    o_ref[0] = r.astype(o_ref.dtype)


def conv2_relu_pool(p, w, b):
    """conv2 matmul + bias + relu + 2x2 max-pool fused, grid over batch."""
    N = p.shape[0]
    return pl.pallas_call(
        _conv2_relu_pool_kernel,
        out_shape=jax.ShapeDtypeStruct((N, 144, 64), jnp.bfloat16),
        grid=(N,),
        in_specs=[
            pl.BlockSpec((1, 4, 144, 288), lambda n: (n, 0, 0, 0)),
            pl.BlockSpec((288, 64), lambda n: (0, 0)),
            pl.BlockSpec((1, 64), lambda n: (0, 0)),
        ],
        out_specs=pl.BlockSpec((1, 144, 64), lambda n: (n, 0, 0)),
        compiler_params=pltpu.CompilerParams(
            dimension_semantics=("parallel",)),
    )(p, w, b)


def _fc_head_kernel(x_ref, w1_ref, b1_ref, w2_ref, b2_ref, o_ref, acc_ref):
    k = pl.program_id(0)

    @pl.when(k == 0)
    def _():
        acc_ref[...] = jnp.zeros_like(acc_ref)

    acc_ref[...] += jnp.dot(x_ref[...], w1_ref[...],
                            preferred_element_type=jnp.float32)

    @pl.when(k == pl.num_programs(0) - 1)
    def _():
        h = jnp.maximum(acc_ref[...] + b1_ref[...], 0.0)          # [N, 512] f32
        logits = jnp.dot(h.astype(jnp.bfloat16), w2_ref[...],
                         preferred_element_type=jnp.float32) + b2_ref[...]
        m = jnp.max(logits, axis=-1, keepdims=True)
        s = logits - m
        lse = jnp.log(jnp.sum(jnp.exp(s), axis=-1, keepdims=True))
        o_ref[...] = s - lse


def fc_head(x, w1, b1, w2, b2, *, tk=2304):
    """fc1 + relu + fc2 + log_softmax fused; K-tiled bf16 matmul, f32 acc."""
    N, K = x.shape
    H = w1.shape[1]
    C = w2.shape[1]
    assert K % tk == 0 and tk % 128 == 0
    return pl.pallas_call(
        _fc_head_kernel,
        out_shape=jax.ShapeDtypeStruct((N, C), jnp.float32),
        grid_spec=pltpu.PrefetchScalarGridSpec(
            num_scalar_prefetch=0,
            grid=(K // tk,),
            in_specs=[
                pl.BlockSpec((N, tk), lambda k: (0, k)),
                pl.BlockSpec((tk, H), lambda k: (k, 0)),
                pl.BlockSpec((1, H), lambda k: (0, 0)),
                pl.BlockSpec((H, C), lambda k: (0, 0)),
                pl.BlockSpec((1, C), lambda k: (0, 0)),
            ],
            out_specs=pl.BlockSpec((N, C), lambda k: (0, 0)),
            scratch_shapes=[pltpu.VMEM((N, H), jnp.float32)],
        ),
        compiler_params=pltpu.CompilerParams(
            dimension_semantics=("arbitrary",)),
    )(x, w1, b1, w2, b2)


# --------------------------------------------------------------------------
# im2col glue (layout plumbing only; NHWC, K-order = (kh, kw, ci))
# --------------------------------------------------------------------------
def _im2col_conv1(x_nhwc):
    # x: [N, 28, 28, 1] -> [N, 676, 9]
    N = x_nhwc.shape[0]
    parts = [x_nhwc[:, kh:kh + 26, kw:kw + 26, :]
             for kh in range(3) for kw in range(3)]
    p = jnp.concatenate(parts, axis=-1)                  # [N, 26, 26, 9]
    return p.reshape(N, 676, 9)


def _im2col_conv2_pooled(y1_nhwc):
    # y1: [N, 26, 26, 32] -> [N, 4, 144, 288]
    # Group g = dh*2+dw holds the patches for conv-output positions
    # (2*h2+dh, 2*w2+dw); rows ordered by (h2, w2).  The 2x2 max-pool then
    # becomes a 4-way elementwise max over the group axis inside the kernel.
    # TODO(synk): im2col could be moved fully in-kernel (halo DMA + shifted
    # dots) to avoid the 9x patch expansion in HBM at large batch.
    N = y1_nhwc.shape[0]
    groups = []
    for dh in range(2):
        for dw in range(2):
            parts = [y1_nhwc[:, dh + kh:dh + kh + 23:2,
                             dw + kw:dw + kw + 23:2, :]
                     for kh in range(3) for kw in range(3)]
            g = jnp.concatenate(parts, axis=-1)          # [N, 12, 12, 288]
            groups.append(g.reshape(N, 144, 288))
    return jnp.stack(groups, axis=1)                     # [N, 4, 144, 288]


# --------------------------------------------------------------------------
# Forward pass (mirrors Net.forward, eval mode)
# --------------------------------------------------------------------------
def net_forward(x_nchw, kparams):
    (w1k, b1k, w2k, b2k, wf1k, bf1k, wf2k, bf2k) = kparams
    N = x_nchw.shape[0]

    # NCHW -> NHWC (C=1, so this is layout-free) + bf16 MXU operand cast.
    x = jnp.transpose(x_nchw, (0, 2, 3, 1)).astype(jnp.bfloat16)

    # conv1 + relu
    p1 = _im2col_conv1(x)                                # [N, 676, 9] bf16
    y1 = conv1_relu(p1, w1k, b1k).reshape(N, 26, 26, 32)  # NHWC bf16

    # conv2 + relu + max_pool2d(2) fused
    p2 = _im2col_conv2_pooled(y1)                        # [N, 4, 144, 288] bf16
    pooled = conv2_relu_pool(p2, w2k, b2k)               # [N, 144, 64] bf16
    # TODO(synk): training-mode Dropout2d/Dropout masking not implemented
    # (dropout1 / dropout2 are eval-mode identities here).

    # NHWC flatten; wf1 columns were pre-permuted to match this ordering.
    flat = pooled.reshape(N, 144 * 64)                   # [N, 9216] bf16

    # fc1 + relu + fc2 + log_softmax fused
    return fc_head(flat, wf1k, bf1k, wf2k, bf2k)         # [N, 10] f32


# --------------------------------------------------------------------------
# Parameters: torch-convention init + one-time kernel-layout preparation
# --------------------------------------------------------------------------
def init_params(key):
    ks = jax.random.split(key, 8)
    g = lambda k, shape, s: jax.random.normal(k, shape, jnp.float32) * s
    w1 = g(ks[0], (32, 1, 3, 3), 0.10)
    b1 = g(ks[1], (32,), 0.10)
    w2 = g(ks[2], (64, 32, 3, 3), 0.05)
    b2 = g(ks[3], (64,), 0.05)
    wf1 = g(ks[4], (512, 9216), 0.01)
    bf1 = g(ks[5], (512,), 0.01)
    wf2 = g(ks[6], (10, 512), 0.05)
    bf2 = g(ks[7], (10,), 0.05)
    return (w1, b1, w2, b2, wf1, bf1, wf2, bf2)


def prepare_params(params):
    """One-time weight relayout + bf16 cast (host-side cost)."""
    (w1, b1, w2, b2, wf1, bf1, wf2, bf2) = params
    bf16 = jnp.bfloat16
    w1k = w1.transpose(2, 3, 1, 0).reshape(9, 32).astype(bf16)      # (kh,kw,ci)xCout
    w2k = w2.transpose(2, 3, 1, 0).reshape(288, 64).astype(bf16)
    # fc1 columns permuted from torch (c, h, w) flatten to our NHWC (h, w, c).
    wf1k = (wf1.reshape(512, 64, 12, 12)
            .transpose(2, 3, 1, 0).reshape(9216, 512).astype(bf16))
    wf2k = wf2.T.astype(bf16)                                       # [512, 10]
    return (w1k, b1.reshape(1, 32), w2k, b2.reshape(1, 64),
            wf1k, bf1.reshape(1, 512), wf2k, bf2.reshape(1, 10))


# --------------------------------------------------------------------------
# Pure-JAX reference (torch-convention layout, same bf16 operand quantization)
# --------------------------------------------------------------------------
def reference(x, params):
    (w1, b1, w2, b2, wf1, bf1, wf2, bf2) = params
    bf16, f32 = jnp.bfloat16, jnp.float32
    dn = ("NCHW", "OIHW", "NCHW")
    y = lax.conv_general_dilated(x.astype(bf16), w1.astype(bf16), (1, 1),
                                 "VALID", dimension_numbers=dn,
                                 preferred_element_type=f32)
    y = jnp.maximum(y + b1[None, :, None, None], 0.0).astype(bf16)
    y = lax.conv_general_dilated(y, w2.astype(bf16), (1, 1), "VALID",
                                 dimension_numbers=dn,
                                 preferred_element_type=f32)
    y = jnp.maximum(y + b2[None, :, None, None], 0.0)
    y = lax.reduce_window(y, -jnp.inf, lax.max, (1, 1, 2, 2), (1, 1, 2, 2),
                          "VALID")
    flat = y.reshape(y.shape[0], -1)
    h = jnp.maximum(
        jnp.dot(flat.astype(bf16), wf1.T.astype(bf16),
                preferred_element_type=f32) + bf1, 0.0)
    logits = jnp.dot(h.astype(bf16), wf2.T.astype(bf16),
                     preferred_element_type=f32) + bf2
    return jax.nn.log_softmax(logits, axis=1)


if __name__ == "__main__":
    key = jax.random.PRNGKey(0)
    kx, kp = jax.random.split(key)
    # MNIST-shaped input implied by fc1(9216 = 64*12*12): 28x28, 1 channel.
    x = jax.random.normal(kx, (2, 1, 28, 28), jnp.float32)
    params = init_params(kp)
    kparams = prepare_params(params)

    out = jax.jit(net_forward)(x, kparams)
    out = jax.block_until_ready(out)

    ref = reference(x, params)
    assert out.shape == (2, 10), out.shape
    err = float(jnp.max(jnp.abs(out - ref)))
    assert err < 2e-2, err
    print("KERNEL_OK")
</pallas_src>

<mosaic_0001>
module attributes {stable_mosaic.version = 11 : i64} {
  func.func @_conv1_kernel(%arg0: i32, %arg1: memref<1x676x9xbf16, #tpu.memory_space<vmem>>, %arg2: memref<9x32xbf16, #tpu.memory_space<vmem>>, %arg3: memref<1x32xf32, #tpu.memory_space<vmem>>, %arg4: memref<1x676x32xbf16, #tpu.memory_space<vmem>>) attributes {dimension_semantics = [#tpu.dimension_semantics<parallel>], iteration_bounds = array<i64: 2>, scalar_prefetch = 0 : i64, scratch_operands = 0 : i64, tpu.core_type = #tpu.core_type<tc>, window_params = [{transform_indices = @transform_0, window_bounds = array<i64: 1, 676, 9>}, {pipeline_mode = #tpu.pipeline_mode<synchronous>, transform_indices = @transform_1, window_bounds = array<i64: 9, 32>}, {pipeline_mode = #tpu.pipeline_mode<synchronous>, transform_indices = @transform_2, window_bounds = array<i64: 1, 32>}, {transform_indices = @transform_3, window_bounds = array<i64: 1, 676, 32>}]} {
    %c0 = arith.constant 0 : index
    %c0_0 = arith.constant 0 : index
    %c0_1 = arith.constant 0 : index
    %0 = vector.load %arg1[%c0, %c0_0, %c0_1] : memref<1x676x9xbf16, #tpu.memory_space<vmem>>, vector<1x676x9xbf16>
    %1 = vector.shape_cast %0 : vector<1x676x9xbf16> to vector<676x9xbf16>
    %c0_2 = arith.constant 0 : index
    %c0_3 = arith.constant 0 : index
    %2 = vector.load %arg2[%c0_2, %c0_3] : memref<9x32xbf16, #tpu.memory_space<vmem>>, vector<9x32xbf16>
    %cst = arith.constant dense<0.000000e+00> : vector<676x32xf32>
    %3 = tpu.matmul %1, %2, %cst {dimension_numbers = #tpu.dot_dimension_numbers<[1], [0], [0], [1], [0, 0, 1, 1], [], []>} : vector<676x9xbf16>, vector<9x32xbf16>, vector<676x32xf32> -> vector<676x32xf32>
    %c0_4 = arith.constant 0 : index
    %c0_5 = arith.constant 0 : index
    %4 = vector.load %arg3[%c0_4, %c0_5] : memref<1x32xf32, #tpu.memory_space<vmem>>, vector<1x32xf32>
    %5 = vector.broadcast %4 : vector<1x32xf32> to vector<676x32xf32>
    %6 = arith.addf %3, %5 : vector<676x32xf32>
    %cst_6 = arith.constant 0.000000e+00 : f32
    %7 = vector.broadcast %cst_6 : f32 to vector<676x32xf32>
    %8 = arith.maximumf %6, %7 : vector<676x32xf32>
    %9 = arith.truncf %8 : vector<676x32xf32> to vector<676x32xbf16>
    %c0_7 = arith.constant 0 : index
    %c0_8 = arith.constant 0 : index
    %c0_9 = arith.constant 0 : index
    %10 = vector.load %arg4[%c0_7, %c0_8, %c0_9] : memref<1x676x32xbf16, #tpu.memory_space<vmem>>, vector<1x676x32xbf16>
    %11 = vector.shape_cast %10 : vector<1x676x32xbf16> to vector<676x32xbf16>
    %12 = vector.shape_cast %9 : vector<676x32xbf16> to vector<1x676x32xbf16>
    tpu.vector_store %arg4[%c0_7, %c0_8, %c0_9], %12 {strides = array<i32>} : memref<1x676x32xbf16, #tpu.memory_space<vmem>>, vector<1x676x32xbf16>,
    return
  }
  func.func @transform_0(%arg0: i32) -> (i32, i32, i32) {
    %c0_i32 = arith.constant 0 : i32
    %c0_i32_0 = arith.constant 0 : i32
    %c0_i32_1 = arith.constant 0 : i32
    return %arg0, %c0_i32, %c0_i32_0 : i32, i32, i32
  }
  func.func @transform_1(%arg0: i32) -> (i32, i32) {
    %c0_i32 = arith.constant 0 : i32
    %c0_i32_0 = arith.constant 0 : i32
    %c0_i32_1 = arith.constant 0 : i32
    return %c0_i32, %c0_i32_0 : i32, i32
  }
  func.func @transform_2(%arg0: i32) -> (i32, i32) {
    %c0_i32 = arith.constant 0 : i32
    %c0_i32_0 = arith.constant 0 : i32
    %c0_i32_1 = arith.constant 0 : i32
    return %c0_i32, %c0_i32_0 : i32, i32
  }
  func.func @transform_3(%arg0: i32) -> (i32, i32, i32) {
    %c0_i32 = arith.constant 0 : i32
    %c0_i32_0 = arith.constant 0 : i32
    %c0_i32_1 = arith.constant 0 : i32
    return %arg0, %c0_i32, %c0_i32_0 : i32, i32, i32
  }
}

module attributes {stable_mosaic.version = 11 : i64} {
  func.func @_conv2_relu_pool_kernel(%arg0: i32, %arg1: memref<1x4x144x288xbf16, #tpu.memory_space<vmem>>, %arg2: memref<288x64xbf16, #tpu.memory_space<vmem>>, %arg3: memref<1x64xf32, #tpu.memory_space<vmem>>, %arg4: memref<1x144x64xbf16, #tpu.memory_space<vmem>>) attributes {dimension_semantics = [#tpu.dimension_semantics<parallel>], iteration_bounds = array<i64: 2>, scalar_prefetch = 0 : i64, scratch_operands = 0 : i64, tpu.core_type = #tpu.core_type<tc>, window_params = [{transform_indices = @transform_0, window_bounds = array<i64: 1, 4, 144, 288>}, {pipeline_mode = #tpu.pipeline_mode<synchronous>, transform_indices = @transform_1, window_bounds = array<i64: 288, 64>}, {pipeline_mode = #tpu.pipeline_mode<synchronous>, transform_indices = @transform_2, window_bounds = array<i64: 1, 64>}, {transform_indices = @transform_3, window_bounds = array<i64: 1, 144, 64>}]} {
    %c0 = arith.constant 0 : index
    %c0_0 = arith.constant 0 : index
    %c0_1 = arith.constant 0 : index
    %c0_2 = arith.constant 0 : index
    %0 = vector.load %arg1[%c0, %c0_0, %c0_1, %c0_2] : memref<1x4x144x288xbf16, #tpu.memory_space<vmem>>, vector<1x4x144x288xbf16>
    %1 = vector.shape_cast %0 : vector<1x4x144x288xbf16> to vector<4x144x288xbf16>
    %c0_3 = arith.constant 0 : index
    %c0_4 = arith.constant 0 : index
    %2 = vector.load %arg2[%c0_3, %c0_4] : memref<288x64xbf16, #tpu.memory_space<vmem>>, vector<288x64xbf16>
    %c0_5 = arith.constant 0 : index
    %c0_6 = arith.constant 0 : index
    %3 = vector.load %arg3[%c0_5, %c0_6] : memref<1x64xf32, #tpu.memory_space<vmem>>, vector<1x64xf32>
    %4 = vector.extract_strided_slice %1 {offsets = [0, 0, 0], sizes = [1, 144, 288], strides = [1, 1, 1]} : vector<4x144x288xbf16> to vector<1x144x288xbf16>
    %5 = vector.shape_cast %4 : vector<1x144x288xbf16> to vector<144x288xbf16>
    %cst = arith.constant dense<0.000000e+00> : vector<144x64xf32>
    %6 = tpu.matmul %5, %2, %cst {dimension_numbers = #tpu.dot_dimension_numbers<[1], [0], [0], [1], [0, 0, 1, 1], [], []>} : vector<144x288xbf16>, vector<288x64xbf16>, vector<144x64xf32> -> vector<144x64xf32>
    %7 = vector.broadcast %3 : vector<1x64xf32> to vector<144x64xf32>
    %8 = arith.addf %6, %7 : vector<144x64xf32>
    %cst_7 = arith.constant 0.000000e+00 : f32
    %9 = vector.broadcast %cst_7 : f32 to vector<144x64xf32>
    %10 = arith.maximumf %8, %9 : vector<144x64xf32>
    %11 = vector.extract_strided_slice %1 {offsets = [1, 0, 0], sizes = [1, 144, 288], strides = [1, 1, 1]} : vector<4x144x288xbf16> to vector<1x144x288xbf16>
    %12 = vector.shape_cast %11 : vector<1x144x288xbf16> to vector<144x288xbf16>
    %cst_8 = arith.constant dense<0.000000e+00> : vector<144x64xf32>
    %13 = tpu.matmul %12, %2, %cst_8 {dimension_numbers = #tpu.dot_dimension_numbers<[1], [0], [0], [1], [0, 0, 1, 1], [], []>} : vector<144x288xbf16>, vector<288x64xbf16>, vector<144x64xf32> -> vector<144x64xf32>
    %14 = vector.broadcast %3 : vector<1x64xf32> to vector<144x64xf32>
    %15 = arith.addf %13, %14 : vector<144x64xf32>
    %cst_9 = arith.constant 0.000000e+00 : f32
    %16 = vector.broadcast %cst_9 : f32 to vector<144x64xf32>
    %17 = arith.maximumf %15, %16 : vector<144x64xf32>
    %18 = arith.maximumf %10, %17 : vector<144x64xf32>
    %19 = vector.extract_strided_slice %1 {offsets = [2, 0, 0], sizes = [1, 144, 288], strides = [1, 1, 1]} : vector<4x144x288xbf16> to vector<1x144x288xbf16>
    %20 = vector.shape_cast %19 : vector<1x144x288xbf16> to vector<144x288xbf16>
    %cst_10 = arith.constant dense<0.000000e+00> : vector<144x64xf32>
    %21 = tpu.matmul %20, %2, %cst_10 {dimension_numbers = #tpu.dot_dimension_numbers<[1], [0], [0], [1], [0, 0, 1, 1], [], []>} : vector<144x288xbf16>, vector<288x64xbf16>, vector<144x64xf32> -> vector<144x64xf32>
    %22 = vector.broadcast %3 : vector<1x64xf32> to vector<144x64xf32>
    %23 = arith.addf %21, %22 : vector<144x64xf32>
    %cst_11 = arith.constant 0.000000e+00 : f32
    %24 = vector.broadcast %cst_11 : f32 to vector<144x64xf32>
    %25 = arith.maximumf %23, %24 : vector<144x64xf32>
    %26 = vector.extract_strided_slice %1 {offsets = [3, 0, 0], sizes = [1, 144, 288], strides = [1, 1, 1]} : vector<4x144x288xbf16> to vector<1x144x288xbf16>
    %27 = vector.shape_cast %26 : vector<1x144x288xbf16> to vector<144x288xbf16>
    %cst_12 = arith.constant dense<0.000000e+00> : vector<144x64xf32>
    %28 = tpu.matmul %27, %2, %cst_12 {dimension_numbers = #tpu.dot_dimension_numbers<[1], [0], [0], [1], [0, 0, 1, 1], [], []>} : vector<144x288xbf16>, vector<288x64xbf16>, vector<144x64xf32> -> vector<144x64xf32>
    %29 = vector.broadcast %3 : vector<1x64xf32> to vector<144x64xf32>
    %30 = arith.addf %28, %29 : vector<144x64xf32>
    %cst_13 = arith.constant 0.000000e+00 : f32
    %31 = vector.broadcast %cst_13 : f32 to vector<144x64xf32>
    %32 = arith.maximumf %30, %31 : vector<144x64xf32>
    %33 = arith.maximumf %25, %32 : vector<144x64xf32>
    %34 = arith.maximumf %18, %33 : vector<144x64xf32>
    %35 = arith.truncf %34 : vector<144x64xf32> to vector<144x64xbf16>
    %c0_14 = arith.constant 0 : index
    %c0_15 = arith.constant 0 : index
    %c0_16 = arith.constant 0 : index
    %36 = vector.load %arg4[%c0_14, %c0_15, %c0_16] : memref<1x144x64xbf16, #tpu.memory_space<vmem>>, vector<1x144x64xbf16>
    %37 = vector.shape_cast %36 : vector<1x144x64xbf16> to vector<144x64xbf16>
    %38 = vector.shape_cast %35 : vector<144x64xbf16> to vector<1x144x64xbf16>
    tpu.vector_store %arg4[%c0_14, %c0_15, %c0_16], %38 {strides = array<i32>} : memref<1x144x64xbf16, #tpu.memory_space<vmem>>, vector<1x144x64xbf16>,
    return
  }
  func.func @transform_0(%arg0: i32) -> (i32, i32, i32, i32) {
    %c0_i32 = arith.constant 0 : i32
    %c0_i32_0 = arith.constant 0 : i32
    %c0_i32_1 = arith.constant 0 : i32
    %c0_i32_2 = arith.constant 0 : i32
    return %arg0, %c0_i32, %c0_i32_0, %c0_i32_1 : i32, i32, i32, i32
  }
  func.func @transform_1(%arg0: i32) -> (i32, i32) {
    %c0_i32 = arith.constant 0 : i32
    %c0_i32_0 = arith.constant 0 : i32
    %c0_i32_1 = arith.constant 0 : i32
    return %c0_i32, %c0_i32_0 : i32, i32
  }
  func.func @transform_2(%arg0: i32) -> (i32, i32) {
    %c0_i32 = arith.constant 0 : i32
    %c0_i32_0 = arith.constant 0 : i32
    %c0_i32_1 = arith.constant 0 : i32
    return %c0_i32, %c0_i32_0 : i32, i32
  }
  func.func @transform_3(%arg0: i32) -> (i32, i32, i32) {
    %c0_i32 = arith.constant 0 : i32
    %c0_i32_0 = arith.constant 0 : i32
    %c0_i32_1 = arith.constant 0 : i32
    return %arg0, %c0_i32, %c0_i32_0 : i32, i32, i32
  }
}

module attributes {stable_mosaic.version = 11 : i64} {
  func.func @_fc_head_kernel(%arg0: i32, %arg1: memref<2x2304xbf16, #tpu.memory_space<vmem>>, %arg2: memref<2304x512xbf16, #tpu.memory_space<vmem>>, %arg3: memref<1x512xf32, #tpu.memory_space<vmem>>, %arg4: memref<512x10xbf16, #tpu.memory_space<vmem>>, %arg5: memref<1x10xf32, #tpu.memory_space<vmem>>, %arg6: memref<2x10xf32, #tpu.memory_space<vmem>>, %arg7: memref<2x512xf32, #tpu.memory_space<vmem>>) attributes {dimension_semantics = [#tpu.dimension_semantics<arbitrary>], iteration_bounds = array<i64: 4>, scalar_prefetch = 0 : i64, scratch_operands = 1 : i64, tpu.core_type = #tpu.core_type<tc>, window_params = [{transform_indices = @transform_0, window_bounds = array<i64: 2, 2304>}, {transform_indices = @transform_1, window_bounds = array<i64: 2304, 512>}, {pipeline_mode = #tpu.pipeline_mode<synchronous>, transform_indices = @transform_2, window_bounds = array<i64: 1, 512>}, {pipeline_mode = #tpu.pipeline_mode<synchronous>, transform_indices = @transform_3, window_bounds = array<i64: 512, 10>}, {pipeline_mode = #tpu.pipeline_mode<synchronous>, transform_indices = @transform_4, window_bounds = array<i64: 1, 10>}, {pipeline_mode = #tpu.pipeline_mode<synchronous>, transform_indices = @transform_5, window_bounds = array<i64: 2, 10>}]} {
    %c0_i32 = arith.constant 0 : i32
    %0 = arith.cmpi eq, %arg0, %c0_i32 : i32
    %1 = arith.extui %0 : i1 to i32
    %c0_i32_0 = arith.constant 0 : i32
    %2 = arith.cmpi ne, %1, %c0_i32_0 : i32
    scf.if %2 {
      %cst_9 = arith.constant 0.000000e+00 : f32
      %12 = vector.broadcast %cst_9 : f32 to vector<2x512xf32>
      %c0_10 = arith.constant 0 : index
      %c0_11 = arith.constant 0 : index
      %13 = vector.load %arg7[%c0_10, %c0_11] : memref<2x512xf32, #tpu.memory_space<vmem>>, vector<2x512xf32>
      tpu.vector_store %arg7[%c0_10, %c0_11], %12 {strides = array<i32>} : memref<2x512xf32, #tpu.memory_space<vmem>>, vector<2x512xf32>,
    } else {
    }
    %c0 = arith.constant 0 : index
    %c0_1 = arith.constant 0 : index
    %3 = vector.load %arg7[%c0, %c0_1] : memref<2x512xf32, #tpu.memory_space<vmem>>, vector<2x512xf32>
    %c0_2 = arith.constant 0 : index
    %c0_3 = arith.constant 0 : index
    %4 = vector.load %arg1[%c0_2, %c0_3] : memref<2x2304xbf16, #tpu.memory_space<vmem>>, vector<2x2304xbf16>
    %c0_4 = arith.constant 0 : index
    %c0_5 = arith.constant 0 : index
    %5 = vector.load %arg2[%c0_4, %c0_5] : memref<2304x512xbf16, #tpu.memory_space<vmem>>, vector<2304x512xbf16>
    %cst = arith.constant dense<0.000000e+00> : vector<2x512xf32>
    %6 = tpu.matmul %4, %5, %cst {dimension_numbers = #tpu.dot_dimension_numbers<[1], [0], [0], [1], [0, 0, 1, 1], [], []>} : vector<2x2304xbf16>, vector<2304x512xbf16>, vector<2x512xf32> -> vector<2x512xf32>
    %7 = arith.addf %3, %6 : vector<2x512xf32>
    %c0_6 = arith.constant 0 : index
    %c0_7 = arith.constant 0 : index
    %8 = vector.load %arg7[%c0_6, %c0_7] : memref<2x512xf32, #tpu.memory_space<vmem>>, vector<2x512xf32>
    tpu.vector_store %arg7[%c0_6, %c0_7], %7 {strides = array<i32>} : memref<2x512xf32, #tpu.memory_space<vmem>>, vector<2x512xf32>,
    %c3_i32 = arith.constant 3 : i32
    %9 = arith.cmpi eq, %arg0, %c3_i32 : i32
    %10 = arith.extui %9 : i1 to i32
    %c0_i32_8 = arith.constant 0 : i32
    %11 = arith.cmpi ne, %10, %c0_i32_8 : i32
    scf.if %11 {
      %c0_9 = arith.constant 0 : index
      %c0_10 = arith.constant 0 : index
      %12 = vector.load %arg7[%c0_9, %c0_10] : memref<2x512xf32, #tpu.memory_space<vmem>>, vector<2x512xf32>
      %c0_11 = arith.constant 0 : index
      %c0_12 = arith.constant 0 : index
      %13 = vector.load %arg3[%c0_11, %c0_12] : memref<1x512xf32, #tpu.memory_space<vmem>>, vector<1x512xf32>
      %14 = vector.broadcast %13 : vector<1x512xf32> to vector<2x512xf32>
      %15 = arith.addf %12, %14 : vector<2x512xf32>
      %cst_13 = arith.constant 0.000000e+00 : f32
      %16 = vector.broadcast %cst_13 : f32 to vector<2x512xf32>
      %17 = arith.maximumf %15, %16 : vector<2x512xf32>
      %18 = arith.truncf %17 : vector<2x512xf32> to vector<2x512xbf16>
      %c0_14 = arith.constant 0 : index
      %c0_15 = arith.constant 0 : index
      %19 = vector.load %arg4[%c0_14, %c0_15] : memref<512x10xbf16, #tpu.memory_space<vmem>>, vector<512x10xbf16>
      %cst_16 = arith.constant dense<0.000000e+00> : vector<2x10xf32>
      %20 = tpu.matmul %18, %19, %cst_16 {dimension_numbers = #tpu.dot_dimension_numbers<[1], [0], [0], [1], [0, 0, 1, 1], [], []>} : vector<2x512xbf16>, vector<512x10xbf16>, vector<2x10xf32> -> vector<2x10xf32>
      %c0_17 = arith.constant 0 : index
      %c0_18 = arith.constant 0 : index
      %21 = vector.load %arg5[%c0_17, %c0_18] : memref<1x10xf32, #tpu.memory_space<vmem>>, vector<1x10xf32>
      %22 = vector.broadcast %21 : vector<1x10xf32> to vector<2x10xf32>
      %23 = arith.addf %20, %22 : vector<2x10xf32>
      %cst_19 = arith.constant dense<0xFF800000> : vector<2xf32>
      %24 = vector.multi_reduction <maximumf>, %23, %cst_19 [1] : vector<2x10xf32> to vector<2xf32>
      %25 = vector.shape_cast %24 : vector<2xf32> to vector<2x1xf32>
      %26 = vector.broadcast %25 : vector<2x1xf32> to vector<2x10xf32>
      %27 = arith.subf %23, %26 : vector<2x10xf32>
      %28 = math.exp %27 : vector<2x10xf32>
      %cst_20 = arith.constant dense<0.000000e+00> : vector<2xf32>
      %29 = vector.multi_reduction <add>, %28, %cst_20 [1] : vector<2x10xf32> to vector<2xf32>
      %30 = vector.shape_cast %29 : vector<2xf32> to vector<2x1xf32>
      %31 = math.log %30 : vector<2x1xf32>
      %32 = vector.broadcast %31 : vector<2x1xf32> to vector<2x10xf32>
      %33 = arith.subf %27, %32 : vector<2x10xf32>
      %c0_21 = arith.constant 0 : index
      %c0_22 = arith.constant 0 : index
      %34 = vector.load %arg6[%c0_21, %c0_22] : memref<2x10xf32, #tpu.memory_space<vmem>>, vector<2x10xf32>
      tpu.vector_store %arg6[%c0_21, %c0_22], %33 {strides = array<i32>} : memref<2x10xf32, #tpu.memory_space<vmem>>, vector<2x10xf32>,
    } else {
    }
    return
  }
  func.func @transform_0(%arg0: i32) -> (i32, i32) {
    %c0_i32 = arith.constant 0 : i32
    %c0_i32_0 = arith.constant 0 : i32
    return %c0_i32, %arg0 : i32, i32
  }
  func.func @transform_1(%arg0: i32) -> (i32, i32) {
    %c0_i32 = arith.constant 0 : i32
    %c0_i32_0 = arith.constant 0 : i32
    return %arg0, %c0_i32 : i32, i32
  }
  func.func @transform_2(%arg0: i32) -> (i32, i32) {
    %c0_i32 = arith.constant 0 : i32
    %c0_i32_0 = arith.constant 0 : i32
    %c0_i32_1 = arith.constant 0 : i32
    return %c0_i32, %c0_i32_0 : i32, i32
  }
  func.func @transform_3(%arg0: i32) -> (i32, i32) {
    %c0_i32 = arith.constant 0 : i32
    %c0_i32_0 = arith.constant 0 : i32
    %c0_i32_1 = arith.constant 0 : i32
    return %c0_i32, %c0_i32_0 : i32, i32
  }
  func.func @transform_4(%arg0: i32) -> (i32, i32) {
    %c0_i32 = arith.constant 0 : i32
    %c0_i32_0 = arith.constant 0 : i32
    %c0_i32_1 = arith.constant 0 : i32
    return %c0_i32, %c0_i32_0 : i32, i32
  }
  func.func @transform_5(%arg0: i32) -> (i32, i32) {
    %c0_i32 = arith.constant 0 : i32
    %c0_i32_0 = arith.constant 0 : i32
    %c0_i32_1 = arith.constant 0 : i32
    return %c0_i32, %c0_i32_0 : i32, i32
  }
}

</mosaic_0001>

<bundles_post_ra>
// kernel: net_forward.3
= control target key start
LH: loop header
LB: loop body
LE: loop exit
PB: predicated region body
PF: predicated region fallthrough
CT: control target
= control target key end

     0   :  { %8 = vsyncpa [#allocation3], 0  ;;  %s2005_s0 = inlined_call_operand.vmem [shape: bf16[2,676,9], index: 0, kind: input, shape index: {}]   ;;  %s2006_s1 = inlined_call_operand.hbm [shape: bf16[9,32], index: 1, kind: input, shape index: {}]   ;;  %s2007_s2 = inlined_call_operand.hbm [shape: f32[1,32], index: 2, kind: input, shape index: {}]   ;;  %s2008_s3 = inlined_call_operand.vmem [shape: bf16[2,676,32], index: 3, kind: output, shape index: {}]  }
   0x1   :  { %9 = vsyncpa [#allocation5], 0  ;;  %s1616_s12 = smov 0  }
   0x2 LB: > { %s125_s15 = sshll.u32 %s2006_s1, 4  ;;  %s1207_s16 = sadd.s32 4294967295, %s1589_s12   ;;  %s1589_s12 = sphi %s1616_s12, %s15_s12   ;;  %s126_s15 = int_to_ptr.hbm [resolvable:$true] %s125_s15 }
   0x3   : > { %p1209_p0 = scmp.ge.s32.totalorder %s1589_s12, 1  ;;  %p114_p1 = scmp.lt.s32.totalorder %s1589_s12, 3 }
   0x4   : > { %p1497_p2 = scmp.eq.s32.totalorder %s1207_s16, 0  ;;  %s1591_s18 = smov [#allocation2]  }
   0x5   : > { %p1627_p3 = pnand %p1209_p0, %p114_p1  ;;  %s127_s19 = sshll.u32 %s1591_s18, 4  ;;  %s128_s19 = int_to_ptr.vmem [resolvable:$true] %s127_s19 }
   0x6   : > { %s140_s22 = sshll.u32 %s2007_s2, 4  ;;  %s1592_s23 = smov [#allocation4]   ;;  %s141_s22 = int_to_ptr.hbm [resolvable:$true] %s140_s22 }
   0x7   : > { %p1490_p4 = pneg %p1627_p3  ;;  %s142_s24 = sshll.u32 %s1592_s23, 4  ;;  %s143_s24 = int_to_ptr.vmem [resolvable:$true] %s142_s24 }
   0x8   : > { %s1593_s25 = smov 64   ;;  %s1594_s26 = smov 4  }
   0x9   : > { %p1491_p5 = pnand %p1497_p2, %p1490_p4  ;;  %163 = sbr.rel (%p1627_p3) target bundleno = 334 (0x14e), region = 32 }
   0xb   : > { %1493 = dma.hbm_to_vmem [thread:$0]  (!%p1491_p5), %s126_s15, 128, %s128_s19, [#allocation3], %s1593_s25, %s1593_s25, %s1594_s26  }
   0xc   : > { %1496 = dma.hbm_to_vmem [thread:$0]  (!%p1491_p5), %s141_s22, 16, %s143_s24, [#allocation5]  }
   0xe   : > { %1580 = dma.done.wait (%p1497_p2), [#allocation3], 128  }
   0xf   : > { %1582 = vsyncadd (%p1497_p2), [#allocation3], 4294967168 }
  0x10   : > { %1584 = dma.done.wait (%p1497_p2), [#allocation5], 16  }
  0x11   : > { %1586 = vsyncadd (%p1497_p2), [#allocation5], 4294967280  ;;  %p193_p6 = scmp.lt.s32.totalorder %s1207_s16, 1  ;;  %vm643_vm0 = vcmask 1043456   ;;  %vm644_vm1 = vcmask 1044480   ;;  %v1595_v0 = vmov 65535  }
  0x12   : > { %v645_v1 = vsel %vm643_vm0, 4294967295, %v1595_v0  ;;  %v1388_v2 = vld [vmem:[#allocation2] sm:$0xf]  ;;  %v1477_v3 = vld [vmem:[#allocation2] sm:$0x10]  ;;  %vm513_vm2 = vcmask 72704  }
  0x13   : > { %s2011_s16 = smov (!%p193_p6, %s1207_s16), 1  ;;  %v646_v4 = vsel %vm644_vm1, %v645_v1, 0  ;;  %v1389_v5 = vor.u32 %v1477_v3, %v1388_v2  ;;  %v1717_v39 = vld [vmem:[#allocation4] ss:$0 sm:$0xff]  ;;  %vm1043_vm3 = vcmask 257024   ;;  %vm1128_vm4 = vcmask 254976  }
  0x14   : > { %s1481_s27 = smul.u32 340, %s2011_s16 }
  0x15   : > { %v648_v6 = vand.u32 %v1389_v5, %v646_v4 }
  0x16   : > { %s1651_s30 = scalar_lea.vmem %s2005_s0, %s1481_s27  ;;  %s1732_s6 = scalar_lea.vmem %s2008_s3, %s1481_s27 }
  0x17   : > { %v1435_v7 = vld [vmem:[%s1651_s30] sm:$0xff]  ;;  %v1446_v8 = vld [vmem:[%s1651_s30 + $0x58] sm:$0xff]  ;;  %657 = vmatpush.bf16.msra.mxu0 %v648_v6  ;;  %1478 = vmatpush.bf16.msra.mxu1 %v648_v6  ;;  %v1457_v9 = vld [vmem:[%s1651_s30 + $0xb0] sm:$0xff] }
  0x18   : > { %v1468_v10 = vld [vmem:[%s1651_s30 + $0x108] sm:$0xff]  ;;  %1479 = vmatpush.bf16.msra.mxu2 %v648_v6  ;;  %1480 = vmatpush.bf16.msra.mxu3 %v648_v6  ;;  %v1447_v12 = vld [vmem:[%s1651_s30 + $0x60] sm:$0xff]  ;;  %v1458_v13 = vld [vmem:[%s1651_s30 + $0xb8] sm:$0xff] }
  0x19   : > { %v1436_v11 = vld [vmem:[%s1651_s30 + $0x8] sm:$0xff]  ;;  %v1469_v14 = vld [vmem:[%s1651_s30 + $0x110] sm:$0xff]  ;;  %v1459_v17 = vld [vmem:[%s1651_s30 + $0xc0] sm:$0xff] }
  0x1a   : > { %1390 = vmatmul.msk.bf16.vlgmr.msra.gmra.mxu0 %vm513_vm2, %v1435_v7  ;;  %1401 = vmatmul.msk.bf16.vlgmr.msra.gmra.mxu1 %vm513_vm2, %v1446_v8  ;;  %v1437_v15 = vld [vmem:[%s1651_s30 + $0x10] sm:$0xff]  ;;  %v1448_v16 = vld [vmem:[%s1651_s30 + $0x68] sm:$0xff]  ;;  %v1470_v18 = vld [vmem:[%s1651_s30 + $0x118] sm:$0xff] }
  0x1b   : > { %1412 = vmatmul.msk.bf16.vlgmr.msra.gmra.mxu2 %vm513_vm2, %v1457_v9  ;;  %1423 = vmatmul.msk.bf16.vlgmr.msra.gmra.mxu3 %vm513_vm2, %v1468_v10  ;;  %v1438_v19 = vld [vmem:[%s1651_s30 + $0x18] sm:$0xff]  ;;  %v1449_v20 = vld [vmem:[%s1651_s30 + $0x70] sm:$0xff]  ;;  %v1460_v21 = vld [vmem:[%s1651_s30 + $0xc8] sm:$0xff] }
  0x1c   : > { %v1471_v22 = vld [vmem:[%s1651_s30 + $0x120] sm:$0xff]  ;;  %v1450_v24 = vld [vmem:[%s1651_s30 + $0x78] sm:$0xff]  ;;  %v1461_v25 = vld [vmem:[%s1651_s30 + $0xd0] sm:$0xff] }
  0x1d   : > { %v1439_v23 = vld [vmem:[%s1651_s30 + $0x20] sm:$0xff]  ;;  %v1472_v26 = vld [vmem:[%s1651_s30 + $0x128] sm:$0xff]  ;;  %v1462_v29 = vld [vmem:[%s1651_s30 + $0xd8] sm:$0xff] }
  0x1e   : > { %v1440_v27 = vld [vmem:[%s1651_s30 + $0x28] sm:$0xff]  ;;  %v1451_v28 = vld [vmem:[%s1651_s30 + $0x80] sm:$0xff]  ;;  %v1473_v30 = vld [vmem:[%s1651_s30 + $0x130] sm:$0xff] }
  0x1f   : > { %v1441_v31 = vld [vmem:[%s1651_s30 + $0x30] sm:$0xff]  ;;  %v1452_v32 = vld [vmem:[%s1651_s30 + $0x88] sm:$0xff]  ;;  %v1463_v33 = vld [vmem:[%s1651_s30 + $0xe0] sm:$0xff] }
  0x20   : > { %v1474_v34 = vld [vmem:[%s1651_s30 + $0x138] sm:$0xff]  ;;  %v1453_v36 = vld [vmem:[%s1651_s30 + $0x90] sm:$0xff]  ;;  %v1464_v37 = vld [vmem:[%s1651_s30 + $0xe8] sm:$0xff] }
  0x21   : > { %v1442_v35 = vld [vmem:[%s1651_s30 + $0x38] sm:$0xff]  ;;  %v1475_v38 = vld [vmem:[%s1651_s30 + $0x140] sm:$0xff]  ;;  %v1465_v44 = vld [vmem:[%s1651_s30 + $0xf0] sm:$0xff] }
  0x22   : > { %v1443_v40 = vld [vmem:[%s1651_s30 + $0x40] sm:$0xff]  ;;  %v1454_v41 = vld [vmem:[%s1651_s30 + $0x98] sm:$0xff]  ;;  %v1476_v45 = vld [vmem:[%s1651_s30 + $0x148] sm:$0xff] }
  0x23   : > { %v288_v60 = vld [vmem:[%s1651_s30 + $0x150] sm:$0x3]  ;;  %v1444_v7 = vld [vmem:[%s1651_s30 + $0x48] sm:$0xff]  ;;  %v1455_v8 = vld [vmem:[%s1651_s30 + $0xa0] sm:$0xff] }
  0x24   : > { %v464_v2 = vunpack.c.l.b16 %v288_v60 }
  0x2a   : > { %1391 = vmatmul.msk.bf16.gmra.mxu0 %vm513_vm2, %v1436_v11  ;;  %1402 = vmatmul.msk.bf16.gmra.mxu1 %vm513_vm2, %v1447_v12 }
  0x2b   : > { %1413 = vmatmul.msk.bf16.gmra.mxu2 %vm513_vm2, %v1458_v13  ;;  %1424 = vmatmul.msk.bf16.gmra.mxu3 %vm513_vm2, %v1469_v14  ;;  %v1466_v13 = vld [vmem:[%s1651_s30 + $0xf8] sm:$0xff] }
  0x3a   : > { %1392 = vmatmul.msk.bf16.gmra.mxu0 %vm513_vm2, %v1437_v15  ;;  %1403 = vmatmul.msk.bf16.gmra.mxu1 %vm513_vm2, %v1448_v16  ;;  %v507_v15 = vpack.c.b16 %v464_v2, %v464_v2 }
  0x3b   : > { %1414 = vmatmul.msk.bf16.gmra.mxu2 %vm513_vm2, %v1459_v17  ;;  %1425 = vmatmul.msk.bf16.gmra.mxu3 %vm513_vm2, %v1470_v18 }
  0x4a   : > { %1393 = vmatmul.msk.bf16.gmra.mxu0 %vm513_vm2, %v1438_v19  ;;  %1404 = vmatmul.msk.bf16.gmra.mxu1 %vm513_vm2, %v1449_v20 }
  0x4b   : > { %1415 = vmatmul.msk.bf16.gmra.mxu2 %vm513_vm2, %v1460_v21  ;;  %1426 = vmatmul.msk.bf16.gmra.mxu3 %vm513_vm2, %v1471_v22 }
  0x5a   : > { %1394 = vmatmul.msk.bf16.gmra.mxu0 %vm513_vm2, %v1439_v23  ;;  %1405 = vmatmul.msk.bf16.gmra.mxu1 %vm513_vm2, %v1450_v24 }
  0x5b   : > { %1416 = vmatmul.msk.bf16.gmra.mxu2 %vm513_vm2, %v1461_v25  ;;  %1427 = vmatmul.msk.bf16.gmra.mxu3 %vm513_vm2, %v1472_v26 }
  0x6a   : > { %1395 = vmatmul.msk.bf16.gmra.mxu0 %vm513_vm2, %v1440_v27  ;;  %1406 = vmatmul.msk.bf16.gmra.mxu1 %vm513_vm2, %v1451_v28 }
  0x6b   : > { %1417 = vmatmul.msk.bf16.gmra.mxu2 %vm513_vm2, %v1462_v29  ;;  %1428 = vmatmul.msk.bf16.gmra.mxu3 %vm513_vm2, %v1473_v30 }
  0x7a   : > { %1396 = vmatmul.msk.bf16.gmra.mxu0 %vm513_vm2, %v1441_v31  ;;  %1407 = vmatmul.msk.bf16.gmra.mxu1 %vm513_vm2, %v1452_v32 }
  0x7b   : > { %1418 = vmatmul.msk.bf16.gmra.mxu2 %vm513_vm2, %v1463_v33  ;;  %1429 = vmatmul.msk.bf16.gmra.mxu3 %vm513_vm2, %v1474_v34 }
  0x8a   : > { %1397 = vmatmul.msk.bf16.gmra.mxu0 %vm513_vm2, %v1442_v35  ;;  %1408 = vmatmul.msk.bf16.gmra.mxu1 %vm513_vm2, %v1453_v36 }
  0x8b   : > { %1419 = vmatmul.msk.bf16.gmra.mxu2 %vm513_vm2, %v1464_v37  ;;  %1430 = vmatmul.msk.bf16.gmra.mxu3 %vm513_vm2, %v1475_v38 }
  0x97   : > { %v659_v42 = vpop.f32.mrf.mxu0  ;;  %v714_v43 = vpop.f32.mrf.mxu1 }
  0x98   : > { %v660_v46 = vadd.f32 %v1717_v39, %v659_v42  ;;  %v715_v47 = vadd.f32 %v1717_v39, %v714_v43 }
  0x9a   : > { %v873_v48 = vmax.f32 %v660_v46, 0.0  ;;  %v895_v49 = vmax.f32 %v715_v47, 0.0  ;;  %1398 = vmatmul.msk.bf16.gmra.mxu0 %vm513_vm2, %v1443_v40  ;;  %1409 = vmatmul.msk.bf16.gmra.mxu1 %vm513_vm2, %v1454_v41 }
  0x9b   : > { %1420 = vmatmul.msk.bf16.gmra.mxu2 %vm513_vm2, %v1465_v44  ;;  %1431 = vmatmul.msk.bf16.gmra.mxu3 %vm513_vm2, %v1476_v45  ;;  %v1445_v44 = vld [vmem:[%s1651_s30 + $0x50] sm:$0xff]  ;;  %v1456_v45 = vld [vmem:[%s1651_s30 + $0xa8] sm:$0xff] }
  0x9c   : > { %v958_v50 = vpack.c.bf16 %v873_v48, %v873_v48  ;;  %v980_v51 = vpack.c.bf16 %v895_v49, %v895_v49 }
  0x9e   : > { %1044 = vst.msk [vmem:[%s1732_s6] sm:$0xf] %vm1043_vm3, %v958_v50  ;;  %v769_v52 = vpop.f32.mrf.mxu2  ;;  %v824_v53 = vpop.f32.mrf.mxu3  ;;  %v1467_v50 = vld [vmem:[%s1651_s30 + $0x100] sm:$0xff] }
  0x9f   : > { %1066 = vst.msk [vmem:[%s1732_s6 + $0x58] sm:$0xf] %vm1043_vm3, %v980_v51  ;;  %v770_v54 = vadd.f32 %v1717_v39, %v769_v52  ;;  %v661_v55 = vpop.f32.mrf.mxu0  ;;  %v716_v56 = vpop.f32.mrf.mxu1  ;;  %v825_v57 = vadd.f32 %v1717_v39, %v824_v53 }
  0xa0   : > { %v662_v58 = vadd.f32 %v1717_v39, %v661_v55  ;;  %v717_v59 = vadd.f32 %v1717_v39, %v716_v56 }
  0xa1   : > { %v917_v61 = vmax.f32 %v770_v54, 0.0  ;;  %v939_v62 = vmax.f32 %v825_v57, 0.0 }
  0xa2   : > { %v874_v63 = vmax.f32 %v662_v58, 0.0  ;;  %v896_v0 = vmax.f32 %v717_v59, 0.0 }
  0xa3   : > { %v1002_v1 = vpack.c.bf16 %v917_v61, %v917_v61  ;;  %v1024_v5 = vpack.c.bf16 %v939_v62, %v939_v62 }
  0xa4   : > { %v959_v3 = vpack.c.bf16 %v874_v63, %v874_v63  ;;  %v981_v4 = vpack.c.bf16 %v896_v0, %v896_v0 }
  0xa5   : > { %1088 = vst.msk [vmem:[%s1732_s6 + $0xb0] sm:$0xf] %vm1043_vm3, %v1002_v1 }
  0xa6   : > { %1045 = vst.msk [vmem:[%s1732_s6 + $0x4] sm:$0xf] %vm1043_vm3, %v959_v3  ;;  %v771_v6 = vpop.f32.mrf.mxu2  ;;  %v826_v9 = vpop.f32.mrf.mxu3 }
  0xa7   : > { %1067 = vst.msk [vmem:[%s1732_s6 + $0x5c] sm:$0xf] %vm1043_vm3, %v981_v4  ;;  %v772_v10 = vadd.f32 %v1717_v39, %v771_v6  ;;  %v664_v11 = vpop.f32.mrf.mxu0  ;;  %v719_v12 = vpop.f32.mrf.mxu1  ;;  %v827_v14 = vadd.f32 %v1717_v39, %v826_v9 }
  0xa8   : > { %v665_v16 = vadd.f32 %v1717_v39, %v664_v11  ;;  %v720_v17 = vadd.f32 %v1717_v39, %v719_v12  ;;  %1110 = vst.msk [vmem:[%s1732_s6 + $0x108] sm:$0xf] %vm1043_vm3, %v1024_v5 }
  0xa9   : > { %v918_v18 = vmax.f32 %v772_v10, 0.0  ;;  %v940_v19 = vmax.f32 %v827_v14, 0.0 }
  0xaa   : > { %v875_v20 = vmax.f32 %v665_v16, 0.0  ;;  %v897_v21 = vmax.f32 %v720_v17, 0.0  ;;  %1399 = vmatmul.msk.bf16.gmra.mxu0 %vm513_vm2, %v1444_v7  ;;  %1410 = vmatmul.msk.bf16.gmra.mxu1 %vm513_vm2, %v1455_v8 }
  0xab   : > { %v1003_v22 = vpack.c.bf16 %v918_v18, %v918_v18  ;;  %1421 = vmatmul.msk.bf16.gmra.mxu2 %vm513_vm2, %v1466_v13  ;;  %1432 = vmatmul.msk.bf16.gmra.mxu3 %vm513_vm2, %v507_v15  ;;  %v1025_v25 = vpack.c.bf16 %v940_v19, %v940_v19 }
  0xac   : > { %v960_v23 = vpack.c.bf16 %v875_v20, %v875_v20  ;;  %v982_v24 = vpack.c.bf16 %v897_v21, %v897_v21 }
  0xad   : > { %1089 = vst.msk [vmem:[%s1732_s6 + $0xb4] sm:$0xf] %vm1043_vm3, %v1003_v22 }
  0xae   : > { %1046 = vst.msk [vmem:[%s1732_s6 + $0x8] sm:$0xf] %vm1043_vm3, %v960_v23  ;;  %v774_v26 = vpop.f32.mrf.mxu2  ;;  %v829_v27 = vpop.f32.mrf.mxu3 }
  0xaf   : > { %1068 = vst.msk [vmem:[%s1732_s6 + $0x60] sm:$0xf] %vm1043_vm3, %v982_v24  ;;  %v775_v28 = vadd.f32 %v1717_v39, %v774_v26  ;;  %v666_v29 = vpop.f32.mrf.mxu0  ;;  %v721_v30 = vpop.f32.mrf.mxu1  ;;  %v830_v31 = vadd.f32 %v1717_v39, %v829_v27 }
  0xb0   : > { %v667_v32 = vadd.f32 %v1717_v39, %v666_v29  ;;  %v722_v33 = vadd.f32 %v1717_v39, %v721_v30  ;;  %1111 = vst.msk [vmem:[%s1732_s6 + $0x10c] sm:$0xf] %vm1043_vm3, %v1025_v25 }
  0xb1   : > { %v919_v34 = vmax.f32 %v775_v28, 0.0  ;;  %v941_v35 = vmax.f32 %v830_v31, 0.0 }
  0xb2   : > { %v876_v36 = vmax.f32 %v667_v32, 0.0  ;;  %v898_v37 = vmax.f32 %v722_v33, 0.0 }
  0xb3   : > { %v1004_v38 = vpack.c.bf16 %v919_v34, %v919_v34  ;;  %v1026_v42 = vpack.c.bf16 %v941_v35, %v941_v35 }
  0xb4   : > { %v961_v40 = vpack.c.bf16 %v876_v36, %v876_v36  ;;  %v983_v41 = vpack.c.bf16 %v898_v37, %v898_v37 }
  0xb5   : > { %1090 = vst.msk [vmem:[%s1732_s6 + $0xb8] sm:$0xf] %vm1043_vm3, %v1004_v38 }
  0xb6   : > { %1047 = vst.msk [vmem:[%s1732_s6 + $0xc] sm:$0xf] %vm1043_vm3, %v961_v40  ;;  %v776_v43 = vpop.f32.mrf.mxu2  ;;  %v831_v46 = vpop.f32.mrf.mxu3 }
  0xb7   : > { %1069 = vst.msk [vmem:[%s1732_s6 + $0x64] sm:$0xf] %vm1043_vm3, %v983_v41  ;;  %v777_v47 = vadd.f32 %v1717_v39, %v776_v43  ;;  %v669_v48 = vpop.f32.mrf.mxu0  ;;  %v724_v49 = vpop.f32.mrf.mxu1  ;;  %v832_v51 = vadd.f32 %v1717_v39, %v831_v46 }
  0xb8   : > { %v670_v52 = vadd.f32 %v1717_v39, %v669_v48  ;;  %v725_v53 = vadd.f32 %v1717_v39, %v724_v49  ;;  %1112 = vst.msk [vmem:[%s1732_s6 + $0x110] sm:$0xf] %vm1043_vm3, %v1026_v42 }
  0xb9   : > { %v920_v54 = vmax.f32 %v777_v47, 0.0  ;;  %v942_v55 = vmax.f32 %v832_v51, 0.0 }
  0xba   : > { %v877_v56 = vmax.f32 %v670_v52, 0.0  ;;  %v899_v57 = vmax.f32 %v725_v53, 0.0  ;;  %1400 = vmatmul.msk.bf16.gmra.mxu0 %vm513_vm2, %v1445_v44  ;;  %1411 = vmatmul.msk.bf16.gmra.mxu1 %vm513_vm2, %v1456_v45 }
  0xbb   : > { %v1005_v58 = vpack.c.bf16 %v920_v54, %v920_v54  ;;  %1422 = vmatmul.msk.bf16.gmra.mxu2 %vm513_vm2, %v1467_v50  ;;  %v1027_v61 = vpack.c.bf16 %v942_v55, %v942_v55 }
  0xbc   : > { %v962_v59 = vpack.c.bf16 %v877_v56, %v877_v56  ;;  %v984_v60 = vpack.c.bf16 %v899_v57, %v899_v57 }
  0xbd   : > { %1091 = vst.msk [vmem:[%s1732_s6 + $0xbc] sm:$0xf] %vm1043_vm3, %v1005_v58 }
  0xbe   : > { %1048 = vst.msk [vmem:[%s1732_s6 + $0x10] sm:$0xf] %vm1043_vm3, %v962_v59  ;;  %v779_v62 = vpop.f32.mrf.mxu2  ;;  %v834_v63 = vpop.f32.mrf.mxu3 }
  0xbf   : > { %1070 = vst.msk [vmem:[%s1732_s6 + $0x68] sm:$0xf] %vm1043_vm3, %v984_v60  ;;  %v780_v0 = vadd.f32 %v1717_v39, %v779_v62  ;;  %v671_v1 = vpop.f32.mrf.mxu0  ;;  %v726_v2 = vpop.f32.mrf.mxu1  ;;  %v835_v3 = vadd.f32 %v1717_v39, %v834_v63 }
  0xc0   : > { %v672_v4 = vadd.f32 %v1717_v39, %v671_v1  ;;  %v727_v5 = vadd.f32 %v1717_v39, %v726_v2  ;;  %1113 = vst.msk [vmem:[%s1732_s6 + $0x114] sm:$0xf] %vm1043_vm3, %v1027_v61 }
  0xc1   : > { %v921_v6 = vmax.f32 %v780_v0, 0.0  ;;  %v943_v7 = vmax.f32 %v835_v3, 0.0 }
  0xc2   : > { %v878_v8 = vmax.f32 %v672_v4, 0.0  ;;  %v900_v9 = vmax.f32 %v727_v5, 0.0 }
  0xc3   : > { %v1006_v10 = vpack.c.bf16 %v921_v6, %v921_v6  ;;  %v1028_v13 = vpack.c.bf16 %v943_v7, %v943_v7 }
  0xc4   : > { %v963_v11 = vpack.c.bf16 %v878_v8, %v878_v8  ;;  %v985_v12 = vpack.c.bf16 %v900_v9, %v900_v9 }
  0xc5   : > { %1092 = vst.msk [vmem:[%s1732_s6 + $0xc0] sm:$0xf] %vm1043_vm3, %v1006_v10 }
  0xc6   : > { %1049 = vst.msk [vmem:[%s1732_s6 + $0x14] sm:$0xf] %vm1043_vm3, %v963_v11  ;;  %v781_v14 = vpop.f32.mrf.mxu2  ;;  %v836_v15 = vpop.f32.mrf.mxu3 }
  0xc7   : > { %1071 = vst.msk [vmem:[%s1732_s6 + $0x6c] sm:$0xf] %vm1043_vm3, %v985_v12  ;;  %v782_v16 = vadd.f32 %v1717_v39, %v781_v14  ;;  %v674_v17 = vpop.f32.mrf.mxu0  ;;  %v729_v18 = vpop.f32.mrf.mxu1  ;;  %v837_v19 = vadd.f32 %v1717_v39, %v836_v15 }
  0xc8   : > { %v675_v20 = vadd.f32 %v1717_v39, %v674_v17  ;;  %v730_v21 = vadd.f32 %v1717_v39, %v729_v18  ;;  %1114 = vst.msk [vmem:[%s1732_s6 + $0x118] sm:$0xf] %vm1043_vm3, %v1028_v13 }
  0xc9   : > { %v922_v22 = vmax.f32 %v782_v16, 0.0  ;;  %v944_v23 = vmax.f32 %v837_v19, 0.0 }
  0xca   : > { %v879_v24 = vmax.f32 %v675_v20, 0.0  ;;  %v901_v25 = vmax.f32 %v730_v21, 0.0 }
  0xcb   : > { %v1007_v26 = vpack.c.bf16 %v922_v22, %v922_v22  ;;  %v1029_v29 = vpack.c.bf16 %v944_v23, %v944_v23 }
  0xcc   : > { %v964_v27 = vpack.c.bf16 %v879_v24, %v879_v24  ;;  %v986_v28 = vpack.c.bf16 %v901_v25, %v901_v25 }
  0xcd   : > { %1093 = vst.msk [vmem:[%s1732_s6 + $0xc4] sm:$0xf] %vm1043_vm3, %v1007_v26 }
  0xce   : > { %1050 = vst.msk [vmem:[%s1732_s6 + $0x18] sm:$0xf] %vm1043_vm3, %v964_v27  ;;  %v784_v30 = vpop.f32.mrf.mxu2  ;;  %v839_v31 = vpop.f32.mrf.mxu3 }
  0xcf   : > { %1072 = vst.msk [vmem:[%s1732_s6 + $0x70] sm:$0xf] %vm1043_vm3, %v986_v28  ;;  %v785_v32 = vadd.f32 %v1717_v39, %v784_v30  ;;  %v676_v33 = vpop.f32.mrf.mxu0  ;;  %v731_v34 = vpop.f32.mrf.mxu1  ;;  %v840_v35 = vadd.f32 %v1717_v39, %v839_v31 }
  0xd0   : > { %v677_v36 = vadd.f32 %v1717_v39, %v676_v33  ;;  %v732_v37 = vadd.f32 %v1717_v39, %v731_v34  ;;  %1115 = vst.msk [vmem:[%s1732_s6 + $0x11c] sm:$0xf] %vm1043_vm3, %v1029_v29 }
  0xd1   : > { %v923_v38 = vmax.f32 %v785_v32, 0.0  ;;  %v945_v40 = vmax.f32 %v840_v35, 0.0 }
  0xd2   : > { %v880_v41 = vmax.f32 %v677_v36, 0.0  ;;  %v902_v42 = vmax.f32 %v732_v37, 0.0 }
  0xd3   : > { %v1008_v43 = vpack.c.bf16 %v923_v38, %v923_v38  ;;  %v1030_v46 = vpack.c.bf16 %v945_v40, %v945_v40 }
  0xd4   : > { %v965_v44 = vpack.c.bf16 %v880_v41, %v880_v41  ;;  %v987_v45 = vpack.c.bf16 %v902_v42, %v902_v42 }
  0xd5   : > { %1094 = vst.msk [vmem:[%s1732_s6 + $0xc8] sm:$0xf] %vm1043_vm3, %v1008_v43 }
  0xd6   : > { %1051 = vst.msk [vmem:[%s1732_s6 + $0x1c] sm:$0xf] %vm1043_vm3, %v965_v44  ;;  %v786_v47 = vpop.f32.mrf.mxu2  ;;  %v841_v48 = vpop.f32.mrf.mxu3 }
  0xd7   : > { %1073 = vst.msk [vmem:[%s1732_s6 + $0x74] sm:$0xf] %vm1043_vm3, %v987_v45  ;;  %v787_v49 = vadd.f32 %v1717_v39, %v786_v47  ;;  %v679_v50 = vpop.f32.mrf.mxu0  ;;  %v734_v51 = vpop.f32.mrf.mxu1  ;;  %v842_v52 = vadd.f32 %v1717_v39, %v841_v48 }
  0xd8   : > { %v680_v53 = vadd.f32 %v1717_v39, %v679_v50  ;;  %v735_v54 = vadd.f32 %v1717_v39, %v734_v51  ;;  %1116 = vst.msk [vmem:[%s1732_s6 + $0x120] sm:$0xf] %vm1043_vm3, %v1030_v46 }
  0xd9   : > { %v924_v55 = vmax.f32 %v787_v49, 0.0  ;;  %v946_v56 = vmax.f32 %v842_v52, 0.0 }
  0xda   : > { %v881_v57 = vmax.f32 %v680_v53, 0.0  ;;  %v903_v58 = vmax.f32 %v735_v54, 0.0 }
  0xdb   : > { %v1009_v59 = vpack.c.bf16 %v924_v55, %v924_v55  ;;  %v1031_v62 = vpack.c.bf16 %v946_v56, %v946_v56 }
  0xdc   : > { %v966_v60 = vpack.c.bf16 %v881_v57, %v881_v57  ;;  %v988_v61 = vpack.c.bf16 %v903_v58, %v903_v58 }
  0xdd   : > { %1095 = vst.msk [vmem:[%s1732_s6 + $0xcc] sm:$0xf] %vm1043_vm3, %v1009_v59 }
  0xde   : > { %1052 = vst.msk [vmem:[%s1732_s6 + $0x20] sm:$0xf] %vm1043_vm3, %v966_v60  ;;  %v789_v63 = vpop.f32.mrf.mxu2  ;;  %v844_v0 = vpop.f32.mrf.mxu3 }
  0xdf   : > { %1074 = vst.msk [vmem:[%s1732_s6 + $0x78] sm:$0xf] %vm1043_vm3, %v988_v61  ;;  %v790_v1 = vadd.f32 %v1717_v39, %v789_v63  ;;  %v681_v2 = vpop.f32.mrf.mxu0  ;;  %v736_v3 = vpop.f32.mrf.mxu1  ;;  %v845_v4 = vadd.f32 %v1717_v39, %v844_v0 }
  0xe0   : > { %v682_v5 = vadd.f32 %v1717_v39, %v681_v2  ;;  %v737_v6 = vadd.f32 %v1717_v39, %v736_v3  ;;  %1117 = vst.msk [vmem:[%s1732_s6 + $0x124] sm:$0xf] %vm1043_vm3, %v1031_v62 }
  0xe1   : > { %v925_v7 = vmax.f32 %v790_v1, 0.0  ;;  %v947_v8 = vmax.f32 %v845_v4, 0.0 }
  0xe2   : > { %v882_v9 = vmax.f32 %v682_v5, 0.0  ;;  %v904_v10 = vmax.f32 %v737_v6, 0.0 }
  0xe3   : > { %v1010_v11 = vpack.c.bf16 %v925_v7, %v925_v7  ;;  %v1032_v14 = vpack.c.bf16 %v947_v8, %v947_v8 }
  0xe4   : > { %v967_v12 = vpack.c.bf16 %v882_v9, %v882_v9  ;;  %v989_v13 = vpack.c.bf16 %v904_v10, %v904_v10 }
  0xe5   : > { %1096 = vst.msk [vmem:[%s1732_s6 + $0xd0] sm:$0xf] %vm1043_vm3, %v1010_v11 }
  0xe6   : > { %1053 = vst.msk [vmem:[%s1732_s6 + $0x24] sm:$0xf] %vm1043_vm3, %v967_v12  ;;  %v791_v15 = vpop.f32.mrf.mxu2  ;;  %v846_v16 = vpop.f32.mrf.mxu3 }
  0xe7   : > { %1075 = vst.msk [vmem:[%s1732_s6 + $0x7c] sm:$0xf] %vm1043_vm3, %v989_v13  ;;  %v792_v17 = vadd.f32 %v1717_v39, %v791_v15  ;;  %v684_v18 = vpop.f32.mrf.mxu0  ;;  %v739_v19 = vpop.f32.mrf.mxu1  ;;  %v847_v20 = vadd.f32 %v1717_v39, %v846_v16 }
  0xe8   : > { %v685_v21 = vadd.f32 %v1717_v39, %v684_v18  ;;  %v740_v22 = vadd.f32 %v1717_v39, %v739_v19  ;;  %1118 = vst.msk [vmem:[%s1732_s6 + $0x128] sm:$0xf] %vm1043_vm3, %v1032_v14 }
  0xe9   : > { %v926_v23 = vmax.f32 %v792_v17, 0.0  ;;  %v948_v24 = vmax.f32 %v847_v20, 0.0 }
  0xea   : > { %v883_v25 = vmax.f32 %v685_v21, 0.0  ;;  %v905_v26 = vmax.f32 %v740_v22, 0.0 }
  0xeb   : > { %v1011_v27 = vpack.c.bf16 %v926_v23, %v926_v23  ;;  %v1033_v30 = vpack.c.bf16 %v948_v24, %v948_v24 }
  0xec   : > { %v968_v28 = vpack.c.bf16 %v883_v25, %v883_v25  ;;  %v990_v29 = vpack.c.bf16 %v905_v26, %v905_v26 }
  0xed   : > { %1097 = vst.msk [vmem:[%s1732_s6 + $0xd4] sm:$0xf] %vm1043_vm3, %v1011_v27 }
  0xee   : > { %1054 = vst.msk [vmem:[%s1732_s6 + $0x28] sm:$0xf] %vm1043_vm3, %v968_v28  ;;  %v794_v31 = vpop.f32.mrf.mxu2  ;;  %v849_v32 = vpop.f32.mrf.mxu3 }
  0xef   : > { %1076 = vst.msk [vmem:[%s1732_s6 + $0x80] sm:$0xf] %vm1043_vm3, %v990_v29  ;;  %v795_v33 = vadd.f32 %v1717_v39, %v794_v31  ;;  %v686_v34 = vpop.f32.mrf.mxu0  ;;  %v741_v35 = vpop.f32.mrf.mxu1  ;;  %v850_v36 = vadd.f32 %v1717_v39, %v849_v32 }
  0xf0   : > { %v687_v37 = vadd.f32 %v1717_v39, %v686_v34  ;;  %v742_v38 = vadd.f32 %v1717_v39, %v741_v35  ;;  %1119 = vst.msk [vmem:[%s1732_s6 + $0x12c] sm:$0xf] %vm1043_vm3, %v1033_v30 }
  0xf1   : > { %v927_v40 = vmax.f32 %v795_v33, 0.0  ;;  %v949_v41 = vmax.f32 %v850_v36, 0.0 }
  0xf2   : > { %v884_v42 = vmax.f32 %v687_v37, 0.0  ;;  %v906_v43 = vmax.f32 %v742_v38, 0.0 }
  0xf3   : > { %v1012_v44 = vpack.c.bf16 %v927_v40, %v927_v40  ;;  %v1034_v47 = vpack.c.bf16 %v949_v41, %v949_v41 }
  0xf4   : > { %v969_v45 = vpack.c.bf16 %v884_v42, %v884_v42  ;;  %v991_v46 = vpack.c.bf16 %v906_v43, %v906_v43 }
  0xf5   : > { %1098 = vst.msk [vmem:[%s1732_s6 + $0xd8] sm:$0xf] %vm1043_vm3, %v1012_v44 }
  0xf6   : > { %1055 = vst.msk [vmem:[%s1732_s6 + $0x2c] sm:$0xf] %vm1043_vm3, %v969_v45  ;;  %v796_v48 = vpop.f32.mrf.mxu2  ;;  %v851_v49 = vpop.f32.mrf.mxu3 }
  0xf7   : > { %1077 = vst.msk [vmem:[%s1732_s6 + $0x84] sm:$0xf] %vm1043_vm3, %v991_v46  ;;  %v797_v50 = vadd.f32 %v1717_v39, %v796_v48  ;;  %v689_v51 = vpop.f32.mrf.mxu0  ;;  %v744_v52 = vpop.f32.mrf.mxu1  ;;  %v852_v53 = vadd.f32 %v1717_v39, %v851_v49 }
  0xf8   : > { %v690_v54 = vadd.f32 %v1717_v39, %v689_v51  ;;  %v745_v55 = vadd.f32 %v1717_v39, %v744_v52  ;;  %1120 = vst.msk [vmem:[%s1732_s6 + $0x130] sm:$0xf] %vm1043_vm3, %v1034_v47 }
  0xf9   : > { %v928_v56 = vmax.f32 %v797_v50, 0.0  ;;  %v950_v57 = vmax.f32 %v852_v53, 0.0 }
  0xfa   : > { %v885_v58 = vmax.f32 %v690_v54, 0.0  ;;  %v907_v59 = vmax.f32 %v745_v55, 0.0 }
  0xfb   : > { %v1013_v60 = vpack.c.bf16 %v928_v56, %v928_v56  ;;  %v1035_v63 = vpack.c.bf16 %v950_v57, %v950_v57 }
  0xfc   : > { %v970_v61 = vpack.c.bf16 %v885_v58, %v885_v58  ;;  %v992_v62 = vpack.c.bf16 %v907_v59, %v907_v59 }
  0xfd   : > { %1099 = vst.msk [vmem:[%s1732_s6 + $0xdc] sm:$0xf] %vm1043_vm3, %v1013_v60 }
  0xfe   : > { %1056 = vst.msk [vmem:[%s1732_s6 + $0x30] sm:$0xf] %vm1043_vm3, %v970_v61  ;;  %v799_v0 = vpop.f32.mrf.mxu2  ;;  %v854_v1 = vpop.f32.mrf.mxu3 }
  0xff   : > { %1078 = vst.msk [vmem:[%s1732_s6 + $0x88] sm:$0xf] %vm1043_vm3, %v992_v62  ;;  %v800_v2 = vadd.f32 %v1717_v39, %v799_v0  ;;  %v691_v3 = vpop.f32.mrf.mxu0  ;;  %v746_v4 = vpop.f32.mrf.mxu1  ;;  %v855_v5 = vadd.f32 %v1717_v39, %v854_v1 }
 0x100   : > { %v692_v6 = vadd.f32 %v1717_v39, %v691_v3  ;;  %v747_v7 = vadd.f32 %v1717_v39, %v746_v4  ;;  %1121 = vst.msk [vmem:[%s1732_s6 + $0x134] sm:$0xf] %vm1043_vm3, %v1035_v63 }
 0x101   : > { %v929_v8 = vmax.f32 %v800_v2, 0.0  ;;  %v951_v9 = vmax.f32 %v855_v5, 0.0 }
 0x102   : > { %v886_v10 = vmax.f32 %v692_v6, 0.0  ;;  %v908_v11 = vmax.f32 %v747_v7, 0.0 }
 0x103   : > { %v1014_v12 = vpack.c.bf16 %v929_v8, %v929_v8  ;;  %v1036_v15 = vpack.c.bf16 %v951_v9, %v951_v9 }
 0x104   : > { %v971_v13 = vpack.c.bf16 %v886_v10, %v886_v10  ;;  %v993_v14 = vpack.c.bf16 %v908_v11, %v908_v11 }
 0x105   : > { %1100 = vst.msk [vmem:[%s1732_s6 + $0xe0] sm:$0xf] %vm1043_vm3, %v1014_v12 }
 0x106   : > { %1057 = vst.msk [vmem:[%s1732_s6 + $0x34] sm:$0xf] %vm1043_vm3, %v971_v13  ;;  %v801_v16 = vpop.f32.mrf.mxu2  ;;  %v856_v17 = vpop.f32.mrf.mxu3 }
 0x107   : > { %1079 = vst.msk [vmem:[%s1732_s6 + $0x8c] sm:$0xf] %vm1043_vm3, %v993_v14  ;;  %v802_v18 = vadd.f32 %v1717_v39, %v801_v16  ;;  %v694_v19 = vpop.f32.mrf.mxu0  ;;  %v749_v20 = vpop.f32.mrf.mxu1  ;;  %v857_v21 = vadd.f32 %v1717_v39, %v856_v17 }
 0x108   : > { %v695_v22 = vadd.f32 %v1717_v39, %v694_v19  ;;  %v750_v23 = vadd.f32 %v1717_v39, %v749_v20  ;;  %1122 = vst.msk [vmem:[%s1732_s6 + $0x138] sm:$0xf] %vm1043_vm3, %v1036_v15 }
 0x109   : > { %v930_v24 = vmax.f32 %v802_v18, 0.0  ;;  %v952_v25 = vmax.f32 %v857_v21, 0.0 }
 0x10a   : > { %v887_v26 = vmax.f32 %v695_v22, 0.0  ;;  %v909_v27 = vmax.f32 %v750_v23, 0.0 }
 0x10b   : > { %v1015_v28 = vpack.c.bf16 %v930_v24, %v930_v24  ;;  %v1037_v31 = vpack.c.bf16 %v952_v25, %v952_v25 }
 0x10c   : > { %v972_v29 = vpack.c.bf16 %v887_v26, %v887_v26  ;;  %v994_v30 = vpack.c.bf16 %v909_v27, %v909_v27 }
 0x10d   : > { %1101 = vst.msk [vmem:[%s1732_s6 + $0xe4] sm:$0xf] %vm1043_vm3, %v1015_v28 }
 0x10e   : > { %1058 = vst.msk [vmem:[%s1732_s6 + $0x38] sm:$0xf] %vm1043_vm3, %v972_v29  ;;  %v804_v32 = vpop.f32.mrf.mxu2  ;;  %v859_v33 = vpop.f32.mrf.mxu3 }
 0x10f   : > { %1080 = vst.msk [vmem:[%s1732_s6 + $0x90] sm:$0xf] %vm1043_vm3, %v994_v30  ;;  %v805_v34 = vadd.f32 %v1717_v39, %v804_v32  ;;  %v696_v35 = vpop.f32.mrf.mxu0  ;;  %v751_v36 = vpop.f32.mrf.mxu1  ;;  %v860_v37 = vadd.f32 %v1717_v39, %v859_v33 }
 0x110   : > { %v697_v38 = vadd.f32 %v1717_v39, %v696_v35  ;;  %v752_v40 = vadd.f32 %v1717_v39, %v751_v36  ;;  %1123 = vst.msk [vmem:[%s1732_s6 + $0x13c] sm:$0xf] %vm1043_vm3, %v1037_v31 }
 0x111   : > { %v931_v41 = vmax.f32 %v805_v34, 0.0  ;;  %v953_v42 = vmax.f32 %v860_v37, 0.0 }
 0x112   : > { %v888_v43 = vmax.f32 %v697_v38, 0.0  ;;  %v910_v44 = vmax.f32 %v752_v40, 0.0 }
 0x113   : > { %v1016_v45 = vpack.c.bf16 %v931_v41, %v931_v41  ;;  %v1038_v48 = vpack.c.bf16 %v953_v42, %v953_v42 }
 0x114   : > { %v973_v46 = vpack.c.bf16 %v888_v43, %v888_v43  ;;  %v995_v47 = vpack.c.bf16 %v910_v44, %v910_v44 }
 0x115   : > { %1102 = vst.msk [vmem:[%s1732_s6 + $0xe8] sm:$0xf] %vm1043_vm3, %v1016_v45 }
 0x116   : > { %1059 = vst.msk [vmem:[%s1732_s6 + $0x3c] sm:$0xf] %vm1043_vm3, %v973_v46  ;;  %v806_v49 = vpop.f32.mrf.mxu2  ;;  %v861_v50 = vpop.f32.mrf.mxu3 }
 0x117   : > { %1081 = vst.msk [vmem:[%s1732_s6 + $0x94] sm:$0xf] %vm1043_vm3, %v995_v47  ;;  %v807_v51 = vadd.f32 %v1717_v39, %v806_v49  ;;  %v699_v52 = vpop.f32.mrf.mxu0  ;;  %v754_v53 = vpop.f32.mrf.mxu1  ;;  %v862_v54 = vadd.f32 %v1717_v39, %v861_v50 }
 0x118   : > { %v700_v55 = vadd.f32 %v1717_v39, %v699_v52  ;;  %v755_v56 = vadd.f32 %v1717_v39, %v754_v53  ;;  %1124 = vst.msk [vmem:[%s1732_s6 + $0x140] sm:$0xf] %vm1043_vm3, %v1038_v48 }
 0x119   : > { %v932_v57 = vmax.f32 %v807_v51, 0.0  ;;  %v954_v58 = vmax.f32 %v862_v54, 0.0 }
 0x11a   : > { %v889_v59 = vmax.f32 %v700_v55, 0.0  ;;  %v911_v60 = vmax.f32 %v755_v56, 0.0 }
 0x11b   : > { %v1017_v61 = vpack.c.bf16 %v932_v57, %v932_v57  ;;  %v1039_v0 = vpack.c.bf16 %v954_v58, %v954_v58 }
 0x11c   : > { %v974_v62 = vpack.c.bf16 %v889_v59, %v889_v59  ;;  %v996_v63 = vpack.c.bf16 %v911_v60, %v911_v60 }
 0x11d   : > { %1103 = vst.msk [vmem:[%s1732_s6 + $0xec] sm:$0xf] %vm1043_vm3, %v1017_v61 }
 0x11e   : > { %1060 = vst.msk [vmem:[%s1732_s6 + $0x40] sm:$0xf] %vm1043_vm3, %v974_v62  ;;  %v809_v1 = vpop.f32.mrf.mxu2  ;;  %v864_v2 = vpop.f32.mrf.mxu3 }
 0x11f   : > { %1082 = vst.msk [vmem:[%s1732_s6 + $0x98] sm:$0xf] %vm1043_vm3, %v996_v63  ;;  %v810_v3 = vadd.f32 %v1717_v39, %v809_v1  ;;  %v701_v4 = vpop.f32.mrf.mxu0  ;;  %v756_v5 = vpop.f32.mrf.mxu1  ;;  %v865_v6 = vadd.f32 %v1717_v39, %v864_v2 }
 0x120   : > { %v702_v7 = vadd.f32 %v1717_v39, %v701_v4  ;;  %v757_v8 = vadd.f32 %v1717_v39, %v756_v5  ;;  %1125 = vst.msk [vmem:[%s1732_s6 + $0x144] sm:$0xf] %vm1043_vm3, %v1039_v0 }
 0x121   : > { %v933_v9 = vmax.f32 %v810_v3, 0.0  ;;  %v955_v10 = vmax.f32 %v865_v6, 0.0 }
 0x122   : > { %v890_v11 = vmax.f32 %v702_v7, 0.0  ;;  %v912_v12 = vmax.f32 %v757_v8, 0.0 }
 0x123   : > { %v1018_v13 = vpack.c.bf16 %v933_v9, %v933_v9  ;;  %v1040_v16 = vpack.c.bf16 %v955_v10, %v955_v10 }
 0x124   : > { %v975_v14 = vpack.c.bf16 %v890_v11, %v890_v11  ;;  %v997_v15 = vpack.c.bf16 %v912_v12, %v912_v12 }
 0x125   : > { %1104 = vst.msk [vmem:[%s1732_s6 + $0xf0] sm:$0xf] %vm1043_vm3, %v1018_v13 }
 0x126   : > { %1061 = vst.msk [vmem:[%s1732_s6 + $0x44] sm:$0xf] %vm1043_vm3, %v975_v14  ;;  %v811_v17 = vpop.f32.mrf.mxu2  ;;  %v866_v18 = vpop.f32.mrf.mxu3 }
 0x127   : > { %1083 = vst.msk [vmem:[%s1732_s6 + $0x9c] sm:$0xf] %vm1043_vm3, %v997_v15  ;;  %v812_v19 = vadd.f32 %v1717_v39, %v811_v17  ;;  %v704_v20 = vpop.f32.mrf.mxu0  ;;  %v759_v21 = vpop.f32.mrf.mxu1  ;;  %v867_v22 = vadd.f32 %v1717_v39, %v866_v18 }
 0x128   : > { %v705_v23 = vadd.f32 %v1717_v39, %v704_v20  ;;  %v760_v24 = vadd.f32 %v1717_v39, %v759_v21  ;;  %1126 = vst.msk [vmem:[%s1732_s6 + $0x148] sm:$0xf] %vm1043_vm3, %v1040_v16 }
 0x129   : > { %v934_v25 = vmax.f32 %v812_v19, 0.0  ;;  %v956_v26 = vmax.f32 %v867_v22, 0.0 }
 0x12a   : > { %v891_v27 = vmax.f32 %v705_v23, 0.0  ;;  %v913_v28 = vmax.f32 %v760_v24, 0.0 }
 0x12b   : > { %v1019_v29 = vpack.c.bf16 %v934_v25, %v934_v25  ;;  %v1041_v32 = vpack.c.bf16 %v956_v26, %v956_v26 }
 0x12c   : > { %v976_v30 = vpack.c.bf16 %v891_v27, %v891_v27  ;;  %v998_v31 = vpack.c.bf16 %v913_v28, %v913_v28 }
 0x12d   : > { %1105 = vst.msk [vmem:[%s1732_s6 + $0xf4] sm:$0xf] %vm1043_vm3, %v1019_v29 }
 0x12e   : > { %1062 = vst.msk [vmem:[%s1732_s6 + $0x48] sm:$0xf] %vm1043_vm3, %v976_v30  ;;  %v814_v33 = vpop.f32.mrf.mxu2  ;;  %v869_v34 = vpop.f32.mrf.mxu3 }
 0x12f   : > { %1084 = vst.msk [vmem:[%s1732_s6 + $0xa0] sm:$0xf] %vm1043_vm3, %v998_v31  ;;  %v815_v35 = vadd.f32 %v1717_v39, %v814_v33  ;;  %v706_v36 = vpop.f32.mrf.mxu0  ;;  %v761_v37 = vpop.f32.mrf.mxu1  ;;  %v870_v38 = vadd.f32 %v1717_v39, %v869_v34 }
 0x130   : > { %v707_v40 = vadd.f32 %v1717_v39, %v706_v36  ;;  %v762_v41 = vadd.f32 %v1717_v39, %v761_v37  ;;  %1127 = vst.msk [vmem:[%s1732_s6 + $0x14c] sm:$0xf] %vm1043_vm3, %v1041_v32 }
 0x131   : > { %v935_v42 = vmax.f32 %v815_v35, 0.0  ;;  %v957_v43 = vmax.f32 %v870_v38, 0.0 }
 0x132   : > { %v892_v44 = vmax.f32 %v707_v40, 0.0  ;;  %v914_v45 = vmax.f32 %v762_v41, 0.0 }
 0x133   : > { %v1020_v46 = vpack.c.bf16 %v935_v42, %v935_v42  ;;  %v1042_v49 = vpack.c.bf16 %v957_v43, %v957_v43 }
 0x134   : > { %v977_v47 = vpack.c.bf16 %v892_v44, %v892_v44  ;;  %v999_v48 = vpack.c.bf16 %v914_v45, %v914_v45 }
 0x135   : > { %1106 = vst.msk [vmem:[%s1732_s6 + $0xf8] sm:$0xf] %vm1043_vm3, %v1020_v46 }
 0x136   : > { %1063 = vst.msk [vmem:[%s1732_s6 + $0x4c] sm:$0xf] %vm1043_vm3, %v977_v47  ;;  %v816_v50 = vpop.f32.mrf.mxu2  ;;  %v871_v51 = vpop.f32.mrf.mxu3 }
 0x137   : > { %1085 = vst.msk [vmem:[%s1732_s6 + $0xa4] sm:$0xf] %vm1043_vm3, %v999_v48  ;;  %v817_v52 = vadd.f32 %v1717_v39, %v816_v50  ;;  %v709_v53 = vpop.f32.mrf.mxu0  ;;  %v764_v54 = vpop.f32.mrf.mxu1 }
 0x138   : > { %v710_v55 = vadd.f32 %v1717_v39, %v709_v53  ;;  %v765_v56 = vadd.f32 %v1717_v39, %v764_v54  ;;  %1129 = vst.msk [vmem:[%s1732_s6 + $0x150] sm:$0x3] %vm1128_vm4, %v1042_v49 }
 0x139   : > { %v936_v57 = vmax.f32 %v817_v52, 0.0 }
 0x13a   : > { %v893_v58 = vmax.f32 %v710_v55, 0.0  ;;  %v915_v59 = vmax.f32 %v765_v56, 0.0 }
 0x13b   : > { %v1021_v60 = vpack.c.bf16 %v936_v57, %v936_v57 }
 0x13c   : > { %v978_v61 = vpack.c.bf16 %v893_v58, %v893_v58  ;;  %v1000_v62 = vpack.c.bf16 %v915_v59, %v915_v59 }
 0x13d   : > { %1107 = vst.msk [vmem:[%s1732_s6 + $0xfc] sm:$0xf] %vm1043_vm3, %v1021_v60 }
 0x13e   : > { %1064 = vst.msk [vmem:[%s1732_s6 + $0x50] sm:$0xf] %vm1043_vm3, %v978_v61  ;;  %v819_v63 = vpop.f32.mrf.mxu2 }
 0x13f   : > { %1086 = vst.msk [vmem:[%s1732_s6 + $0xa8] sm:$0xf] %vm1043_vm3, %v1000_v62  ;;  %v820_v0 = vadd.f32 %v1717_v39, %v819_v63  ;;  %v711_v1 = vpop.f32.mrf.mxu0  ;;  %v766_v2 = vpop.f32.mrf.mxu1 }
 0x140   : > { %v712_v3 = vadd.f32 %v1717_v39, %v711_v1  ;;  %v767_v4 = vadd.f32 %v1717_v39, %v766_v2 }
 0x141   : > { %v937_v5 = vmax.f32 %v820_v0, 0.0 }
 0x142   : > { %v894_v6 = vmax.f32 %v712_v3, 0.0  ;;  %v916_v7 = vmax.f32 %v767_v4, 0.0 }
 0x143   : > { %v1022_v8 = vpack.c.bf16 %v937_v5, %v937_v5 }
 0x144   : > { %v979_v9 = vpack.c.bf16 %v894_v6, %v894_v6  ;;  %v1001_v10 = vpack.c.bf16 %v916_v7, %v916_v7 }
 0x145   : > { %1108 = vst.msk [vmem:[%s1732_s6 + $0x100] sm:$0xf] %vm1043_vm3, %v1022_v8 }
 0x146   : > { %1065 = vst.msk [vmem:[%s1732_s6 + $0x54] sm:$0xf] %vm1043_vm3, %v979_v9  ;;  %v821_v11 = vpop.f32.mrf.mxu2 }
 0x147   : > { %1087 = vst.msk [vmem:[%s1732_s6 + $0xac] sm:$0xf] %vm1043_vm3, %v1001_v10  ;;  %v822_v12 = vadd.f32 %v1717_v39, %v821_v11 }
 0x149   : > { %v938_v13 = vmax.f32 %v822_v12, 0.0 }
 0x14b   : > { %v1023_v14 = vpack.c.bf16 %v938_v13, %v938_v13 }
 0x14d   : > { %1109 = vst.msk [vmem:[%s1732_s6 + $0x104] sm:$0xf] %vm1043_vm3, %v1023_v14 }
 0x14e PF: > { %s15_s12 = sadd.s32 1, %s1589_s12  }
 0x14f   : > { %p12_p7 = scmp.ge.s32.totalorder %s15_s12, 4  }
 0x151   :  { %14 = sbr.rel (!%p12_p7) target bundleno = 2 (0x2), region = 71 }
 0x156   :  { %1151 = vsyncpa [#allocation3], 1 }
 0x157   :  { %1153 = vsyncpa [#allocation3 + $0x1], 1 }
 0x158   :  { %1154 = vsyncpa [#allocation5], 1 }

// kernel: net_forward.4
= control target key start
LH: loop header
LB: loop body
LE: loop exit
PB: predicated region body
PF: predicated region fallthrough
CT: control target
= control target key end

     0   :  { %s2694_s12 = smov 0   ;;  %s3467_s0 = inlined_call_operand.vmem [shape: bf16[2,4,144,288], index: 0, kind: input, shape index: {}]   ;;  %s3468_s1 = inlined_call_operand.vmem [shape: bf16[288,64], index: 1, kind: input, shape index: {}]   ;;  %s3469_s2 = inlined_call_operand.vmem [shape: f32[1,64], index: 2, kind: input, shape index: {}]   ;;  %s3470_s3 = inlined_call_operand.vmem [shape: bf16[2,144,64], index: 3, kind: output, shape index: {}]  }
   0x1 LB: > { %s1979_s13 = sadd.s32 4294967295, %s2672_s12   ;;  %p1983_p0 = scmp.ge.s32.totalorder %s2672_s12, 1  ;;  %s2672_s12 = sphi %s2694_s12, %s13_s12  }
   0x2   : > { %p137_p1 = scmp.lt.s32.totalorder %s2672_s12, 3 }
   0x4   : > { %p138_p2 = pnand %p1983_p0, %p137_p1 }
   0x5   : > { %p161_p3 = scmp.lt.s32.totalorder (!%p138_p2), %s1979_s13, 1 }
   0x6   : > { %141 = sbr.rel (%p138_p2) target bundleno = 613 (0x265), region = 32 }
   0xb   : > { %v2705_v0 = vld [vmem:[%s3468_s1 + $0x38] sm:$0xff]  ;;  %v2715_v2 = vld [vmem:[%s3468_s1 + $0x88] sm:$0xff]  ;;  %v2722_v3 = vld [vmem:[%s3468_s1 + $0x30] sm:$0xff]  ;;  %s3472_s13 = smov (!%p161_p3, %s1979_s13), 1  ;;  %vm599_vm0 = vcmask 261120   ;;  %vm1905_vm1 = vcmask 519168  }
   0xc   : > { %v2710_v1 = vld [vmem:[%s3468_s1 + $0x78] sm:$0xff]  ;;  %627 = vmatpush.bf16.msra.mxu0 %v2705_v0  ;;  %v2727_v4 = vld [vmem:[%s3468_s1 + $0x70] sm:$0xff]  ;;  %741 = vmatpush.bf16.msra.mxu2 %v2715_v2  ;;  %v2736_v5 = vld [vmem:[%s3468_s1 + $0x80] sm:$0xff]  ;;  %s2654_s26 = smul.u32 864, %s3472_s13 }
   0xd   : > { %681 = vmatpush.bf16.msra.mxu1 %v2710_v1  ;;  %969 = vmatpush.bf16.msra.mxu3 %v2705_v0  ;;  %v2749_v6 = vld [vmem:[%s3468_s1 + $0x28] sm:$0xff]  ;;  %v2766_v11 = vld [vmem:[%s3468_s1 + $0x20] sm:$0xff]  ;;  %v2780_v13 = vld [vmem:[%s3468_s1 + $0x18] sm:$0xff] }
   0xe   : > { %s2744_s29 = scalar_lea.vmem %s3467_s0, %s2654_s26  ;;  %v2758_v9 = vld [vmem:[%s3468_s1 + $0x68] sm:$0xff]  ;;  %v2773_v12 = vld [vmem:[%s3468_s1 + $0x60] sm:$0xff]  ;;  %v2787_v14 = vld [vmem:[%s3468_s1 + $0x58] sm:$0xff] }
   0xf   : > { %v1996_v7 = vld [vmem:[%s2744_s29 + $0x8] sm:$0xf]  ;;  %v2530_v8 = vld [vmem:[%s2744_s29 + $0x10] sm:$0xf0]  ;;  %v2008_v17 = vld [vmem:[%s2744_s29 + $0x20] sm:$0xf] }
  0x10   : > { %628 = vmatpush.bf16.msra.mxu0 %v2722_v3  ;;  %742 = vmatpush.bf16.msra.mxu2 %v2736_v5  ;;  %v1997_v10 = vor.u32 %v2530_v8, %v1996_v7  ;;  %v2794_v15 = vld [vmem:[%s3468_s1 + $0x10] sm:$0xff]  ;;  %v2533_v18 = vld [vmem:[%s2744_s29 + $0x28] sm:$0xf0]  ;;  %v2823_v22 = vld [vmem:[%s3468_s1] sm:$0xff] }
  0x11   : > { %682 = vmatpush.bf16.msra.mxu1 %v2727_v4  ;;  %970 = vmatpush.bf16.msra.mxu3 %v2722_v3  ;;  %v2801_v16 = vld [vmem:[%s3468_s1 + $0x50] sm:$0xff]  ;;  %v2009_v19 = vor.u32 %v2533_v18, %v2008_v17  ;;  %v2810_v20 = vld [vmem:[%s3468_s1 + $0x8] sm:$0xff]  ;;  %v2828_v23 = vld [vmem:[%s3468_s1 + $0x40] sm:$0xff] }
  0x12   : > { %v2817_v21 = vld [vmem:[%s3468_s1 + $0x48] sm:$0xff]  ;;  %v1988_v24 = vld [vmem:[%s2744_s29] sm:$0xf]  ;;  %v2528_v26 = vld [vmem:[%s2744_s29 + $0x4] sm:$0xf] }
  0x13   : > { %2166 = vmatmul.msk.bf16.vlgmr.msra.gmra.mxu2 %vm599_vm0, %v1997_v10  ;;  %v2529_v25 = vld [vmem:[%s2744_s29 + $0x8] sm:$0xf0]  ;;  %v1990_v27 = vld [vmem:[%s2744_s29 + $0xc] sm:$0xf0]  ;;  %v2177_v28 = vld [vmem:[%s2744_s29 + $0xd8] sm:$0xf] }
  0x14   : > { %1023 = vmatpush.bf16.msrb.mxu2 %v2710_v1  ;;  %629 = vmatpush.bf16.msra.mxu0 %v2749_v6  ;;  %v2556_v29 = vld [vmem:[%s2744_s29 + $0xe0] sm:$0xf0]  ;;  %v1989_v30 = vor.u32 %v2529_v25, %v1988_v24  ;;  %v1993_v31 = vor.u32 %v2528_v26, %v1990_v27  ;;  %v2020_v33 = vld [vmem:[%s2744_s29 + $0x38] sm:$0xf]  ;;  %v2531_v38 = vld [vmem:[%s2744_s29 + $0x1c] sm:$0xf] }
  0x15   : > { %683 = vmatpush.bf16.msra.mxu1 %v2758_v9  ;;  %971 = vmatpush.bf16.msra.mxu3 %v2749_v6  ;;  %v2178_v32 = vor.u32 %v2556_v29, %v2177_v28  ;;  %v2536_v34 = vld [vmem:[%s2744_s29 + $0x40] sm:$0xf0]  ;;  %v2000_v36 = vld [vmem:[%s2744_s29 + $0x18] sm:$0xf]  ;;  %v2002_v39 = vld [vmem:[%s2744_s29 + $0x24] sm:$0xf0] }
  0x16   : > { %v2021_v35 = vor.u32 %v2536_v34, %v2020_v33  ;;  %v2532_v37 = vld [vmem:[%s2744_s29 + $0x20] sm:$0xf0]  ;;  %v2189_v40 = vld [vmem:[%s2744_s29 + $0xf0] sm:$0xf]  ;;  %v2559_v41 = vld [vmem:[%s2744_s29 + $0xf8] sm:$0xf0]  ;;  %v2005_v43 = vor.u32 %v2531_v38, %v2002_v39 }
  0x17   : > { %v2001_v42 = vor.u32 %v2532_v37, %v2000_v36  ;;  %v2190_v44 = vor.u32 %v2559_v41, %v2189_v40  ;;  %v2032_v45 = vld [vmem:[%s2744_s29 + $0x50] sm:$0xf]  ;;  %v2539_v46 = vld [vmem:[%s2744_s29 + $0x58] sm:$0xf0]  ;;  %v2534_v50 = vld [vmem:[%s2744_s29 + $0x34] sm:$0xf] }
  0x18   : > { %1024 = vmatpush.bf16.msrb.mxu2 %v2727_v4  ;;  %630 = vmatpush.bf16.msra.mxu0 %v2766_v11  ;;  %v2033_v47 = vor.u32 %v2539_v46, %v2032_v45  ;;  %v2012_v48 = vld [vmem:[%s2744_s29 + $0x30] sm:$0xf]  ;;  %v2535_v49 = vld [vmem:[%s2744_s29 + $0x38] sm:$0xf0]  ;;  %v2014_v51 = vld [vmem:[%s2744_s29 + $0x3c] sm:$0xf0] }
  0x19   : > { %684 = vmatpush.bf16.msra.mxu1 %v2773_v12  ;;  %972 = vmatpush.bf16.msra.mxu3 %v2766_v11  ;;  %v2201_v52 = vld [vmem:[%s2744_s29 + $0x108] sm:$0xf]  ;;  %v2562_v53 = vld [vmem:[%s2744_s29 + $0x110] sm:$0xf0]  ;;  %v2013_v54 = vor.u32 %v2535_v49, %v2012_v48  ;;  %v2017_v55 = vor.u32 %v2534_v50, %v2014_v51  ;;  %v2537_v62 = vld [vmem:[%s2744_s29 + $0x4c] sm:$0xf] }
  0x1a   : > { %v2202_v56 = vor.u32 %v2562_v53, %v2201_v52  ;;  %v2044_v57 = vld [vmem:[%s2744_s29 + $0x68] sm:$0xf]  ;;  %v2542_v58 = vld [vmem:[%s2744_s29 + $0x70] sm:$0xf0]  ;;  %v2026_v63 = vld [vmem:[%s2744_s29 + $0x54] sm:$0xf0] }
  0x1b   : > { %v2045_v59 = vor.u32 %v2542_v58, %v2044_v57  ;;  %v2024_v60 = vld [vmem:[%s2744_s29 + $0x48] sm:$0xf]  ;;  %v2538_v61 = vld [vmem:[%s2744_s29 + $0x50] sm:$0xf0]  ;;  %v2036_v8 = vld [vmem:[%s2744_s29 + $0x60] sm:$0xf] }
  0x1c   : > { %1025 = vmatpush.bf16.msrb.mxu2 %v2758_v9  ;;  %631 = vmatpush.bf16.msra.mxu0 %v2780_v13  ;;  %v2540_v10 = vld [vmem:[%s2744_s29 + $0x64] sm:$0xf]  ;;  %v2068_v17 = vld [vmem:[%s2744_s29 + $0x98] sm:$0xf]  ;;  %v2237_v24 = vld [vmem:[%s2744_s29 + $0x150] sm:$0xf] }
  0x1d   : > { %685 = vmatpush.bf16.msra.mxu1 %v2787_v14  ;;  %973 = vmatpush.bf16.msra.mxu3 %v2780_v13  ;;  %v2548_v18 = vld [vmem:[%s2744_s29 + $0xa0] sm:$0xf0]  ;;  %v2571_v25 = vld [vmem:[%s2744_s29 + $0x158] sm:$0xf0]  ;;  %v2080_v29 = vld [vmem:[%s2744_s29 + $0xb0] sm:$0xf] }
  0x1e   : > { %v2238_v28 = vor.u32 %v2571_v25, %v2237_v24  ;;  %v2547_v33 = vld [vmem:[%s2744_s29 + $0x98] sm:$0xf0]  ;;  %v2546_v34 = vld [vmem:[%s2744_s29 + $0x94] sm:$0xf]  ;;  %v2249_v36 = vld [vmem:[%s2744_s29 + $0x168] sm:$0xf] }
  0x1f   : > { %v2574_v37 = vld [vmem:[%s2744_s29 + $0x170] sm:$0xf0]  ;;  %v2092_v41 = vld [vmem:[%s2744_s29 + $0xc8] sm:$0xf]  ;;  %v2549_v46 = vld [vmem:[%s2744_s29 + $0xac] sm:$0xf] }
  0x20   : > { %1026 = vmatpush.bf16.msrb.mxu2 %v2773_v12  ;;  %632 = vmatpush.bf16.msra.mxu0 %v2794_v15  ;;  %v2250_v40 = vor.u32 %v2574_v37, %v2249_v36  ;;  %v2550_v45 = vld [vmem:[%s2744_s29 + $0xb0] sm:$0xf0]  ;;  %v2261_v48 = vld [vmem:[%s2744_s29 + $0x180] sm:$0xf]  ;;  %v2577_v49 = vld [vmem:[%s2744_s29 + $0x188] sm:$0xf0] }
  0x21   : > { %686 = vmatpush.bf16.msra.mxu1 %v2801_v16  ;;  %974 = vmatpush.bf16.msra.mxu3 %v2794_v15  ;;  %v2262_v53 = vor.u32 %v2577_v49, %v2261_v48  ;;  %v2952_v58 = vld [vmem:[%s3469_s2] ss:$0 sm:$0xff]  ;;  %v2582_v24 = vld [vmem:[%s2744_s29 + $0x1b4] sm:$0xf]  ;;  %v2561_v36 = vld [vmem:[%s2744_s29 + $0x10c] sm:$0xf] }
  0x22   : > { %v2296_v25 = vld [vmem:[%s2744_s29 + $0x1bc] sm:$0xf0]  ;;  %v2203_v37 = vld [vmem:[%s2744_s29 + $0x114] sm:$0xf0]  ;;  %v2586_v49 = vld [vmem:[%s2744_s29 + $0x1d0] sm:$0xf0] }
  0x23   : > { %2167 = vmatmul.msk.bf16.gmra.mxu2 %vm599_vm0, %v2009_v19  ;;  %v2069_v19 = vor.u32 %v2548_v18, %v2068_v17 }
  0x24   : > { %1027 = vmatpush.bf16.msrb.mxu2 %v2787_v14  ;;  %633 = vmatpush.bf16.msra.mxu0 %v2810_v20 }
  0x25   : > { %687 = vmatpush.bf16.msra.mxu1 %v2817_v21  ;;  %975 = vmatpush.bf16.msra.mxu3 %v2810_v20 }
  0x28   : > { %1028 = vmatpush.bf16.msrb.mxu2 %v2801_v16  ;;  %634 = vmatpush.bf16.msra.mxu0 %v2823_v22 }
  0x29   : > { %688 = vmatpush.bf16.msra.mxu1 %v2828_v23  ;;  %976 = vmatpush.bf16.msra.mxu3 %v2823_v22 }
  0x2b   : > { %635 = vmatmul.bf16.vlgmr.msra.gmra.mxu0 %v1989_v30  ;;  %v2551_v30 = vld [vmem:[%s2744_s29 + $0xb8] sm:$0xf0] }
  0x2c   : > { %1083 = vmatpush.bf16.msrb.mxu0 %v2715_v2  ;;  %689 = vmatmul.bf16.vlgmr.msra.gmra.mxu1 %v1993_v31  ;;  %v2081_v31 = vor.u32 %v2551_v30, %v2080_v29 }
  0x2d   : > { %1383 = vmatpush.bf16.msrb.mxu3 %v2710_v1  ;;  %1329 = vmatpush.bf16.msrb.mxu1 %v2705_v0 }
  0x2e   : > { %977 = vmatmul.bf16.vlgmr.msra.gmra.mxu3 %v2178_v32  ;;  %1029 = vmatpush.bf16.msrb.mxu2 %v2817_v21  ;;  %v2060_v32 = vld [vmem:[%s2744_s29 + $0x90] sm:$0xf] }
  0x2f   : > { %v2061_v38 = vor.u32 %v2547_v33, %v2060_v32 }
  0x30   : > { %1084 = vmatpush.bf16.msrb.mxu0 %v2736_v5 }
  0x31   : > { %1384 = vmatpush.bf16.msrb.mxu3 %v2727_v4  ;;  %1330 = vmatpush.bf16.msrb.mxu1 %v2722_v3 }
  0x32   : > { %1030 = vmatpush.bf16.msrb.mxu2 %v2828_v23 }
  0x33   : > { %2168 = vmatmul.msk.bf16.gmra.mxu2 %vm599_vm0, %v2021_v35  ;;  %v2062_v35 = vld [vmem:[%s2744_s29 + $0x9c] sm:$0xf0] }
  0x34   : > { %1671 = vmatpush.bf16.msra.mxu0 %v2705_v0  ;;  %v2213_v0 = vld [vmem:[%s2744_s29 + $0x120] sm:$0xf]  ;;  %v2065_v39 = vor.u32 %v2546_v34, %v2062_v35 }
  0x35   : > { %1385 = vmatpush.bf16.msrb.mxu3 %v2758_v9  ;;  %1331 = vmatpush.bf16.msrb.mxu1 %v2749_v6 }
  0x36   : > { %1443 = vmatpush.bf16.msra.mxu2 %v2715_v2 }
  0x38   : > { %1672 = vmatpush.bf16.msra.mxu0 %v2722_v3  ;;  %v2029_v3 = vor.u32 %v2537_v62, %v2026_v63  ;;  %v2086_v62 = vld [vmem:[%s2744_s29 + $0xcc] sm:$0xf0]  ;;  %v2273_v63 = vld [vmem:[%s2744_s29 + $0x198] sm:$0xf] }
  0x39   : > { %1386 = vmatpush.bf16.msrb.mxu3 %v2773_v12  ;;  %1332 = vmatpush.bf16.msrb.mxu1 %v2766_v11 }
  0x3a   : > { %1444 = vmatpush.bf16.msra.mxu2 %v2736_v5 }
  0x3b   : > { %640 = vmatmul.bf16.gmra.mxu0 %v2001_v42  ;;  %v2554_v42 = vld [vmem:[%s2744_s29 + $0xd0] sm:$0xf0] }
  0x3c   : > { %1673 = vmatpush.bf16.msra.mxu0 %v2749_v6  ;;  %694 = vmatmul.bf16.gmra.mxu1 %v2005_v43  ;;  %v2545_v6 = vld [vmem:[%s2744_s29 + $0x88] sm:$0xf0]  ;;  %v2093_v43 = vor.u32 %v2554_v42, %v2092_v41  ;;  %v2206_v41 = vor.u32 %v2561_v36, %v2203_v37 }
  0x3d   : > { %1387 = vmatpush.bf16.msrb.mxu3 %v2787_v14  ;;  %1333 = vmatpush.bf16.msrb.mxu1 %v2780_v13 }
  0x3e   : > { %982 = vmatmul.bf16.gmra.mxu3 %v2190_v44  ;;  %v2072_v44 = vld [vmem:[%s2744_s29 + $0xa8] sm:$0xf] }
  0x3f   : > { %v2073_v51 = vor.u32 %v2550_v45, %v2072_v44  ;;  %v2197_v45 = vld [vmem:[%s2744_s29 + $0xf8] sm:$0xf] }
  0x40   : > { %1674 = vmatpush.bf16.msra.mxu0 %v2766_v11  ;;  %v2038_v11 = vld [vmem:[%s2744_s29 + $0x6c] sm:$0xf0] }
  0x41   : > { %1388 = vmatpush.bf16.msrb.mxu3 %v2801_v16  ;;  %1334 = vmatpush.bf16.msrb.mxu1 %v2794_v15 }
  0x43   : > { %2169 = vmatmul.msk.bf16.gmra.mxu2 %vm599_vm0, %v2033_v47  ;;  %v2074_v47 = vld [vmem:[%s2744_s29 + $0xb4] sm:$0xf0] }
  0x44   : > { %1675 = vmatpush.bf16.msra.mxu0 %v2780_v13  ;;  %v2568_v13 = vld [vmem:[%s2744_s29 + $0x140] sm:$0xf0]  ;;  %v2077_v52 = vor.u32 %v2549_v46, %v2074_v47  ;;  %v2306_v47 = vld [vmem:[%s2744_s29 + $0x1c8] sm:$0xf] }
  0x45   : > { %1389 = vmatpush.bf16.msrb.mxu3 %v2817_v21  ;;  %1335 = vmatpush.bf16.msrb.mxu1 %v2810_v20  ;;  %v2560_v46 = vld [vmem:[%s2744_s29 + $0x100] sm:$0xf0] }
  0x48   : > { %1676 = vmatpush.bf16.msra.mxu0 %v2794_v15  ;;  %v2041_v15 = vor.u32 %v2540_v10, %v2038_v11  ;;  %v2558_v10 = vld [vmem:[%s2744_s29 + $0xf4] sm:$0xf]  ;;  %v2191_v11 = vld [vmem:[%s2744_s29 + $0xfc] sm:$0xf0] }
  0x49   : > { %1390 = vmatpush.bf16.msrb.mxu3 %v2828_v23  ;;  %1336 = vmatpush.bf16.msrb.mxu1 %v2823_v22 }
  0x4b   : > { %645 = vmatmul.bf16.gmra.mxu0 %v2013_v54  ;;  %v2555_v54 = vld [vmem:[%s2744_s29 + $0xdc] sm:$0xf] }
  0x4c   : > { %1677 = vmatpush.bf16.msra.mxu0 %v2810_v20  ;;  %699 = vmatmul.bf16.gmra.mxu1 %v2017_v55  ;;  %v2048_v20 = vld [vmem:[%s2744_s29 + $0x78] sm:$0xf]  ;;  %v2179_v55 = vld [vmem:[%s2744_s29 + $0xe4] sm:$0xf0] }
  0x4d   : > { %1785 = vmatpush.bf16.msra.mxu3 %v2715_v2  ;;  %1725 = vmatpush.bf16.msra.mxu1 %v2710_v1  ;;  %v2565_v1 = vld [vmem:[%s2744_s29 + $0x128] sm:$0xf0]  ;;  %v2025_v2 = vor.u32 %v2538_v61, %v2024_v60  ;;  %v2182_v57 = vor.u32 %v2555_v54, %v2179_v55  ;;  %v2552_v61 = vld [vmem:[%s2744_s29 + $0xc4] sm:$0xf]  ;;  %v2198_v54 = vor.u32 %v2560_v46, %v2197_v45  ;;  %v2591_v45 = vld [vmem:[%s2744_s29 + $0x1fc] sm:$0xf] }
  0x4e   : > { %987 = vmatmul.bf16.gmra.mxu3 %v2202_v56  ;;  %v2553_v60 = vld [vmem:[%s2744_s29 + $0xc8] sm:$0xf0]  ;;  %v2332_v46 = vld [vmem:[%s2744_s29 + $0x204] sm:$0xf0] }
  0x50   : > { %1678 = vmatpush.bf16.msra.mxu0 %v2823_v22  ;;  %v2543_v22 = vld [vmem:[%s2744_s29 + $0x7c] sm:$0xf] }
  0x51   : > { %1786 = vmatpush.bf16.msra.mxu3 %v2736_v5  ;;  %1726 = vmatpush.bf16.msra.mxu1 %v2727_v4  ;;  %v2214_v4 = vor.u32 %v2565_v1, %v2213_v0  ;;  %v2056_v5 = vld [vmem:[%s2744_s29 + $0x80] sm:$0xf]  ;;  %v2580_v0 = vld [vmem:[%s2744_s29 + $0x1a0] sm:$0xf0] }
  0x52   : > { %v2057_v7 = vor.u32 %v2545_v6, %v2056_v5  ;;  %v2274_v5 = vor.u32 %v2580_v0, %v2273_v63  ;;  %v2564_v63 = vld [vmem:[%s2744_s29 + $0x124] sm:$0xf]  ;;  %v2215_v0 = vld [vmem:[%s2744_s29 + $0x12c] sm:$0xf0] }
  0x53   : > { %2170 = vmatmul.msk.bf16.gmra.mxu2 %vm599_vm0, %v2045_v59  ;;  %v2084_v59 = vld [vmem:[%s2744_s29 + $0xc0] sm:$0xf] }
  0x55   : > { %1727 = vmatpush.bf16.msra.mxu1 %v2758_v9  ;;  %v2541_v9 = vld [vmem:[%s2744_s29 + $0x68] sm:$0xf0] }
  0x59   : > { %1728 = vmatpush.bf16.msra.mxu1 %v2773_v12  ;;  %v2225_v12 = vld [vmem:[%s2744_s29 + $0x138] sm:$0xf] }
  0x5b   : > { %650 = vmatmul.bf16.gmra.mxu0 %v2025_v2  ;;  %v2085_v2 = vor.u32 %v2553_v60, %v2084_v59 }
  0x5c   : > { %704 = vmatmul.bf16.gmra.mxu1 %v2029_v3 }
  0x5d   : > { %1729 = vmatpush.bf16.msra.mxu1 %v2787_v14  ;;  %v2037_v14 = vor.u32 %v2541_v9, %v2036_v8 }
  0x5e   : > { %992 = vmatmul.bf16.gmra.mxu3 %v2214_v4  ;;  %v2089_v4 = vor.u32 %v2552_v61, %v2086_v62 }
  0x61   : > { %1730 = vmatpush.bf16.msra.mxu1 %v2801_v16  ;;  %v2226_v16 = vor.u32 %v2568_v13, %v2225_v12 }
  0x63   : > { %2171 = vmatmul.msk.bf16.gmra.mxu2 %vm599_vm0, %v2057_v7 }
  0x65   : > { %1731 = vmatpush.bf16.msra.mxu1 %v2817_v21  ;;  %v2544_v21 = vld [vmem:[%s2744_s29 + $0x80] sm:$0xf0] }
  0x66   : > { %v2049_v26 = vor.u32 %v2544_v21, %v2048_v20  ;;  %v2557_v20 = vld [vmem:[%s2744_s29 + $0xe8] sm:$0xf0]  ;;  %v2294_v21 = vld [vmem:[%s2744_s29 + $0x1b0] sm:$0xf] }
  0x69   : > { %1732 = vmatpush.bf16.msra.mxu1 %v2828_v23  ;;  %v2050_v23 = vld [vmem:[%s2744_s29 + $0x84] sm:$0xf0] }
  0x6a   : > { %v2053_v27 = vor.u32 %v2543_v22, %v2050_v23  ;;  %v2583_v23 = vld [vmem:[%s2744_s29 + $0x1b8] sm:$0xf0] }
  0x6b   : > { %655 = vmatmul.bf16.gmra.mxu0 %v2037_v14  ;;  %v2295_v30 = vor.u32 %v2583_v23, %v2294_v21 }
  0x6c   : > { %709 = vmatmul.bf16.gmra.mxu1 %v2041_v15  ;;  %v2194_v15 = vor.u32 %v2558_v10, %v2191_v11  ;;  %v2563_v10 = vld [vmem:[%s2744_s29 + $0x118] sm:$0xf0]  ;;  %v2318_v11 = vld [vmem:[%s2744_s29 + $0x1e0] sm:$0xf] }
  0x6e   : > { %997 = vmatmul.bf16.gmra.mxu3 %v2226_v16 }
  0x73   : > { %2172 = vmatmul.msk.bf16.gmra.mxu2 %vm599_vm0, %v2069_v19  ;;  %v2185_v19 = vld [vmem:[%s2744_s29 + $0xe0] sm:$0xf] }
  0x7b   : > { %660 = vmatmul.bf16.gmra.mxu0 %v2049_v26 }
  0x7c   : > { %714 = vmatmul.bf16.gmra.mxu1 %v2053_v27 }
  0x7e   : > { %1002 = vmatmul.bf16.gmra.mxu3 %v2238_v28  ;;  %v2186_v28 = vor.u32 %v2557_v20, %v2185_v19 }
  0x83   : > { %2173 = vmatmul.msk.bf16.gmra.mxu2 %vm599_vm0, %v2081_v31  ;;  %v2299_v31 = vor.u32 %v2582_v24, %v2296_v25 }
  0x8b   : > { %665 = vmatmul.bf16.gmra.mxu0 %v2061_v38 }
  0x8c   : > { %719 = vmatmul.bf16.gmra.mxu1 %v2065_v39 }
  0x8e   : > { %1007 = vmatmul.bf16.gmra.mxu3 %v2250_v40 }
  0x93   : > { %2174 = vmatmul.msk.bf16.gmra.mxu2 %vm599_vm0, %v2093_v43 }
  0x96   : > { %v744_v50 = vpop.f32.mrf.mxu2 }
  0x9b   : > { %670 = vmatmul.bf16.gmra.mxu0 %v2073_v51  ;;  %v2308_v51 = vld [vmem:[%s2744_s29 + $0x1d4] sm:$0xf0] }
  0x9c   : > { %724 = vmatmul.bf16.gmra.mxu1 %v2077_v52 }
  0x9e   : > { %1012 = vmatmul.bf16.gmra.mxu3 %v2262_v53  ;;  %v746_v56 = vpop.f32.mrf.mxu2 }
  0xa3   : > { %1031 = vmatmul.bf16.vlgmr.msrb.gmra.mxu2 %v2182_v57 }
  0xa6   : > { %v749_v1 = vpop.f32.mrf.mxu2 }
  0xa8   : > { %v636_v3 = vpop.f32.mrf.mxu0 }
  0xa9   : > { %v637_v6 = vadd.f32 %v2952_v58, %v636_v3  ;;  %v690_v7 = vpop.f32.mrf.mxu1 }
  0xab   : > { %v691_v8 = vadd.f32 %v690_v7, %v637_v6  ;;  %675 = vmatmul.bf16.gmra.mxu0 %v2085_v2 }
  0xac   : > { %729 = vmatmul.bf16.gmra.mxu1 %v2089_v4  ;;  %v2218_v4 = vor.u32 %v2564_v63, %v2215_v0 }
  0xad   : > { %v2961_v9 = vadd.f32 %v744_v50, %v691_v8  ;;  %v2585_v50 = vld [vmem:[%s2744_s29 + $0x1cc] sm:$0xf]  ;;  %v2209_v8 = vld [vmem:[%s2744_s29 + $0x110] sm:$0xf] }
  0xae   : > { %1017 = vmatmul.bf16.gmra.mxu3 %v2274_v5  ;;  %v751_v12 = vpop.f32.mrf.mxu2  ;;  %v2311_v57 = vor.u32 %v2585_v50, %v2308_v51  ;;  %v2210_v19 = vor.u32 %v2563_v10, %v2209_v8  ;;  %v2569_v8 = vld [vmem:[%s2744_s29 + $0x148] sm:$0xf0]  ;;  %v2342_v10 = vld [vmem:[%s2744_s29 + $0x210] sm:$0xf] }
  0xb0   : > { %v638_v14 = vpop.f32.mrf.mxu0 }
  0xb1   : > { %v2965_v13 = vpop.f32.mrf.mxu3  ;;  %v639_v16 = vadd.f32 %v2952_v58, %v638_v14  ;;  %v692_v17 = vpop.f32.mrf.mxu1  ;;  %v2589_v14 = vld [vmem:[%s2744_s29 + $0x1e8] sm:$0xf0] }
  0xb2   : > { %v2319_v21 = vor.u32 %v2589_v14, %v2318_v11  ;;  %v2595_v14 = vld [vmem:[%s2744_s29 + $0x218] sm:$0xf0] }
  0xb3   : > { %v693_v18 = vadd.f32 %v692_v17, %v639_v16  ;;  %1036 = vmatmul.bf16.gmra.mxu2 %v2194_v15  ;;  %v2588_v15 = vld [vmem:[%s2744_s29 + $0x1e4] sm:$0xf]  ;;  %v2320_v16 = vld [vmem:[%s2744_s29 + $0x1ec] sm:$0xf0] }
  0xb4   : > { %v2323_v23 = vor.u32 %v2588_v15, %v2320_v16  ;;  %v2594_v15 = vld [vmem:[%s2744_s29 + $0x214] sm:$0xf]  ;;  %v2344_v16 = vld [vmem:[%s2744_s29 + $0x21c] sm:$0xf0] }
  0xb5   : > { %v2971_v22 = vadd.f32 %v746_v56, %v693_v18  ;;  %v2307_v56 = vor.u32 %v2586_v49, %v2306_v47 }
  0xb6   : > { %v754_v26 = vpop.f32.mrf.mxu2 }
  0xb8   : > { %v641_v29 = vpop.f32.mrf.mxu0 }
  0xb9   : > { %v2976_v27 = vpop.f32.mrf.mxu3  ;;  %v642_v32 = vadd.f32 %v2952_v58, %v641_v29  ;;  %v695_v33 = vpop.f32.mrf.mxu1  ;;  %v2567_v29 = vld [vmem:[%s2744_s29 + $0x13c] sm:$0xf] }
  0xbb   : > { %v696_v34 = vadd.f32 %v695_v33, %v642_v32  ;;  %2283 = vmatmul.msk.bf16.vlgmr.msrb.gmra.mxu0 %vm599_vm0, %v2186_v28 }
  0xbc   : > { %1337 = vmatmul.bf16.vlgmr.msrb.gmra.mxu1 %v2295_v30  ;;  %v2227_v30 = vld [vmem:[%s2744_s29 + $0x144] sm:$0xf0] }
  0xbd   : > { %v2980_v35 = vadd.f32 %v749_v1, %v696_v34  ;;  %v2230_v34 = vor.u32 %v2567_v29, %v2227_v30 }
  0xbe   : > { %1391 = vmatmul.bf16.vlgmr.msrb.gmra.mxu3 %v2299_v31  ;;  %v756_v38 = vpop.f32.mrf.mxu2 }
  0xc0   : > { %v643_v40 = vpop.f32.mrf.mxu0 }
  0xc1   : > { %v2984_v39 = vpop.f32.mrf.mxu3  ;;  %v644_v42 = vadd.f32 %v2952_v58, %v643_v40  ;;  %v697_v43 = vpop.f32.mrf.mxu1  ;;  %v2221_v40 = vld [vmem:[%s2744_s29 + $0x128] sm:$0xf] }
  0xc3   : > { %v698_v44 = vadd.f32 %v697_v43, %v644_v42  ;;  %1041 = vmatmul.bf16.gmra.mxu2 %v2206_v41  ;;  %v2566_v41 = vld [vmem:[%s2744_s29 + $0x130] sm:$0xf0]  ;;  %v2330_v42 = vld [vmem:[%s2744_s29 + $0x1f8] sm:$0xf] }
  0xc4   : > { %v2222_v50 = vor.u32 %v2566_v41, %v2221_v40 }
  0xc5   : > { %v2990_v48 = vadd.f32 %v751_v12, %v698_v44  ;;  %v2592_v44 = vld [vmem:[%s2744_s29 + $0x200] sm:$0xf0] }
  0xc6   : > { %v759_v52 = vpop.f32.mrf.mxu2 }
  0xc8   : > { %v646_v55 = vpop.f32.mrf.mxu0 }
  0xc9   : > { %v2995_v53 = vpop.f32.mrf.mxu3  ;;  %v647_v59 = vadd.f32 %v2952_v58, %v646_v55  ;;  %v700_v60 = vpop.f32.mrf.mxu1 }
  0xcb   : > { %v701_v61 = vadd.f32 %v700_v60, %v647_v59  ;;  %2284 = vmatmul.msk.bf16.gmra.mxu0 %vm599_vm0, %v2198_v54  ;;  %v2335_v54 = vor.u32 %v2591_v45, %v2332_v46  ;;  %v2570_v60 = vld [vmem:[%s2744_s29 + $0x154] sm:$0xf]  ;;  %v2572_v45 = vld [vmem:[%s2744_s29 + $0x160] sm:$0xf0]  ;;  %v2354_v46 = vld [vmem:[%s2744_s29 + $0x228] sm:$0xf] }
  0xcc   : > { %1342 = vmatmul.bf16.gmra.mxu1 %v2307_v56 }
  0xcd   : > { %v2999_v62 = vadd.f32 %v754_v26, %v701_v61  ;;  %v2239_v61 = vld [vmem:[%s2744_s29 + $0x15c] sm:$0xf0] }
  0xce   : > { %1396 = vmatmul.bf16.gmra.mxu3 %v2311_v57  ;;  %v761_v1 = vpop.f32.mrf.mxu2 }
  0xd0   : > { %v648_v3 = vpop.f32.mrf.mxu0 }
  0xd1   : > { %v3003_v2 = vpop.f32.mrf.mxu3  ;;  %v649_v5 = vadd.f32 %v2952_v58, %v648_v3  ;;  %v702_v6 = vpop.f32.mrf.mxu1  ;;  %v2242_v3 = vor.u32 %v2570_v60, %v2239_v61 }
  0xd3   : > { %v703_v7 = vadd.f32 %v702_v6, %v649_v5  ;;  %1046 = vmatmul.bf16.gmra.mxu2 %v2218_v4 }
  0xd5   : > { %v3009_v12 = vadd.f32 %v756_v38, %v703_v7  ;;  %v2233_v7 = vld [vmem:[%s2744_s29 + $0x140] sm:$0xf] }
  0xd6   : > { %v764_v17 = vpop.f32.mrf.mxu2 }
  0xd8   : > { %v651_v20 = vpop.f32.mrf.mxu0 }
  0xd9   : > { %v3014_v18 = vpop.f32.mrf.mxu3  ;;  %v652_v24 = vadd.f32 %v2952_v58, %v651_v20  ;;  %v705_v25 = vpop.f32.mrf.mxu1  ;;  %v2234_v20 = vor.u32 %v2569_v8, %v2233_v7 }
  0xdb   : > { %v706_v26 = vadd.f32 %v705_v25, %v652_v24  ;;  %2285 = vmatmul.msk.bf16.gmra.mxu0 %vm599_vm0, %v2210_v19  ;;  %v2347_v24 = vor.u32 %v2594_v15, %v2344_v16 }
  0xdc   : > { %1347 = vmatmul.bf16.gmra.mxu1 %v2319_v21 }
  0xdd   : > { %v3018_v28 = vadd.f32 %v759_v52, %v706_v26  ;;  %v2331_v52 = vor.u32 %v2592_v44, %v2330_v42  ;;  %v2245_v44 = vld [vmem:[%s2744_s29 + $0x158] sm:$0xf] }
  0xde   : > { %1401 = vmatmul.bf16.gmra.mxu3 %v2323_v23  ;;  %v766_v31 = vpop.f32.mrf.mxu2  ;;  %v2343_v23 = vor.u32 %v2595_v14, %v2342_v10 }
  0xe0   : > { %v653_v33 = vpop.f32.mrf.mxu0 }
  0xe1   : > { %v3022_v32 = vpop.f32.mrf.mxu3  ;;  %v654_v36 = vadd.f32 %v2952_v58, %v653_v33  ;;  %v707_v37 = vpop.f32.mrf.mxu1  ;;  %v2251_v33 = vld [vmem:[%s2744_s29 + $0x174] sm:$0xf0] }
  0xe3   : > { %v708_v38 = vadd.f32 %v707_v37, %v654_v36  ;;  %1051 = vmatmul.bf16.gmra.mxu2 %v2230_v34 }
  0xe5   : > { %v3028_v43 = vadd.f32 %v761_v1, %v708_v38 }
  0xe6   : > { %v769_v47 = vpop.f32.mrf.mxu2 }
  0xe8   : > { %v656_v51 = vpop.f32.mrf.mxu0 }
  0xe9   : > { %v3033_v49 = vpop.f32.mrf.mxu3  ;;  %v657_v55 = vadd.f32 %v2952_v58, %v656_v51  ;;  %v710_v56 = vpop.f32.mrf.mxu1  ;;  %v2597_v51 = vld [vmem:[%s2744_s29 + $0x22c] sm:$0xf] }
  0xeb   : > { %v711_v57 = vadd.f32 %v710_v56, %v657_v55  ;;  %2286 = vmatmul.msk.bf16.gmra.mxu0 %vm599_vm0, %v2222_v50  ;;  %v2246_v56 = vor.u32 %v2572_v45, %v2245_v44 }
  0xec   : > { %1352 = vmatmul.bf16.gmra.mxu1 %v2331_v52  ;;  %v2356_v52 = vld [vmem:[%s2744_s29 + $0x234] sm:$0xf0] }
  0xed   : > { %v3037_v59 = vadd.f32 %v764_v17, %v711_v57  ;;  %v2359_v61 = vor.u32 %v2597_v51, %v2356_v52 }
  0xee   : > { %1406 = vmatmul.bf16.gmra.mxu3 %v2335_v54  ;;  %v771_v63 = vpop.f32.mrf.mxu2 }
  0xf0   : > { %v658_v1 = vpop.f32.mrf.mxu0 }
  0xf1   : > { %v3041_v0 = vpop.f32.mrf.mxu3  ;;  %v659_v4 = vadd.f32 %v2952_v58, %v658_v1  ;;  %v712_v5 = vpop.f32.mrf.mxu1 }
  0xf3   : > { %v713_v6 = vadd.f32 %v712_v5, %v659_v4  ;;  %1056 = vmatmul.bf16.gmra.mxu2 %v2242_v3  ;;  %v2576_v5 = vld [vmem:[%s2744_s29 + $0x184] sm:$0xf] }
  0xf5   : > { %v3047_v11 = vadd.f32 %v766_v31, %v713_v6  ;;  %v2573_v31 = vld [vmem:[%s2744_s29 + $0x16c] sm:$0xf]  ;;  %v2263_v6 = vld [vmem:[%s2744_s29 + $0x18c] sm:$0xf0] }
  0xf6   : > { %v774_v17 = vpop.f32.mrf.mxu2  ;;  %v2254_v38 = vor.u32 %v2573_v31, %v2251_v33  ;;  %v2266_v14 = vor.u32 %v2576_v5, %v2263_v6  ;;  %v2378_v5 = vld [vmem:[%s2744_s29 + $0x258] sm:$0xf] }
  0xf8   : > { %v661_v21 = vpop.f32.mrf.mxu0 }
  0xf9   : > { %v3052_v19 = vpop.f32.mrf.mxu3  ;;  %v662_v25 = vadd.f32 %v2952_v58, %v661_v21  ;;  %v715_v26 = vpop.f32.mrf.mxu1  ;;  %v2257_v21 = vld [vmem:[%s2744_s29 + $0x170] sm:$0xf] }
  0xfb   : > { %v716_v29 = vadd.f32 %v715_v26, %v662_v25  ;;  %2287 = vmatmul.msk.bf16.gmra.mxu0 %vm599_vm0, %v2234_v20  ;;  %v2600_v26 = vld [vmem:[%s2744_s29 + $0x244] sm:$0xf] }
  0xfc   : > { %1357 = vmatmul.bf16.gmra.mxu1 %v2343_v23  ;;  %v2575_v23 = vld [vmem:[%s2744_s29 + $0x178] sm:$0xf0] }
  0xfd   : > { %v3056_v30 = vadd.f32 %v769_v47, %v716_v29  ;;  %v2598_v47 = vld [vmem:[%s2744_s29 + $0x230] sm:$0xf0]  ;;  %v2368_v29 = vld [vmem:[%s2744_s29 + $0x24c] sm:$0xf0] }
  0xfe   : > { %1411 = vmatmul.bf16.gmra.mxu3 %v2347_v24  ;;  %v776_v34 = vpop.f32.mrf.mxu2  ;;  %v2355_v60 = vor.u32 %v2598_v47, %v2354_v46  ;;  %v2366_v24 = vld [vmem:[%s2744_s29 + $0x240] sm:$0xf]  ;;  %v2579_v46 = vld [vmem:[%s2744_s29 + $0x19c] sm:$0xf]  ;;  %v2275_v47 = vld [vmem:[%s2744_s29 + $0x1a4] sm:$0xf0] }
 0x100   : > { %v663_v37 = vpop.f32.mrf.mxu0 }
 0x101   : > { %v3060_v36 = vpop.f32.mrf.mxu3  ;;  %v664_v40 = vadd.f32 %v2952_v58, %v663_v37  ;;  %v717_v41 = vpop.f32.mrf.mxu1  ;;  %v2258_v37 = vor.u32 %v2575_v23, %v2257_v21 }
 0x103   : > { %v718_v42 = vadd.f32 %v717_v41, %v664_v40  ;;  %1061 = vmatmul.bf16.gmra.mxu2 %v2254_v38  ;;  %v2371_v41 = vor.u32 %v2600_v26, %v2368_v29 }
 0x105   : > { %v3066_v50 = vadd.f32 %v771_v63, %v718_v42 }
 0x106   : > { %v779_v54 = vpop.f32.mrf.mxu2 }
 0x108   : > { %v666_v57 = vpop.f32.mrf.mxu0 }
 0x109   : > { %v3071_v55 = vpop.f32.mrf.mxu3  ;;  %v667_v1 = vadd.f32 %v2952_v58, %v666_v57  ;;  %v720_v3 = vpop.f32.mrf.mxu1  ;;  %v2278_v57 = vor.u32 %v2579_v46, %v2275_v47 }
 0x10b   : > { %v721_v4 = vadd.f32 %v720_v3, %v667_v1  ;;  %2288 = vmatmul.msk.bf16.gmra.mxu0 %vm599_vm0, %v2246_v56  ;;  %v2269_v3 = vld [vmem:[%s2744_s29 + $0x188] sm:$0xf] }
 0x10c   : > { %1362 = vmatmul.bf16.gmra.mxu1 %v2355_v60 }
 0x10d   : > { %v3075_v63 = vadd.f32 %v774_v17, %v721_v4  ;;  %v2601_v17 = vld [vmem:[%s2744_s29 + $0x248] sm:$0xf0]  ;;  %v2578_v4 = vld [vmem:[%s2744_s29 + $0x190] sm:$0xf0] }
 0x10e   : > { %1416 = vmatmul.bf16.gmra.mxu3 %v2359_v61  ;;  %v781_v7 = vpop.f32.mrf.mxu2  ;;  %v2367_v40 = vor.u32 %v2601_v17, %v2366_v24  ;;  %v2270_v21 = vor.u32 %v2578_v4, %v2269_v3  ;;  %v2607_v4 = vld [vmem:[%s2744_s29 + $0x278] sm:$0xf0] }
 0x110   : > { %v668_v10 = vpop.f32.mrf.mxu0 }
 0x111   : > { %v3079_v8 = vpop.f32.mrf.mxu3  ;;  %v669_v15 = vadd.f32 %v2952_v58, %v668_v10  ;;  %v722_v16 = vpop.f32.mrf.mxu1  ;;  %v2603_v10 = vld [vmem:[%s2744_s29 + $0x25c] sm:$0xf] }
 0x113   : > { %v723_v20 = vadd.f32 %v722_v16, %v669_v15  ;;  %1066 = vmatmul.bf16.gmra.mxu2 %v2266_v14  ;;  %v2380_v14 = vld [vmem:[%s2744_s29 + $0x264] sm:$0xf0]  ;;  %v979_v15 = vadd.f32 %v2952_v58, %v2965_v13 }
 0x114   : > { %v2383_v26 = vor.u32 %v2603_v10, %v2380_v14 }
 0x115   : > { %v3085_v25 = vadd.f32 %v776_v34, %v723_v20 }
 0x116   : > { %v784_v31 = vpop.f32.mrf.mxu2 }
 0x118   : > { %v671_v38 = vpop.f32.mrf.mxu0 }
 0x119   : > { %v3090_v33 = vpop.f32.mrf.mxu3  ;;  %v672_v42 = vadd.f32 %v2952_v58, %v671_v38  ;;  %v725_v44 = vpop.f32.mrf.mxu1  ;;  %v2302_v38 = vld [vmem:[%s2744_s29 + $0x1b8] sm:$0xf] }
 0x11b   : > { %v726_v45 = vadd.f32 %v725_v44, %v672_v42  ;;  %2289 = vmatmul.msk.bf16.gmra.mxu0 %vm599_vm0, %v2258_v37 }
 0x11c   : > { %1367 = vmatmul.bf16.gmra.mxu1 %v2367_v40  ;;  %v2584_v40 = vld [vmem:[%s2744_s29 + $0x1c0] sm:$0xf0] }
 0x11d   : > { %v3094_v34 = vadd.f32 %v779_v54, %v726_v45  ;;  %v2604_v54 = vld [vmem:[%s2744_s29 + $0x260] sm:$0xf0]  ;;  %v2303_v47 = vor.u32 %v2584_v40, %v2302_v38  ;;  %v2314_v38 = vld [vmem:[%s2744_s29 + $0x1d0] sm:$0xf]  ;;  %v2587_v40 = vld [vmem:[%s2744_s29 + $0x1d8] sm:$0xf0] }
 0x11e   : > { %1421 = vmatmul.bf16.gmra.mxu3 %v2371_v41  ;;  %v786_v51 = vpop.f32.mrf.mxu2  ;;  %v2379_v17 = vor.u32 %v2604_v54, %v2378_v5  ;;  %v981_v41 = vadd.f32 %v2952_v58, %v2976_v27  ;;  %v2606_v27 = vld [vmem:[%s2744_s29 + $0x274] sm:$0xf]  ;;  %v2392_v5 = vld [vmem:[%s2744_s29 + $0x27c] sm:$0xf0]  ;;  %v984_v54 = vadd.f32 %v2952_v58, %v2984_v39 }
 0x120   : > { %v673_v56 = vpop.f32.mrf.mxu0 }
 0x121   : > { %v3098_v52 = vpop.f32.mrf.mxu3  ;;  %v674_v60 = vadd.f32 %v2952_v58, %v673_v56  ;;  %v727_v61 = vpop.f32.mrf.mxu1 }
 0x123   : > { %v728_v1 = vadd.f32 %v727_v61, %v674_v60  ;;  %1071 = vmatmul.bf16.gmra.mxu2 %v2278_v57  ;;  %v2581_v61 = vld [vmem:[%s2744_s29 + $0x1a8] sm:$0xf0] }
 0x125   : > { %v3104_v6 = vadd.f32 %v781_v7, %v728_v1  ;;  %v2390_v1 = vld [vmem:[%s2744_s29 + $0x270] sm:$0xf] }
 0x126   : > { %v1032_v20 = vpop.f32.mrf.mxu2 }
 0x127   : > { %v1033_v23 = vadd.f32 %v1032_v20, %v979_v15 }
 0x128   : > { %v676_v24 = vpop.f32.mrf.mxu0 }
 0x129   : > { %v3111_v16 = vpop.f32.mrf.mxu3  ;;  %v677_v29 = vadd.f32 %v2952_v58, %v676_v24  ;;  %v730_v7 = vpop.f32.mrf.mxu1  ;;  %v2391_v24 = vor.u32 %v2607_v4, %v2390_v1  ;;  %v2411_v1 = vld [vmem:[%s2744_s29 + $0x288] sm:$0xf]  ;;  %v2610_v4 = vld [vmem:[%s2744_s29 + $0x290] sm:$0xf0] }
 0x12b   : > { %v731_v37 = vadd.f32 %v730_v7, %v677_v29  ;;  %2290 = vmatmul.msk.bf16.gmra.mxu0 %vm599_vm0, %v2270_v21 }
 0x12c   : > { %1372 = vmatmul.bf16.gmra.mxu1 %v2379_v17  ;;  %v2395_v17 = vor.u32 %v2606_v27, %v2392_v5  ;;  %v2413_v5 = vld [vmem:[%s2744_s29 + $0x294] sm:$0xf0] }
 0x12d   : > { %v3115_v13 = vadd.f32 %v784_v31, %v731_v37  ;;  %v2281_v31 = vld [vmem:[%s2744_s29 + $0x1a0] sm:$0xf] }
 0x12e   : > { %1426 = vmatmul.bf16.gmra.mxu3 %v2383_v26  ;;  %v1034_v44 = vpop.f32.mrf.mxu2  ;;  %v2282_v15 = vor.u32 %v2581_v61, %v2281_v31  ;;  %v790_v31 = vmax.f32 %v2971_v22, 0.0  ;;  %v2412_v22 = vor.u32 %v2610_v4, %v2411_v1 }
 0x12f   : > { %v1035_v45 = vadd.f32 %v1034_v44, %v981_v41 }
 0x130   : > { %v678_v46 = vpop.f32.mrf.mxu0 }
 0x131   : > { %v3121_v42 = vpop.f32.mrf.mxu3  ;;  %v679_v56 = vadd.f32 %v2952_v58, %v678_v46  ;;  %v732_v57 = vpop.f32.mrf.mxu1 }
 0x133   : > { %v733_v60 = vadd.f32 %v732_v57, %v679_v56  ;;  %2400 = vmatmul.msk.bf16.vlgmr.msra.gmra.mxu2 %vm599_vm0, %v2303_v47  ;;  %v2315_v56 = vor.u32 %v2587_v40, %v2314_v38  ;;  %v791_v40 = vmax.f32 %v2980_v35, 0.0 }
 0x135   : > { %v3128_v3 = vadd.f32 %v786_v51, %v733_v60  ;;  %v789_v51 = vmax.f32 %v2961_v9, 0.0 }
 0x136   : > { %v1037_v14 = vpop.f32.mrf.mxu2 }
 0x137   : > { %v1038_v20 = vadd.f32 %v1037_v14, %v984_v54  ;;  %v2419_v54 = vld [vmem:[%s2744_s29 + $0x290] sm:$0xf]  ;;  %v2611_v14 = vld [vmem:[%s2744_s29 + $0x298] sm:$0xf0] }
 0x138   : > { %v1086_v21 = vpop.f32.mrf.mxu0 }
 0x139   : > { %v3135_v10 = vpop.f32.mrf.mxu3  ;;  %v1087_v26 = vadd.f32 %v1086_v21, %v1033_v23  ;;  %v1338_v29 = vpop.f32.mrf.mxu1  ;;  %v986_v23 = vadd.f32 %v2952_v58, %v2995_v53  ;;  %v2609_v53 = vld [vmem:[%s2744_s29 + $0x28c] sm:$0xf] }
 0x13a   : > { %v1339_v37 = vadd.f32 %v2952_v58, %v1338_v29 }
 0x13b   : > { %v1131_v7 = vmax.f32 %v1087_v26, 0.0  ;;  %2291 = vmatmul.msk.bf16.gmra.mxu0 %vm599_vm0, %v2282_v15  ;;  %v989_v15 = vadd.f32 %v2952_v58, %v3003_v2 }
 0x13c   : > { %1377 = vmatmul.bf16.gmra.mxu1 %v2391_v24 }
 0x13d   : > { %v3140_v39 = vmax.f32 %v789_v51, %v1131_v7  ;;  %v2416_v51 = vor.u32 %v2609_v53, %v2413_v5  ;;  %v2420_v7 = vor.u32 %v2611_v14, %v2419_v54  ;;  %v792_v53 = vmax.f32 %v2990_v48, 0.0  ;;  %v2423_v54 = vld [vmem:[%s2744_s29 + $0x2a0] sm:$0xf]  ;;  %v2613_v14 = vld [vmem:[%s2744_s29 + $0x2a8] sm:$0xf0] }
 0x13e   : > { %1431 = vmatmul.bf16.gmra.mxu3 %v2395_v17  ;;  %v1039_v41 = vpop.f32.mrf.mxu2  ;;  %v2424_v48 = vor.u32 %v2613_v14, %v2423_v54 }
 0x13f   : > { %v1040_v44 = vadd.f32 %v1039_v41, %v986_v23 }
 0x140   : > { %v1088_v47 = vpop.f32.mrf.mxu0 }
 0x141   : > { %v1392_v9 = vpop.f32.mrf.mxu3  ;;  %v1089_v57 = vadd.f32 %v1088_v47, %v1035_v45  ;;  %v1340_v60 = vpop.f32.mrf.mxu1  ;;  %v2590_v47 = vld [vmem:[%s2744_s29 + $0x1f0] sm:$0xf0] }
 0x142   : > { %v3146_v46 = vadd.f32 %v1392_v9, %v1339_v37  ;;  %v1341_v21 = vadd.f32 %v2952_v58, %v1340_v60  ;;  %v2326_v9 = vld [vmem:[%s2744_s29 + $0x1e8] sm:$0xf] }
 0x143   : > { %v1132_v61 = vmax.f32 %v1089_v57, 0.0  ;;  %2401 = vmatmul.msk.bf16.gmra.mxu2 %vm599_vm0, %v2315_v56 }
 0x145   : > { %v3153_v27 = vmax.f32 %v790_v31, %v1132_v61  ;;  %v2327_v61 = vor.u32 %v2590_v47, %v2326_v9  ;;  %v793_v47 = vmax.f32 %v2999_v62, 0.0 }
 0x146   : > { %v1042_v45 = vpop.f32.mrf.mxu2 }
 0x147   : > { %v1043_v17 = vadd.f32 %v1042_v45, %v989_v15  ;;  %v2431_v45 = vld [vmem:[%s2744_s29 + $0x2a8] sm:$0xf] }
 0x148   : > { %v1091_v29 = vpop.f32.mrf.mxu0 }
 0x149   : > { %v1394_v24 = vpop.f32.mrf.mxu3  ;;  %v1092_v37 = vadd.f32 %v1091_v29, %v1038_v20  ;;  %v1343_v38 = vpop.f32.mrf.mxu1  ;;  %v991_v20 = vadd.f32 %v2952_v58, %v3014_v18  ;;  %v2612_v18 = vld [vmem:[%s2744_s29 + $0x2a4] sm:$0xf] }
 0x14a   : > { %v3161_v26 = vadd.f32 %v1394_v24, %v1341_v21  ;;  %v1344_v2 = vadd.f32 %v2952_v58, %v1343_v38  ;;  %v2425_v21 = vld [vmem:[%s2744_s29 + $0x2ac] sm:$0xf0]  ;;  %v2614_v24 = vld [vmem:[%s2744_s29 + $0x2b0] sm:$0xf0] }
 0x14b   : > { %v1133_v23 = vmax.f32 %v1092_v37, 0.0  ;;  %1679 = vmatmul.bf16.vlgmr.msra.gmra.mxu0 %v2412_v22  ;;  %v994_v22 = vadd.f32 %v2952_v58, %v3022_v32 }
 0x14c   : > { %1733 = vmatmul.bf16.vlgmr.msra.gmra.mxu1 %v2416_v51 }
 0x14d   : > { %v3166_v41 = vmax.f32 %v791_v40, %v1133_v23  ;;  %v2428_v40 = vor.u32 %v2612_v18, %v2425_v21  ;;  %v2432_v23 = vor.u32 %v2614_v24, %v2431_v45  ;;  %v794_v18 = vmax.f32 %v3009_v12, 0.0  ;;  %v2435_v45 = vld [vmem:[%s2744_s29 + $0x2b8] sm:$0xf]  ;;  %v2616_v24 = vld [vmem:[%s2744_s29 + $0x2c0] sm:$0xf0] }
 0x14e   : > { %2517 = vmatmul.msk.bf16.vlgmr.msra.gmra.mxu3 %vm599_vm0, %v2420_v7  ;;  %v1044_v56 = vpop.f32.mrf.mxu2  ;;  %v2436_v12 = vor.u32 %v2616_v24, %v2435_v45 }
 0x14f   : > { %v1045_v57 = vadd.f32 %v1044_v56, %v991_v20 }
 0x150   : > { %v1093_v31 = vpop.f32.mrf.mxu0 }
 0x151   : > { %v1397_v35 = vpop.f32.mrf.mxu3  ;;  %v1094_v1 = vadd.f32 %v1093_v31, %v1040_v44  ;;  %v1345_v4 = vpop.f32.mrf.mxu1  ;;  %v2593_v31 = vld [vmem:[%s2744_s29 + $0x208] sm:$0xf0] }
 0x152   : > { %v3172_v60 = vadd.f32 %v1397_v35, %v1344_v2  ;;  %v1346_v29 = vadd.f32 %v2952_v58, %v1345_v4  ;;  %v2338_v35 = vld [vmem:[%s2744_s29 + $0x200] sm:$0xf] }
 0x153   : > { %v1134_v5 = vmax.f32 %v1094_v1, 0.0  ;;  %2402 = vmatmul.msk.bf16.gmra.mxu2 %vm599_vm0, %v2327_v61 }
 0x155   : > { %v3179_v15 = vmax.f32 %v792_v53, %v1134_v5  ;;  %v2339_v5 = vor.u32 %v2593_v31, %v2338_v35  ;;  %v795_v31 = vmax.f32 %v3018_v28, 0.0 }
 0x156   : > { %v1047_v44 = vpop.f32.mrf.mxu2 }
 0x157   : > { %v1048_v7 = vadd.f32 %v1047_v44, %v994_v22  ;;  %v2443_v44 = vld [vmem:[%s2744_s29 + $0x2c0] sm:$0xf] }
 0x158   : > { %v1096_v38 = vpop.f32.mrf.mxu0 }
 0x159   : > { %v1399_v51 = vpop.f32.mrf.mxu3  ;;  %v1097_v2 = vadd.f32 %v1096_v38, %v1043_v17  ;;  %v1348_v9 = vpop.f32.mrf.mxu1  ;;  %v996_v17 = vadd.f32 %v2952_v58, %v3033_v49  ;;  %v2615_v49 = vld [vmem:[%s2744_s29 + $0x2bc] sm:$0xf] }
 0x15a   : > { %v3187_v37 = vadd.f32 %v1399_v51, %v1346_v29  ;;  %v1349_v32 = vadd.f32 %v2952_v58, %v1348_v9  ;;  %v2437_v29 = vld [vmem:[%s2744_s29 + $0x2c4] sm:$0xf0]  ;;  %v2617_v51 = vld [vmem:[%s2744_s29 + $0x2c8] sm:$0xf0] }
 0x15b   : > { %v1135_v20 = vmax.f32 %v1097_v2, 0.0  ;;  %1684 = vmatmul.bf16.gmra.mxu0 %v2424_v48  ;;  %v999_v48 = vadd.f32 %v2952_v58, %v3041_v0 }
 0x15c   : > { %1738 = vmatmul.bf16.gmra.mxu1 %v2428_v40 }
 0x15d   : > { %v3192_v56 = vmax.f32 %v793_v47, %v1135_v20  ;;  %v2440_v47 = vor.u32 %v2615_v49, %v2437_v29  ;;  %v2444_v20 = vor.u32 %v2617_v51, %v2443_v44  ;;  %v796_v49 = vmax.f32 %v3028_v43, 0.0  ;;  %v2447_v44 = vld [vmem:[%s2744_s29 + $0x2d0] sm:$0xf]  ;;  %v2619_v51 = vld [vmem:[%s2744_s29 + $0x2d8] sm:$0xf0] }
 0x15e   : > { %2518 = vmatmul.msk.bf16.gmra.mxu3 %vm599_vm0, %v2432_v23  ;;  %v1049_v61 = vpop.f32.mrf.mxu2  ;;  %v2448_v43 = vor.u32 %v2619_v51, %v2447_v44 }
 0x15f   : > { %v1050_v1 = vadd.f32 %v1049_v61, %v996_v17 }
 0x160   : > { %v1098_v53 = vpop.f32.mrf.mxu0 }
 0x161   : > { %v1402_v62 = vpop.f32.mrf.mxu3  ;;  %v1099_v54 = vadd.f32 %v1098_v53, %v1045_v57  ;;  %v1350_v14 = vpop.f32.mrf.mxu1  ;;  %v2596_v53 = vld [vmem:[%s2744_s29 + $0x220] sm:$0xf0] }
 0x162   : > { %v3198_v4 = vadd.f32 %v1402_v62, %v1349_v32  ;;  %v1351_v38 = vadd.f32 %v2952_v58, %v1350_v14  ;;  %v2350_v62 = vld [vmem:[%s2744_s29 + $0x218] sm:$0xf] }
 0x163   : > { %v1136_v21 = vmax.f32 %v1099_v54, 0.0  ;;  %2403 = vmatmul.msk.bf16.gmra.mxu2 %vm599_vm0, %v2339_v5 }
 0x165   : > { %v3205_v22 = vmax.f32 %v794_v18, %v1136_v21  ;;  %v2351_v21 = vor.u32 %v2596_v53, %v2350_v62  ;;  %v797_v53 = vmax.f32 %v3037_v59, 0.0 }
 0x166   : > { %v1052_v57 = vpop.f32.mrf.mxu2 }
 0x167   : > { %v1053_v23 = vadd.f32 %v1052_v57, %v999_v48  ;;  %v2455_v57 = vld [vmem:[%s2744_s29 + $0x2d8] sm:$0xf] }
 0x168   : > { %v1101_v9 = vpop.f32.mrf.mxu0 }
 0x169   : > { %v1404_v40 = vpop.f32.mrf.mxu3  ;;  %v1102_v32 = vadd.f32 %v1101_v9, %v1048_v7  ;;  %v1353_v35 = vpop.f32.mrf.mxu1  ;;  %v1001_v7 = vadd.f32 %v2952_v58, %v3052_v19  ;;  %v2618_v19 = vld [vmem:[%s2744_s29 + $0x2d4] sm:$0xf] }
 0x16a   : > { %v3213_v2 = vadd.f32 %v1404_v40, %v1351_v38  ;;  %v1354_v0 = vadd.f32 %v2952_v58, %v1353_v35  ;;  %v2449_v38 = vld [vmem:[%s2744_s29 + $0x2dc] sm:$0xf0]  ;;  %v2620_v40 = vld [vmem:[%s2744_s29 + $0x2e0] sm:$0xf0] }
 0x16b   : > { %v1137_v17 = vmax.f32 %v1102_v32, 0.0  ;;  %1689 = vmatmul.bf16.gmra.mxu0 %v2436_v12  ;;  %v1004_v12 = vadd.f32 %v2952_v58, %v3060_v36 }
 0x16c   : > { %1743 = vmatmul.bf16.gmra.mxu1 %v2440_v47 }
 0x16d   : > { %v3218_v61 = vmax.f32 %v795_v31, %v1137_v17  ;;  %v2452_v31 = vor.u32 %v2618_v19, %v2449_v38  ;;  %v2456_v17 = vor.u32 %v2620_v40, %v2455_v57  ;;  %v798_v19 = vmax.f32 %v3047_v11, 0.0  ;;  %v2459_v57 = vld [vmem:[%s2744_s29 + $0x2e8] sm:$0xf]  ;;  %v2622_v40 = vld [vmem:[%s2744_s29 + $0x2f0] sm:$0xf0] }
 0x16e   : > { %2519 = vmatmul.msk.bf16.gmra.mxu3 %vm599_vm0, %v2444_v20  ;;  %v1054_v5 = vpop.f32.mrf.mxu2  ;;  %v2460_v11 = vor.u32 %v2622_v40, %v2459_v57 }
 0x16f   : > { %v1055_v54 = vadd.f32 %v1054_v5, %v1001_v7 }
 0x170   : > { %v1103_v18 = vpop.f32.mrf.mxu0 }
 0x171   : > { %v1407_v28 = vpop.f32.mrf.mxu3  ;;  %v1104_v45 = vadd.f32 %v1103_v18, %v1050_v1  ;;  %v1355_v24 = vpop.f32.mrf.mxu1  ;;  %v2599_v18 = vld [vmem:[%s2744_s29 + $0x238] sm:$0xf0] }
 0x172   : > { %v3224_v14 = vadd.f32 %v1407_v28, %v1354_v0  ;;  %v1356_v9 = vadd.f32 %v2952_v58, %v1355_v24  ;;  %v2362_v28 = vld [vmem:[%s2744_s29 + $0x230] sm:$0xf] }
 0x173   : > { %v1138_v29 = vmax.f32 %v1104_v45, 0.0  ;;  %2404 = vmatmul.msk.bf16.gmra.mxu2 %vm599_vm0, %v2351_v21 }
 0x175   : > { %v3231_v48 = vmax.f32 %v796_v49, %v1138_v29  ;;  %v2363_v29 = vor.u32 %v2599_v18, %v2362_v28  ;;  %v799_v18 = vmax.f32 %v3056_v30, 0.0 }
 0x176   : > { %v1057_v1 = vpop.f32.mrf.mxu2 }
 0x177   : > { %v1058_v20 = vadd.f32 %v1057_v1, %v1004_v12  ;;  %v2467_v1 = vld [vmem:[%s2744_s29 + $0x2f0] sm:$0xf] }
 0x178   : > { %v1106_v35 = vpop.f32.mrf.mxu0 }
 0x179   : > { %v1409_v47 = vpop.f32.mrf.mxu3  ;;  %v1107_v0 = vadd.f32 %v1106_v35, %v1053_v23  ;;  %v1358_v62 = vpop.f32.mrf.mxu1  ;;  %v1006_v23 = vadd.f32 %v2952_v58, %v3071_v55  ;;  %v2621_v55 = vld [vmem:[%s2744_s29 + $0x2ec] sm:$0xf] }
 0x17a   : > { %v3239_v32 = vadd.f32 %v1409_v47, %v1356_v9  ;;  %v1359_v36 = vadd.f32 %v2952_v58, %v1358_v62  ;;  %v2461_v9 = vld [vmem:[%s2744_s29 + $0x2f4] sm:$0xf0]  ;;  %v2623_v47 = vld [vmem:[%s2744_s29 + $0x2f8] sm:$0xf0] }
 0x17b   : > { %v1139_v7 = vmax.f32 %v1107_v0, 0.0  ;;  %1694 = vmatmul.bf16.gmra.mxu0 %v2448_v43  ;;  %v1009_v43 = vadd.f32 %v2952_v58, %v3079_v8 }
 0x17c   : > { %1748 = vmatmul.bf16.gmra.mxu1 %v2452_v31 }
 0x17d   : > { %v3244_v5 = vmax.f32 %v797_v53, %v1139_v7  ;;  %v2464_v53 = vor.u32 %v2621_v55, %v2461_v9  ;;  %v2468_v7 = vor.u32 %v2623_v47, %v2467_v1  ;;  %v800_v55 = vmax.f32 %v3066_v50, 0.0  ;;  %v2471_v1 = vld [vmem:[%s2744_s29 + $0x300] sm:$0xf]  ;;  %v2625_v47 = vld [vmem:[%s2744_s29 + $0x308] sm:$0xf0] }
 0x17e   : > { %2520 = vmatmul.msk.bf16.gmra.mxu3 %vm599_vm0, %v2456_v17  ;;  %v1059_v21 = vpop.f32.mrf.mxu2 }
 0x17f   : > { %v1060_v45 = vadd.f32 %v1059_v21, %v1006_v23 }
 0x180   : > { %v1108_v49 = vpop.f32.mrf.mxu0 }
 0x181   : > { %v1412_v59 = vpop.f32.mrf.mxu3  ;;  %v1109_v44 = vadd.f32 %v1108_v49, %v1055_v54  ;;  %v1360_v51 = vpop.f32.mrf.mxu1  ;;  %v2602_v49 = vld [vmem:[%s2744_s29 + $0x250] sm:$0xf0] }
 0x182   : > { %v3250_v24 = vadd.f32 %v1412_v59, %v1359_v36  ;;  %v1361_v35 = vadd.f32 %v2952_v58, %v1360_v51  ;;  %v2374_v59 = vld [vmem:[%s2744_s29 + $0x248] sm:$0xf] }
 0x183   : > { %v1140_v38 = vmax.f32 %v1109_v44, 0.0  ;;  %2405 = vmatmul.msk.bf16.gmra.mxu2 %vm599_vm0, %v2363_v29 }
 0x185   : > { %v3257_v12 = vmax.f32 %v798_v19, %v1140_v38  ;;  %v2375_v38 = vor.u32 %v2602_v49, %v2374_v59  ;;  %v801_v49 = vmax.f32 %v3075_v63, 0.0 }
 0x186   : > { %v1062_v54 = vpop.f32.mrf.mxu2 }
 0x187   : > { %v1063_v17 = vadd.f32 %v1062_v54, %v1009_v43  ;;  %v2473_v43 = vld [vmem:[%s2744_s29 + $0x30c] sm:$0xf0]  ;;  %v2626_v54 = vld [vmem:[%s2744_s29 + $0x310] sm:$0xf0] }
 0x188   : > { %v1111_v62 = vpop.f32.mrf.mxu0 }
 0x189   : > { %v1414_v31 = vpop.f32.mrf.mxu3  ;;  %v1112_v36 = vadd.f32 %v1111_v62, %v1058_v20  ;;  %v1363_v28 = vpop.f32.mrf.mxu1  ;;  %v1011_v20 = vadd.f32 %v2952_v58, %v3090_v33 }
 0x18a   : > { %v3265_v0 = vadd.f32 %v1414_v31, %v1361_v35  ;;  %v1364_v8 = vadd.f32 %v2952_v58, %v1363_v28  ;;  %v2624_v58 = vld [vmem:[%s2744_s29 + $0x304] sm:$0xf]  ;;  %v2479_v35 = vld [vmem:[%s2744_s29 + $0x308] sm:$0xf]  ;;  %v3291_v31 = vld [vmem:[%s3469_s2] ss:$0 sm:$0xff] }
 0x18b   : > { %v1141_v23 = vmax.f32 %v1112_v36, 0.0  ;;  %1699 = vmatmul.bf16.gmra.mxu0 %v2460_v11 }
 0x18c   : > { %1753 = vmatmul.bf16.gmra.mxu1 %v2464_v53  ;;  %v2472_v53 = vor.u32 %v2625_v47, %v2471_v1 }
 0x18d   : > { %v3270_v21 = vmax.f32 %v799_v18, %v1141_v23  ;;  %v2476_v18 = vor.u32 %v2624_v58, %v2473_v43  ;;  %v2480_v23 = vor.u32 %v2626_v54, %v2479_v35  ;;  %v802_v58 = vmax.f32 %v3085_v25, 0.0  ;;  %v2483_v35 = vld [vmem:[%s2744_s29 + $0x318] sm:$0xf]  ;;  %v2628_v54 = vld [vmem:[%s2744_s29 + $0x320] sm:$0xf0] }
 0x18e   : > { %2521 = vmatmul.msk.bf16.gmra.mxu3 %vm599_vm0, %v2468_v7  ;;  %v1064_v29 = vpop.f32.mrf.mxu2  ;;  %v2484_v25 = vor.u32 %v2628_v54, %v2483_v35 }
 0x18f   : > { %v1065_v44 = vadd.f32 %v1064_v29, %v1011_v20 }
 0x190   : > { %v1113_v19 = vpop.f32.mrf.mxu0 }
 0x191   : > { %v1417_v30 = vpop.f32.mrf.mxu3  ;;  %v1114_v57 = vadd.f32 %v1113_v19, %v1060_v45  ;;  %v1365_v40 = vpop.f32.mrf.mxu1  ;;  %v1014_v45 = vadd.f32 %v3291_v31, %v3098_v52  ;;  %v2605_v19 = vld [vmem:[%s2744_s29 + $0x268] sm:$0xf0] }
 0x192   : > { %v3276_v51 = vadd.f32 %v1417_v30, %v1364_v8  ;;  %v1366_v50 = vadd.f32 %v3291_v31, %v1365_v40  ;;  %v2386_v30 = vld [vmem:[%s2744_s29 + $0x260] sm:$0xf] }
 0x193   : > { %v1142_v9 = vmax.f32 %v1114_v57, 0.0  ;;  %2406 = vmatmul.msk.bf16.gmra.mxu2 %vm599_vm0, %v2375_v38 }
 0x195   : > { %v3283_v33 = vmax.f32 %v800_v55, %v1142_v9  ;;  %v2387_v9 = vor.u32 %v2605_v19, %v2386_v30  ;;  %v803_v19 = vmax.f32 %v3094_v34, 0.0 }
 0x196   : > { %v1067_v11 = vpop.f32.mrf.mxu2 }
 0x197   : > { %v1068_v7 = vadd.f32 %v1067_v11, %v1014_v45  ;;  %v2491_v11 = vld [vmem:[%s2744_s29 + $0x320] sm:$0xf] }
 0x198   : > { %v1116_v28 = vpop.f32.mrf.mxu0 }
 0x199   : > { %v1419_v62 = vpop.f32.mrf.mxu3  ;;  %v1117_v8 = vadd.f32 %v1116_v28, %v1063_v17  ;;  %v1368_v59 = vpop.f32.mrf.mxu1  ;;  %v1016_v17 = vadd.f32 %v3291_v31, %v3111_v16  ;;  %v2627_v16 = vld [vmem:[%s2744_s29 + $0x31c] sm:$0xf] }
 0x19a   : > { %v3296_v36 = vadd.f32 %v1419_v62, %v1366_v50  ;;  %v1369_v52 = vadd.f32 %v3291_v31, %v1368_v59  ;;  %v2485_v50 = vld [vmem:[%s2744_s29 + $0x324] sm:$0xf0]  ;;  %v2629_v62 = vld [vmem:[%s2744_s29 + $0x328] sm:$0xf0] }
 0x19b   : > { %v1143_v20 = vmax.f32 %v1117_v8, 0.0  ;;  %1704 = vmatmul.bf16.gmra.mxu0 %v2472_v53  ;;  %v1019_v53 = vadd.f32 %v3291_v31, %v3121_v42 }
 0x19c   : > { %1758 = vmatmul.bf16.gmra.mxu1 %v2476_v18 }
 0x19d   : > { %v3301_v29 = vmax.f32 %v801_v49, %v1143_v20  ;;  %v2488_v49 = vor.u32 %v2627_v16, %v2485_v50  ;;  %v2492_v20 = vor.u32 %v2629_v62, %v2491_v11  ;;  %v804_v16 = vmax.f32 %v3104_v6, 0.0  ;;  %v2495_v11 = vld [vmem:[%s2744_s29 + $0x330] sm:$0xf]  ;;  %v2631_v62 = vld [vmem:[%s2744_s29 + $0x338] sm:$0xf0] }
 0x19e   : > { %2522 = vmatmul.msk.bf16.gmra.mxu3 %vm599_vm0, %v2480_v23  ;;  %v1069_v38 = vpop.f32.mrf.mxu2 }
 0x19f   : > { %v1070_v57 = vadd.f32 %v1069_v38, %v1016_v17 }
 0x1a0   : > { %v1118_v55 = vpop.f32.mrf.mxu0 }
 0x1a1   : > { %v1422_v63 = vpop.f32.mrf.mxu3  ;;  %v1119_v1 = vadd.f32 %v1118_v55, %v1065_v44  ;;  %v1370_v47 = vpop.f32.mrf.mxu1  ;;  %v2608_v55 = vld [vmem:[%s2744_s29 + $0x280] sm:$0xf0] }
 0x1a2   : > { %v3307_v40 = vadd.f32 %v1422_v63, %v1369_v52  ;;  %v1371_v28 = vadd.f32 %v3291_v31, %v1370_v47  ;;  %v2398_v63 = vld [vmem:[%s2744_s29 + $0x278] sm:$0xf] }
 0x1a3   : > { %v1144_v43 = vmax.f32 %v1119_v1, 0.0  ;;  %2407 = vmatmul.msk.bf16.gmra.mxu2 %vm599_vm0, %v2387_v9 }
 0x1a5   : > { %v3314_v45 = vmax.f32 %v802_v58, %v1144_v43  ;;  %v2399_v43 = vor.u32 %v2608_v55, %v2398_v63 }
 0x1a6   : > { %v1072_v44 = vpop.f32.mrf.mxu2 }
 0x1a7   : > { %v1073_v23 = vadd.f32 %v1072_v44, %v1019_v53  ;;  %v2503_v44 = vld [vmem:[%s2744_s29 + $0x338] sm:$0xf] }
 0x1a8   : > { %v1121_v59 = vpop.f32.mrf.mxu0 }
 0x1a9   : > { %v1424_v18 = vpop.f32.mrf.mxu3  ;;  %v1122_v52 = vadd.f32 %v1121_v59, %v1068_v7  ;;  %v1373_v30 = vpop.f32.mrf.mxu1  ;;  %v1021_v7 = vadd.f32 %v3291_v31, %v3135_v10  ;;  %v2630_v10 = vld [vmem:[%s2744_s29 + $0x334] sm:$0xf] }
 0x1aa   : > { %v3322_v8 = vadd.f32 %v1424_v18, %v1371_v28  ;;  %v1374_v42 = vadd.f32 %v3291_v31, %v1373_v30  ;;  %v2497_v28 = vld [vmem:[%s2744_s29 + $0x33c] sm:$0xf0]  ;;  %v2632_v18 = vld [vmem:[%s2744_s29 + $0x340] sm:$0xf0] }
 0x1ab   : > { %v1145_v17 = vmax.f32 %v1122_v52, 0.0  ;;  %1709 = vmatmul.bf16.gmra.mxu0 %v2484_v25  ;;  %v2500_v6 = vor.u32 %v2630_v10, %v2497_v28  ;;  %v2504_v30 = vor.u32 %v2632_v18, %v2503_v44  ;;  %v2509_v10 = vld [vmem:[%s2744_s29 + $0x354] sm:$0xf0]  ;;  %v2515_v28 = vld [vmem:[%s2744_s29 + $0x350] sm:$0xf] }
 0x1ac   : > { %1763 = vmatmul.bf16.gmra.mxu1 %v2488_v49  ;;  %v2635_v44 = vld [vmem:[%s2744_s29 + $0x358] sm:$0xf0] }
 0x1ad   : > { %v3327_v38 = vmax.f32 %v803_v19, %v1145_v17 }
 0x1ae   : > { %2523 = vmatmul.msk.bf16.gmra.mxu3 %vm599_vm0, %v2492_v20  ;;  %v1074_v9 = vpop.f32.mrf.mxu2  ;;  %v2496_v20 = vor.u32 %v2631_v62, %v2495_v11  ;;  %v2633_v11 = vld [vmem:[%s2744_s29 + $0x34c] sm:$0xf] }
 0x1af   : > { %v1075_v1 = vadd.f32 %v1074_v9, %v1021_v7 }
 0x1b0   : > { %v1123_v58 = vpop.f32.mrf.mxu0 }
 0x1b1   : > { %v1427_v34 = vpop.f32.mrf.mxu3  ;;  %v1124_v35 = vadd.f32 %v1123_v58, %v1070_v57  ;;  %v1375_v54 = vpop.f32.mrf.mxu1 }
 0x1b2   : > { %v3333_v47 = vadd.f32 %v1427_v34, %v1374_v42  ;;  %v1376_v25 = vadd.f32 %v3291_v31, %v1375_v54  ;;  %v805_v42 = vmax.f32 %v3115_v13, 0.0 }
 0x1b3   : > { %v1146_v50 = vmax.f32 %v1124_v35, 0.0  ;;  %2408 = vmatmul.msk.bf16.gmra.mxu2 %vm599_vm0, %v2399_v43  ;;  %v806_v35 = vmax.f32 %v3128_v3, 0.0 }
 0x1b5   : > { %v3340_v53 = vmax.f32 %v804_v16, %v1146_v50  ;;  %v2507_v16 = vld [vmem:[%s2744_s29 + $0x348] sm:$0xf]  ;;  %v2634_v50 = vld [vmem:[%s2744_s29 + $0x350] sm:$0xf0]  ;;  %s2655_s29 = smul.u32 72, %s3472_s13 }
 0x1b6   : > { %v1446_v49 = vpop.f32.mrf.mxu2 }
 0x1b7   : > { %s3377_s9 = scalar_lea.vmem %s3470_s3, %s2655_s29 }
 0x1b8   : > { %v1126_v52 = vpop.f32.mrf.mxu0 }
 0x1b9   : > { %v1429_v59 = vpop.f32.mrf.mxu3  ;;  %v1127_v19 = vadd.f32 %v1126_v52, %v1073_v23  ;;  %v1378_v17 = vpop.f32.mrf.mxu1 }
 0x1ba   : > { %v3346_v57 = vadd.f32 %v1429_v59, %v1376_v25  ;;  %v1379_v55 = vadd.f32 %v3291_v31, %v1378_v17 }
 0x1bb   : > { %v1147_v63 = vmax.f32 %v1127_v19, 0.0  ;;  %1714 = vmatmul.bf16.gmra.mxu0 %v2496_v20  ;;  %v2508_v20 = vor.u32 %v2634_v50, %v2507_v16 }
 0x1bc   : > { %1768 = vmatmul.bf16.gmra.mxu1 %v2500_v6  ;;  %v2512_v6 = vor.u32 %v2633_v11, %v2509_v10 }
 0x1bd   : > { %v3351_v7 = vmax.f32 %v805_v42, %v1147_v63  ;;  %v1447_v42 = vadd.f32 %v1446_v49, %v3146_v46 }
 0x1be   : > { %2524 = vmatmul.msk.bf16.gmra.mxu3 %vm599_vm0, %v2504_v30  ;;  %v1448_v23 = vpop.f32.mrf.mxu2  ;;  %v2516_v30 = vor.u32 %v2635_v44, %v2515_v28 }
 0x1bf   : > { %v1449_v50 = vadd.f32 %v1448_v23, %v3161_v26 }
 0x1c0   : > { %v1128_v58 = vpop.f32.mrf.mxu0 }
 0x1c1   : > { %v1432_v9 = vpop.f32.mrf.mxu3  ;;  %v1129_v13 = vadd.f32 %v1128_v58, %v1075_v1  ;;  %v1380_v43 = vpop.f32.mrf.mxu1  ;;  %v1492_v26 = vmax.f32 %v1449_v50, 0.0 }
 0x1c2   : > { %v3353_v34 = vadd.f32 %v1432_v9, %v1379_v55  ;;  %v1381_v18 = vadd.f32 %v3291_v31, %v1380_v43  ;;  %v1491_v43 = vmax.f32 %v1447_v42, 0.0 }
 0x1c3   : > { %v1148_v54 = vmax.f32 %v1129_v13, 0.0 }
 0x1c5   : > { %v3359_v62 = vmax.f32 %v806_v35, %v1148_v54 }
 0x1c6   : > { %v1451_v59 = vpop.f32.mrf.mxu2 }
 0x1c8   : > { %v1680_v1 = vpop.f32.mrf.mxu0 }
 0x1c9   : > { %v1434_v25 = vpop.f32.mrf.mxu3  ;;  %v1681_v3 = vadd.f32 %v3291_v31, %v1680_v1  ;;  %v1734_v19 = vpop.f32.mrf.mxu1 }
 0x1ca   : > { %v3365_v52 = vadd.f32 %v1434_v25, %v1381_v18 }
 0x1cb   : > { %1719 = vmatmul.bf16.gmra.mxu0 %v2508_v20  ;;  %v1735_v17 = vadd.f32 %v1734_v19, %v1681_v3 }
 0x1cc   : > { %1773 = vmatmul.bf16.gmra.mxu1 %v2512_v6  ;;  %v1452_v6 = vadd.f32 %v1451_v59, %v3172_v60 }
 0x1ce   : > { %2525 = vmatmul.msk.bf16.gmra.mxu3 %vm599_vm0, %v2516_v30  ;;  %v1453_v63 = vpop.f32.mrf.mxu2 }
 0x1d0   : > { %v1682_v58 = vpop.f32.mrf.mxu0 }
 0x1d1   : > { %v1788_v55 = vpop.f32.mrf.mxu3  ;;  %v1736_v13 = vpop.f32.mrf.mxu1  ;;  %v1683_v54 = vadd.f32 %v3291_v31, %v1682_v58  ;;  %v1493_v58 = vmax.f32 %v1452_v6, 0.0 }
 0x1d2   : > { %v1789_v9 = vadd.f32 %v1788_v55, %v1735_v17 }
 0x1d3   : > { %v1737_v10 = vadd.f32 %v1736_v13, %v1683_v54  ;;  %v1454_v54 = vadd.f32 %v1453_v63, %v3187_v37 }
 0x1d4   : > { %v1833_v35 = vmax.f32 %v1789_v9, 0.0 }
 0x1d6   : > { %v1851_v16 = vmax.f32 %v1491_v43, %v1833_v35  ;;  %v1456_v46 = vpop.f32.mrf.mxu2 }
 0x1d7   : > { %v1457_v37 = vadd.f32 %v1456_v46, %v3198_v4 }
 0x1d8   : > { %v1869_v11 = vmax.f32 %v3140_v39, %v1851_v16  ;;  %v1685_v18 = vpop.f32.mrf.mxu0 }
 0x1d9   : > { %v1790_v49 = vpop.f32.mrf.mxu3  ;;  %v1686_v25 = vadd.f32 %v3291_v31, %v1685_v18  ;;  %v1739_v20 = vpop.f32.mrf.mxu1 }
 0x1da   : > { %v1887_v28 = vpack.c.bf16 %v1869_v11, %v1869_v11  ;;  %v1791_v44 = vadd.f32 %v1790_v49, %v1737_v10 }
 0x1db   : > { %v1740_v1 = vadd.f32 %v1739_v20, %v1686_v25 }
 0x1dc   : > { %1906 = vst.msk [vmem:[%s3377_s9] sm:$0xf] %vm1905_vm1, %v1887_v28  ;;  %v1834_v39 = vmax.f32 %v1791_v44, 0.0  ;;  %v1494_v44 = vmax.f32 %v1454_v54, 0.0 }
 0x1de   : > { %v1852_v23 = vmax.f32 %v1492_v26, %v1834_v39  ;;  %v1458_v3 = vpop.f32.mrf.mxu2 }
 0x1e0   : > { %v1870_v30 = vmax.f32 %v3153_v27, %v1852_v23  ;;  %v1687_v55 = vpop.f32.mrf.mxu0 }
 0x1e1   : > { %v1793_v19 = vpop.f32.mrf.mxu3  ;;  %v1741_v9 = vpop.f32.mrf.mxu1  ;;  %v1688_v43 = vadd.f32 %v3291_v31, %v1687_v55  ;;  %v1459_v55 = vadd.f32 %v1458_v3, %v3213_v2 }
 0x1e2   : > { %v1888_v17 = vpack.c.bf16 %v1870_v30, %v1870_v30  ;;  %v1794_v42 = vadd.f32 %v1793_v19, %v1740_v1  ;;  %v1495_v30 = vmax.f32 %v1457_v37, 0.0 }
 0x1e3   : > { %v1742_v59 = vadd.f32 %v1741_v9, %v1688_v43 }
 0x1e4   : > { %1907 = vst.msk [vmem:[%s3377_s9 + $0x4] sm:$0xf] %vm1905_vm1, %v1888_v17  ;;  %v1835_v13 = vmax.f32 %v1794_v42, 0.0 }
 0x1e6   : > { %v1853_v35 = vmax.f32 %v1493_v58, %v1835_v13  ;;  %v1461_v27 = vpop.f32.mrf.mxu2 }
 0x1e7   : > { %v1462_v2 = vadd.f32 %v1461_v27, %v3224_v14 }
 0x1e8   : > { %v1871_v60 = vmax.f32 %v3166_v41, %v1853_v35  ;;  %v1690_v10 = vpop.f32.mrf.mxu0 }
 0x1e9   : > { %v1795_v16 = vpop.f32.mrf.mxu3  ;;  %v1691_v49 = vadd.f32 %v3291_v31, %v1690_v10  ;;  %v1744_v28 = vpop.f32.mrf.mxu1 }
 0x1ea   : > { %v1889_v50 = vpack.c.bf16 %v1871_v60, %v1871_v60  ;;  %v1796_v11 = vadd.f32 %v1795_v16, %v1742_v59  ;;  %v1496_v60 = vmax.f32 %v1459_v55, 0.0 }
 0x1eb   : > { %v1745_v20 = vadd.f32 %v1744_v28, %v1691_v49 }
 0x1ec   : > { %1908 = vst.msk [vmem:[%s3377_s9 + $0x8] sm:$0xf] %vm1905_vm1, %v1889_v50  ;;  %v1836_v18 = vmax.f32 %v1796_v11, 0.0 }
 0x1ee   : > { %v1854_v25 = vmax.f32 %v1494_v44, %v1836_v18  ;;  %v1463_v63 = vpop.f32.mrf.mxu2  ;;  %v1497_v44 = vmax.f32 %v1462_v2, 0.0 }
 0x1f0   : > { %v1872_v41 = vmax.f32 %v3179_v15, %v1854_v25  ;;  %v1692_v1 = vpop.f32.mrf.mxu0 }
 0x1f1   : > { %v1798_v26 = vpop.f32.mrf.mxu3  ;;  %v1746_v6 = vpop.f32.mrf.mxu1  ;;  %v1693_v17 = vadd.f32 %v3291_v31, %v1692_v1 }
 0x1f2   : > { %v1890_v39 = vpack.c.bf16 %v1872_v41, %v1872_v41  ;;  %v1799_v23 = vadd.f32 %v1798_v26, %v1745_v20  ;;  %v1464_v41 = vadd.f32 %v1463_v63, %v3239_v32 }
 0x1f3   : > { %v1747_v46 = vadd.f32 %v1746_v6, %v1693_v17 }
 0x1f4   : > { %1909 = vst.msk [vmem:[%s3377_s9 + $0xc] sm:$0xf] %vm1905_vm1, %v1890_v39  ;;  %v1837_v19 = vmax.f32 %v1799_v23, 0.0 }
 0x1f6   : > { %v1855_v42 = vmax.f32 %v1495_v30, %v1837_v19  ;;  %v1466_v43 = vpop.f32.mrf.mxu2  ;;  %v1498_v30 = vmax.f32 %v1464_v41, 0.0 }
 0x1f7   : > { %v1467_v32 = vadd.f32 %v1466_v43, %v3250_v24 }
 0x1f8   : > { %v1873_v4 = vmax.f32 %v3192_v56, %v1855_v42  ;;  %v1695_v13 = vpop.f32.mrf.mxu0 }
 0x1f9   : > { %v1800_v15 = vpop.f32.mrf.mxu3  ;;  %v1696_v35 = vadd.f32 %v3291_v31, %v1695_v13  ;;  %v1749_v54 = vpop.f32.mrf.mxu1 }
 0x1fa   : > { %v1891_v9 = vpack.c.bf16 %v1873_v4, %v1873_v4  ;;  %v1801_v58 = vadd.f32 %v1800_v15, %v1747_v46 }
 0x1fb   : > { %v1750_v50 = vadd.f32 %v1749_v54, %v1696_v35 }
 0x1fc   : > { %1910 = vst.msk [vmem:[%s3377_s9 + $0x10] sm:$0xf] %vm1905_vm1, %v1891_v9  ;;  %v1838_v59 = vmax.f32 %v1801_v58, 0.0  ;;  %v1499_v58 = vmax.f32 %v1467_v32, 0.0 }
 0x1fe   : > { %v1856_v16 = vmax.f32 %v1496_v60, %v1838_v59  ;;  %v1468_v20 = vpop.f32.mrf.mxu2 }
 0x1ff   : > { %v1469_v60 = vadd.f32 %v1468_v20, %v3265_v0 }
 0x200   : > { %v1874_v56 = vmax.f32 %v3205_v22, %v1856_v16  ;;  %v1697_v49 = vpop.f32.mrf.mxu0 }
 0x201   : > { %v1803_v3 = vpop.f32.mrf.mxu3  ;;  %v1751_v28 = vpop.f32.mrf.mxu1  ;;  %v1698_v25 = vadd.f32 %v3291_v31, %v1697_v49 }
 0x202   : > { %v1892_v11 = vpack.c.bf16 %v1874_v56, %v1874_v56  ;;  %v1804_v10 = vadd.f32 %v1803_v3, %v1750_v50 }
 0x203   : > { %v1752_v27 = vadd.f32 %v1751_v28, %v1698_v25 }
 0x204   : > { %1911 = vst.msk [vmem:[%s3377_s9 + $0x14] sm:$0xf] %vm1905_vm1, %v1892_v11  ;;  %v1839_v18 = vmax.f32 %v1804_v10, 0.0  ;;  %v1500_v11 = vmax.f32 %v1469_v60, 0.0 }
 0x206   : > { %v1857_v37 = vmax.f32 %v1497_v44, %v1839_v18  ;;  %v1471_v55 = vpop.f32.mrf.mxu2 }
 0x207   : > { %v1472_v0 = vadd.f32 %v1471_v55, %v3276_v51 }
 0x208   : > { %v1875_v14 = vmax.f32 %v3218_v61, %v1857_v37  ;;  %v1700_v23 = vpop.f32.mrf.mxu0 }
 0x209   : > { %v1805_v22 = vpop.f32.mrf.mxu3  ;;  %v1701_v1 = vadd.f32 %v3291_v31, %v1700_v23  ;;  %v1754_v6 = vpop.f32.mrf.mxu1 }
 0x20a   : > { %v1893_v26 = vpack.c.bf16 %v1875_v14, %v1875_v14  ;;  %v1806_v39 = vadd.f32 %v1805_v22, %v1752_v27  ;;  %v1501_v14 = vmax.f32 %v1472_v0, 0.0 }
 0x20b   : > { %v1755_v42 = vadd.f32 %v1754_v6, %v1701_v1 }
 0x20c   : > { %1912 = vst.msk [vmem:[%s3377_s9 + $0x18] sm:$0xf] %vm1905_vm1, %v1893_v26  ;;  %v1840_v19 = vmax.f32 %v1806_v39, 0.0 }
 0x20e   : > { %v1858_v17 = vmax.f32 %v1498_v30, %v1840_v19  ;;  %v1473_v43 = vpop.f32.mrf.mxu2 }
 0x20f   : > { %v1474_v39 = vadd.f32 %v1473_v43, %v3296_v36 }
 0x210   : > { %v1876_v61 = vmax.f32 %v3231_v48, %v1858_v17  ;;  %v1702_v15 = vpop.f32.mrf.mxu0 }
 0x211   : > { %v1808_v63 = vpop.f32.mrf.mxu3  ;;  %v1756_v9 = vpop.f32.mrf.mxu1  ;;  %v1703_v35 = vadd.f32 %v3291_v31, %v1702_v15 }
 0x212   : > { %v1894_v4 = vpack.c.bf16 %v1876_v61, %v1876_v61  ;;  %v1809_v46 = vadd.f32 %v1808_v63, %v1755_v42  ;;  %v1502_v42 = vmax.f32 %v1474_v39, 0.0 }
 0x213   : > { %v1757_v24 = vadd.f32 %v1756_v9, %v1703_v35 }
 0x214   : > { %1913 = vst.msk [vmem:[%s3377_s9 + $0x1c] sm:$0xf] %vm1905_vm1, %v1894_v4  ;;  %v1841_v13 = vmax.f32 %v1809_v46, 0.0 }
 0x216   : > { %v1859_v54 = vmax.f32 %v1499_v58, %v1841_v13  ;;  %v1476_v37 = vpop.f32.mrf.mxu2 }
 0x217   : > { %v1477_v36 = vadd.f32 %v1476_v37, %v3307_v40 }
 0x218   : > { %v1877_v59 = vmax.f32 %v3244_v5, %v1859_v54  ;;  %v1705_v2 = vpop.f32.mrf.mxu0 }
 0x219   : > { %v1810_v48 = vpop.f32.mrf.mxu3  ;;  %v1706_v56 = vadd.f32 %v3291_v31, %v1705_v2  ;;  %v1759_v3 = vpop.f32.mrf.mxu1  ;;  %v1503_v13 = vmax.f32 %v1477_v36, 0.0 }
 0x21a   : > { %v1895_v16 = vpack.c.bf16 %v1877_v59, %v1877_v59  ;;  %v1811_v50 = vadd.f32 %v1810_v48, %v1757_v24 }
 0x21b   : > { %v1760_v28 = vadd.f32 %v1759_v3, %v1706_v56 }
 0x21c   : > { %1914 = vst.msk [vmem:[%s3377_s9 + $0x20] sm:$0xf] %vm1905_vm1, %v1895_v16  ;;  %v1842_v10 = vmax.f32 %v1811_v50, 0.0 }
 0x21e   : > { %v1860_v49 = vmax.f32 %v1500_v11, %v1842_v10  ;;  %v1478_v32 = vpop.f32.mrf.mxu2 }
 0x21f   : > { %v1479_v24 = vadd.f32 %v1478_v32, %v3322_v8 }
 0x220   : > { %v1878_v5 = vmax.f32 %v3257_v12, %v1860_v49  ;;  %v1707_v20 = vpop.f32.mrf.mxu0 }
 0x221   : > { %v1813_v44 = vpop.f32.mrf.mxu3  ;;  %v1761_v41 = vpop.f32.mrf.mxu1  ;;  %v1708_v22 = vadd.f32 %v3291_v31, %v1707_v20  ;;  %v1504_v3 = vmax.f32 %v1479_v24, 0.0 }
 0x222   : > { %v1896_v18 = vpack.c.bf16 %v1878_v5, %v1878_v5  ;;  %v1814_v25 = vadd.f32 %v1813_v44, %v1760_v28 }
 0x223   : > { %v1762_v23 = vadd.f32 %v1761_v41, %v1708_v22 }
 0x224   : > { %1915 = vst.msk [vmem:[%s3377_s9 + $0x24] sm:$0xf] %vm1905_vm1, %v1896_v18  ;;  %v1843_v27 = vmax.f32 %v1814_v25, 0.0 }
 0x226   : > { %v1861_v26 = vmax.f32 %v1501_v14, %v1843_v27  ;;  %v1481_v59 = vpop.f32.mrf.mxu2 }
 0x227   : > { %v1482_v28 = vadd.f32 %v1481_v59, %v3333_v47 }
 0x228   : > { %v1879_v51 = vmax.f32 %v3270_v21, %v1861_v26  ;;  %v1710_v30 = vpop.f32.mrf.mxu0 }
 0x229   : > { %v1815_v12 = vpop.f32.mrf.mxu3  ;;  %v1711_v19 = vadd.f32 %v3291_v31, %v1710_v30  ;;  %v1764_v17 = vpop.f32.mrf.mxu1  ;;  %v1505_v20 = vmax.f32 %v1482_v28, 0.0 }
 0x22a   : > { %v1897_v1 = vpack.c.bf16 %v1879_v51, %v1879_v51  ;;  %v1816_v6 = vadd.f32 %v1815_v12, %v1762_v23 }
 0x22b   : > { %v1765_v63 = vadd.f32 %v1764_v17, %v1711_v19 }
 0x22c   : > { %1916 = vst.msk [vmem:[%s3377_s9 + $0x28] sm:$0xf] %vm1905_vm1, %v1897_v1  ;;  %v1844_v55 = vmax.f32 %v1816_v6, 0.0 }
 0x22e   : > { %v1862_v61 = vmax.f32 %v1502_v42, %v1844_v55 }
 0x230   : > { %v1880_v21 = vmax.f32 %v3283_v33, %v1862_v61  ;;  %v1712_v9 = vpop.f32.mrf.mxu0 }
 0x231   : > { %v1818_v4 = vpop.f32.mrf.mxu3  ;;  %v1766_v58 = vpop.f32.mrf.mxu1  ;;  %v1713_v54 = vadd.f32 %v3291_v31, %v1712_v9 }
 0x232   : > { %v1898_v46 = vpack.c.bf16 %v1880_v21, %v1880_v21  ;;  %v1819_v15 = vadd.f32 %v1818_v4, %v1765_v63 }
 0x233   : > { %v1767_v43 = vadd.f32 %v1766_v58, %v1713_v54 }
 0x234   : > { %1917 = vst.msk [vmem:[%s3377_s9 + $0x2c] sm:$0xf] %vm1905_vm1, %v1898_v46  ;;  %v1845_v35 = vmax.f32 %v1819_v15, 0.0 }
 0x236   : > { %v1863_v60 = vmax.f32 %v1503_v13, %v1845_v35 }
 0x238   : > { %v1881_v40 = vmax.f32 %v3301_v29, %v1863_v60  ;;  %v1715_v50 = vpop.f32.mrf.mxu0  ;;  %v1483_v29 = vpop.f32.mrf.mxu2 }
 0x239   : > { %v1820_v33 = vpop.f32.mrf.mxu3  ;;  %v1716_v2 = vadd.f32 %v3291_v31, %v1715_v50  ;;  %v1769_v56 = vpop.f32.mrf.mxu1  ;;  %v1484_v27 = vadd.f32 %v1483_v29, %v3346_v57 }
 0x23a   : > { %v1899_v48 = vpack.c.bf16 %v1881_v40, %v1881_v40  ;;  %v1821_v16 = vadd.f32 %v1820_v33, %v1767_v43 }
 0x23b   : > { %v1770_v49 = vadd.f32 %v1769_v56, %v1716_v2  ;;  %v1506_v1 = vmax.f32 %v1484_v27, 0.0 }
 0x23c   : > { %1918 = vst.msk [vmem:[%s3377_s9 + $0x30] sm:$0xf] %vm1905_vm1, %v1899_v48  ;;  %v1846_v11 = vmax.f32 %v1821_v16, 0.0 }
 0x23e   : > { %v1864_v10 = vmax.f32 %v1504_v3, %v1846_v11 }
 0x240   : > { %v1882_v8 = vmax.f32 %v3314_v45, %v1864_v10  ;;  %v1717_v18 = vpop.f32.mrf.mxu0  ;;  %v1486_v23 = vpop.f32.mrf.mxu2 }
 0x241   : > { %v1823_v0 = vpop.f32.mrf.mxu3  ;;  %v1771_v25 = vpop.f32.mrf.mxu1  ;;  %v1718_v41 = vadd.f32 %v3291_v31, %v1717_v18  ;;  %v1487_v57 = vadd.f32 %v1486_v23, %v3353_v34 }
 0x242   : > { %v1900_v5 = vpack.c.bf16 %v1882_v8, %v1882_v8  ;;  %v1824_v44 = vadd.f32 %v1823_v0, %v1770_v49 }
 0x243   : > { %v1772_v22 = vadd.f32 %v1771_v25, %v1718_v41  ;;  %v1507_v63 = vmax.f32 %v1487_v57, 0.0 }
 0x244   : > { %1919 = vst.msk [vmem:[%s3377_s9 + $0x34] sm:$0xf] %vm1905_vm1, %v1900_v5  ;;  %v1847_v37 = vmax.f32 %v1824_v44, 0.0 }
 0x246   : > { %v1865_v14 = vmax.f32 %v1505_v20, %v1847_v37 }
 0x248   : > { %v1883_v47 = vmax.f32 %v3327_v38, %v1865_v14  ;;  %v1720_v51 = vpop.f32.mrf.mxu0  ;;  %v1488_v4 = vpop.f32.mrf.mxu2 }
 0x249   : > { %v1825_v45 = vpop.f32.mrf.mxu3  ;;  %v1721_v12 = vadd.f32 %v3291_v31, %v1720_v51  ;;  %v1774_v30 = vpop.f32.mrf.mxu1  ;;  %v1489_v9 = vadd.f32 %v1488_v4, %v3365_v52 }
 0x24a   : > { %v1901_v26 = vpack.c.bf16 %v1883_v47, %v1883_v47  ;;  %v1826_v39 = vadd.f32 %v1825_v45, %v1772_v22 }
 0x24b   : > { %v1775_v17 = vadd.f32 %v1774_v30, %v1721_v12  ;;  %v1508_v54 = vmax.f32 %v1489_v9, 0.0 }
 0x24c   : > { %1920 = vst.msk [vmem:[%s3377_s9 + $0x38] sm:$0xf] %vm1905_vm1, %v1901_v26  ;;  %v1848_v6 = vmax.f32 %v1826_v39, 0.0 }
 0x24e   : > { %v1866_v19 = vmax.f32 %v1506_v1, %v1848_v6 }
 0x250   : > { %v1884_v38 = vmax.f32 %v3340_v53, %v1866_v19  ;;  %v1722_v61 = vpop.f32.mrf.mxu0 }
 0x251   : > { %v1828_v42 = vpop.f32.mrf.mxu3  ;;  %v1723_v21 = vadd.f32 %v3291_v31, %v1722_v61  ;;  %v1776_v15 = vpop.f32.mrf.mxu1 }
 0x252   : > { %v1902_v55 = vpack.c.bf16 %v1884_v38, %v1884_v38  ;;  %v1829_v32 = vadd.f32 %v1828_v42, %v1775_v17 }
 0x253   : > { %v1777_v53 = vadd.f32 %v1776_v15, %v1723_v21 }
 0x254   : > { %1921 = vst.msk [vmem:[%s3377_s9 + $0x3c] sm:$0xf] %vm1905_vm1, %v1902_v55  ;;  %v1849_v36 = vmax.f32 %v1829_v32, 0.0 }
 0x256   : > { %v1867_v46 = vmax.f32 %v1507_v63, %v1849_v36 }
 0x258   : > { %v1885_v34 = vmax.f32 %v3351_v7, %v1867_v46 }
 0x259   : > { %v1830_v58 = vpop.f32.mrf.mxu3 }
 0x25a   : > { %v1903_v13 = vpack.c.bf16 %v1885_v34, %v1885_v34  ;;  %v1831_v35 = vadd.f32 %v1830_v58, %v1777_v53 }
 0x25c   : > { %1922 = vst.msk [vmem:[%s3377_s9 + $0x40] sm:$0xf] %vm1905_vm1, %v1903_v13  ;;  %v1850_v60 = vmax.f32 %v1831_v35, 0.0 }
 0x25e   : > { %v1868_v59 = vmax.f32 %v1508_v54, %v1850_v60 }
 0x260   : > { %v1886_v24 = vmax.f32 %v3359_v62, %v1868_v59 }
 0x262   : > { %v1904_v31 = vpack.c.bf16 %v1886_v24, %v1886_v24 }
 0x264   : > { %1923 = vst.msk [vmem:[%s3377_s9 + $0x44] sm:$0xf] %vm1905_vm1, %v1904_v31 }
 0x265 PF: > { %s13_s12 = sadd.s32 1, %s2672_s12  }
 0x266   : > { %p10_p4 = scmp.ge.s32.totalorder %s13_s12, 4  }
 0x268   :  { %12 = sbr.rel (!%p10_p4) target bundleno = 1 (0x1), region = 62 }

// kernel: net_forward.5
= control target key start
LH: loop header
LB: loop body
LE: loop exit
PB: predicated region body
PF: predicated region fallthrough
CT: control target
= control target key end

     0   :  { %10 = vsyncpa [#allocation4], 0  ;;  %s8263_s18 = smov 0   ;;  %s9695_s0 = inlined_call_operand.vmem [shape: bf16[2,9216], index: 0, kind: input, shape index: {}]   ;;  %s9696_s1 = inlined_call_operand.vmem [shape: bf16[9216,512], index: 1, kind: input, shape index: {}]   ;;  %s9697_s2 = inlined_call_operand.vmem [shape: f32[1,512], index: 2, kind: input, shape index: {}]   ;;  %s9698_s3 = inlined_call_operand.vmem [shape: bf16[512,10], index: 3, kind: input, shape index: {}]   ;;  %s9699_s4 = inlined_call_operand.vmem [shape: f32[1,10], index: 4, kind: input, shape index: {}]   ;;  %s9700_s5 = inlined_call_operand.hbm [shape: f32[2,10], index: 5, kind: output, shape index: {}]  }
   0x1 LB: > { %s8269_s19 = sadd.s32 4294967295, %s8229_s18   ;;  %p5114_p0 = scmp.ge.s32.totalorder %s8229_s18, 1  ;;  %s8229_s18 = sphi %s8263_s18, %s16_s18  }
   0x2   : > { %p195_p1 = scmp.lt.s32.totalorder %s8229_s18, 5 }
   0x4   : > { %p196_p2 = pnand %p5114_p0, %p195_p1 }
   0x5   : > { %s223_s20 = smul.u32 (!%p196_p2), 18, %s8269_s19  ;;  %p5117_p5 = scmp.ne.s32.totalorder (!%p196_p2), %s8269_s19, 0 }
   0x6   : > { %199 = sbr.rel (%p196_p2) target bundleno = 1181 (0x49d), region = 40 }
   0x7   : > { %s228_s21 = smul.u32 (!%p196_p2), 288, %s8269_s19  ;;  %p224_p3 = scmp.lt.s32.totalorder (!%p196_p2), %s223_s20, 71 }
   0x9   : > { %p229_p4 = scmp.lt.s32.totalorder (!%p196_p2), %s228_s21, 1151 }
   0xb   : > { %s9702_s20 = smov (!%p224_p3, %s223_s20), 71  ;;  %s9704_s21 = smov (!%p229_p4, %s228_s21), 1151 }
   0xc   : > { %s8278_s24 = scalar_lea.vmem %s9695_s0, %s9702_s20  ;;  %s7555_s25 = sshll.u32 %s9704_s21, 4 }
   0xd   : > { %s8283_s28 = scalar_lea.vmem %s9696_s1, %s7555_s25  ;;  %238 = sbr.rel (%p5117_p5) target bundleno = 20 (0x14), region = 44 }
  0x12   : > { %v8231_v0 = vmov 0.0  }
  0x13   : > { %239 = vst [vmem:[#allocation2] sm:$0xff] %v8231_v0 }
  0x14 PF: > { %v5232_v1 = vld [vmem:[%s8283_s28 + $0xe0] sm:$0xf]  ;;  %v7586_v2 = vld [vmem:[%s8283_s28 + $0xec] sm:$0xf0]  ;;  %vm4685_vm0 = vcmask 1041408   ;;  %vm4687_vm1 = vcmask 1045508  }
  0x15   : > { %v5360_v3 = vld [vmem:[%s8283_s28 + $0x1e0] sm:$0xf]  ;;  %v5233_v4 = vor.u32 %v7586_v2, %v5232_v1  ;;  %v7618_v5 = vld [vmem:[%s8283_s28 + $0x1ec] sm:$0xf0]  ;;  %vm4689_vm2 = vcmask 1043456   ;;  %p7422_p6 = scmp.ne.s32.totalorder %s8269_s19, 3 }
  0x16   : > { %v5488_v6 = vld [vmem:[%s8283_s28 + $0x2e0] sm:$0xf]  ;;  %v7650_v7 = vld [vmem:[%s8283_s28 + $0x2ec] sm:$0xf0]  ;;  %v5361_v8 = vor.u32 %v7618_v5, %v5360_v3 }
  0x17   : > { %v5489_v9 = vor.u32 %v7650_v7, %v5488_v6  ;;  %v5616_v10 = vld [vmem:[%s8283_s28 + $0x3e0] sm:$0xf]  ;;  %v7682_v11 = vld [vmem:[%s8283_s28 + $0x3ec] sm:$0xf0]  ;;  %3742 = vmatpush.bf16.msra.mxu0 %v5233_v4 }
  0x18   : > { %v5216_v12 = vld [vmem:[%s8283_s28 + $0xc0] sm:$0xf]  ;;  %v5617_v13 = vor.u32 %v7682_v11, %v5616_v10  ;;  %v7582_v14 = vld [vmem:[%s8283_s28 + $0xcc] sm:$0xf0]  ;;  %3755 = vmatpush.bf16.msra.mxu1 %v5361_v8 }
  0x19   : > { %v5344_v15 = vld [vmem:[%s8283_s28 + $0x1c0] sm:$0xf]  ;;  %v7614_v16 = vld [vmem:[%s8283_s28 + $0x1cc] sm:$0xf0]  ;;  %3768 = vmatpush.bf16.msra.mxu2 %v5489_v9  ;;  %v5217_v17 = vor.u32 %v7582_v14, %v5216_v12 }
  0x1a   : > { %v5345_v18 = vor.u32 %v7614_v16, %v5344_v15  ;;  %v5472_v19 = vld [vmem:[%s8283_s28 + $0x2c0] sm:$0xf]  ;;  %v7646_v20 = vld [vmem:[%s8283_s28 + $0x2cc] sm:$0xf0]  ;;  %3781 = vmatpush.bf16.msra.mxu3 %v5617_v13 }
  0x1b   : > { %v5600_v21 = vld [vmem:[%s8283_s28 + $0x3c0] sm:$0xf]  ;;  %v5473_v22 = vor.u32 %v7646_v20, %v5472_v19  ;;  %v7678_v23 = vld [vmem:[%s8283_s28 + $0x3cc] sm:$0xf0]  ;;  %3743 = vmatpush.bf16.msra.mxu0 %v5217_v17 }
  0x1c   : > { %v5200_v24 = vld [vmem:[%s8283_s28 + $0xa0] sm:$0xf]  ;;  %v7578_v25 = vld [vmem:[%s8283_s28 + $0xac] sm:$0xf0]  ;;  %v5601_v26 = vor.u32 %v7678_v23, %v5600_v21  ;;  %3756 = vmatpush.bf16.msra.mxu1 %v5345_v18 }
  0x1d   : > { %v5328_v27 = vld [vmem:[%s8283_s28 + $0x1a0] sm:$0xf]  ;;  %v7610_v28 = vld [vmem:[%s8283_s28 + $0x1ac] sm:$0xf0]  ;;  %v5201_v30 = vor.u32 %v7578_v25, %v5200_v24  ;;  %3769 = vmatpush.bf16.msra.mxu2 %v5473_v22 }
  0x1e   : > { %v5456_v29 = vld [vmem:[%s8283_s28 + $0x2a0] sm:$0xf]  ;;  %v7642_v31 = vld [vmem:[%s8283_s28 + $0x2ac] sm:$0xf0]  ;;  %v5329_v34 = vor.u32 %v7610_v28, %v5328_v27  ;;  %3782 = vmatpush.bf16.msra.mxu3 %v5601_v26 }
  0x1f   : > { %v5584_v32 = vld [vmem:[%s8283_s28 + $0x3a0] sm:$0xf]  ;;  %v7674_v33 = vld [vmem:[%s8283_s28 + $0x3ac] sm:$0xf0]  ;;  %v5457_v35 = vor.u32 %v7642_v31, %v5456_v29  ;;  %3744 = vmatpush.bf16.msra.mxu0 %v5201_v30 }
  0x20   : > { %v5184_v36 = vld [vmem:[%s8283_s28 + $0x80] sm:$0xf]  ;;  %v7574_v37 = vld [vmem:[%s8283_s28 + $0x8c] sm:$0xf0]  ;;  %v5585_v39 = vor.u32 %v7674_v33, %v5584_v32  ;;  %3757 = vmatpush.bf16.msra.mxu1 %v5329_v34 }
  0x21   : > { %v5312_v38 = vld [vmem:[%s8283_s28 + $0x180] sm:$0xf]  ;;  %v7606_v40 = vld [vmem:[%s8283_s28 + $0x18c] sm:$0xf0]  ;;  %v5185_v45 = vor.u32 %v7574_v37, %v5184_v36  ;;  %3770 = vmatpush.bf16.msra.mxu2 %v5457_v35 }
  0x22   : > { %v5440_v41 = vld [vmem:[%s8283_s28 + $0x280] sm:$0xf]  ;;  %v7638_v42 = vld [vmem:[%s8283_s28 + $0x28c] sm:$0xf0]  ;;  %v5313_v46 = vor.u32 %v7606_v40, %v5312_v38  ;;  %3783 = vmatpush.bf16.msra.mxu3 %v5585_v39 }
  0x23   : > { %v5568_v43 = vld [vmem:[%s8283_s28 + $0x380] sm:$0xf]  ;;  %v7670_v44 = vld [vmem:[%s8283_s28 + $0x38c] sm:$0xf0]  ;;  %v5441_v47 = vor.u32 %v7638_v42, %v5440_v41  ;;  %3745 = vmatpush.bf16.msra.mxu0 %v5185_v45 }
  0x24   : > { %v5168_v48 = vld [vmem:[%s8283_s28 + $0x60] sm:$0xf]  ;;  %v7570_v49 = vld [vmem:[%s8283_s28 + $0x6c] sm:$0xf0]  ;;  %v5569_v51 = vor.u32 %v7670_v44, %v5568_v43  ;;  %3758 = vmatpush.bf16.msra.mxu1 %v5313_v46 }
  0x25   : > { %v5296_v50 = vld [vmem:[%s8283_s28 + $0x160] sm:$0xf]  ;;  %v7602_v52 = vld [vmem:[%s8283_s28 + $0x16c] sm:$0xf0]  ;;  %v5169_v57 = vor.u32 %v7570_v49, %v5168_v48  ;;  %3771 = vmatpush.bf16.msra.mxu2 %v5441_v47 }
  0x26   : > { %v5424_v53 = vld [vmem:[%s8283_s28 + $0x260] sm:$0xf]  ;;  %v7634_v54 = vld [vmem:[%s8283_s28 + $0x26c] sm:$0xf0]  ;;  %v5297_v58 = vor.u32 %v7602_v52, %v5296_v50  ;;  %3784 = vmatpush.bf16.msra.mxu3 %v5569_v51 }
  0x27   : > { %v5552_v55 = vld [vmem:[%s8283_s28 + $0x360] sm:$0xf]  ;;  %v7666_v56 = vld [vmem:[%s8283_s28 + $0x36c] sm:$0xf0]  ;;  %v5425_v59 = vor.u32 %v7634_v54, %v5424_v53  ;;  %3746 = vmatpush.bf16.msra.mxu0 %v5169_v57 }
  0x28   : > { %v5152_v60 = vld [vmem:[%s8283_s28 + $0x40] sm:$0xf]  ;;  %v7566_v61 = vld [vmem:[%s8283_s28 + $0x4c] sm:$0xf0]  ;;  %v5553_v63 = vor.u32 %v7666_v56, %v5552_v55  ;;  %3759 = vmatpush.bf16.msra.mxu1 %v5297_v58 }
  0x29   : > { %v5280_v62 = vld [vmem:[%s8283_s28 + $0x140] sm:$0xf]  ;;  %v7598_v0 = vld [vmem:[%s8283_s28 + $0x14c] sm:$0xf0]  ;;  %v5153_v5 = vor.u32 %v7566_v61, %v5152_v60  ;;  %3772 = vmatpush.bf16.msra.mxu2 %v5425_v59 }
  0x2a   : > { %v5408_v1 = vld [vmem:[%s8283_s28 + $0x240] sm:$0xf]  ;;  %v7630_v2 = vld [vmem:[%s8283_s28 + $0x24c] sm:$0xf0]  ;;  %v5281_v6 = vor.u32 %v7598_v0, %v5280_v62  ;;  %3785 = vmatpush.bf16.msra.mxu3 %v5553_v63 }
  0x2b   : > { %v5536_v3 = vld [vmem:[%s8283_s28 + $0x340] sm:$0xf]  ;;  %v7662_v4 = vld [vmem:[%s8283_s28 + $0x34c] sm:$0xf0]  ;;  %v5409_v7 = vor.u32 %v7630_v2, %v5408_v1  ;;  %3747 = vmatpush.bf16.msra.mxu0 %v5153_v5 }
  0x2c   : > { %v5136_v8 = vld [vmem:[%s8283_s28 + $0x20] sm:$0xf]  ;;  %v7562_v9 = vld [vmem:[%s8283_s28 + $0x2c] sm:$0xf0]  ;;  %v5537_v11 = vor.u32 %v7662_v4, %v5536_v3  ;;  %3760 = vmatpush.bf16.msra.mxu1 %v5281_v6 }
  0x2d   : > { %v5264_v10 = vld [vmem:[%s8283_s28 + $0x120] sm:$0xf]  ;;  %v7594_v12 = vld [vmem:[%s8283_s28 + $0x12c] sm:$0xf0]  ;;  %v5137_v17 = vor.u32 %v7562_v9, %v5136_v8  ;;  %3773 = vmatpush.bf16.msra.mxu2 %v5409_v7 }
  0x2e   : > { %v5392_v13 = vld [vmem:[%s8283_s28 + $0x220] sm:$0xf]  ;;  %v7626_v14 = vld [vmem:[%s8283_s28 + $0x22c] sm:$0xf0]  ;;  %v5265_v20 = vor.u32 %v7594_v12, %v5264_v10  ;;  %3786 = vmatpush.bf16.msra.mxu3 %v5537_v11 }
  0x2f   : > { %v5520_v15 = vld [vmem:[%s8283_s28 + $0x320] sm:$0xf]  ;;  %v7658_v16 = vld [vmem:[%s8283_s28 + $0x32c] sm:$0xf0]  ;;  %v5393_v21 = vor.u32 %v7626_v14, %v5392_v13  ;;  %3748 = vmatpush.bf16.msra.mxu0 %v5137_v17 }
  0x30   : > { %v5120_v18 = vld [vmem:[%s8283_s28] sm:$0xf]  ;;  %v7558_v19 = vld [vmem:[%s8283_s28 + $0xc] sm:$0xf0]  ;;  %v5521_v25 = vor.u32 %v7658_v16, %v5520_v15  ;;  %3761 = vmatpush.bf16.msra.mxu1 %v5265_v20 }
  0x31   : > { %v5248_v22 = vld [vmem:[%s8283_s28 + $0x100] sm:$0xf]  ;;  %v7590_v23 = vld [vmem:[%s8283_s28 + $0x10c] sm:$0xf0]  ;;  %v5121_v32 = vor.u32 %v7558_v19, %v5120_v18  ;;  %3774 = vmatpush.bf16.msra.mxu2 %v5393_v21 }
  0x32   : > { %v5376_v24 = vld [vmem:[%s8283_s28 + $0x200] sm:$0xf]  ;;  %v7622_v26 = vld [vmem:[%s8283_s28 + $0x20c] sm:$0xf0]  ;;  %v5249_v36 = vor.u32 %v7590_v23, %v5248_v22  ;;  %3787 = vmatpush.bf16.msra.mxu3 %v5521_v25 }
  0x33   : > { %v5504_v27 = vld [vmem:[%s8283_s28 + $0x300] sm:$0xf]  ;;  %v7654_v28 = vld [vmem:[%s8283_s28 + $0x30c] sm:$0xf0]  ;;  %v5377_v37 = vor.u32 %v7622_v26, %v5376_v24  ;;  %3749 = vmatpush.bf16.msra.mxu0 %v5121_v32 }
  0x34   : > { %v5744_v29 = vld [vmem:[%s8283_s28 + $0x4e0] sm:$0xf]  ;;  %v7714_v30 = vld [vmem:[%s8283_s28 + $0x4ec] sm:$0xf0]  ;;  %v5505_v40 = vor.u32 %v7654_v28, %v5504_v27  ;;  %3762 = vmatpush.bf16.msra.mxu1 %v5249_v36 }
  0x35   : > { %v5872_v31 = vld [vmem:[%s8283_s28 + $0x5e0] sm:$0xf]  ;;  %v7746_v33 = vld [vmem:[%s8283_s28 + $0x5ec] sm:$0xf0]  ;;  %v5745_v41 = vor.u32 %v7714_v30, %v5744_v29  ;;  %3775 = vmatpush.bf16.msra.mxu2 %v5377_v37 }
  0x36   : > { %v6000_v34 = vld [vmem:[%s8283_s28 + $0x6e0] sm:$0xf]  ;;  %v7778_v35 = vld [vmem:[%s8283_s28 + $0x6ec] sm:$0xf0]  ;;  %v5873_v42 = vor.u32 %v7746_v33, %v5872_v31  ;;  %3788 = vmatpush.bf16.msra.mxu3 %v5505_v40 }
  0x37   : > { %v6128_v38 = vld [vmem:[%s8283_s28 + $0x7e0] sm:$0xf]  ;;  %v7810_v39 = vld [vmem:[%s8283_s28 + $0x7ec] sm:$0xf0]  ;;  %v6001_v43 = vor.u32 %v7778_v35, %v6000_v34  ;;  %3794 = vmatpush.bf16.msrb.mxu0 %v5745_v41 }
  0x38   : > { %v5728_v44 = vld [vmem:[%s8283_s28 + $0x4c0] sm:$0xf]  ;;  %v7710_v45 = vld [vmem:[%s8283_s28 + $0x4cc] sm:$0xf0]  ;;  %v6129_v47 = vor.u32 %v7810_v39, %v6128_v38  ;;  %3807 = vmatpush.bf16.msrb.mxu1 %v5873_v42 }
  0x39   : > { %v5856_v46 = vld [vmem:[%s8283_s28 + $0x5c0] sm:$0xf]  ;;  %v7742_v48 = vld [vmem:[%s8283_s28 + $0x5cc] sm:$0xf0]  ;;  %v5729_v53 = vor.u32 %v7710_v45, %v5728_v44  ;;  %3820 = vmatpush.bf16.msrb.mxu2 %v6001_v43 }
  0x3a   : > { %v5984_v49 = vld [vmem:[%s8283_s28 + $0x6c0] sm:$0xf]  ;;  %v7774_v50 = vld [vmem:[%s8283_s28 + $0x6cc] sm:$0xf0]  ;;  %v5857_v56 = vor.u32 %v7742_v48, %v5856_v46  ;;  %3833 = vmatpush.bf16.msrb.mxu3 %v6129_v47 }
  0x3b   : > { %v6112_v51 = vld [vmem:[%s8283_s28 + $0x7c0] sm:$0xf]  ;;  %v7806_v52 = vld [vmem:[%s8283_s28 + $0x7cc] sm:$0xf0]  ;;  %v5985_v57 = vor.u32 %v7774_v50, %v5984_v49  ;;  %3795 = vmatpush.bf16.msrb.mxu0 %v5729_v53 }
  0x3c   : > { %v5712_v54 = vld [vmem:[%s8283_s28 + $0x4a0] sm:$0xf]  ;;  %v7706_v55 = vld [vmem:[%s8283_s28 + $0x4ac] sm:$0xf0]  ;;  %v6113_v61 = vor.u32 %v7806_v52, %v6112_v51  ;;  %3808 = vmatpush.bf16.msrb.mxu1 %v5857_v56 }
  0x3d   : > { %v5840_v58 = vld [vmem:[%s8283_s28 + $0x5a0] sm:$0xf]  ;;  %v7738_v59 = vld [vmem:[%s8283_s28 + $0x5ac] sm:$0xf0]  ;;  %v5713_v2 = vor.u32 %v7706_v55, %v5712_v54  ;;  %3821 = vmatpush.bf16.msrb.mxu2 %v5985_v57 }
  0x3e   : > { %v241_v60 = vld [vmem:[%s8278_s24] sm:$0xff]  ;;  %v7770_v63 = vld [vmem:[%s8283_s28 + $0x6ac] sm:$0xf0]  ;;  %v5841_v3 = vor.u32 %v7738_v59, %v5840_v58  ;;  %3834 = vmatpush.bf16.msrb.mxu3 %v6113_v61 }
  0x3f   : > { %v5968_v62 = vld [vmem:[%s8283_s28 + $0x6a0] sm:$0xf]  ;;  %821 = vst [vmem:[#allocation1] ss:$9 sm:$0xff] %v241_v60  ;;  %v7802_v1 = vld [vmem:[%s8283_s28 + $0x7ac] sm:$0xf0]  ;;  %3796 = vmatpush.bf16.msrb.mxu0 %v5713_v2 }
  0x40   : > { %v6096_v0 = vld [vmem:[%s8283_s28 + $0x7a0] sm:$0xf]  ;;  %v5969_v4 = vor.u32 %v7770_v63, %v5968_v62  ;;  %v7702_v6 = vld [vmem:[%s8283_s28 + $0x48c] sm:$0xf0]  ;;  %3809 = vmatpush.bf16.msrb.mxu1 %v5841_v3  ;;  %v242_v62 = vld [vmem:[%s8278_s24 + $0x8] sm:$0xff] }
  0x41   : > { %v5696_v5 = vld [vmem:[%s8283_s28 + $0x480] sm:$0xf]  ;;  %v6097_v8 = vor.u32 %v7802_v1, %v6096_v0  ;;  %v7734_v9 = vld [vmem:[%s8283_s28 + $0x58c] sm:$0xf0] }
  0x42   : > { %v5824_v7 = vld [vmem:[%s8283_s28 + $0x580] sm:$0xf]  ;;  %v7766_v11 = vld [vmem:[%s8283_s28 + $0x68c] sm:$0xf0]  ;;  %v5697_v15 = vor.u32 %v7702_v6, %v5696_v5  ;;  %3822 = vmatpush.bf16.msrb.mxu2 %v5969_v4 }
  0x43   : > { %v5952_v10 = vld [vmem:[%s8283_s28 + $0x680] sm:$0xf]  ;;  %v7798_v13 = vld [vmem:[%s8283_s28 + $0x78c] sm:$0xf0]  ;;  %v5825_v19 = vor.u32 %v7734_v9, %v5824_v7  ;;  %3835 = vmatpush.bf16.msrb.mxu3 %v6097_v8 }
  0x44   : > { %v6080_v12 = vld [vmem:[%s8283_s28 + $0x780] sm:$0xf]  ;;  %v7698_v16 = vld [vmem:[%s8283_s28 + $0x46c] sm:$0xf0]  ;;  %v5953_v20 = vor.u32 %v7766_v11, %v5952_v10  ;;  %3797 = vmatpush.bf16.msrb.mxu0 %v5697_v15 }
  0x45   : > { %v5680_v14 = vld [vmem:[%s8283_s28 + $0x460] sm:$0xf]  ;;  %v7730_v18 = vld [vmem:[%s8283_s28 + $0x56c] sm:$0xf0]  ;;  %v6081_v24 = vor.u32 %v7798_v13, %v6080_v12  ;;  %3810 = vmatpush.bf16.msrb.mxu1 %v5825_v19 }
  0x46   : > { %v5808_v17 = vld [vmem:[%s8283_s28 + $0x560] sm:$0xf]  ;;  %v8387_v21 = vld [vmem:[#allocation1 + $0x12] sm:$0xff]  ;;  %v8396_v27 = vld [vmem:[#allocation1 + $0x9] sm:$0xff]  ;;  %v5681_v30 = vor.u32 %v7698_v16, %v5680_v14  ;;  %3823 = vmatpush.bf16.msrb.mxu2 %v5953_v20 }
  0x47   : > { %v8389_v22 = vld [vmem:[#allocation1] sm:$0xff]  ;;  %v7762_v26 = vld [vmem:[%s8283_s28 + $0x66c] sm:$0xf0]  ;;  %3776 = vmatmul.bf16.vlgmr.msra.gmra.mxu2 %v8387_v21  ;;  %3763 = vmatmul.bf16.vlgmr.msra.gmra.mxu1 %v8396_v27  ;;  %v5809_v31 = vor.u32 %v7730_v18, %v5808_v17  ;;  %v8425_v61 = vld [vmem:[#allocation1 + $0x36] sm:$0xff] }
  0x48   : > { %v8391_v23 = vld [vmem:[#allocation1 + $0x1b] sm:$0xff]  ;;  %v7794_v29 = vld [vmem:[%s8283_s28 + $0x76c] sm:$0xf0]  ;;  %3750 = vmatmul.bf16.vlgmr.msra.gmra.mxu0 %v8389_v22  ;;  %3836 = vmatpush.bf16.msrb.mxu3 %v6081_v24  ;;  %v8428_v1 = vld [vmem:[#allocation1 + $0x24] sm:$0xff] }
  0x49   : > { %v5936_v25 = vld [vmem:[%s8283_s28 + $0x660] sm:$0xf]  ;;  %3789 = vmatmul.bf16.vlgmr.msra.gmra.mxu3 %v8391_v23  ;;  %v7694_v34 = vld [vmem:[%s8283_s28 + $0x44c] sm:$0xf0]  ;;  %3798 = vmatpush.bf16.msrb.mxu0 %v5681_v30 }
  0x4a   : > { %v6064_v28 = vld [vmem:[%s8283_s28 + $0x760] sm:$0xf]  ;;  %v5937_v32 = vor.u32 %v7762_v26, %v5936_v25  ;;  %v7726_v37 = vld [vmem:[%s8283_s28 + $0x54c] sm:$0xf0]  ;;  %3811 = vmatpush.bf16.msrb.mxu1 %v5809_v31 }
  0x4b   : > { %v5664_v33 = vld [vmem:[%s8283_s28 + $0x440] sm:$0xf]  ;;  %v6065_v36 = vor.u32 %v7794_v29, %v6064_v28  ;;  %v7758_v39 = vld [vmem:[%s8283_s28 + $0x64c] sm:$0xf0] }
  0x4c   : > { %v5792_v35 = vld [vmem:[%s8283_s28 + $0x540] sm:$0xf]  ;;  %v7790_v41 = vld [vmem:[%s8283_s28 + $0x74c] sm:$0xf0]  ;;  %v5665_v42 = vor.u32 %v7694_v34, %v5664_v33  ;;  %3824 = vmatpush.bf16.msrb.mxu2 %v5937_v32 }
  0x4d   : > { %v5920_v38 = vld [vmem:[%s8283_s28 + $0x640] sm:$0xf]  ;;  %v5793_v44 = vor.u32 %v7726_v37, %v5792_v35  ;;  %v7690_v46 = vld [vmem:[%s8283_s28 + $0x42c] sm:$0xf0]  ;;  %3837 = vmatpush.bf16.msrb.mxu3 %v6065_v36 }
  0x4e   : > { %v6048_v40 = vld [vmem:[%s8283_s28 + $0x740] sm:$0xf]  ;;  %v5921_v45 = vor.u32 %v7758_v39, %v5920_v38  ;;  %v7722_v48 = vld [vmem:[%s8283_s28 + $0x52c] sm:$0xf0]  ;;  %3799 = vmatpush.bf16.msrb.mxu0 %v5665_v42 }
  0x4f   : > { %v5648_v43 = vld [vmem:[%s8283_s28 + $0x420] sm:$0xf]  ;;  %v6049_v49 = vor.u32 %v7790_v41, %v6048_v40  ;;  %v7754_v51 = vld [vmem:[%s8283_s28 + $0x62c] sm:$0xf0]  ;;  %3812 = vmatpush.bf16.msrb.mxu1 %v5793_v44 }
  0x50   : > { %v5776_v47 = vld [vmem:[%s8283_s28 + $0x520] sm:$0xf]  ;;  %v7786_v53 = vld [vmem:[%s8283_s28 + $0x72c] sm:$0xf0]  ;;  %v5649_v56 = vor.u32 %v7690_v46, %v5648_v43  ;;  %3825 = vmatpush.bf16.msrb.mxu2 %v5921_v45 }
  0x51   : > { %v5904_v50 = vld [vmem:[%s8283_s28 + $0x620] sm:$0xf]  ;;  %v7686_v55 = vld [vmem:[%s8283_s28 + $0x40c] sm:$0xf0]  ;;  %v5777_v63 = vor.u32 %v7722_v48, %v5776_v47  ;;  %3838 = vmatpush.bf16.msrb.mxu3 %v6049_v49 }
  0x52   : > { %v6032_v52 = vld [vmem:[%s8283_s28 + $0x720] sm:$0xf]  ;;  %v7718_v58 = vld [vmem:[%s8283_s28 + $0x50c] sm:$0xf0]  ;;  %v5905_v0 = vor.u32 %v7754_v51, %v5904_v50  ;;  %3800 = vmatpush.bf16.msrb.mxu0 %v5649_v56 }
  0x53   : > { %v5632_v54 = vld [vmem:[%s8283_s28 + $0x400] sm:$0xf]  ;;  %v7750_v60 = vld [vmem:[%s8283_s28 + $0x60c] sm:$0xf0]  ;;  %v6033_v4 = vor.u32 %v7786_v53, %v6032_v52  ;;  %3813 = vmatpush.bf16.msrb.mxu1 %v5777_v63 }
  0x54   : > { %v5760_v57 = vld [vmem:[%s8283_s28 + $0x500] sm:$0xf]  ;;  %v8432_v3 = vld [vmem:[#allocation1 + $0x2d] sm:$0xff]  ;;  %v5633_v10 = vor.u32 %v7686_v55, %v5632_v54  ;;  %3826 = vmatpush.bf16.msrb.mxu2 %v5905_v0 }
  0x55   : > { %v5888_v59 = vld [vmem:[%s8283_s28 + $0x600] sm:$0xf]  ;;  %v7782_v6 = vld [vmem:[%s8283_s28 + $0x70c] sm:$0xf0]  ;;  %v5761_v14 = vor.u32 %v7718_v58, %v5760_v57  ;;  %3839 = vmatpush.bf16.msrb.mxu3 %v6033_v4 }
  0x56   : > { %v8430_v2 = vld [vmem:[#allocation1 + $0x3f] sm:$0xff]  ;;  %v7842_v8 = vld [vmem:[%s8283_s28 + $0x8ec] sm:$0xf0]  ;;  %v5889_v15 = vor.u32 %v7750_v60, %v5888_v59  ;;  %3801 = vmatpush.bf16.msrb.mxu0 %v5633_v10 }
  0x57   : > { %v6016_v5 = vld [vmem:[%s8283_s28 + $0x700] sm:$0xf]  ;;  %831 = vst [vmem:[#allocation1] ss:$9 sm:$0xff] %v242_v62  ;;  %v7874_v11 = vld [vmem:[%s8283_s28 + $0x9ec] sm:$0xf0]  ;;  %3814 = vmatpush.bf16.msrb.mxu1 %v5761_v14 }
  0x58   : > { %v6256_v7 = vld [vmem:[%s8283_s28 + $0x8e0] sm:$0xf]  ;;  %v7906_v13 = vld [vmem:[%s8283_s28 + $0xaec] sm:$0xf0]  ;;  %v6017_v18 = vor.u32 %v7782_v6, %v6016_v5  ;;  %3827 = vmatpush.bf16.msrb.mxu2 %v5889_v15 }
  0x59   : > { %v6384_v9 = vld [vmem:[%s8283_s28 + $0x9e0] sm:$0xf]  ;;  %v7938_v17 = vld [vmem:[%s8283_s28 + $0xbec] sm:$0xf0]  ;;  %v6257_v19 = vor.u32 %v7842_v8, %v6256_v7  ;;  %3802 = vmatmul.bf16.vlgmr.msrb.gmra.mxu0 %v8428_v1 }
  0x5a   : > { %v6512_v12 = vld [vmem:[%s8283_s28 + $0xae0] sm:$0xf]  ;;  %v6385_v20 = vor.u32 %v7874_v11, %v6384_v9  ;;  %v7838_v26 = vld [vmem:[%s8283_s28 + $0x8cc] sm:$0xf0]  ;;  %3840 = vmatpush.bf16.msrb.mxu3 %v6017_v18  ;;  %3815 = vmatmul.bf16.vlgmr.msrb.gmra.mxu1 %v8432_v3 }
  0x5b   : > { %v6640_v16 = vld [vmem:[%s8283_s28 + $0xbe0] sm:$0xf]  ;;  %v6513_v24 = vor.u32 %v7906_v13, %v6512_v12  ;;  %v7870_v30 = vld [vmem:[%s8283_s28 + $0x9cc] sm:$0xf0]  ;;  %3846 = vmatpush.bf16.msra.mxu0 %v6257_v19  ;;  %3828 = vmatmul.bf16.vlgmr.msrb.gmra.mxu2 %v8425_v61 }
  0x5c   : > { %v6240_v25 = vld [vmem:[%s8283_s28 + $0x8c0] sm:$0xf]  ;;  %v6641_v29 = vor.u32 %v7938_v17, %v6640_v16  ;;  %v7902_v32 = vld [vmem:[%s8283_s28 + $0xacc] sm:$0xf0]  ;;  %3859 = vmatpush.bf16.msra.mxu1 %v6385_v20 }
  0x5d   : > { %v6368_v28 = vld [vmem:[%s8283_s28 + $0x9c0] sm:$0xf]  ;;  %v7934_v34 = vld [vmem:[%s8283_s28 + $0xbcc] sm:$0xf0]  ;;  %v6241_v35 = vor.u32 %v7838_v26, %v6240_v25  ;;  %3872 = vmatpush.bf16.msra.mxu2 %v6513_v24  ;;  %3841 = vmatmul.bf16.vlgmr.msrb.gmra.mxu3 %v8430_v2 }
  0x5e   : > { %v6496_v31 = vld [vmem:[%s8283_s28 + $0xac0] sm:$0xf]  ;;  %v6369_v36 = vor.u32 %v7870_v30, %v6368_v28  ;;  %v7834_v39 = vld [vmem:[%s8283_s28 + $0x8ac] sm:$0xf0]  ;;  %3885 = vmatpush.bf16.msra.mxu3 %v6641_v29 }
  0x5f   : > { %v6624_v33 = vld [vmem:[%s8283_s28 + $0xbc0] sm:$0xf]  ;;  %v6497_v37 = vor.u32 %v7902_v32, %v6496_v31  ;;  %v7866_v42 = vld [vmem:[%s8283_s28 + $0x9ac] sm:$0xf0]  ;;  %3847 = vmatpush.bf16.msra.mxu0 %v6241_v35 }
  0x60   : > { %v6224_v38 = vld [vmem:[%s8283_s28 + $0x8a0] sm:$0xf]  ;;  %v6625_v41 = vor.u32 %v7934_v34, %v6624_v33  ;;  %v7898_v44 = vld [vmem:[%s8283_s28 + $0xaac] sm:$0xf0]  ;;  %3860 = vmatpush.bf16.msra.mxu1 %v6369_v36 }
  0x61   : > { %v6352_v40 = vld [vmem:[%s8283_s28 + $0x9a0] sm:$0xf]  ;;  %v7930_v46 = vld [vmem:[%s8283_s28 + $0xbac] sm:$0xf0]  ;;  %v6225_v47 = vor.u32 %v7834_v39, %v6224_v38  ;;  %3873 = vmatpush.bf16.msra.mxu2 %v6497_v37 }
  0x62   : > { %v6480_v43 = vld [vmem:[%s8283_s28 + $0xaa0] sm:$0xf]  ;;  %v6353_v48 = vor.u32 %v7866_v42, %v6352_v40  ;;  %v7830_v51 = vld [vmem:[%s8283_s28 + $0x88c] sm:$0xf0]  ;;  %3886 = vmatpush.bf16.msra.mxu3 %v6625_v41 }
  0x63   : > { %v6608_v45 = vld [vmem:[%s8283_s28 + $0xba0] sm:$0xf]  ;;  %v6481_v49 = vor.u32 %v7898_v44, %v6480_v43  ;;  %v7862_v54 = vld [vmem:[%s8283_s28 + $0x98c] sm:$0xf0]  ;;  %3848 = vmatpush.bf16.msra.mxu0 %v6225_v47 }
  0x64   : > { %v6208_v50 = vld [vmem:[%s8283_s28 + $0x880] sm:$0xf]  ;;  %v6609_v53 = vor.u32 %v7930_v46, %v6608_v45  ;;  %v7894_v56 = vld [vmem:[%s8283_s28 + $0xa8c] sm:$0xf0]  ;;  %3861 = vmatpush.bf16.msra.mxu1 %v6353_v48 }
  0x65   : > { %v6336_v52 = vld [vmem:[%s8283_s28 + $0x980] sm:$0xf]  ;;  %v7926_v58 = vld [vmem:[%s8283_s28 + $0xb8c] sm:$0xf0]  ;;  %v6209_v59 = vor.u32 %v7830_v51, %v6208_v50  ;;  %3874 = vmatpush.bf16.msra.mxu2 %v6481_v49 }
  0x66   : > { %v6464_v55 = vld [vmem:[%s8283_s28 + $0xa80] sm:$0xf]  ;;  %v6337_v60 = vor.u32 %v7862_v54, %v6336_v52  ;;  %v7826_v0 = vld [vmem:[%s8283_s28 + $0x86c] sm:$0xf0]  ;;  %3887 = vmatpush.bf16.msra.mxu3 %v6609_v53 }
  0x67   : > { %v6592_v57 = vld [vmem:[%s8283_s28 + $0xb80] sm:$0xf]  ;;  %v6465_v62 = vor.u32 %v7894_v56, %v6464_v55  ;;  %v7858_v6 = vld [vmem:[%s8283_s28 + $0x96c] sm:$0xf0]  ;;  %3849 = vmatpush.bf16.msra.mxu0 %v6209_v59 }
  0x68   : > { %v6192_v63 = vld [vmem:[%s8283_s28 + $0x860] sm:$0xf]  ;;  %v6593_v5 = vor.u32 %v7926_v58, %v6592_v57  ;;  %v7890_v8 = vld [vmem:[%s8283_s28 + $0xa6c] sm:$0xf0]  ;;  %3862 = vmatpush.bf16.msra.mxu1 %v6337_v60 }
  0x69   : > { %v6320_v4 = vld [vmem:[%s8283_s28 + $0x960] sm:$0xf]  ;;  %v7922_v10 = vld [vmem:[%s8283_s28 + $0xb6c] sm:$0xf0]  ;;  %v6193_v11 = vor.u32 %v7826_v0, %v6192_v63  ;;  %3875 = vmatpush.bf16.msra.mxu2 %v6465_v62 }
  0x6a   : > { %v6448_v7 = vld [vmem:[%s8283_s28 + $0xa60] sm:$0xf]  ;;  %v6321_v12 = vor.u32 %v7858_v6, %v6320_v4  ;;  %v7822_v15 = vld [vmem:[%s8283_s28 + $0x84c] sm:$0xf0]  ;;  %3888 = vmatpush.bf16.msra.mxu3 %v6593_v5 }
  0x6b   : > { %v6576_v9 = vld [vmem:[%s8283_s28 + $0xb60] sm:$0xf]  ;;  %v6449_v13 = vor.u32 %v7890_v8, %v6448_v7  ;;  %v7854_v18 = vld [vmem:[%s8283_s28 + $0x94c] sm:$0xf0]  ;;  %3850 = vmatpush.bf16.msra.mxu0 %v6193_v11 }
  0x6c   : > { %v6176_v14 = vld [vmem:[%s8283_s28 + $0x840] sm:$0xf]  ;;  %v6577_v17 = vor.u32 %v7922_v10, %v6576_v9  ;;  %v7886_v20 = vld [vmem:[%s8283_s28 + $0xa4c] sm:$0xf0]  ;;  %3863 = vmatpush.bf16.msra.mxu1 %v6321_v12 }
  0x6d   : > { %v6304_v16 = vld [vmem:[%s8283_s28 + $0x940] sm:$0xf]  ;;  %v7918_v25 = vld [vmem:[%s8283_s28 + $0xb4c] sm:$0xf0]  ;;  %v6177_v26 = vor.u32 %v7822_v15, %v6176_v14  ;;  %3876 = vmatpush.bf16.msra.mxu2 %v6449_v13 }
  0x6e   : > { %v6432_v19 = vld [vmem:[%s8283_s28 + $0xa40] sm:$0xf]  ;;  %v6305_v28 = vor.u32 %v7854_v18, %v6304_v16  ;;  %v7818_v31 = vld [vmem:[%s8283_s28 + $0x82c] sm:$0xf0]  ;;  %3889 = vmatpush.bf16.msra.mxu3 %v6577_v17 }
  0x6f   : > { %v6560_v24 = vld [vmem:[%s8283_s28 + $0xb40] sm:$0xf]  ;;  %v6433_v29 = vor.u32 %v7886_v20, %v6432_v19  ;;  %v7850_v34 = vld [vmem:[%s8283_s28 + $0x92c] sm:$0xf0]  ;;  %3851 = vmatpush.bf16.msra.mxu0 %v6177_v26 }
  0x70   : > { %v6160_v30 = vld [vmem:[%s8283_s28 + $0x820] sm:$0xf]  ;;  %v6561_v33 = vor.u32 %v7918_v25, %v6560_v24  ;;  %v7882_v36 = vld [vmem:[%s8283_s28 + $0xa2c] sm:$0xf0]  ;;  %3864 = vmatpush.bf16.msra.mxu1 %v6305_v28 }
  0x71   : > { %v6288_v32 = vld [vmem:[%s8283_s28 + $0x920] sm:$0xf]  ;;  %v7914_v38 = vld [vmem:[%s8283_s28 + $0xb2c] sm:$0xf0]  ;;  %v6161_v39 = vor.u32 %v7818_v31, %v6160_v30  ;;  %3877 = vmatpush.bf16.msra.mxu2 %v6433_v29 }
  0x72   : > { %v6416_v35 = vld [vmem:[%s8283_s28 + $0xa20] sm:$0xf]  ;;  %v7814_v41 = vld [vmem:[%s8283_s28 + $0x80c] sm:$0xf0]  ;;  %v6289_v42 = vor.u32 %v7850_v34, %v6288_v32  ;;  %3890 = vmatpush.bf16.msra.mxu3 %v6561_v33 }
  0x73   : > { %v6544_v37 = vld [vmem:[%s8283_s28 + $0xb20] sm:$0xf]  ;;  %v6417_v43 = vor.u32 %v7882_v36, %v6416_v35  ;;  %v7846_v45 = vld [vmem:[%s8283_s28 + $0x90c] sm:$0xf0]  ;;  %3852 = vmatpush.bf16.msra.mxu0 %v6161_v39 }
  0x74   : > { %v6144_v40 = vld [vmem:[%s8283_s28 + $0x800] sm:$0xf]  ;;  %v6545_v47 = vor.u32 %v7914_v38, %v6544_v37  ;;  %v7878_v48 = vld [vmem:[%s8283_s28 + $0xa0c] sm:$0xf0]  ;;  %3865 = vmatpush.bf16.msra.mxu1 %v6289_v42 }
  0x75   : > { %v6272_v44 = vld [vmem:[%s8283_s28 + $0x900] sm:$0xf]  ;;  %v7910_v50 = vld [vmem:[%s8283_s28 + $0xb0c] sm:$0xf0]  ;;  %v6145_v54 = vor.u32 %v7814_v41, %v6144_v40  ;;  %3878 = vmatpush.bf16.msra.mxu2 %v6417_v43 }
  0x76   : > { %v6400_v46 = vld [vmem:[%s8283_s28 + $0xa00] sm:$0xf]  ;;  %v7970_v52 = vld [vmem:[%s8283_s28 + $0xcec] sm:$0xf0]  ;;  %v6273_v58 = vor.u32 %v7846_v45, %v6272_v44  ;;  %3891 = vmatpush.bf16.msra.mxu3 %v6545_v47 }
  0x77   : > { %v6528_v49 = vld [vmem:[%s8283_s28 + $0xb00] sm:$0xf]  ;;  %v8002_v55 = vld [vmem:[%s8283_s28 + $0xdec] sm:$0xf0]  ;;  %v6401_v59 = vor.u32 %v7878_v48, %v6400_v46  ;;  %3853 = vmatpush.bf16.msra.mxu0 %v6145_v54 }
  0x78   : > { %v6768_v51 = vld [vmem:[%s8283_s28 + $0xce0] sm:$0xf]  ;;  %v8034_v57 = vld [vmem:[%s8283_s28 + $0xeec] sm:$0xf0]  ;;  %v6529_v63 = vor.u32 %v7910_v50, %v6528_v49  ;;  %3866 = vmatpush.bf16.msra.mxu1 %v6273_v58 }
  0x79   : > { %v6896_v53 = vld [vmem:[%s8283_s28 + $0xde0] sm:$0xf]  ;;  %v8066_v62 = vld [vmem:[%s8283_s28 + $0xfec] sm:$0xf0]  ;;  %v6769_v0 = vor.u32 %v7970_v52, %v6768_v51  ;;  %3879 = vmatpush.bf16.msra.mxu2 %v6401_v59 }
  0x7a   : > { %v7024_v56 = vld [vmem:[%s8283_s28 + $0xee0] sm:$0xf]  ;;  %v6897_v4 = vor.u32 %v8002_v55, %v6896_v53  ;;  %v7966_v7 = vld [vmem:[%s8283_s28 + $0xccc] sm:$0xf0]  ;;  %3892 = vmatpush.bf16.msra.mxu3 %v6529_v63 }
  0x7b   : > { %v7152_v60 = vld [vmem:[%s8283_s28 + $0xfe0] sm:$0xf]  ;;  %v7025_v5 = vor.u32 %v8034_v57, %v7024_v56  ;;  %v7998_v10 = vld [vmem:[%s8283_s28 + $0xdcc] sm:$0xf0]  ;;  %3898 = vmatpush.bf16.msrb.mxu0 %v6769_v0 }
  0x7c   : > { %v6752_v6 = vld [vmem:[%s8283_s28 + $0xcc0] sm:$0xf]  ;;  %v7153_v9 = vor.u32 %v8066_v62, %v7152_v60  ;;  %v8030_v12 = vld [vmem:[%s8283_s28 + $0xecc] sm:$0xf0]  ;;  %3911 = vmatpush.bf16.msrb.mxu1 %v6897_v4 }
  0x7d   : > { %v6880_v8 = vld [vmem:[%s8283_s28 + $0xdc0] sm:$0xf]  ;;  %v8062_v15 = vld [vmem:[%s8283_s28 + $0xfcc] sm:$0xf0]  ;;  %v6753_v19 = vor.u32 %v7966_v7, %v6752_v6  ;;  %3924 = vmatpush.bf16.msrb.mxu2 %v7025_v5 }
  0x7e   : > { %v7008_v11 = vld [vmem:[%s8283_s28 + $0xec0] sm:$0xf]  ;;  %v8522_v16 = vld [vmem:[#allocation1 + $0x12] sm:$0xff]  ;;  %v8524_v17 = vld [vmem:[#allocation1 + $0x9] sm:$0xff]  ;;  %v6881_v20 = vor.u32 %v7998_v10, %v6880_v8  ;;  %3937 = vmatpush.bf16.msrb.mxu3 %v7153_v9 }
  0x7f   : > { %v8518_v13 = vld [vmem:[#allocation1] sm:$0xff]  ;;  %v7009_v24 = vor.u32 %v8030_v12, %v7008_v11  ;;  %v7962_v26 = vld [vmem:[%s8283_s28 + $0xcac] sm:$0xf0]  ;;  %3880 = vmatmul.bf16.vlgmr.msra.gmra.mxu2 %v8522_v16  ;;  %3867 = vmatmul.bf16.vlgmr.msra.gmra.mxu1 %v8524_v17 }
  0x80   : > { %v7136_v14 = vld [vmem:[%s8283_s28 + $0xfc0] sm:$0xf]  ;;  %3854 = vmatmul.bf16.vlgmr.msra.gmra.mxu0 %v8518_v13  ;;  %v7994_v30 = vld [vmem:[%s8283_s28 + $0xdac] sm:$0xf0]  ;;  %3912 = vmatpush.bf16.msrb.mxu1 %v6881_v20 }
  0x81   : > { %v8526_v18 = vld [vmem:[#allocation1 + $0x1b] sm:$0xff]  ;;  %v7137_v29 = vor.u32 %v8062_v15, %v7136_v14  ;;  %v8026_v32 = vld [vmem:[%s8283_s28 + $0xeac] sm:$0xf0]  ;;  %3899 = vmatpush.bf16.msrb.mxu0 %v6753_v19  ;;  %3925 = vmatpush.bf16.msrb.mxu2 %v7009_v24 }
  0x82   : > { %v6736_v25 = vld [vmem:[%s8283_s28 + $0xca0] sm:$0xf]  ;;  %v8058_v34 = vld [vmem:[%s8283_s28 + $0xfac] sm:$0xf0]  ;;  %3893 = vmatmul.bf16.vlgmr.msra.gmra.mxu3 %v8526_v18 }
  0x83   : > { %v6864_v28 = vld [vmem:[%s8283_s28 + $0xda0] sm:$0xf]  ;;  %v6737_v35 = vor.u32 %v7962_v26, %v6736_v25  ;;  %v7958_v39 = vld [vmem:[%s8283_s28 + $0xc8c] sm:$0xf0]  ;;  %3938 = vmatpush.bf16.msrb.mxu3 %v7137_v29 }
  0x84   : > { %v6992_v31 = vld [vmem:[%s8283_s28 + $0xea0] sm:$0xf]  ;;  %v6865_v36 = vor.u32 %v7994_v30, %v6864_v28  ;;  %v7990_v42 = vld [vmem:[%s8283_s28 + $0xd8c] sm:$0xf0] }
  0x85   : > { %v7120_v33 = vld [vmem:[%s8283_s28 + $0xfa0] sm:$0xf]  ;;  %v6993_v37 = vor.u32 %v8026_v32, %v6992_v31  ;;  %v8022_v44 = vld [vmem:[%s8283_s28 + $0xe8c] sm:$0xf0]  ;;  %3900 = vmatpush.bf16.msrb.mxu0 %v6737_v35 }
  0x86   : > { %v6720_v38 = vld [vmem:[%s8283_s28 + $0xc80] sm:$0xf]  ;;  %v7121_v41 = vor.u32 %v8058_v34, %v7120_v33  ;;  %v8054_v46 = vld [vmem:[%s8283_s28 + $0xf8c] sm:$0xf0]  ;;  %3913 = vmatpush.bf16.msrb.mxu1 %v6865_v36 }
  0x87   : > { %v6848_v40 = vld [vmem:[%s8283_s28 + $0xd80] sm:$0xf]  ;;  %v6721_v47 = vor.u32 %v7958_v39, %v6720_v38  ;;  %3926 = vmatpush.bf16.msrb.mxu2 %v6993_v37  ;;  %v7954_v51 = vld [vmem:[%s8283_s28 + $0xc6c] sm:$0xf0] }
  0x88   : > { %v6976_v43 = vld [vmem:[%s8283_s28 + $0xe80] sm:$0xf]  ;;  %v6849_v48 = vor.u32 %v7990_v42, %v6848_v40  ;;  %3939 = vmatpush.bf16.msrb.mxu3 %v7121_v41  ;;  %v7986_v54 = vld [vmem:[%s8283_s28 + $0xd6c] sm:$0xf0] }
  0x89   : > { %v7104_v45 = vld [vmem:[%s8283_s28 + $0xf80] sm:$0xf]  ;;  %v6977_v49 = vor.u32 %v8022_v44, %v6976_v43  ;;  %v8018_v56 = vld [vmem:[%s8283_s28 + $0xe6c] sm:$0xf0]  ;;  %3901 = vmatpush.bf16.msrb.mxu0 %v6721_v47  ;;  %v8584_v47 = vld [vmem:[#allocation1 + $0x24] sm:$0xff] }
  0x8a   : > { %v6704_v50 = vld [vmem:[%s8283_s28 + $0xc60] sm:$0xf]  ;;  %v7105_v53 = vor.u32 %v8054_v46, %v7104_v45  ;;  %v8050_v58 = vld [vmem:[%s8283_s28 + $0xf6c] sm:$0xf0]  ;;  %3914 = vmatpush.bf16.msrb.mxu1 %v6849_v48  ;;  %v8586_v48 = vld [vmem:[#allocation1 + $0x36] sm:$0xff] }
  0x8b   : > { %v6832_v52 = vld [vmem:[%s8283_s28 + $0xd60] sm:$0xf]  ;;  %v6705_v59 = vor.u32 %v7954_v51, %v6704_v50  ;;  %3927 = vmatpush.bf16.msrb.mxu2 %v6977_v49  ;;  %v7950_v0 = vld [vmem:[%s8283_s28 + $0xc4c] sm:$0xf0] }
  0x8c   : > { %v6960_v55 = vld [vmem:[%s8283_s28 + $0xe60] sm:$0xf]  ;;  %v6833_v60 = vor.u32 %v7986_v54, %v6832_v52  ;;  %3940 = vmatpush.bf16.msrb.mxu3 %v7105_v53  ;;  %v7982_v6 = vld [vmem:[%s8283_s28 + $0xd4c] sm:$0xf0]  ;;  %v7584_v53 = vld [vmem:[%s8283_s28 + $0xe4] sm:$0xf] }
  0x8d   : > { %v7088_v57 = vld [vmem:[%s8283_s28 + $0xf60] sm:$0xf]  ;;  %v6961_v62 = vor.u32 %v8018_v56, %v6960_v55  ;;  %v8014_v8 = vld [vmem:[%s8283_s28 + $0xe4c] sm:$0xf0]  ;;  %3902 = vmatpush.bf16.msrb.mxu0 %v6705_v59  ;;  %v5234_v54 = vld [vmem:[%s8283_s28 + $0xf0] sm:$0xf0] }
  0x8e   : > { %v6688_v63 = vld [vmem:[%s8283_s28 + $0xc40] sm:$0xf]  ;;  %v7089_v5 = vor.u32 %v8050_v58, %v7088_v57  ;;  %v8046_v10 = vld [vmem:[%s8283_s28 + $0xf4c] sm:$0xf0]  ;;  %3915 = vmatpush.bf16.msrb.mxu1 %v6833_v60  ;;  %v7616_v57 = vld [vmem:[%s8283_s28 + $0x1e4] sm:$0xf] }
  0x8f   : > { %v6816_v4 = vld [vmem:[%s8283_s28 + $0xd40] sm:$0xf]  ;;  %v6689_v11 = vor.u32 %v7950_v0, %v6688_v63  ;;  %3928 = vmatpush.bf16.msrb.mxu2 %v6961_v62  ;;  %v7946_v19 = vld [vmem:[%s8283_s28 + $0xc2c] sm:$0xf0]  ;;  %v5362_v58 = vld [vmem:[%s8283_s28 + $0x1f0] sm:$0xf0]  ;;  %v5237_v63 = vor.u32 %v7584_v53, %v5234_v54 }
  0x90   : > { %v6944_v7 = vld [vmem:[%s8283_s28 + $0xe40] sm:$0xf]  ;;  %v6817_v14 = vor.u32 %v7982_v6, %v6816_v4  ;;  %v7978_v24 = vld [vmem:[%s8283_s28 + $0xd2c] sm:$0xf0]  ;;  %3941 = vmatpush.bf16.msrb.mxu3 %v7089_v5  ;;  %v5365_v6 = vor.u32 %v7616_v57, %v5362_v58  ;;  %v5170_v57 = vld [vmem:[%s8283_s28 + $0x70] sm:$0xf0] }
  0x91   : > { %v7072_v9 = vld [vmem:[%s8283_s28 + $0xf40] sm:$0xf]  ;;  %v6945_v15 = vor.u32 %v8014_v8, %v6944_v7  ;;  %v8010_v28 = vld [vmem:[%s8283_s28 + $0xe2c] sm:$0xf0]  ;;  %3903 = vmatpush.bf16.msrb.mxu0 %v6689_v11  ;;  %v7580_v8 = vld [vmem:[%s8283_s28 + $0xc4] sm:$0xf] }
  0x92   : > { %v6672_v12 = vld [vmem:[%s8283_s28 + $0xc20] sm:$0xf]  ;;  %v7073_v25 = vor.u32 %v8046_v10, %v7072_v9  ;;  %v8042_v30 = vld [vmem:[%s8283_s28 + $0xf2c] sm:$0xf0]  ;;  %3916 = vmatpush.bf16.msrb.mxu1 %v6817_v14  ;;  %v5218_v9 = vld [vmem:[%s8283_s28 + $0xd0] sm:$0xf0] }
  0x93   : > { %v6800_v20 = vld [vmem:[%s8283_s28 + $0xd20] sm:$0xf]  ;;  %v7942_v32 = vld [vmem:[%s8283_s28 + $0xc0c] sm:$0xf0]  ;;  %v6673_v33 = vor.u32 %v7946_v19, %v6672_v12  ;;  %3929 = vmatpush.bf16.msrb.mxu2 %v6945_v15  ;;  %v7612_v10 = vld [vmem:[%s8283_s28 + $0x1c4] sm:$0xf]  ;;  %v5221_v15 = vor.u32 %v7580_v8, %v5218_v9 }
  0x94   : > { %v6928_v26 = vld [vmem:[%s8283_s28 + $0xe20] sm:$0xf]  ;;  %v7974_v35 = vld [vmem:[%s8283_s28 + $0xd0c] sm:$0xf0]  ;;  %v6801_v38 = vor.u32 %v7978_v24, %v6800_v20  ;;  %3942 = vmatpush.bf16.msrb.mxu3 %v7073_v25  ;;  %v5346_v11 = vld [vmem:[%s8283_s28 + $0x1d0] sm:$0xf0] }
  0x95   : > { %v7056_v29 = vld [vmem:[%s8283_s28 + $0xf20] sm:$0xf]  ;;  %v8006_v37 = vld [vmem:[%s8283_s28 + $0xe0c] sm:$0xf0]  ;;  %v6929_v39 = vor.u32 %v8010_v28, %v6928_v26  ;;  %3904 = vmatpush.bf16.msrb.mxu0 %v6673_v33  ;;  %v5349_v25 = vor.u32 %v7612_v10, %v5346_v11  ;;  %v7576_v28 = vld [vmem:[%s8283_s28 + $0xa4] sm:$0xf] }
  0x96   : > { %v6656_v31 = vld [vmem:[%s8283_s28 + $0xc00] sm:$0xf]  ;;  %v8038_v41 = vld [vmem:[%s8283_s28 + $0xf0c] sm:$0xf0]  ;;  %v7057_v44 = vor.u32 %v8042_v30, %v7056_v29  ;;  %3917 = vmatpush.bf16.msrb.mxu1 %v6801_v38  ;;  %v5202_v29 = vld [vmem:[%s8283_s28 + $0xb0] sm:$0xf0] }
  0x97   : > { %v6784_v34 = vld [vmem:[%s8283_s28 + $0xd00] sm:$0xf]  ;;  %v8098_v43 = vld [vmem:[%s8283_s28 + $0x10ec] sm:$0xf0]  ;;  %v6657_v52 = vor.u32 %v7942_v32, %v6656_v31  ;;  %3930 = vmatpush.bf16.msrb.mxu2 %v6929_v39  ;;  %v7608_v30 = vld [vmem:[%s8283_s28 + $0x1a4] sm:$0xf] }
  0x98   : > { %v6912_v36 = vld [vmem:[%s8283_s28 + $0xe00] sm:$0xf]  ;;  %v8130_v46 = vld [vmem:[%s8283_s28 + $0x11ec] sm:$0xf0]  ;;  %v6785_v55 = vor.u32 %v7974_v35, %v6784_v34  ;;  %3943 = vmatpush.bf16.msrb.mxu3 %v7057_v44  ;;  %v5330_v31 = vld [vmem:[%s8283_s28 + $0x1b0] sm:$0xf0]  ;;  %v5205_v34 = vor.u32 %v7576_v28, %v5202_v29 }
  0x99   : > { %v7040_v40 = vld [vmem:[%s8283_s28 + $0xf00] sm:$0xf]  ;;  %v8588_v49 = vld [vmem:[#allocation1 + $0x2d] sm:$0xff]  ;;  %v6913_v56 = vor.u32 %v8006_v37, %v6912_v36  ;;  %3905 = vmatpush.bf16.msrb.mxu0 %v6657_v52  ;;  %v5333_v38 = vor.u32 %v7608_v30, %v5330_v31  ;;  %v7600_v58 = vld [vmem:[%s8283_s28 + $0x164] sm:$0xf] }
  0x9a   : > { %v7280_v42 = vld [vmem:[%s8283_s28 + $0x10e0] sm:$0xf]  ;;  %v243_v51 = vld [vmem:[%s8278_s24 + $0x10] sm:$0x3]  ;;  %v7041_v59 = vor.u32 %v8038_v41, %v7040_v40  ;;  %3918 = vmatpush.bf16.msrb.mxu1 %v6785_v55  ;;  %v7572_v40 = vld [vmem:[%s8283_s28 + $0x84] sm:$0xf] }
  0x9b   : > { %v7408_v45 = vld [vmem:[%s8283_s28 + $0x11e0] sm:$0xf]  ;;  %v7281_v60 = vor.u32 %v8098_v43, %v7280_v42  ;;  %v8094_v4 = vld [vmem:[%s8283_s28 + $0x10cc] sm:$0xf0]  ;;  %3931 = vmatpush.bf16.msrb.mxu2 %v6913_v56  ;;  %v5186_v41 = vld [vmem:[%s8283_s28 + $0x90] sm:$0xf0] }
  0x9c   : > { %v8590_v50 = vld [vmem:[#allocation1 + $0x3f] sm:$0xff]  ;;  %v7409_v62 = vor.u32 %v8130_v46, %v7408_v45  ;;  %v8126_v7 = vld [vmem:[%s8283_s28 + $0x11cc] sm:$0xf0]  ;;  %3944 = vmatpush.bf16.msrb.mxu3 %v7041_v59  ;;  %3906 = vmatmul.bf16.vlgmr.msrb.gmra.mxu0 %v8584_v47  ;;  %v5314_v43 = vld [vmem:[%s8283_s28 + $0x190] sm:$0xf0]  ;;  %v5189_v46 = vor.u32 %v7572_v40, %v5186_v41 }
  0x9d   : > { %841 = vst [vmem:[#allocation1] ss:$9 sm:$0xff] %v243_v51  ;;  %v7264_v0 = vld [vmem:[%s8283_s28 + $0x10c0] sm:$0xf]  ;;  %3950 = vmatpush.bf16.msra.mxu0 %v7281_v60  ;;  %v8090_v20 = vld [vmem:[%s8283_s28 + $0x10ac] sm:$0xf0]  ;;  %3919 = vmatmul.bf16.vlgmr.msrb.gmra.mxu1 %v8588_v49 }
  0x9e   : > { %v7392_v5 = vld [vmem:[%s8283_s28 + $0x11c0] sm:$0xf]  ;;  %v7265_v12 = vor.u32 %v8094_v4, %v7264_v0  ;;  %3963 = vmatpush.bf16.msra.mxu1 %v7409_v62  ;;  %v8122_v26 = vld [vmem:[%s8283_s28 + $0x11ac] sm:$0xf0]  ;;  %3932 = vmatmul.bf16.vlgmr.msrb.gmra.mxu2 %v8586_v48  ;;  %v7604_v42 = vld [vmem:[%s8283_s28 + $0x184] sm:$0xf] }
  0x9f   : > { %3976 = vmatpush.bf16.msra.mxu2 %v5237_v63  ;;  %v7393_v14 = vor.u32 %v8126_v7, %v7392_v5  ;;  %v7248_v19 = vld [vmem:[%s8283_s28 + $0x10a0] sm:$0xf]  ;;  %3945 = vmatmul.bf16.vlgmr.msrb.gmra.mxu3 %v8590_v50  ;;  %v8086_v36 = vld [vmem:[%s8283_s28 + $0x108c] sm:$0xf0]  ;;  %v5317_v54 = vor.u32 %v7604_v42, %v5314_v43  ;;  %v7568_v56 = vld [vmem:[%s8283_s28 + $0x64] sm:$0xf] }
  0xa0   : > { %v7376_v24 = vld [vmem:[%s8283_s28 + $0x11a0] sm:$0xf]  ;;  %3989 = vmatpush.bf16.msra.mxu3 %v5365_v6  ;;  %v7249_v32 = vor.u32 %v8090_v20, %v7248_v19  ;;  %v8118_v39 = vld [vmem:[%s8283_s28 + $0x118c] sm:$0xf0]  ;;  %v5298_v59 = vld [vmem:[%s8283_s28 + $0x170] sm:$0xf0]  ;;  %v5173_v63 = vor.u32 %v7568_v56, %v5170_v57 }
  0xa1   : > { %3951 = vmatpush.bf16.msra.mxu0 %v7265_v12  ;;  %v7377_v33 = vor.u32 %v8122_v26, %v7376_v24  ;;  %v7232_v35 = vld [vmem:[%s8283_s28 + $0x1080] sm:$0xf]  ;;  %v8082_v52 = vld [vmem:[%s8283_s28 + $0x106c] sm:$0xf0]  ;;  %v5301_v6 = vor.u32 %v7600_v58, %v5298_v59  ;;  %v7564_v8 = vld [vmem:[%s8283_s28 + $0x44] sm:$0xf] }
  0xa2   : > { %3964 = vmatpush.bf16.msra.mxu1 %v7393_v14  ;;  %v7360_v37 = vld [vmem:[%s8283_s28 + $0x1180] sm:$0xf]  ;;  %v7233_v44 = vor.u32 %v8086_v36, %v7232_v35  ;;  %v8114_v55 = vld [vmem:[%s8283_s28 + $0x116c] sm:$0xf0]  ;;  %v5154_v9 = vld [vmem:[%s8283_s28 + $0x50] sm:$0xf0] }
  0xa3   : > { %3977 = vmatpush.bf16.msra.mxu2 %v5221_v15  ;;  %v7361_v45 = vor.u32 %v8118_v39, %v7360_v37  ;;  %v7216_v51 = vld [vmem:[%s8283_s28 + $0x1060] sm:$0xf]  ;;  %v8078_v4 = vld [vmem:[%s8283_s28 + $0x104c] sm:$0xf0]  ;;  %v7596_v10 = vld [vmem:[%s8283_s28 + $0x144] sm:$0xf]  ;;  %v5157_v15 = vor.u32 %v7564_v8, %v5154_v9 }
  0xa4   : > { %3990 = vmatpush.bf16.msra.mxu3 %v5349_v25  ;;  %v7344_v53 = vld [vmem:[%s8283_s28 + $0x1160] sm:$0xf]  ;;  %v7217_v60 = vor.u32 %v8082_v52, %v7216_v51  ;;  %v8110_v7 = vld [vmem:[%s8283_s28 + $0x114c] sm:$0xf0]  ;;  %v5282_v11 = vld [vmem:[%s8283_s28 + $0x150] sm:$0xf0] }
  0xa5   : > { %3952 = vmatpush.bf16.msra.mxu0 %v7249_v32  ;;  %v7345_v62 = vor.u32 %v8114_v55, %v7344_v53  ;;  %v7200_v0 = vld [vmem:[%s8283_s28 + $0x1040] sm:$0xf]  ;;  %v8074_v20 = vld [vmem:[%s8283_s28 + $0x102c] sm:$0xf0]  ;;  %v5285_v25 = vor.u32 %v7596_v10, %v5282_v11  ;;  %v7560_v28 = vld [vmem:[%s8283_s28 + $0x24] sm:$0xf] }
  0xa6   : > { %3965 = vmatpush.bf16.msra.mxu1 %v7377_v33  ;;  %v7328_v5 = vld [vmem:[%s8283_s28 + $0x1140] sm:$0xf]  ;;  %v7201_v12 = vor.u32 %v8078_v4, %v7200_v0  ;;  %v8106_v26 = vld [vmem:[%s8283_s28 + $0x112c] sm:$0xf0]  ;;  %v5138_v29 = vld [vmem:[%s8283_s28 + $0x30] sm:$0xf0] }
  0xa7   : > { %3978 = vmatpush.bf16.msra.mxu2 %v5205_v34  ;;  %v7329_v14 = vor.u32 %v8110_v7, %v7328_v5  ;;  %v7184_v19 = vld [vmem:[%s8283_s28 + $0x1020] sm:$0xf]  ;;  %v7592_v30 = vld [vmem:[%s8283_s28 + $0x124] sm:$0xf]  ;;  %v5266_v31 = vld [vmem:[%s8283_s28 + $0x130] sm:$0xf0]  ;;  %v5141_v36 = vor.u32 %v7560_v28, %v5138_v29 }
  0xa8   : > { %3991 = vmatpush.bf16.msra.mxu3 %v5333_v38  ;;  %v7312_v24 = vld [vmem:[%s8283_s28 + $0x1120] sm:$0xf]  ;;  %v7185_v32 = vor.u32 %v8074_v20, %v7184_v19  ;;  %v8070_v34 = vld [vmem:[%s8283_s28 + $0x100c] sm:$0xf0]  ;;  %v7556_v39 = vld [vmem:[%s8283_s28 + $0x4] sm:$0xf]  ;;  %v5269_v40 = vor.u32 %v7592_v30, %v5266_v31 }
  0xa9   : > { %3953 = vmatpush.bf16.msra.mxu0 %v7233_v44  ;;  %v7168_v33 = vld [vmem:[%s8283_s28 + $0x1000] sm:$0xf]  ;;  %v7313_v35 = vor.u32 %v8106_v26, %v7312_v24  ;;  %v8102_v38 = vld [vmem:[%s8283_s28 + $0x110c] sm:$0xf0]  ;;  %v5122_v41 = vld [vmem:[%s8283_s28 + $0x10] sm:$0xf0] }
  0xaa   : > { %3966 = vmatpush.bf16.msra.mxu1 %v7361_v45  ;;  %v7296_v37 = vld [vmem:[%s8283_s28 + $0x1100] sm:$0xf]  ;;  %v7588_v42 = vld [vmem:[%s8283_s28 + $0x104] sm:$0xf]  ;;  %v5250_v43 = vld [vmem:[%s8283_s28 + $0x110] sm:$0xf0]  ;;  %v7169_v51 = vor.u32 %v8070_v34, %v7168_v33  ;;  %v5125_v56 = vor.u32 %v7556_v39, %v5122_v41 }
  0xab   : > { %3979 = vmatpush.bf16.msra.mxu2 %v5189_v46  ;;  %v7648_v44 = vld [vmem:[%s8283_s28 + $0x2e4] sm:$0xf]  ;;  %v5490_v45 = vld [vmem:[%s8283_s28 + $0x2f0] sm:$0xf0]  ;;  %v7297_v55 = vor.u32 %v8102_v38, %v7296_v37  ;;  %v5253_v59 = vor.u32 %v7588_v42, %v5250_v43 }
  0xac   : > { %3992 = vmatpush.bf16.msra.mxu3 %v5317_v54  ;;  %v7680_v46 = vld [vmem:[%s8283_s28 + $0x3e4] sm:$0xf]  ;;  %v5618_v52 = vld [vmem:[%s8283_s28 + $0x3f0] sm:$0xf0] }
  0xad   : > { %3954 = vmatpush.bf16.msra.mxu0 %v7217_v60  ;;  %v7712_v53 = vld [vmem:[%s8283_s28 + $0x4e4] sm:$0xf]  ;;  %v5746_v54 = vld [vmem:[%s8283_s28 + $0x4f0] sm:$0xf0]  ;;  %v5493_v60 = vor.u32 %v7648_v44, %v5490_v45 }
  0xae   : > { %3967 = vmatpush.bf16.msra.mxu1 %v7345_v62  ;;  %v7744_v57 = vld [vmem:[%s8283_s28 + $0x5e4] sm:$0xf]  ;;  %v5874_v58 = vld [vmem:[%s8283_s28 + $0x5f0] sm:$0xf0]  ;;  %v5621_v62 = vor.u32 %v7680_v46, %v5618_v52 }
  0xaf   : > { %3980 = vmatpush.bf16.msra.mxu2 %v5173_v63  ;;  %v5749_v63 = vor.u32 %v7712_v53, %v5746_v54  ;;  %v7644_v0 = vld [vmem:[%s8283_s28 + $0x2c4] sm:$0xf]  ;;  %v5474_v4 = vld [vmem:[%s8283_s28 + $0x2d0] sm:$0xf0] }
  0xb0   : > { %3993 = vmatpush.bf16.msra.mxu3 %v5301_v6  ;;  %v7676_v5 = vld [vmem:[%s8283_s28 + $0x3c4] sm:$0xf]  ;;  %v5877_v6 = vor.u32 %v7744_v57, %v5874_v58  ;;  %v5602_v7 = vld [vmem:[%s8283_s28 + $0x3d0] sm:$0xf0] }
  0xb1   : > { %3955 = vmatpush.bf16.msra.mxu0 %v7201_v12  ;;  %v7708_v8 = vld [vmem:[%s8283_s28 + $0x4c4] sm:$0xf]  ;;  %v5730_v9 = vld [vmem:[%s8283_s28 + $0x4d0] sm:$0xf0]  ;;  %v5605_v19 = vor.u32 %v7676_v5, %v5602_v7 }
  0xb2   : > { %3968 = vmatpush.bf16.msra.mxu1 %v7329_v14  ;;  %v842_v10 = vld [vmem:[#allocation1] sm:$0xff]  ;;  %v5858_v12 = vld [vmem:[%s8283_s28 + $0x5d0] sm:$0xf0]  ;;  %v843_v14 = vld [vmem:[#allocation1 + $0x9] sm:$0xff]  ;;  %v5733_v20 = vor.u32 %v7708_v8, %v5730_v9 }
  0xb3   : > { %3981 = vmatpush.bf16.msra.mxu2 %v5157_v15  ;;  %v7740_v11 = vld [vmem:[%s8283_s28 + $0x5c4] sm:$0xf]  ;;  %v5477_v15 = vor.u32 %v7644_v0, %v5474_v4  ;;  %v5586_v29 = vld [vmem:[%s8283_s28 + $0x3b0] sm:$0xf0] }
  0xb4   : > { %3994 = vmatpush.bf16.msra.mxu3 %v5285_v25  ;;  %v7640_v24 = vld [vmem:[%s8283_s28 + $0x2a4] sm:$0xf]  ;;  %v5458_v25 = vld [vmem:[%s8283_s28 + $0x2b0] sm:$0xf0]  ;;  %v5861_v28 = vor.u32 %v7740_v11, %v5858_v12 }
  0xb5   : > { %3956 = vmatpush.bf16.msra.mxu0 %v7185_v32  ;;  %v7672_v26 = vld [vmem:[%s8283_s28 + $0x3a4] sm:$0xf]  ;;  %v5714_v31 = vld [vmem:[%s8283_s28 + $0x4b0] sm:$0xf0]  ;;  %v5461_v34 = vor.u32 %v7640_v24, %v5458_v25 }
  0xb6   : > { %3969 = vmatpush.bf16.msra.mxu1 %v7313_v35  ;;  %v7704_v30 = vld [vmem:[%s8283_s28 + $0x4a4] sm:$0xf]  ;;  %v5842_v33 = vld [vmem:[%s8283_s28 + $0x5b0] sm:$0xf0]  ;;  %v5589_v35 = vor.u32 %v7672_v26, %v5586_v29 }
  0xb7   : > { %3982 = vmatpush.bf16.msra.mxu2 %v5141_v36  ;;  %v7736_v32 = vld [vmem:[%s8283_s28 + $0x5a4] sm:$0xf]  ;;  %v5717_v36 = vor.u32 %v7704_v30, %v5714_v31  ;;  %v5442_v38 = vld [vmem:[%s8283_s28 + $0x290] sm:$0xf0] }
  0xb8   : > { %3995 = vmatpush.bf16.msra.mxu3 %v5269_v40  ;;  %v7636_v37 = vld [vmem:[%s8283_s28 + $0x284] sm:$0xf]  ;;  %v5845_v40 = vor.u32 %v7736_v32, %v5842_v33  ;;  %v5570_v41 = vld [vmem:[%s8283_s28 + $0x390] sm:$0xf0] }
  0xb9   : > { %3957 = vmatpush.bf16.msra.mxu0 %v7169_v51  ;;  %v7668_v39 = vld [vmem:[%s8283_s28 + $0x384] sm:$0xf]  ;;  %v5698_v43 = vld [vmem:[%s8283_s28 + $0x490] sm:$0xf0]  ;;  %v5445_v46 = vor.u32 %v7636_v37, %v5442_v38 }
  0xba   : > { %3970 = vmatpush.bf16.msra.mxu1 %v7297_v55  ;;  %v7700_v42 = vld [vmem:[%s8283_s28 + $0x484] sm:$0xf]  ;;  %v5826_v45 = vld [vmem:[%s8283_s28 + $0x590] sm:$0xf0]  ;;  %v5573_v51 = vor.u32 %v7668_v39, %v5570_v41 }
  0xbb   : > { %3983 = vmatpush.bf16.msra.mxu2 %v5125_v56  ;;  %v7732_v44 = vld [vmem:[%s8283_s28 + $0x584] sm:$0xf]  ;;  %v5701_v52 = vor.u32 %v7700_v42, %v5698_v43  ;;  %v5426_v54 = vld [vmem:[%s8283_s28 + $0x270] sm:$0xf0] }
  0xbc   : > { %3996 = vmatpush.bf16.msra.mxu3 %v5253_v59  ;;  %3958 = vmatmul.bf16.vlgmr.msra.gmra.mxu0 %v842_v10  ;;  %v7632_v53 = vld [vmem:[%s8283_s28 + $0x264] sm:$0xf]  ;;  %v5829_v56 = vor.u32 %v7732_v44, %v5826_v45  ;;  %v5554_v57 = vld [vmem:[%s8283_s28 + $0x370] sm:$0xf0] }
  0xbd   : > { %4002 = vmatpush.bf16.msrb.mxu0 %v5493_v60  ;;  %3971 = vmatmul.bf16.vlgmr.msra.gmra.mxu1 %v843_v14  ;;  %v7664_v55 = vld [vmem:[%s8283_s28 + $0x364] sm:$0xf]  ;;  %v5682_v59 = vld [vmem:[%s8283_s28 + $0x470] sm:$0xf0] }
  0xbe   : > { %4015 = vmatpush.bf16.msrb.mxu1 %v5621_v62  ;;  %3984 = vmatmul.bf16.vlgmr.msra.gmra.mxu2 %v8389_v22  ;;  %v7696_v58 = vld [vmem:[%s8283_s28 + $0x464] sm:$0xf]  ;;  %v5810_v62 = vld [vmem:[%s8283_s28 + $0x570] sm:$0xf0]  ;;  %v5557_v0 = vor.u32 %v7664_v55, %v5554_v57 }
  0xbf   : > { %4028 = vmatpush.bf16.msrb.mxu2 %v5749_v63  ;;  %3997 = vmatmul.bf16.vlgmr.msra.gmra.mxu3 %v8396_v27  ;;  %v7728_v60 = vld [vmem:[%s8283_s28 + $0x564] sm:$0xf]  ;;  %v5429_v63 = vor.u32 %v7632_v53, %v5426_v54  ;;  %v5685_v4 = vor.u32 %v7696_v58, %v5682_v59  ;;  %v5538_v9 = vld [vmem:[%s8283_s28 + $0x350] sm:$0xf0] }
  0xc0   : > { %4041 = vmatpush.bf16.msrb.mxu3 %v5877_v6  ;;  %v7628_v5 = vld [vmem:[%s8283_s28 + $0x244] sm:$0xf]  ;;  %v5410_v6 = vld [vmem:[%s8283_s28 + $0x250] sm:$0xf0]  ;;  %v5813_v8 = vor.u32 %v7728_v60, %v5810_v62 }
  0xc1   : > { %4003 = vmatpush.bf16.msrb.mxu0 %v5477_v15  ;;  %v7660_v7 = vld [vmem:[%s8283_s28 + $0x344] sm:$0xf]  ;;  %v5666_v11 = vld [vmem:[%s8283_s28 + $0x450] sm:$0xf0]  ;;  %v5413_v15 = vor.u32 %v7628_v5, %v5410_v6 }
  0xc2   : > { %4016 = vmatpush.bf16.msrb.mxu1 %v5605_v19  ;;  %v7692_v10 = vld [vmem:[%s8283_s28 + $0x444] sm:$0xf]  ;;  %v5794_v14 = vld [vmem:[%s8283_s28 + $0x550] sm:$0xf0] }
  0xc3   : > { %4029 = vmatpush.bf16.msrb.mxu2 %v5733_v20  ;;  %v7724_v12 = vld [vmem:[%s8283_s28 + $0x544] sm:$0xf]  ;;  %v5541_v20 = vor.u32 %v7660_v7, %v5538_v9  ;;  %v5669_v24 = vor.u32 %v7692_v10, %v5666_v11  ;;  %v5394_v26 = vld [vmem:[%s8283_s28 + $0x230] sm:$0xf0] }
  0xc4   : > { %4042 = vmatpush.bf16.msrb.mxu3 %v5861_v28  ;;  %v7624_v25 = vld [vmem:[%s8283_s28 + $0x224] sm:$0xf]  ;;  %v3764_v29 = vpop.f32.mrf.mxu1  ;;  %v5797_v30 = vor.u32 %v7724_v12, %v5794_v14  ;;  %v5522_v31 = vld [vmem:[%s8283_s28 + $0x330] sm:$0xf0] }
  0xc5   : > { %4004 = vmatpush.bf16.msrb.mxu0 %v5461_v34  ;;  %v3751_v19 = vpop.f32.mrf.mxu0  ;;  %v7656_v28 = vld [vmem:[%s8283_s28 + $0x324] sm:$0xf]  ;;  %v5650_v33 = vld [vmem:[%s8283_s28 + $0x430] sm:$0xf0]  ;;  %v5397_v37 = vor.u32 %v7624_v25, %v5394_v26 }
  0xc6   : > { %4017 = vmatpush.bf16.msrb.mxu1 %v5589_v35  ;;  %v7688_v32 = vld [vmem:[%s8283_s28 + $0x424] sm:$0xf]  ;;  %v3765_v34 = vadd.f32 %v3764_v29, %v3751_v19  ;;  %v5378_v39 = vld [vmem:[%s8283_s28 + $0x210] sm:$0xf0] }
  0xc7   : > { %4030 = vmatpush.bf16.msrb.mxu2 %v5717_v36  ;;  %v7720_v35 = vld [vmem:[%s8283_s28 + $0x524] sm:$0xf]  ;;  %v5778_v36 = vld [vmem:[%s8283_s28 + $0x530] sm:$0xf0]  ;;  %v5653_v41 = vor.u32 %v7688_v32, %v5650_v33 }
  0xc8   : > { %4043 = vmatpush.bf16.msrb.mxu3 %v5845_v40  ;;  %v7620_v38 = vld [vmem:[%s8283_s28 + $0x204] sm:$0xf]  ;;  %v5525_v40 = vor.u32 %v7656_v28, %v5522_v31  ;;  %v5506_v43 = vld [vmem:[%s8283_s28 + $0x310] sm:$0xf0] }
  0xc9   : > { %4005 = vmatpush.bf16.msrb.mxu0 %v5445_v46  ;;  %v7652_v42 = vld [vmem:[%s8283_s28 + $0x304] sm:$0xf]  ;;  %v5781_v46 = vor.u32 %v7720_v35, %v5778_v36  ;;  %v5762_v53 = vld [vmem:[%s8283_s28 + $0x510] sm:$0xf0]  ;;  %v5381_v59 = vor.u32 %v7620_v38, %v5378_v39 }
  0xca   : > { %4018 = vmatpush.bf16.msrb.mxu1 %v5573_v51  ;;  %v7684_v44 = vld [vmem:[%s8283_s28 + $0x404] sm:$0xf]  ;;  %v3777_v45 = vpop.f32.mrf.mxu2  ;;  %v5634_v51 = vld [vmem:[%s8283_s28 + $0x410] sm:$0xf0]  ;;  %v5509_v5 = vor.u32 %v7652_v42, %v5506_v43 }
  0xcb   : > { %4031 = vmatpush.bf16.msrb.mxu2 %v5701_v52  ;;  %v7716_v52 = vld [vmem:[%s8283_s28 + $0x504] sm:$0xf]  ;;  %v3778_v54 = vadd.f32 %v3777_v45, %v3765_v34  ;;  %v6002_v57 = vld [vmem:[%s8283_s28 + $0x6f0] sm:$0xf0]  ;;  %v5637_v6 = vor.u32 %v7684_v44, %v5634_v51 }
  0xcc   : > { %4044 = vmatpush.bf16.msrb.mxu3 %v5829_v56  ;;  %v3790_v55 = vpop.f32.mrf.mxu3  ;;  %v7776_v56 = vld [vmem:[%s8283_s28 + $0x6e4] sm:$0xf]  ;;  %v6130_v60 = vld [vmem:[%s8283_s28 + $0x7f0] sm:$0xf0]  ;;  %v3766_v9 = vpop.f32.mrf.mxu1  ;;  %v5765_v10 = vor.u32 %v7716_v52, %v5762_v53 }
  0xcd   : > { %4006 = vmatpush.bf16.msrb.mxu0 %v5429_v63  ;;  %v7808_v58 = vld [vmem:[%s8283_s28 + $0x7e4] sm:$0xf]  ;;  %v6258_v63 = vld [vmem:[%s8283_s28 + $0x8f0] sm:$0xf0]  ;;  %v6005_v11 = vor.u32 %v7776_v56, %v6002_v57 }
  0xce   : > { %4019 = vmatpush.bf16.msrb.mxu1 %v5557_v0  ;;  %v7840_v62 = vld [vmem:[%s8283_s28 + $0x8e4] sm:$0xf]  ;;  %v8729_v0 = vadd.f32 %v3790_v55, %v3778_v54  ;;  %v6133_v12 = vor.u32 %v7808_v58, %v6130_v60  ;;  %v5986_v19 = vld [vmem:[%s8283_s28 + $0x6d0] sm:$0xf0] }
  0xcf   : > { %4032 = vmatpush.bf16.msrb.mxu2 %v5685_v4  ;;  %v3753_v4 = vpop.f32.mrf.mxu0  ;;  %v7872_v7 = vld [vmem:[%s8283_s28 + $0x9e4] sm:$0xf]  ;;  %v6261_v14 = vor.u32 %v7840_v62, %v6258_v63  ;;  %v6114_v25 = vld [vmem:[%s8283_s28 + $0x7d0] sm:$0xf0] }
  0xd0   : > { %4045 = vmatpush.bf16.msrb.mxu3 %v5813_v8  ;;  %v6386_v8 = vld [vmem:[%s8283_s28 + $0x9f0] sm:$0xf0]  ;;  %v7836_v26 = vld [vmem:[%s8283_s28 + $0x8c4] sm:$0xf] }
  0xd1   : > { %4007 = vmatpush.bf16.msrb.mxu0 %v5413_v15  ;;  %v7772_v15 = vld [vmem:[%s8283_s28 + $0x6c4] sm:$0xf]  ;;  %v6242_v28 = vld [vmem:[%s8283_s28 + $0x8d0] sm:$0xf0] }
  0xd2   : > { %4020 = vmatpush.bf16.msrb.mxu1 %v5541_v20  ;;  %v7804_v20 = vld [vmem:[%s8283_s28 + $0x7c4] sm:$0xf]  ;;  %v3779_v31 = vpop.f32.mrf.mxu2  ;;  %v5989_v32 = vor.u32 %v7772_v15, %v5986_v19  ;;  %v6245_v35 = vor.u32 %v7836_v26, %v6242_v28  ;;  %v6226_v42 = vld [vmem:[%s8283_s28 + $0x8b0] sm:$0xf0] }
  0xd3   : > { %4033 = vmatpush.bf16.msrb.mxu2 %v5669_v24  ;;  %v6389_v24 = vor.u32 %v7872_v7, %v6386_v8  ;;  %v7868_v29 = vld [vmem:[%s8283_s28 + $0x9c4] sm:$0xf]  ;;  %v6117_v34 = vor.u32 %v7804_v20, %v6114_v25  ;;  %v6354_v44 = vld [vmem:[%s8283_s28 + $0x9b0] sm:$0xf0] }
  0xd4   : > { %4046 = vmatpush.bf16.msrb.mxu3 %v5797_v30  ;;  %v6370_v30 = vld [vmem:[%s8283_s28 + $0x9d0] sm:$0xf0]  ;;  %v3792_v33 = vpop.f32.mrf.mxu3  ;;  %v7768_v36 = vld [vmem:[%s8283_s28 + $0x6a4] sm:$0xf] }
  0xd5   : > { %4008 = vmatpush.bf16.msrb.mxu0 %v5397_v37  ;;  %v5970_v37 = vld [vmem:[%s8283_s28 + $0x6b0] sm:$0xf0]  ;;  %v7800_v38 = vld [vmem:[%s8283_s28 + $0x7a4] sm:$0xf]  ;;  %v6373_v39 = vor.u32 %v7868_v29, %v6370_v30 }
  0xd6   : > { %4021 = vmatpush.bf16.msrb.mxu1 %v5525_v40  ;;  %v6098_v40 = vld [vmem:[%s8283_s28 + $0x7b0] sm:$0xf0]  ;;  %v7864_v43 = vld [vmem:[%s8283_s28 + $0x9a4] sm:$0xf]  ;;  %v5973_v45 = vor.u32 %v7768_v36, %v5970_v37 }
  0xd7   : > { %4034 = vmatpush.bf16.msrb.mxu2 %v5653_v41  ;;  %v7832_v41 = vld [vmem:[%s8283_s28 + $0x8a4] sm:$0xf]  ;;  %v5954_v53 = vld [vmem:[%s8283_s28 + $0x690] sm:$0xf0]  ;;  %v6357_v55 = vor.u32 %v7864_v43, %v6354_v44  ;;  %v3803_v63 = vpop.f32.mrf.mxu0 }
  0xd8   : > { %4047 = vmatpush.bf16.msrb.mxu3 %v5781_v46  ;;  %v6101_v46 = vor.u32 %v7800_v38, %v6098_v40  ;;  %v6229_v51 = vor.u32 %v7832_v41, %v6226_v42  ;;  %v7764_v52 = vld [vmem:[%s8283_s28 + $0x684] sm:$0xf]  ;;  %v6082_v56 = vld [vmem:[%s8283_s28 + $0x790] sm:$0xf0]  ;;  %v3804_v9 = vadd.f32 %v3803_v63, %v8729_v0 }
  0xd9   : > { %4009 = vmatpush.bf16.msrb.mxu0 %v5381_v59  ;;  %v7796_v54 = vld [vmem:[%s8283_s28 + $0x784] sm:$0xf]  ;;  %v6210_v58 = vld [vmem:[%s8283_s28 + $0x890] sm:$0xf0]  ;;  %v5957_v62 = vor.u32 %v7764_v52, %v5954_v53 }
  0xda   : > { %4022 = vmatpush.bf16.msrb.mxu1 %v5509_v5  ;;  %v7828_v57 = vld [vmem:[%s8283_s28 + $0x884] sm:$0xf]  ;;  %v6338_v60 = vld [vmem:[%s8283_s28 + $0x990] sm:$0xf0]  ;;  %v6085_v4 = vor.u32 %v7796_v54, %v6082_v56 }
  0xdb   : > { %4035 = vmatpush.bf16.msrb.mxu2 %v5637_v6  ;;  %v7860_v59 = vld [vmem:[%s8283_s28 + $0x984] sm:$0xf]  ;;  %v6213_v5 = vor.u32 %v7828_v57, %v6210_v58  ;;  %v5938_v7 = vld [vmem:[%s8283_s28 + $0x670] sm:$0xf0] }
  0xdc   : > { %4048 = vmatpush.bf16.msrb.mxu3 %v5765_v10  ;;  %4010 = vmatmul.bf16.vlgmr.msrb.gmra.mxu0 %v8387_v21  ;;  %v7760_v6 = vld [vmem:[%s8283_s28 + $0x664] sm:$0xf]  ;;  %v3816_v10 = vpop.f32.mrf.mxu1  ;;  %v6194_v15 = vld [vmem:[%s8283_s28 + $0x870] sm:$0xf0] }
  0xdd   : > { %4054 = vmatpush.bf16.msra.mxu0 %v6005_v11  ;;  %4023 = vmatmul.bf16.vlgmr.msrb.gmra.mxu1 %v8391_v23  ;;  %v7792_v8 = vld [vmem:[%s8283_s28 + $0x764] sm:$0xf]  ;;  %v6341_v11 = vor.u32 %v7860_v59, %v6338_v60  ;;  %v6322_v20 = vld [vmem:[%s8283_s28 + $0x970] sm:$0xf0]  ;;  %v5941_v25 = vor.u32 %v7760_v6, %v5938_v7 }
  0xde   : > { %4067 = vmatpush.bf16.msra.mxu1 %v6133_v12  ;;  %4036 = vmatmul.bf16.vlgmr.msrb.gmra.mxu2 %v8428_v1  ;;  %v6066_v12 = vld [vmem:[%s8283_s28 + $0x770] sm:$0xf0]  ;;  %v7856_v19 = vld [vmem:[%s8283_s28 + $0x964] sm:$0xf]  ;;  %v3829_v31 = vpop.f32.mrf.mxu2 }
  0xdf   : > { %4080 = vmatpush.bf16.msra.mxu2 %v6261_v14  ;;  %4049 = vmatmul.bf16.vlgmr.msrb.gmra.mxu3 %v8432_v3  ;;  %v7824_v14 = vld [vmem:[%s8283_s28 + $0x864] sm:$0xf]  ;;  %v6069_v0 = vor.u32 %v7792_v8, %v6066_v12  ;;  %v5922_v29 = vld [vmem:[%s8283_s28 + $0x650] sm:$0xf0]  ;;  %v3805_v42 = vpop.f32.mrf.mxu0 }
  0xe0   : > { %4093 = vmatpush.bf16.msra.mxu3 %v6389_v24  ;;  %v3817_v24 = vadd.f32 %v3816_v10, %v3804_v9  ;;  %v6197_v26 = vor.u32 %v7824_v14, %v6194_v15  ;;  %v7756_v28 = vld [vmem:[%s8283_s28 + $0x644] sm:$0xf]  ;;  %v6050_v33 = vld [vmem:[%s8283_s28 + $0x750] sm:$0xf0]  ;;  %v3842_v37 = vpop.f32.mrf.mxu3 }
  0xe1   : > { %4055 = vmatpush.bf16.msra.mxu0 %v5989_v32  ;;  %v7788_v30 = vld [vmem:[%s8283_s28 + $0x744] sm:$0xf]  ;;  %v6325_v32 = vor.u32 %v7856_v19, %v6322_v20  ;;  %v5925_v40 = vor.u32 %v7756_v28, %v5922_v29  ;;  %v6034_v54 = vld [vmem:[%s8283_s28 + $0x730] sm:$0xf0] }
  0xe2   : > { %4068 = vmatpush.bf16.msra.mxu1 %v6117_v34  ;;  %v7820_v34 = vld [vmem:[%s8283_s28 + $0x844] sm:$0xf]  ;;  %v3830_v36 = vadd.f32 %v3829_v31, %v3817_v24  ;;  %v6053_v43 = vor.u32 %v7788_v30, %v6050_v33  ;;  %v6162_v56 = vld [vmem:[%s8283_s28 + $0x830] sm:$0xf0] }
  0xe3   : > { %4081 = vmatpush.bf16.msra.mxu2 %v6245_v35  ;;  %v6178_v35 = vld [vmem:[%s8283_s28 + $0x850] sm:$0xf0]  ;;  %v7852_v38 = vld [vmem:[%s8283_s28 + $0x944] sm:$0xf] }
  0xe4   : > { %4094 = vmatpush.bf16.msra.mxu3 %v6373_v39  ;;  %v6306_v39 = vld [vmem:[%s8283_s28 + $0x950] sm:$0xf0]  ;;  %v8778_v41 = vadd.f32 %v3842_v37, %v3830_v36  ;;  %v6181_v44 = vor.u32 %v7820_v34, %v6178_v35  ;;  %v3818_v52 = vpop.f32.mrf.mxu1  ;;  %v7848_v57 = vld [vmem:[%s8283_s28 + $0x924] sm:$0xf] }
  0xe5   : > { %4056 = vmatpush.bf16.msra.mxu0 %v5973_v45  ;;  %v7752_v45 = vld [vmem:[%s8283_s28 + $0x624] sm:$0xf]  ;;  %v6309_v53 = vor.u32 %v7852_v38, %v6306_v39  ;;  %v6290_v58 = vld [vmem:[%s8283_s28 + $0x930] sm:$0xf0] }
  0xe6   : > { %4069 = vmatpush.bf16.msra.mxu1 %v6101_v46  ;;  %v5906_v46 = vld [vmem:[%s8283_s28 + $0x630] sm:$0xf0]  ;;  %v7748_v60 = vld [vmem:[%s8283_s28 + $0x604] sm:$0xf]  ;;  %v3831_v8 = vpop.f32.mrf.mxu2  ;;  %v6293_v9 = vor.u32 %v7848_v57, %v6290_v58 }
  0xe7   : > { %4082 = vmatpush.bf16.msra.mxu2 %v6229_v51  ;;  %v7784_v51 = vld [vmem:[%s8283_s28 + $0x724] sm:$0xf]  ;;  %v5909_v59 = vor.u32 %v7752_v45, %v5906_v46  ;;  %v6018_v6 = vld [vmem:[%s8283_s28 + $0x710] sm:$0xf0] }
  0xe8   : > { %4095 = vmatpush.bf16.msra.mxu3 %v6357_v55  ;;  %v7816_v55 = vld [vmem:[%s8283_s28 + $0x824] sm:$0xf]  ;;  %v6037_v63 = vor.u32 %v7784_v51, %v6034_v54  ;;  %v6146_v10 = vld [vmem:[%s8283_s28 + $0x810] sm:$0xf0]  ;;  %v3844_v14 = vpop.f32.mrf.mxu3 }
  0xe9   : > { %4057 = vmatpush.bf16.msra.mxu0 %v5957_v62  ;;  %v5890_v62 = vld [vmem:[%s8283_s28 + $0x610] sm:$0xf0]  ;;  %v7812_v7 = vld [vmem:[%s8283_s28 + $0x804] sm:$0xf] }
  0xea   : > { %4070 = vmatpush.bf16.msra.mxu1 %v6085_v4  ;;  %v6165_v4 = vor.u32 %v7816_v55, %v6162_v56  ;;  %v6274_v12 = vld [vmem:[%s8283_s28 + $0x910] sm:$0xf0]  ;;  %v7904_v15 = vld [vmem:[%s8283_s28 + $0xae4] sm:$0xf]  ;;  %v5893_v24 = vor.u32 %v7748_v60, %v5890_v62  ;;  %v6149_v29 = vor.u32 %v7812_v7, %v6146_v10 }
  0xeb   : > { %4083 = vmatpush.bf16.msra.mxu2 %v6213_v5  ;;  %v7780_v5 = vld [vmem:[%s8283_s28 + $0x704] sm:$0xf]  ;;  %v6514_v19 = vld [vmem:[%s8283_s28 + $0xaf0] sm:$0xf0] }
  0xec   : > { %4096 = vmatpush.bf16.msra.mxu3 %v6341_v11  ;;  %v7844_v11 = vld [vmem:[%s8283_s28 + $0x904] sm:$0xf]  ;;  %v6021_v28 = vor.u32 %v7780_v5, %v6018_v6  ;;  %v6898_v31 = vld [vmem:[%s8283_s28 + $0xdf0] sm:$0xf0]  ;;  %v6517_v33 = vor.u32 %v7904_v15, %v6514_v19 }
  0xed   : > { %4058 = vmatpush.bf16.msra.mxu0 %v5941_v25  ;;  %v7936_v20 = vld [vmem:[%s8283_s28 + $0xbe4] sm:$0xf]  ;;  %v6642_v25 = vld [vmem:[%s8283_s28 + $0xbf0] sm:$0xf0] }
  0xee   : > { %4071 = vmatpush.bf16.msra.mxu1 %v6069_v0  ;;  %v7968_v0 = vld [vmem:[%s8283_s28 + $0xce4] sm:$0xf]  ;;  %v6645_v34 = vor.u32 %v7936_v20, %v6642_v25  ;;  %v6498_v37 = vld [vmem:[%s8283_s28 + $0xad0] sm:$0xf0] }
  0xef   : > { %4084 = vmatpush.bf16.msra.mxu2 %v6197_v26  ;;  %v6770_v26 = vld [vmem:[%s8283_s28 + $0xcf0] sm:$0xf0]  ;;  %v8000_v30 = vld [vmem:[%s8283_s28 + $0xde4] sm:$0xf] }
  0xf0   : > { %4097 = vmatpush.bf16.msra.mxu3 %v6325_v32  ;;  %v6277_v32 = vor.u32 %v7844_v11, %v6274_v12  ;;  %v6773_v35 = vor.u32 %v7968_v0, %v6770_v26  ;;  %v7900_v36 = vld [vmem:[%s8283_s28 + $0xac4] sm:$0xf]  ;;  %v6901_v39 = vor.u32 %v8000_v30, %v6898_v31  ;;  %v6882_v45 = vld [vmem:[%s8283_s28 + $0xdd0] sm:$0xf0] }
  0xf1   : > { %4059 = vmatpush.bf16.msra.mxu0 %v5925_v40  ;;  %v7932_v38 = vld [vmem:[%s8283_s28 + $0xbc4] sm:$0xf]  ;;  %v6626_v40 = vld [vmem:[%s8283_s28 + $0xbd0] sm:$0xf0]  ;;  %v6501_v46 = vor.u32 %v7900_v36, %v6498_v37 }
  0xf2   : > { %4072 = vmatpush.bf16.msra.mxu1 %v6053_v43  ;;  %v7964_v42 = vld [vmem:[%s8283_s28 + $0xcc4] sm:$0xf]  ;;  %v6754_v43 = vld [vmem:[%s8283_s28 + $0xcd0] sm:$0xf0]  ;;  %v6629_v51 = vor.u32 %v7932_v38, %v6626_v40 }
  0xf3   : > { %4085 = vmatpush.bf16.msra.mxu2 %v6181_v44  ;;  %v7996_v44 = vld [vmem:[%s8283_s28 + $0xdc4] sm:$0xf]  ;;  %v6757_v52 = vor.u32 %v7964_v42, %v6754_v43  ;;  %v6482_v54 = vld [vmem:[%s8283_s28 + $0xab0] sm:$0xf0] }
  0xf4   : > { %4098 = vmatpush.bf16.msra.mxu3 %v6309_v53  ;;  %v7896_v53 = vld [vmem:[%s8283_s28 + $0xaa4] sm:$0xf]  ;;  %v6885_v56 = vor.u32 %v7996_v44, %v6882_v45  ;;  %v6610_v57 = vld [vmem:[%s8283_s28 + $0xbb0] sm:$0xf0] }
  0xf5   : > { %4060 = vmatpush.bf16.msra.mxu0 %v5909_v59  ;;  %v7928_v55 = vld [vmem:[%s8283_s28 + $0xba4] sm:$0xf]  ;;  %v6738_v59 = vld [vmem:[%s8283_s28 + $0xcb0] sm:$0xf0] }
  0xf6   : > { %4073 = vmatpush.bf16.msra.mxu1 %v6037_v63  ;;  %v7960_v58 = vld [vmem:[%s8283_s28 + $0xca4] sm:$0xf]  ;;  %v6866_v62 = vld [vmem:[%s8283_s28 + $0xdb0] sm:$0xf0]  ;;  %v6485_v63 = vor.u32 %v7896_v53, %v6482_v54 }
  0xf7   : > { %4086 = vmatpush.bf16.msra.mxu2 %v6165_v4  ;;  %v7992_v60 = vld [vmem:[%s8283_s28 + $0xda4] sm:$0xf]  ;;  %v6613_v4 = vor.u32 %v7928_v55, %v6610_v57  ;;  %v6741_v5 = vor.u32 %v7960_v58, %v6738_v59  ;;  %v6466_v7 = vld [vmem:[%s8283_s28 + $0xa90] sm:$0xf0] }
  0xf8   : > { %4099 = vmatpush.bf16.msra.mxu3 %v6293_v9  ;;  %v7892_v6 = vld [vmem:[%s8283_s28 + $0xa84] sm:$0xf]  ;;  %v6869_v9 = vor.u32 %v7992_v60, %v6866_v62  ;;  %v6594_v10 = vld [vmem:[%s8283_s28 + $0xb90] sm:$0xf0] }
  0xf9   : > { %4061 = vmatpush.bf16.msra.mxu0 %v5893_v24  ;;  %v7924_v8 = vld [vmem:[%s8283_s28 + $0xb84] sm:$0xf]  ;;  %v6722_v12 = vld [vmem:[%s8283_s28 + $0xc90] sm:$0xf0]  ;;  %v6469_v24 = vor.u32 %v7892_v6, %v6466_v7 }
  0xfa   : > { %4074 = vmatpush.bf16.msra.mxu1 %v6021_v28  ;;  %v7956_v11 = vld [vmem:[%s8283_s28 + $0xc84] sm:$0xf]  ;;  %v6850_v19 = vld [vmem:[%s8283_s28 + $0xd90] sm:$0xf0]  ;;  %v6597_v0 = vor.u32 %v7924_v8, %v6594_v10 }
  0xfb   : > { %4087 = vmatpush.bf16.msra.mxu2 %v6149_v29  ;;  %v7988_v15 = vld [vmem:[%s8283_s28 + $0xd84] sm:$0xf]  ;;  %v6725_v26 = vor.u32 %v7956_v11, %v6722_v12  ;;  %v6450_v29 = vld [vmem:[%s8283_s28 + $0xa70] sm:$0xf0] }
  0xfc   : > { %4100 = vmatpush.bf16.msra.mxu3 %v6277_v32  ;;  %4062 = vmatmul.bf16.vlgmr.msra.gmra.mxu0 %v8425_v61  ;;  %v3868_v25 = vpop.f32.mrf.mxu1  ;;  %v7888_v28 = vld [vmem:[%s8283_s28 + $0xa64] sm:$0xf]  ;;  %v6853_v31 = vor.u32 %v7988_v15, %v6850_v19  ;;  %v6834_v36 = vld [vmem:[%s8283_s28 + $0xd70] sm:$0xf0] }
  0xfd   : > { %4106 = vmatpush.bf16.msrb.mxu0 %v6517_v33  ;;  %4075 = vmatmul.bf16.vlgmr.msra.gmra.mxu1 %v8430_v2  ;;  %v3855_v14 = vpop.f32.mrf.mxu0  ;;  %v7920_v30 = vld [vmem:[%s8283_s28 + $0xb64] sm:$0xf]  ;;  %v6578_v33 = vld [vmem:[%s8283_s28 + $0xb70] sm:$0xf0]  ;;  %v6453_v37 = vor.u32 %v7888_v28, %v6450_v29 }
  0xfe   : > { %4119 = vmatpush.bf16.msrb.mxu1 %v6645_v34  ;;  %4088 = vmatmul.bf16.vlgmr.msra.gmra.mxu2 %v8518_v13  ;;  %v3856_v20 = vadd.f32 %v3855_v14, %v8778_v41  ;;  %v7952_v34 = vld [vmem:[%s8283_s28 + $0xc64] sm:$0xf]  ;;  %v6706_v41 = vld [vmem:[%s8283_s28 + $0xc70] sm:$0xf0]  ;;  %v6581_v38 = vor.u32 %v7920_v30, %v6578_v33 }
  0xff   : > { %4132 = vmatpush.bf16.msrb.mxu2 %v6773_v35  ;;  %4101 = vmatmul.bf16.vlgmr.msra.gmra.mxu3 %v8524_v17  ;;  %v7984_v35 = vld [vmem:[%s8283_s28 + $0xd64] sm:$0xf]  ;;  %v6434_v42 = vld [vmem:[%s8283_s28 + $0xa50] sm:$0xf0] }
 0x100   : > { %4145 = vmatpush.bf16.msrb.mxu3 %v6901_v39  ;;  %v3869_v32 = vadd.f32 %v3868_v25, %v3856_v20  ;;  %v6709_v39 = vor.u32 %v7952_v34, %v6706_v41  ;;  %v7884_v40 = vld [vmem:[%s8283_s28 + $0xa44] sm:$0xf]  ;;  %v6837_v44 = vor.u32 %v7984_v35, %v6834_v36  ;;  %v6546_v8 = vld [vmem:[%s8283_s28 + $0xb30] sm:$0xf0] }
 0x101   : > { %4107 = vmatpush.bf16.msrb.mxu0 %v6501_v46  ;;  %v7916_v43 = vld [vmem:[%s8283_s28 + $0xb44] sm:$0xf]  ;;  %v6562_v46 = vld [vmem:[%s8283_s28 + $0xb50] sm:$0xf0]  ;;  %v6437_v58 = vor.u32 %v7884_v40, %v6434_v42 }
 0x102   : > { %4120 = vmatpush.bf16.msrb.mxu1 %v6629_v51  ;;  %v3881_v45 = vpop.f32.mrf.mxu2  ;;  %v7948_v51 = vld [vmem:[%s8283_s28 + $0xc44] sm:$0xf]  ;;  %v6565_v62 = vor.u32 %v7916_v43, %v6562_v46  ;;  %v6674_v10 = vld [vmem:[%s8283_s28 + $0xc30] sm:$0xf0] }
 0x103   : > { %4133 = vmatpush.bf16.msrb.mxu2 %v6757_v52  ;;  %v6690_v52 = vld [vmem:[%s8283_s28 + $0xc50] sm:$0xf0]  ;;  %v3882_v53 = vadd.f32 %v3881_v45, %v3869_v32  ;;  %v7980_v55 = vld [vmem:[%s8283_s28 + $0xd44] sm:$0xf] }
 0x104   : > { %4146 = vmatpush.bf16.msrb.mxu3 %v6885_v56  ;;  %v6818_v56 = vld [vmem:[%s8283_s28 + $0xd50] sm:$0xf0]  ;;  %v3870_v59 = vpop.f32.mrf.mxu1  ;;  %v7912_v6 = vld [vmem:[%s8283_s28 + $0xb24] sm:$0xf] }
 0x105   : > { %4108 = vmatpush.bf16.msrb.mxu0 %v6485_v63  ;;  %v3894_v54 = vpop.f32.mrf.mxu3  ;;  %v3857_v57 = vpop.f32.mrf.mxu0  ;;  %v6693_v63 = vor.u32 %v7948_v51, %v6690_v52  ;;  %v6821_v7 = vor.u32 %v7980_v55, %v6818_v56  ;;  %v7976_v11 = vld [vmem:[%s8283_s28 + $0xd24] sm:$0xf]  ;;  %v6802_v12 = vld [vmem:[%s8283_s28 + $0xd30] sm:$0xf0]  ;;  %v6549_v20 = vor.u32 %v7912_v6, %v6546_v8 }
 0x106   : > { %4121 = vmatpush.bf16.msrb.mxu1 %v6613_v4  ;;  %v8849_v60 = vadd.f32 %v3894_v54, %v3882_v53  ;;  %v7880_v4 = vld [vmem:[%s8283_s28 + $0xa24] sm:$0xf]  ;;  %v6402_v19 = vld [vmem:[%s8283_s28 + $0xa10] sm:$0xf0]  ;;  %v6805_v28 = vor.u32 %v7976_v11, %v6802_v12 }
 0x107   : > { %4134 = vmatpush.bf16.msrb.mxu2 %v6741_v5  ;;  %v6418_v5 = vld [vmem:[%s8283_s28 + $0xa30] sm:$0xf0]  ;;  %v7876_v15 = vld [vmem:[%s8283_s28 + $0xa04] sm:$0xf] }
 0x108   : > { %4147 = vmatpush.bf16.msrb.mxu3 %v6869_v9  ;;  %v7944_v9 = vld [vmem:[%s8283_s28 + $0xc24] sm:$0xf]  ;;  %v6421_v14 = vor.u32 %v7880_v4, %v6418_v5  ;;  %v6658_v29 = vld [vmem:[%s8283_s28 + $0xc10] sm:$0xf0]  ;;  %v6405_v36 = vor.u32 %v7876_v15, %v6402_v19 }
 0x109   : > { %4109 = vmatpush.bf16.msrb.mxu0 %v6469_v24  ;;  %v6677_v24 = vor.u32 %v7944_v9, %v6674_v10  ;;  %v7908_v25 = vld [vmem:[%s8283_s28 + $0xb04] sm:$0xf]  ;;  %v7026_v34 = vld [vmem:[%s8283_s28 + $0xef0] sm:$0xf0] }
 0x10a   : > { %4122 = vmatpush.bf16.msrb.mxu1 %v6597_v0  ;;  %v6530_v0 = vld [vmem:[%s8283_s28 + $0xb10] sm:$0xf0]  ;;  %v7972_v30 = vld [vmem:[%s8283_s28 + $0xd04] sm:$0xf]  ;;  %v3883_v32 = vpop.f32.mrf.mxu2 }
 0x10b   : > { %4135 = vmatpush.bf16.msrb.mxu2 %v6725_v26  ;;  %v7940_v26 = vld [vmem:[%s8283_s28 + $0xc04] sm:$0xf]  ;;  %v6533_v40 = vor.u32 %v7908_v25, %v6530_v0  ;;  %v7010_v54 = vld [vmem:[%s8283_s28 + $0xed0] sm:$0xf0] }
 0x10c   : > { %4148 = vmatpush.bf16.msrb.mxu3 %v6853_v31  ;;  %v6786_v31 = vld [vmem:[%s8283_s28 + $0xd10] sm:$0xf0]  ;;  %v8032_v33 = vld [vmem:[%s8283_s28 + $0xee4] sm:$0xf]  ;;  %v6661_v42 = vor.u32 %v7940_v26, %v6658_v29 }
 0x10d   : > { %4110 = vmatpush.bf16.msrb.mxu0 %v6453_v37  ;;  %v8064_v41 = vld [vmem:[%s8283_s28 + $0xfe4] sm:$0xf]  ;;  %v3896_v35 = vpop.f32.mrf.mxu3  ;;  %v7154_v37 = vld [vmem:[%s8283_s28 + $0xff0] sm:$0xf0]  ;;  %v6789_v45 = vor.u32 %v7972_v30, %v6786_v31  ;;  %v7029_v46 = vor.u32 %v8032_v33, %v7026_v34 }
 0x10e   : > { %4123 = vmatpush.bf16.msrb.mxu1 %v6581_v38  ;;  %v8096_v38 = vld [vmem:[%s8283_s28 + $0x10e4] sm:$0xf]  ;;  %v7157_v51 = vor.u32 %v8064_v41, %v7154_v37  ;;  %v7138_v57 = vld [vmem:[%s8283_s28 + $0xfd0] sm:$0xf0] }
 0x10f   : > { %4136 = vmatpush.bf16.msrb.mxu2 %v6709_v39  ;;  %v7282_v39 = vld [vmem:[%s8283_s28 + $0x10f0] sm:$0xf0]  ;;  %v8128_v43 = vld [vmem:[%s8283_s28 + $0x11e4] sm:$0xf] }
 0x110   : > { %4149 = vmatpush.bf16.msrb.mxu3 %v6837_v44  ;;  %v7410_v44 = vld [vmem:[%s8283_s28 + $0x11f0] sm:$0xf0]  ;;  %v7285_v52 = vor.u32 %v8096_v38, %v7282_v39  ;;  %v8028_v53 = vld [vmem:[%s8283_s28 + $0xec4] sm:$0xf] }
 0x111   : > { %4111 = vmatpush.bf16.msrb.mxu0 %v6437_v58  ;;  %v8060_v55 = vld [vmem:[%s8283_s28 + $0xfc4] sm:$0xf]  ;;  %v7413_v56 = vor.u32 %v8128_v43, %v7410_v44  ;;  %v7266_v59 = vld [vmem:[%s8283_s28 + $0x10d0] sm:$0xf0]  ;;  %v7013_v4 = vor.u32 %v8028_v53, %v7010_v54 }
 0x112   : > { %4124 = vmatpush.bf16.msrb.mxu1 %v6565_v62  ;;  %v8092_v58 = vld [vmem:[%s8283_s28 + $0x10c4] sm:$0xf]  ;;  %v7141_v5 = vor.u32 %v8060_v55, %v7138_v57  ;;  %v6994_v8 = vld [vmem:[%s8283_s28 + $0xeb0] sm:$0xf0] }
 0x113   : > { %4137 = vmatpush.bf16.msrb.mxu2 %v6693_v63  ;;  %v8124_v62 = vld [vmem:[%s8283_s28 + $0x11c4] sm:$0xf]  ;;  %v7394_v63 = vld [vmem:[%s8283_s28 + $0x11d0] sm:$0xf0]  ;;  %v7269_v6 = vor.u32 %v8092_v58, %v7266_v59 }
 0x114   : > { %4150 = vmatpush.bf16.msrb.mxu3 %v6821_v7  ;;  %v8024_v7 = vld [vmem:[%s8283_s28 + $0xea4] sm:$0xf]  ;;  %v7397_v10 = vor.u32 %v8124_v62, %v7394_v63  ;;  %v7122_v11 = vld [vmem:[%s8283_s28 + $0xfb0] sm:$0xf0] }
 0x115   : > { %4112 = vmatpush.bf16.msrb.mxu0 %v6421_v14  ;;  %v8056_v9 = vld [vmem:[%s8283_s28 + $0xfa4] sm:$0xf]  ;;  %v7250_v14 = vld [vmem:[%s8283_s28 + $0x10b0] sm:$0xf0] }
 0x116   : > { %4125 = vmatpush.bf16.msrb.mxu1 %v6549_v20  ;;  %v8088_v12 = vld [vmem:[%s8283_s28 + $0x10a4] sm:$0xf]  ;;  %v7378_v19 = vld [vmem:[%s8283_s28 + $0x11b0] sm:$0xf0]  ;;  %v6997_v20 = vor.u32 %v8024_v7, %v6994_v8 }
 0x117   : > { %4138 = vmatpush.bf16.msrb.mxu2 %v6677_v24  ;;  %v8120_v15 = vld [vmem:[%s8283_s28 + $0x11a4] sm:$0xf]  ;;  %v7125_v24 = vor.u32 %v8056_v9, %v7122_v11  ;;  %v7253_v25 = vor.u32 %v8088_v12, %v7250_v14  ;;  %v6978_v26 = vld [vmem:[%s8283_s28 + $0xe90] sm:$0xf0] }
 0x118   : > { %4151 = vmatpush.bf16.msrb.mxu3 %v6805_v28  ;;  %v8020_v0 = vld [vmem:[%s8283_s28 + $0xe84] sm:$0xf]  ;;  %v7381_v29 = vor.u32 %v8120_v15, %v7378_v19  ;;  %v7106_v30 = vld [vmem:[%s8283_s28 + $0xf90] sm:$0xf0] }
 0x119   : > { %4113 = vmatpush.bf16.msrb.mxu0 %v6405_v36  ;;  %v8052_v28 = vld [vmem:[%s8283_s28 + $0xf84] sm:$0xf]  ;;  %v7234_v32 = vld [vmem:[%s8283_s28 + $0x1090] sm:$0xf0]  ;;  %v3907_v33 = vpop.f32.mrf.mxu0  ;;  %v6981_v36 = vor.u32 %v8020_v0, %v6978_v26 }
 0x11a   : > { %4126 = vmatpush.bf16.msrb.mxu1 %v6533_v40  ;;  %v8084_v31 = vld [vmem:[%s8283_s28 + $0x1084] sm:$0xf]  ;;  %v7362_v41 = vld [vmem:[%s8283_s28 + $0x1190] sm:$0xf0]  ;;  %v3908_v35 = vadd.f32 %v3907_v33, %v8849_v60  ;;  %v3920_v37 = vpop.f32.mrf.mxu1  ;;  %v7109_v38 = vor.u32 %v8052_v28, %v7106_v30 }
 0x11b   : > { %4139 = vmatpush.bf16.msrb.mxu2 %v6661_v42  ;;  %v8116_v34 = vld [vmem:[%s8283_s28 + $0x1184] sm:$0xf]  ;;  %v7237_v39 = vor.u32 %v8084_v31, %v7234_v32  ;;  %v6962_v42 = vld [vmem:[%s8283_s28 + $0xe70] sm:$0xf0] }
 0x11c   : > { %4152 = vmatpush.bf16.msrb.mxu3 %v6789_v45  ;;  %4114 = vmatmul.bf16.vlgmr.msrb.gmra.mxu0 %v8522_v16  ;;  %v8016_v40 = vld [vmem:[%s8283_s28 + $0xe64] sm:$0xf]  ;;  %v7365_v44 = vor.u32 %v8116_v34, %v7362_v41  ;;  %v3921_v45 = vadd.f32 %v3920_v37, %v3908_v35  ;;  %v7218_v60 = vld [vmem:[%s8283_s28 + $0x1070] sm:$0xf0] }
 0x11d   : > { %4158 = vmatpush.bf16.msra.mxu0 %v7029_v46  ;;  %4127 = vmatmul.bf16.vlgmr.msrb.gmra.mxu1 %v8526_v18  ;;  %v8048_v43 = vld [vmem:[%s8283_s28 + $0xf64] sm:$0xf]  ;;  %v7090_v46 = vld [vmem:[%s8283_s28 + $0xf70] sm:$0xf0]  ;;  %v6965_v54 = vor.u32 %v8016_v40, %v6962_v42 }
 0x11e   : > { %4171 = vmatpush.bf16.msra.mxu1 %v7157_v51  ;;  %4140 = vmatmul.bf16.vlgmr.msrb.gmra.mxu2 %v8584_v47  ;;  %v8080_v51 = vld [vmem:[%s8283_s28 + $0x1064] sm:$0xf]  ;;  %v7346_v53 = vld [vmem:[%s8283_s28 + $0x1170] sm:$0xf0]  ;;  %v7093_v55 = vor.u32 %v8048_v43, %v7090_v46  ;;  %v5240_v46 = vld [vmem:[%s8283_s28 + $0xe8] sm:$0xf] }
 0x11f   : > { %4184 = vmatpush.bf16.msra.mxu2 %v7285_v52  ;;  %4153 = vmatmul.bf16.vlgmr.msrb.gmra.mxu3 %v8588_v49  ;;  %v8112_v52 = vld [vmem:[%s8283_s28 + $0x1164] sm:$0xf]  ;;  %v6946_v58 = vld [vmem:[%s8283_s28 + $0xe50] sm:$0xf0] }
 0x120   : > { %4197 = vmatpush.bf16.msra.mxu3 %v7413_v56  ;;  %v7221_v56 = vor.u32 %v8080_v51, %v7218_v60  ;;  %v8012_v57 = vld [vmem:[%s8283_s28 + $0xe44] sm:$0xf]  ;;  %v7349_v62 = vor.u32 %v8112_v52, %v7346_v53  ;;  %v7058_v28 = vld [vmem:[%s8283_s28 + $0xf30] sm:$0xf0]  ;;  %v7587_v51 = vld [vmem:[%s8283_s28 + $0xf4] sm:$0xf0] }
 0x121   : > { %4159 = vmatpush.bf16.msra.mxu0 %v7013_v4  ;;  %v8044_v59 = vld [vmem:[%s8283_s28 + $0xf44] sm:$0xf]  ;;  %v3933_v63 = vpop.f32.mrf.mxu2  ;;  %v7074_v4 = vld [vmem:[%s8283_s28 + $0xf50] sm:$0xf0]  ;;  %v3909_v11 = vpop.f32.mrf.mxu0  ;;  %v6949_v12 = vor.u32 %v8012_v57, %v6946_v58  ;;  %v5368_v60 = vld [vmem:[%s8283_s28 + $0x1e8] sm:$0xf] }
 0x122   : > { %4172 = vmatpush.bf16.msra.mxu1 %v7141_v5  ;;  %v8076_v5 = vld [vmem:[%s8283_s28 + $0x1044] sm:$0xf]  ;;  %v3934_v7 = vadd.f32 %v3933_v63, %v3921_v45  ;;  %v3946_v8 = vpop.f32.mrf.mxu3  ;;  %v3922_v14 = vpop.f32.mrf.mxu1  ;;  %v7077_v19 = vor.u32 %v8044_v59, %v7074_v4  ;;  %v7186_v30 = vld [vmem:[%s8283_s28 + $0x1030] sm:$0xf0]  ;;  %v5624_v59 = vld [vmem:[%s8283_s28 + $0x3e8] sm:$0xf]  ;;  %v5241_v4 = vor.u32 %v7587_v51, %v5240_v46 }
 0x123   : > { %4185 = vmatpush.bf16.msra.mxu2 %v7269_v6  ;;  %v7202_v6 = vld [vmem:[%s8283_s28 + $0x1050] sm:$0xf0]  ;;  %v8108_v9 = vld [vmem:[%s8283_s28 + $0x1144] sm:$0xf]  ;;  %v7615_v11 = vld [vmem:[%s8283_s28 + $0x1d4] sm:$0xf0] }
 0x124   : > { %4198 = vmatpush.bf16.msra.mxu3 %v7397_v10  ;;  %v7330_v10 = vld [vmem:[%s8283_s28 + $0x1150] sm:$0xf0]  ;;  %v8920_v15 = vadd.f32 %v3946_v8, %v3934_v7  ;;  %v8040_v0 = vld [vmem:[%s8283_s28 + $0xf24] sm:$0xf]  ;;  %v5224_v7 = vld [vmem:[%s8283_s28 + $0xc8] sm:$0xf] }
 0x125   : > { %4160 = vmatpush.bf16.msra.mxu0 %v6997_v20  ;;  %v7205_v20 = vor.u32 %v8076_v5, %v7202_v6  ;;  %v7333_v26 = vor.u32 %v8108_v9, %v7330_v10  ;;  %v8104_v31 = vld [vmem:[%s8283_s28 + $0x1124] sm:$0xf]  ;;  %v7314_v32 = vld [vmem:[%s8283_s28 + $0x1130] sm:$0xf0]  ;;  %v7061_v35 = vor.u32 %v8040_v0, %v7058_v28  ;;  %v7583_v8 = vld [vmem:[%s8283_s28 + $0xd4] sm:$0xf0] }
 0x126   : > { %4173 = vmatpush.bf16.msra.mxu1 %v7125_v24  ;;  %v8008_v24 = vld [vmem:[%s8283_s28 + $0xe24] sm:$0xf]  ;;  %v6914_v41 = vld [vmem:[%s8283_s28 + $0xe10] sm:$0xf0]  ;;  %v7317_v40 = vor.u32 %v8104_v31, %v7314_v32  ;;  %v5352_v9 = vld [vmem:[%s8283_s28 + $0x1c8] sm:$0xf] }
 0x127   : > { %4186 = vmatpush.bf16.msra.mxu2 %v7253_v25  ;;  %v6930_v25 = vld [vmem:[%s8283_s28 + $0xe30] sm:$0xf0]  ;;  %v8004_v34 = vld [vmem:[%s8283_s28 + $0xe04] sm:$0xf]  ;;  %v7647_v14 = vld [vmem:[%s8283_s28 + $0x2d4] sm:$0xf0] }
 0x128   : > { %4199 = vmatpush.bf16.msra.mxu3 %v7381_v29  ;;  %v8072_v29 = vld [vmem:[%s8283_s28 + $0x1024] sm:$0xf]  ;;  %v6933_v33 = vor.u32 %v8008_v24, %v6930_v25  ;;  %v7170_v42 = vld [vmem:[%s8283_s28 + $0x1010] sm:$0xf0]  ;;  %v6917_v53 = vor.u32 %v8004_v34, %v6914_v41  ;;  %v5225_v24 = vor.u32 %v7583_v8, %v5224_v7  ;;  %v5353_v25 = vor.u32 %v7615_v11, %v5352_v9  ;;  %v7579_v28 = vld [vmem:[%s8283_s28 + $0xb4] sm:$0xf0] }
 0x129   : > { %4161 = vmatpush.bf16.msra.mxu0 %v6981_v36  ;;  %v7189_v36 = vor.u32 %v8072_v29, %v7186_v30  ;;  %v8036_v37 = vld [vmem:[%s8283_s28 + $0xf04] sm:$0xf]  ;;  %v3935_v45 = vpop.f32.mrf.mxu2  ;;  %v5336_v29 = vld [vmem:[%s8283_s28 + $0x1a8] sm:$0xf]  ;;  %v7611_v31 = vld [vmem:[%s8283_s28 + $0x1b4] sm:$0xf0] }
 0x12a   : > { %4174 = vmatpush.bf16.msra.mxu1 %v7109_v38  ;;  %v7042_v38 = vld [vmem:[%s8283_s28 + $0xf10] sm:$0xf0]  ;;  %v8100_v43 = vld [vmem:[%s8283_s28 + $0x1104] sm:$0xf]  ;;  %v3948_v52 = vpop.f32.mrf.mxu3  ;;  %v5464_v32 = vld [vmem:[%s8283_s28 + $0x2a8] sm:$0xf] }
 0x12b   : > { %4187 = vmatpush.bf16.msra.mxu2 %v7237_v39  ;;  %v8068_v39 = vld [vmem:[%s8283_s28 + $0x1004] sm:$0xf]  ;;  %v7045_v57 = vor.u32 %v8036_v37, %v7042_v38  ;;  %v5592_v41 = vld [vmem:[%s8283_s28 + $0x3a8] sm:$0xf]  ;;  %v5337_v38 = vor.u32 %v7611_v31, %v5336_v29  ;;  %v7607_v45 = vld [vmem:[%s8283_s28 + $0x194] sm:$0xf0] }
 0x12c   : > { %4200 = vmatpush.bf16.msra.mxu3 %v7365_v44  ;;  %v7298_v44 = vld [vmem:[%s8283_s28 + $0x1110] sm:$0xf0]  ;;  %v7173_v58 = vor.u32 %v8068_v39, %v7170_v42  ;;  %v8180_v34 = vld [vmem:[#allocation1] sm:$0xff]  ;;  %v7575_v42 = vld [vmem:[%s8283_s28 + $0x94] sm:$0xf0] }
 0x12d   : > { %4162 = vmatpush.bf16.msra.mxu0 %v6965_v54  ;;  %v7619_v54 = vld [vmem:[%s8283_s28 + $0x1f4] sm:$0xf0]  ;;  %v7301_v63 = vor.u32 %v8100_v43, %v7298_v44  ;;  %v5320_v43 = vld [vmem:[%s8283_s28 + $0x188] sm:$0xf] }
 0x12e   : > { %4175 = vmatpush.bf16.msra.mxu1 %v7093_v55  ;;  %v5496_v55 = vld [vmem:[%s8283_s28 + $0x2e8] sm:$0xf]  ;;  %v5369_v5 = vor.u32 %v7619_v54, %v5368_v60  ;;  %v7639_v51 = vld [vmem:[%s8283_s28 + $0x294] sm:$0xf0] }
 0x12f   : > { %4188 = vmatpush.bf16.msra.mxu2 %v7221_v56  ;;  %v7651_v56 = vld [vmem:[%s8283_s28 + $0x2f4] sm:$0xf0]  ;;  %v5448_v46 = vld [vmem:[%s8283_s28 + $0x288] sm:$0xf] }
 0x130   : > { %4201 = vmatpush.bf16.msra.mxu3 %v7349_v62  ;;  %v7683_v62 = vld [vmem:[%s8283_s28 + $0x3f4] sm:$0xf0]  ;;  %v5497_v6 = vor.u32 %v7651_v56, %v5496_v55  ;;  %v5576_v52 = vld [vmem:[%s8283_s28 + $0x388] sm:$0xf] }
 0x131   : > { %4163 = vmatpush.bf16.msra.mxu0 %v6949_v12  ;;  %v5625_v10 = vor.u32 %v7683_v62, %v5624_v59  ;;  %v5480_v12 = vld [vmem:[%s8283_s28 + $0x2c8] sm:$0xf]  ;;  %v7571_v62 = vld [vmem:[%s8283_s28 + $0x74] sm:$0xf0] }
 0x132   : > { %4176 = vmatpush.bf16.msra.mxu1 %v7077_v19  ;;  %v5608_v19 = vld [vmem:[%s8283_s28 + $0x3c8] sm:$0xf]  ;;  %v5481_v0 = vor.u32 %v7647_v14, %v5480_v12  ;;  %v7635_v7 = vld [vmem:[%s8283_s28 + $0x274] sm:$0xf0] }
 0x133   : > { %4189 = vmatpush.bf16.msra.mxu2 %v7205_v20  ;;  %v7679_v20 = vld [vmem:[%s8283_s28 + $0x3d4] sm:$0xf0]  ;;  %v5176_v59 = vld [vmem:[%s8283_s28 + $0x68] sm:$0xf] }
 0x134   : > { %4202 = vmatpush.bf16.msra.mxu3 %v7333_v26  ;;  %v5208_v26 = vld [vmem:[%s8283_s28 + $0xa8] sm:$0xf]  ;;  %v5609_v30 = vor.u32 %v7679_v20, %v5608_v19  ;;  %v7667_v9 = vld [vmem:[%s8283_s28 + $0x374] sm:$0xf0] }
 0x135   : > { %4164 = vmatpush.bf16.msra.mxu0 %v6933_v33  ;;  %v7643_v33 = vld [vmem:[%s8283_s28 + $0x2b4] sm:$0xf0]  ;;  %v5209_v37 = vor.u32 %v7579_v28, %v5208_v26  ;;  %v5560_v8 = vld [vmem:[%s8283_s28 + $0x368] sm:$0xf] }
 0x136   : > { %4177 = vmatpush.bf16.msra.mxu1 %v7061_v35  ;;  %v7675_v35 = vld [vmem:[%s8283_s28 + $0x3b4] sm:$0xf0]  ;;  %v5465_v39 = vor.u32 %v7643_v33, %v5464_v32  ;;  %v5160_v14 = vld [vmem:[%s8283_s28 + $0x48] sm:$0xf] }
 0x137   : > { %4190 = vmatpush.bf16.msra.mxu2 %v7189_v36  ;;  %v8181_v36 = vld [vmem:[#allocation1 + $0x9] sm:$0xff]  ;;  %v5593_v44 = vor.u32 %v7675_v35, %v5592_v41  ;;  %v7567_v19 = vld [vmem:[%s8283_s28 + $0x54] sm:$0xf0] }
 0x138   : > { %4203 = vmatpush.bf16.msra.mxu3 %v7317_v40  ;;  %v5192_v40 = vld [vmem:[%s8283_s28 + $0x88] sm:$0xf]  ;;  %v7631_v26 = vld [vmem:[%s8283_s28 + $0x254] sm:$0xf0]  ;;  %v5161_v33 = vor.u32 %v7567_v19, %v5160_v14 }
 0x139   : > { %4165 = vmatpush.bf16.msra.mxu0 %v6917_v53  ;;  %v3959_v60 = vpop.f32.mrf.mxu0  ;;  %v7671_v53 = vld [vmem:[%s8283_s28 + $0x394] sm:$0xf0]  ;;  %v5193_v55 = vor.u32 %v7575_v42, %v5192_v40  ;;  %v5288_v20 = vld [vmem:[%s8283_s28 + $0x148] sm:$0xf] }
 0x13a   : > { %4178 = vmatpush.bf16.msra.mxu1 %v7045_v57  ;;  %v3960_v54 = vadd.f32 %v3959_v60, %v8920_v15  ;;  %v3972_v56 = vpop.f32.mrf.mxu1  ;;  %v5321_v57 = vor.u32 %v7607_v45, %v5320_v43  ;;  %v5432_v15 = vld [vmem:[%s8283_s28 + $0x268] sm:$0xf]  ;;  %v7595_v42 = vld [vmem:[%s8283_s28 + $0x134] sm:$0xf0] }
 0x13b   : > { %4191 = vmatpush.bf16.msra.mxu2 %v7173_v58  ;;  %v5449_v58 = vor.u32 %v7639_v51, %v5448_v46  ;;  %v5433_v12 = vor.u32 %v7635_v7, %v5432_v15  ;;  %v5544_v29 = vld [vmem:[%s8283_s28 + $0x348] sm:$0xf]  ;;  %v7659_v46 = vld [vmem:[%s8283_s28 + $0x334] sm:$0xf0] }
 0x13c   : > { %4204 = vmatpush.bf16.msra.mxu3 %v7301_v63  ;;  %4166 = vmatmul.bf16.vlgmr.msra.gmra.mxu0 %v8586_v48  ;;  %v5304_v63 = vld [vmem:[%s8283_s28 + $0x168] sm:$0xf]  ;;  %v7715_v15 = vld [vmem:[%s8283_s28 + $0x4f4] sm:$0xf0] }
 0x13d   : > { %4210 = vmatpush.bf16.msrb.mxu0 %v5241_v4  ;;  %4179 = vmatmul.bf16.vlgmr.msra.gmra.mxu1 %v8590_v50  ;;  %v5577_v4 = vor.u32 %v7671_v53, %v5576_v52  ;;  %v5400_v43 = vld [vmem:[%s8283_s28 + $0x228] sm:$0xf]  ;;  %v7559_v52 = vld [vmem:[%s8283_s28 + $0x14] sm:$0xf0] }
 0x13e   : > { %4223 = vmatpush.bf16.msrb.mxu1 %v5369_v5  ;;  %4192 = vmatmul.bf16.vlgmr.msra.gmra.mxu2 %v8180_v34  ;;  %v8976_v5 = vadd.f32 %v3972_v56, %v3960_v54  ;;  %v5528_v45 = vld [vmem:[%s8283_s28 + $0x328] sm:$0xf]  ;;  %v7591_v56 = vld [vmem:[%s8283_s28 + $0x114] sm:$0xf0] }
 0x13f   : > { %4236 = vmatpush.bf16.msrb.mxu2 %v5497_v6  ;;  %4205 = vmatmul.bf16.vlgmr.msra.gmra.mxu3 %v8181_v36  ;;  %v7603_v6 = vld [vmem:[%s8283_s28 + $0x174] sm:$0xf0]  ;;  %v5128_v60 = vld [vmem:[%s8283_s28 + $0x8] sm:$0xf] }
 0x140   : > { %4249 = vmatpush.bf16.msrb.mxu3 %v5625_v10  ;;  %v5177_v10 = vor.u32 %v7571_v62, %v5176_v59  ;;  %v5305_v11 = vor.u32 %v7603_v6, %v5304_v63  ;;  %v7623_v59 = vld [vmem:[%s8283_s28 + $0x214] sm:$0xf0]  ;;  %v5512_v62 = vld [vmem:[%s8283_s28 + $0x308] sm:$0xf] }
 0x141   : > { %4211 = vmatpush.bf16.msrb.mxu0 %v5225_v24  ;;  %v5561_v24 = vor.u32 %v7667_v9, %v5560_v8  ;;  %v3985_v28 = vpop.f32.mrf.mxu2  ;;  %v3961_v32 = vpop.f32.mrf.mxu0  ;;  %v7655_v63 = vld [vmem:[%s8283_s28 + $0x314] sm:$0xf0]  ;;  %v5752_v6 = vld [vmem:[%s8283_s28 + $0x4e8] sm:$0xf]  ;;  %v5129_v9 = vor.u32 %v7559_v52, %v5128_v60 }
 0x142   : > { %4224 = vmatpush.bf16.msrb.mxu1 %v5353_v25  ;;  %v7599_v25 = vld [vmem:[%s8283_s28 + $0x154] sm:$0xf0]  ;;  %v3998_v31 = vpop.f32.mrf.mxu3  ;;  %v3974_v41 = vpop.f32.mrf.mxu1  ;;  %v5880_v7 = vld [vmem:[%s8283_s28 + $0x5e8] sm:$0xf] }
 0x143   : > { %4237 = vmatpush.bf16.msrb.mxu2 %v5481_v0  ;;  %v5416_v0 = vld [vmem:[%s8283_s28 + $0x248] sm:$0xf]  ;;  %v8991_v34 = vadd.f32 %v3998_v31, %v3985_v28  ;;  %v5289_v35 = vor.u32 %v7599_v25, %v5288_v20  ;;  %v5513_v25 = vor.u32 %v7655_v63, %v5512_v62  ;;  %v7771_v60 = vld [vmem:[%s8283_s28 + $0x6b4] sm:$0xf0] }
 0x144   : > { %4250 = vmatpush.bf16.msrb.mxu3 %v5609_v30  ;;  %v7663_v30 = vld [vmem:[%s8283_s28 + $0x354] sm:$0xf0]  ;;  %v5417_v36 = vor.u32 %v7631_v26, %v5416_v0  ;;  %v6136_v20 = vld [vmem:[%s8283_s28 + $0x7e8] sm:$0xf]  ;;  %v5753_v0 = vor.u32 %v7715_v15, %v5752_v6 }
 0x145   : > { %4212 = vmatpush.bf16.msrb.mxu0 %v5209_v37  ;;  %v5144_v37 = vld [vmem:[%s8283_s28 + $0x28] sm:$0xf]  ;;  %v5545_v40 = vor.u32 %v7663_v30, %v5544_v29  ;;  %v7711_v30 = vld [vmem:[%s8283_s28 + $0x4d4] sm:$0xf0] }
 0x146   : > { %4225 = vmatpush.bf16.msrb.mxu1 %v5337_v38  ;;  %v7563_v38 = vld [vmem:[%s8283_s28 + $0x34] sm:$0xf0]  ;;  %v5736_v29 = vld [vmem:[%s8283_s28 + $0x4c8] sm:$0xf] }
 0x147   : > { %4238 = vmatpush.bf16.msrb.mxu2 %v5465_v39  ;;  %v5272_v39 = vld [vmem:[%s8283_s28 + $0x128] sm:$0xf]  ;;  %v5145_v51 = vor.u32 %v7563_v38, %v5144_v37  ;;  %v7807_v37 = vld [vmem:[%s8283_s28 + $0x7d4] sm:$0xf0]  ;;  %v5737_v38 = vor.u32 %v7711_v30, %v5736_v29 }
 0x148   : > { %4251 = vmatpush.bf16.msrb.mxu3 %v5593_v44  ;;  %v7627_v44 = vld [vmem:[%s8283_s28 + $0x234] sm:$0xf0]  ;;  %v5273_v53 = vor.u32 %v7595_v42, %v5272_v39  ;;  %v5864_v31 = vld [vmem:[%s8283_s28 + $0x5c8] sm:$0xf] }
 0x149   : > { %4213 = vmatpush.bf16.msrb.mxu0 %v5193_v55  ;;  %v5401_v54 = vor.u32 %v7627_v44, %v5400_v43  ;;  %v5256_v55 = vld [vmem:[%s8283_s28 + $0x108] sm:$0xf]  ;;  %v7707_v43 = vld [vmem:[%s8283_s28 + $0x4b4] sm:$0xf0] }
 0x14a   : > { %4226 = vmatpush.bf16.msrb.mxu1 %v5321_v57  ;;  %v5384_v57 = vld [vmem:[%s8283_s28 + $0x208] sm:$0xf]  ;;  %v4000_v8 = vpop.f32.mrf.mxu3  ;;  %v5257_v14 = vor.u32 %v7591_v56, %v5256_v55  ;;  %v7735_v63 = vld [vmem:[%s8283_s28 + $0x594] sm:$0xf0] }
 0x14b   : > { %4239 = vmatpush.bf16.msrb.mxu2 %v5449_v58  ;;  %v5529_v58 = vor.u32 %v7659_v46, %v5528_v45  ;;  %v5385_v19 = vor.u32 %v7623_v59, %v5384_v57  ;;  %v5992_v41 = vld [vmem:[%s8283_s28 + $0x6c8] sm:$0xf]  ;;  %v7739_v46 = vld [vmem:[%s8283_s28 + $0x5b4] sm:$0xf0] }
 0x14c   : > { %4252 = vmatpush.bf16.msrb.mxu3 %v5577_v4  ;;  %v3987_v4 = vpop.f32.mrf.mxu2  ;;  %v5720_v42 = vld [vmem:[%s8283_s28 + $0x4a8] sm:$0xf]  ;;  %v7767_v6 = vld [vmem:[%s8283_s28 + $0x694] sm:$0xf0] }
 0x14d   : > { %4214 = vmatpush.bf16.msrb.mxu0 %v5177_v10  ;;  %v7747_v10 = vld [vmem:[%s8283_s28 + $0x5f4] sm:$0xf0]  ;;  %v5848_v44 = vld [vmem:[%s8283_s28 + $0x5a8] sm:$0xf] }
 0x14e   : > { %4227 = vmatpush.bf16.msrb.mxu1 %v5305_v11  ;;  %v6008_v11 = vld [vmem:[%s8283_s28 + $0x6e8] sm:$0xf]  ;;  %v5881_v26 = vor.u32 %v7747_v10, %v5880_v7  ;;  %v5849_v55 = vor.u32 %v7739_v46, %v5848_v44  ;;  %v7799_v7 = vld [vmem:[%s8283_s28 + $0x794] sm:$0xf0] }
 0x14f   : > { %4240 = vmatpush.bf16.msrb.mxu2 %v5433_v12  ;;  %v7779_v12 = vld [vmem:[%s8283_s28 + $0x6f4] sm:$0xf0]  ;;  %v6104_v52 = vld [vmem:[%s8283_s28 + $0x7a8] sm:$0xf] }
 0x150   : > { %4253 = vmatpush.bf16.msrb.mxu3 %v5561_v24  ;;  %v7811_v24 = vld [vmem:[%s8283_s28 + $0x7f4] sm:$0xf0]  ;;  %v6009_v28 = vor.u32 %v7779_v12, %v6008_v11  ;;  %v5704_v57 = vld [vmem:[%s8283_s28 + $0x488] sm:$0xf] }
 0x151   : > { %4215 = vmatpush.bf16.msrb.mxu0 %v5161_v33  ;;  %v6137_v32 = vor.u32 %v7811_v24, %v6136_v20  ;;  %v7743_v33 = vld [vmem:[%s8283_s28 + $0x5d4] sm:$0xf0]  ;;  %v5832_v59 = vld [vmem:[%s8283_s28 + $0x588] sm:$0xf] }
 0x152   : > { %4228 = vmatpush.bf16.msrb.mxu1 %v5289_v35  ;;  %v7775_v35 = vld [vmem:[%s8283_s28 + $0x6d4] sm:$0xf0]  ;;  %v5865_v39 = vor.u32 %v7743_v33, %v5864_v31  ;;  %v5960_v4 = vld [vmem:[%s8283_s28 + $0x688] sm:$0xf]  ;;  %v5833_v10 = vor.u32 %v7735_v63, %v5832_v59 }
 0x153   : > { %4241 = vmatpush.bf16.msrb.mxu2 %v5417_v36  ;;  %v6120_v36 = vld [vmem:[%s8283_s28 + $0x7c8] sm:$0xf]  ;;  %v5961_v11 = vor.u32 %v7767_v6, %v5960_v4  ;;  %v7795_v30 = vld [vmem:[%s8283_s28 + $0x774] sm:$0xf0] }
 0x154   : > { %4254 = vmatpush.bf16.msrb.mxu3 %v5545_v40  ;;  %v5993_v40 = vor.u32 %v7775_v35, %v5992_v41  ;;  %v6121_v45 = vor.u32 %v7807_v37, %v6120_v36  ;;  %v6088_v15 = vld [vmem:[%s8283_s28 + $0x788] sm:$0xf]  ;;  %v7695_v35 = vld [vmem:[%s8283_s28 + $0x454] sm:$0xf0] }
 0x155   : > { %4216 = vmatpush.bf16.msrb.mxu0 %v5145_v51  ;;  %v5976_v51 = vld [vmem:[%s8283_s28 + $0x6a8] sm:$0xf]  ;;  %v7791_v46 = vld [vmem:[%s8283_s28 + $0x754] sm:$0xf0] }
 0x156   : > { %4229 = vmatpush.bf16.msrb.mxu1 %v5273_v53  ;;  %v7803_v53 = vld [vmem:[%s8283_s28 + $0x7b4] sm:$0xf0]  ;;  %v5977_v56 = vor.u32 %v7771_v60, %v5976_v51  ;;  %v5688_v12 = vld [vmem:[%s8283_s28 + $0x468] sm:$0xf] }
 0x157   : > { %4242 = vmatpush.bf16.msrb.mxu2 %v5401_v54  ;;  %v5721_v54 = vor.u32 %v7707_v43, %v5720_v42  ;;  %v6105_v62 = vor.u32 %v7803_v53, %v6104_v52  ;;  %v6072_v29 = vld [vmem:[%s8283_s28 + $0x768] sm:$0xf]  ;;  %v7759_v42 = vld [vmem:[%s8283_s28 + $0x654] sm:$0xf0] }
 0x158   : > { %4255 = vmatpush.bf16.msrb.mxu3 %v5529_v58  ;;  %v7703_v58 = vld [vmem:[%s8283_s28 + $0x494] sm:$0xf0]  ;;  %v5672_v41 = vld [vmem:[%s8283_s28 + $0x448] sm:$0xf] }
 0x159   : > { %4217 = vmatpush.bf16.msrb.mxu0 %v5129_v9  ;;  %v5705_v8 = vor.u32 %v7703_v58, %v5704_v57  ;;  %v4011_v9 = vpop.f32.mrf.mxu0  ;;  %v5800_v36 = vld [vmem:[%s8283_s28 + $0x548] sm:$0xf]  ;;  %v5673_v51 = vor.u32 %v7695_v35, %v5672_v41  ;;  %v7755_v4 = vld [vmem:[%s8283_s28 + $0x634] sm:$0xf0] }
 0x15a   : > { %4230 = vmatpush.bf16.msrb.mxu1 %v5257_v14  ;;  %v7699_v14 = vld [vmem:[%s8283_s28 + $0x474] sm:$0xf0]  ;;  %v4012_v20 = vadd.f32 %v4011_v9, %v8991_v34  ;;  %v4024_v24 = vpop.f32.mrf.mxu1  ;;  %v5784_v57 = vld [vmem:[%s8283_s28 + $0x528] sm:$0xf] }
 0x15b   : > { %4243 = vmatpush.bf16.msrb.mxu2 %v5385_v19  ;;  %v5816_v19 = vld [vmem:[%s8283_s28 + $0x568] sm:$0xf]  ;;  %v7687_v9 = vld [vmem:[%s8283_s28 + $0x414] sm:$0xf0] }
 0x15c   : > { %4256 = vmatpush.bf16.msrb.mxu3 %v5513_v25  ;;  %4218 = vmatmul.bf16.vlgmr.msrb.gmra.mxu0 %v8389_v22  ;;  %v6089_v25 = vor.u32 %v7799_v7, %v6088_v15  ;;  %v4025_v31 = vadd.f32 %v4024_v24, %v4012_v20  ;;  %v5912_v63 = vld [vmem:[%s8283_s28 + $0x628] sm:$0xf]  ;;  %v7787_v15 = vld [vmem:[%s8283_s28 + $0x734] sm:$0xf0] }
 0x15d   : > { %4262 = vmatpush.bf16.msra.mxu0 %v5753_v0  ;;  %4231 = vmatmul.bf16.vlgmr.msrb.gmra.mxu1 %v8396_v27  ;;  %v7731_v0 = vld [vmem:[%s8283_s28 + $0x574] sm:$0xf0]  ;;  %v6040_v6 = vld [vmem:[%s8283_s28 + $0x728] sm:$0xf] }
 0x15e   : > { %4275 = vmatpush.bf16.msra.mxu1 %v5881_v26  ;;  %4244 = vmatmul.bf16.vlgmr.msrb.gmra.mxu2 %v8387_v21  ;;  %v5944_v26 = vld [vmem:[%s8283_s28 + $0x668] sm:$0xf]  ;;  %v5817_v34 = vor.u32 %v7731_v0, %v5816_v19  ;;  %v6041_v24 = vor.u32 %v7787_v15, %v6040_v6  ;;  %v7907_v41 = vld [vmem:[%s8283_s28 + $0xaf4] sm:$0xf0] }
 0x15f   : > { %4288 = vmatpush.bf16.msra.mxu2 %v6009_v28  ;;  %4257 = vmatmul.bf16.vlgmr.msrb.gmra.mxu3 %v8391_v23  ;;  %v7763_v28 = vld [vmem:[%s8283_s28 + $0x674] sm:$0xf0]  ;;  %v5896_v19 = vld [vmem:[%s8283_s28 + $0x608] sm:$0xf] }
 0x160   : > { %4301 = vmatpush.bf16.msra.mxu3 %v6137_v32  ;;  %v5689_v32 = vor.u32 %v7699_v14, %v5688_v12  ;;  %v5945_v33 = vor.u32 %v7763_v28, %v5944_v26  ;;  %v5768_v12 = vld [vmem:[%s8283_s28 + $0x508] sm:$0xf]  ;;  %v7719_v14 = vld [vmem:[%s8283_s28 + $0x514] sm:$0xf0] }
 0x161   : > { %4263 = vmatpush.bf16.msra.mxu0 %v5737_v38  ;;  %v4037_v37 = vpop.f32.mrf.mxu2  ;;  %v6073_v38 = vor.u32 %v7795_v30, %v6072_v29  ;;  %v4013_v52 = vpop.f32.mrf.mxu0  ;;  %v6024_v0 = vld [vmem:[%s8283_s28 + $0x708] sm:$0xf]  ;;  %v7783_v26 = vld [vmem:[%s8283_s28 + $0x714] sm:$0xf0]  ;;  %v5769_v35 = vor.u32 %v7719_v14, %v5768_v12 }
 0x162   : > { %4276 = vmatpush.bf16.msra.mxu1 %v5865_v39  ;;  %v7727_v39 = vld [vmem:[%s8283_s28 + $0x554] sm:$0xf0]  ;;  %v4038_v43 = vadd.f32 %v4037_v37, %v4025_v31  ;;  %v4050_v44 = vpop.f32.mrf.mxu3  ;;  %v4026_v58 = vpop.f32.mrf.mxu1  ;;  %v6264_v29 = vld [vmem:[%s8283_s28 + $0x8e8] sm:$0xf] }
 0x163   : > { %4289 = vmatpush.bf16.msra.mxu2 %v5993_v40  ;;  %v5928_v40 = vld [vmem:[%s8283_s28 + $0x648] sm:$0xf]  ;;  %v5801_v53 = vor.u32 %v7727_v39, %v5800_v36  ;;  %v7843_v30 = vld [vmem:[%s8283_s28 + $0x8f4] sm:$0xf0]  ;;  %v6025_v39 = vor.u32 %v7783_v26, %v6024_v0 }
 0x164   : > { %4302 = vmatpush.bf16.msra.mxu3 %v6121_v45  ;;  %v6056_v45 = vld [vmem:[%s8283_s28 + $0x748] sm:$0xf]  ;;  %v9062_v60 = vadd.f32 %v4050_v44, %v4038_v43  ;;  %v7871_v52 = vld [vmem:[%s8283_s28 + $0x9d4] sm:$0xf0] }
 0x165   : > { %4264 = vmatpush.bf16.msra.mxu0 %v5721_v54  ;;  %v5929_v54 = vor.u32 %v7759_v42, %v5928_v40  ;;  %v6057_v59 = vor.u32 %v7791_v46, %v6056_v45  ;;  %v6392_v31 = vld [vmem:[%s8283_s28 + $0x9e8] sm:$0xf]  ;;  %v6265_v40 = vor.u32 %v7843_v30, %v6264_v29  ;;  %v7839_v45 = vld [vmem:[%s8283_s28 + $0x8d4] sm:$0xf0] }
 0x166   : > { %4277 = vmatpush.bf16.msra.mxu1 %v5849_v55  ;;  %v5656_v55 = vld [vmem:[%s8283_s28 + $0x428] sm:$0xf]  ;;  %v7867_v15 = vld [vmem:[%s8283_s28 + $0x9b4] sm:$0xf0] }
 0x167   : > { %4290 = vmatpush.bf16.msra.mxu2 %v5977_v56  ;;  %v7691_v56 = vld [vmem:[%s8283_s28 + $0x434] sm:$0xf0]  ;;  %v6648_v37 = vld [vmem:[%s8283_s28 + $0xbe8] sm:$0xf] }
 0x168   : > { %4303 = vmatpush.bf16.msra.mxu3 %v6105_v62  ;;  %v7723_v62 = vld [vmem:[%s8283_s28 + $0x534] sm:$0xf0]  ;;  %v5657_v7 = vor.u32 %v7691_v56, %v5656_v55  ;;  %v6248_v44 = vld [vmem:[%s8283_s28 + $0x8c8] sm:$0xf] }
 0x169   : > { %4265 = vmatpush.bf16.msra.mxu0 %v5705_v8  ;;  %v5640_v8 = vld [vmem:[%s8283_s28 + $0x408] sm:$0xf]  ;;  %v4039_v20 = vpop.f32.mrf.mxu2  ;;  %v7935_v56 = vld [vmem:[%s8283_s28 + $0xbd4] sm:$0xf0] }
 0x16a   : > { %4278 = vmatpush.bf16.msra.mxu1 %v5833_v10  ;;  %v5785_v10 = vor.u32 %v7723_v62, %v5784_v57  ;;  %v4052_v28 = vpop.f32.mrf.mxu3  ;;  %v6376_v46 = vld [vmem:[%s8283_s28 + $0x9c8] sm:$0xf]  ;;  %v6249_v57 = vor.u32 %v7839_v45, %v6248_v44  ;;  %v7831_v20 = vld [vmem:[%s8283_s28 + $0x894] sm:$0xf0] }
 0x16b   : > { %4291 = vmatpush.bf16.msra.mxu2 %v5961_v11  ;;  %v5913_v11 = vor.u32 %v7755_v4, %v5912_v63  ;;  %v6632_v55 = vld [vmem:[%s8283_s28 + $0xbc8] sm:$0xf]  ;;  %v6377_v58 = vor.u32 %v7871_v52, %v6376_v46  ;;  %v7835_v63 = vld [vmem:[%s8283_s28 + $0x8b4] sm:$0xf0] }
 0x16c   : > { %4304 = vmatpush.bf16.msra.mxu3 %v6089_v25  ;;  %v7751_v25 = vld [vmem:[%s8283_s28 + $0x614] sm:$0xf0]  ;;  %v6232_v62 = vld [vmem:[%s8283_s28 + $0x8a8] sm:$0xf]  ;;  %v6633_v6 = vor.u32 %v7935_v56, %v6632_v55 }
 0x16d   : > { %4266 = vmatpush.bf16.msra.mxu0 %v5689_v32  ;;  %v5641_v32 = vor.u32 %v7687_v9, %v5640_v8  ;;  %v5897_v36 = vor.u32 %v7751_v25, %v5896_v19  ;;  %v6360_v4 = vld [vmem:[%s8283_s28 + $0x9a8] sm:$0xf]  ;;  %v7899_v8 = vld [vmem:[%s8283_s28 + $0xab4] sm:$0xf0] }
 0x16e   : > { %4279 = vmatpush.bf16.msra.mxu1 %v5817_v34  ;;  %v7875_v34 = vld [vmem:[%s8283_s28 + $0x9f4] sm:$0xf0]  ;;  %v6616_v9 = vld [vmem:[%s8283_s28 + $0xba8] sm:$0xf]  ;;  %v6361_v12 = vor.u32 %v7867_v15, %v6360_v4 }
 0x16f   : > { %4292 = vmatpush.bf16.msra.mxu2 %v5945_v33  ;;  %v6520_v33 = vld [vmem:[%s8283_s28 + $0xae8] sm:$0xf]  ;;  %v6393_v42 = vor.u32 %v7875_v34, %v6392_v31  ;;  %v7863_v0 = vld [vmem:[%s8283_s28 + $0x994] sm:$0xf0] }
 0x170   : > { %4305 = vmatpush.bf16.msra.mxu3 %v6073_v38  ;;  %v7939_v38 = vld [vmem:[%s8283_s28 + $0xbf4] sm:$0xf0]  ;;  %v6521_v43 = vor.u32 %v7907_v41, %v6520_v33  ;;  %v6216_v19 = vld [vmem:[%s8283_s28 + $0x888] sm:$0xf] }
 0x171   : > { %4267 = vmatpush.bf16.msra.mxu0 %v5673_v51  ;;  %v6649_v51 = vor.u32 %v7939_v38, %v6648_v37  ;;  %v6472_v26 = vld [vmem:[%s8283_s28 + $0xa88] sm:$0xf]  ;;  %v7895_v28 = vld [vmem:[%s8283_s28 + $0xa94] sm:$0xf0]  ;;  %v6217_v34 = vor.u32 %v7831_v20, %v6216_v19 }
 0x172   : > { %4280 = vmatpush.bf16.msra.mxu1 %v5801_v53  ;;  %v6504_v53 = vld [vmem:[%s8283_s28 + $0xac8] sm:$0xf]  ;;  %v7927_v31 = vld [vmem:[%s8283_s28 + $0xb94] sm:$0xf0] }
 0x173   : > { %4293 = vmatpush.bf16.msra.mxu2 %v5929_v54  ;;  %v7903_v54 = vld [vmem:[%s8283_s28 + $0xad4] sm:$0xf0]  ;;  %v6600_v30 = vld [vmem:[%s8283_s28 + $0xb88] sm:$0xf] }
 0x174   : > { %4306 = vmatpush.bf16.msra.mxu3 %v6057_v59  ;;  %v6505_v59 = vor.u32 %v7903_v54, %v6504_v53  ;;  %v7827_v37 = vld [vmem:[%s8283_s28 + $0x874] sm:$0xf0]  ;;  %v6328_v38 = vld [vmem:[%s8283_s28 + $0x968] sm:$0xf] }
 0x175   : > { %4268 = vmatpush.bf16.msra.mxu0 %v5657_v7  ;;  %v6488_v7 = vld [vmem:[%s8283_s28 + $0xaa8] sm:$0xf]  ;;  %v7923_v45 = vld [vmem:[%s8283_s28 + $0xb74] sm:$0xf0] }
 0x176   : > { %4281 = vmatpush.bf16.msra.mxu1 %v5785_v10  ;;  %v7931_v10 = vld [vmem:[%s8283_s28 + $0xbb4] sm:$0xf0]  ;;  %v6489_v14 = vor.u32 %v7899_v8, %v6488_v7  ;;  %v6584_v44 = vld [vmem:[%s8283_s28 + $0xb68] sm:$0xf] }
 0x177   : > { %4294 = vmatpush.bf16.msra.mxu2 %v5913_v11  ;;  %v6233_v11 = vor.u32 %v7835_v63, %v6232_v62  ;;  %v6617_v25 = vor.u32 %v7931_v10, %v6616_v9  ;;  %v6184_v53 = vld [vmem:[%s8283_s28 + $0x848] sm:$0xf]  ;;  %v7823_v54 = vld [vmem:[%s8283_s28 + $0x854] sm:$0xf0]  ;;  %v6585_v56 = vor.u32 %v7923_v45, %v6584_v44 }
 0x178   : > { %4307 = vmatpush.bf16.msra.mxu3 %v6041_v24  ;;  %v6344_v24 = vld [vmem:[%s8283_s28 + $0x988] sm:$0xf]  ;;  %v7887_v62 = vld [vmem:[%s8283_s28 + $0xa54] sm:$0xf0]  ;;  %v6185_v8 = vor.u32 %v7823_v54, %v6184_v53 }
 0x179   : > { %4269 = vmatpush.bf16.msra.mxu0 %v5641_v32  ;;  %v4063_v29 = vpop.f32.mrf.mxu0  ;;  %v6345_v41 = vor.u32 %v7863_v0, %v6344_v24  ;;  %v6312_v55 = vld [vmem:[%s8283_s28 + $0x948] sm:$0xf]  ;;  %v7919_v15 = vld [vmem:[%s8283_s28 + $0xb54] sm:$0xf0] }
 0x17a   : > { %4282 = vmatpush.bf16.msra.mxu1 %v5769_v35  ;;  %v4064_v32 = vadd.f32 %v4063_v29, %v9062_v60  ;;  %v4076_v33 = vpop.f32.mrf.mxu1  ;;  %v6473_v35 = vor.u32 %v7895_v28, %v6472_v26  ;;  %v7891_v60 = vld [vmem:[%s8283_s28 + $0xa74] sm:$0xf0]  ;;  %v6296_v20 = vld [vmem:[%s8283_s28 + $0x928] sm:$0xf] }
 0x17b   : > { %4295 = vmatpush.bf16.msra.mxu2 %v5897_v36  ;;  %v6200_v36 = vld [vmem:[%s8283_s28 + $0x868] sm:$0xf]  ;;  %v7819_v19 = vld [vmem:[%s8283_s28 + $0x834] sm:$0xf0] }
 0x17c   : > { %4308 = vmatpush.bf16.msra.mxu3 %v6025_v39  ;;  %4270 = vmatmul.bf16.vlgmr.msra.gmra.mxu0 %v8428_v1  ;;  %v6601_v39 = vor.u32 %v7927_v31, %v6600_v30  ;;  %v6201_v46 = vor.u32 %v7827_v37, %v6200_v36  ;;  %v6424_v0 = vld [vmem:[%s8283_s28 + $0xa28] sm:$0xf]  ;;  %v7883_v26 = vld [vmem:[%s8283_s28 + $0xa34] sm:$0xf0] }
 0x17d   : > { %4314 = vmatpush.bf16.msrb.mxu0 %v6265_v40  ;;  %4283 = vmatmul.bf16.vlgmr.msra.gmra.mxu1 %v8432_v3  ;;  %v4077_v40 = vadd.f32 %v4076_v33, %v4064_v32  ;;  %v6552_v28 = vld [vmem:[%s8283_s28 + $0xb28] sm:$0xf]  ;;  %v7915_v29 = vld [vmem:[%s8283_s28 + $0xb34] sm:$0xf0]  ;;  %v6425_v33 = vor.u32 %v7883_v26, %v6424_v0 }
 0x17e   : > { %4327 = vmatpush.bf16.msrb.mxu1 %v6393_v42  ;;  %4296 = vmatmul.bf16.vlgmr.msra.gmra.mxu2 %v8425_v61  ;;  %v7859_v42 = vld [vmem:[%s8283_s28 + $0x974] sm:$0xf0]  ;;  %v6152_v31 = vld [vmem:[%s8283_s28 + $0x808] sm:$0xf]  ;;  %v6553_v37 = vor.u32 %v7915_v29, %v6552_v28 }
 0x17f   : > { %4340 = vmatpush.bf16.msrb.mxu2 %v6521_v43  ;;  %4309 = vmatmul.bf16.vlgmr.msra.gmra.mxu3 %v8430_v2  ;;  %v6456_v43 = vld [vmem:[%s8283_s28 + $0xa68] sm:$0xf]  ;;  %v7815_v32 = vld [vmem:[%s8283_s28 + $0x814] sm:$0xf0] }
 0x180   : > { %4353 = vmatpush.bf16.msrb.mxu3 %v6649_v51  ;;  %v6329_v51 = vor.u32 %v7859_v42, %v6328_v38  ;;  %v6457_v52 = vor.u32 %v7891_v60, %v6456_v43  ;;  %v6408_v36 = vld [vmem:[%s8283_s28 + $0xa08] sm:$0xf]  ;;  %v7879_v38 = vld [vmem:[%s8283_s28 + $0xa14] sm:$0xf0] }
 0x181   : > { %4315 = vmatpush.bf16.msrb.mxu0 %v6249_v57  ;;  %v4089_v57 = vpop.f32.mrf.mxu2  ;;  %v4065_v7 = vpop.f32.mrf.mxu0  ;;  %v6776_v43 = vld [vmem:[%s8283_s28 + $0xce8] sm:$0xf]  ;;  %v7971_v60 = vld [vmem:[%s8283_s28 + $0xcf4] sm:$0xf0] }
 0x182   : > { %4328 = vmatpush.bf16.msrb.mxu1 %v6377_v58  ;;  %v7855_v58 = vld [vmem:[%s8283_s28 + $0x954] sm:$0xf0]  ;;  %v4090_v63 = vadd.f32 %v4089_v57, %v4077_v40  ;;  %v4102_v4 = vpop.f32.mrf.mxu3  ;;  %v4078_v9 = vpop.f32.mrf.mxu1  ;;  %v6904_v44 = vld [vmem:[%s8283_s28 + $0xde8] sm:$0xf] }
 0x183   : > { %4341 = vmatpush.bf16.msrb.mxu2 %v6505_v59  ;;  %v6440_v59 = vld [vmem:[%s8283_s28 + $0xa48] sm:$0xf]  ;;  %v7911_v40 = vld [vmem:[%s8283_s28 + $0xb14] sm:$0xf0] }
 0x184   : > { %4354 = vmatpush.bf16.msrb.mxu3 %v6633_v6  ;;  %v6568_v6 = vld [vmem:[%s8283_s28 + $0xb48] sm:$0xf]  ;;  %v9133_v10 = vadd.f32 %v4102_v4, %v4090_v63  ;;  %v8035_v53 = vld [vmem:[%s8283_s28 + $0xef4] sm:$0xf0] }
 0x185   : > { %4316 = vmatpush.bf16.msrb.mxu0 %v6233_v11  ;;  %v6313_v11 = vor.u32 %v7855_v58, %v6312_v55  ;;  %v6569_v24 = vor.u32 %v7919_v15, %v6568_v6  ;;  %v6409_v55 = vor.u32 %v7879_v38, %v6408_v36  ;;  %v8067_v57 = vld [vmem:[%s8283_s28 + $0xff4] sm:$0xf0]  ;;  %v6760_v4 = vld [vmem:[%s8283_s28 + $0xcc8] sm:$0xf] }
 0x186   : > { %4329 = vmatpush.bf16.msrb.mxu1 %v6361_v12  ;;  %v6441_v12 = vor.u32 %v7887_v62, %v6440_v59  ;;  %v6777_v59 = vor.u32 %v7971_v60, %v6776_v43  ;;  %v7967_v6 = vld [vmem:[%s8283_s28 + $0xcd4] sm:$0xf0]  ;;  %v6888_v15 = vld [vmem:[%s8283_s28 + $0xdc8] sm:$0xf] }
 0x187   : > { %4342 = vmatpush.bf16.msrb.mxu2 %v6489_v14  ;;  %v6168_v14 = vld [vmem:[%s8283_s28 + $0x828] sm:$0xf]  ;;  %v7963_v0 = vld [vmem:[%s8283_s28 + $0xcb4] sm:$0xf0] }
 0x188   : > { %4355 = vmatpush.bf16.msrb.mxu3 %v6617_v25  ;;  %v7851_v25 = vld [vmem:[%s8283_s28 + $0x934] sm:$0xf0]  ;;  %v6169_v30 = vor.u32 %v7819_v19, %v6168_v14  ;;  %v7016_v9 = vld [vmem:[%s8283_s28 + $0xec8] sm:$0xf]  ;;  %v6761_v19 = vor.u32 %v7967_v6, %v6760_v4 }
 0x189   : > { %4317 = vmatpush.bf16.msrb.mxu0 %v6217_v34  ;;  %v6297_v34 = vor.u32 %v7851_v25, %v6296_v20  ;;  %v4091_v42 = vpop.f32.mrf.mxu2  ;;  %v8063_v14 = vld [vmem:[%s8283_s28 + $0xfd4] sm:$0xf0]  ;;  %v6744_v25 = vld [vmem:[%s8283_s28 + $0xca8] sm:$0xf] }
 0x18a   : > { %4330 = vmatpush.bf16.msrb.mxu1 %v6345_v41  ;;  %v6280_v41 = vld [vmem:[%s8283_s28 + $0x908] sm:$0xf]  ;;  %v4104_v45 = vpop.f32.mrf.mxu3  ;;  %v7995_v29 = vld [vmem:[%s8283_s28 + $0xdb4] sm:$0xf0] }
 0x18b   : > { %4343 = vmatpush.bf16.msrb.mxu2 %v6473_v35  ;;  %v7847_v35 = vld [vmem:[%s8283_s28 + $0x914] sm:$0xf0]  ;;  %v6872_v26 = vld [vmem:[%s8283_s28 + $0xda8] sm:$0xf] }
 0x18c   : > { %4356 = vmatpush.bf16.msrb.mxu3 %v6601_v39  ;;  %v6536_v39 = vld [vmem:[%s8283_s28 + $0xb08] sm:$0xf]  ;;  %v6281_v54 = vor.u32 %v7847_v35, %v6280_v41  ;;  %v6873_v41 = vor.u32 %v7995_v29, %v6872_v26  ;;  %v8023_v43 = vld [vmem:[%s8283_s28 + $0xe94] sm:$0xf0] }
 0x18d   : > { %4318 = vmatpush.bf16.msrb.mxu0 %v6201_v46  ;;  %v6153_v46 = vor.u32 %v7815_v32, %v6152_v31  ;;  %v6537_v58 = vor.u32 %v7911_v40, %v6536_v39  ;;  %v8027_v31 = vld [vmem:[%s8283_s28 + $0xeb4] sm:$0xf0]  ;;  %v7128_v32 = vld [vmem:[%s8283_s28 + $0xfa8] sm:$0xf] }
 0x18e   : > { %4331 = vmatpush.bf16.msrb.mxu1 %v6329_v51  ;;  %v8003_v51 = vld [vmem:[%s8283_s28 + $0xdf4] sm:$0xf0]  ;;  %v6728_v36 = vld [vmem:[%s8283_s28 + $0xc88] sm:$0xf] }
 0x18f   : > { %4344 = vmatpush.bf16.msrb.mxu2 %v6457_v52  ;;  %v7032_v52 = vld [vmem:[%s8283_s28 + $0xee8] sm:$0xf]  ;;  %v6905_v62 = vor.u32 %v8003_v51, %v6904_v44  ;;  %v7991_v40 = vld [vmem:[%s8283_s28 + $0xd94] sm:$0xf0] }
 0x190   : > { %4357 = vmatpush.bf16.msrb.mxu3 %v6585_v56  ;;  %v7160_v56 = vld [vmem:[%s8283_s28 + $0xfe8] sm:$0xf]  ;;  %v7033_v63 = vor.u32 %v8035_v53, %v7032_v52  ;;  %v8055_v45 = vld [vmem:[%s8283_s28 + $0xf94] sm:$0xf0] }
 0x191   : > { %4319 = vmatpush.bf16.msrb.mxu0 %v6185_v8  ;;  %v7161_v7 = vor.u32 %v8067_v57, %v7160_v56  ;;  %v7999_v8 = vld [vmem:[%s8283_s28 + $0xdd4] sm:$0xf0]  ;;  %v6856_v38 = vld [vmem:[%s8283_s28 + $0xd88] sm:$0xf] }
 0x192   : > { %4332 = vmatpush.bf16.msrb.mxu1 %v6313_v11  ;;  %v8031_v11 = vld [vmem:[%s8283_s28 + $0xed4] sm:$0xf0]  ;;  %v6889_v20 = vor.u32 %v7999_v8, %v6888_v15  ;;  %v6984_v42 = vld [vmem:[%s8283_s28 + $0xe88] sm:$0xf]  ;;  %v6857_v53 = vor.u32 %v7991_v40, %v6856_v38 }
 0x193   : > { %4345 = vmatpush.bf16.msrb.mxu2 %v6441_v12  ;;  %v7144_v12 = vld [vmem:[%s8283_s28 + $0xfc8] sm:$0xf]  ;;  %v7955_v56 = vld [vmem:[%s8283_s28 + $0xc74] sm:$0xf0] }
 0x194   : > { %4358 = vmatpush.bf16.msrb.mxu3 %v6569_v24  ;;  %v7017_v24 = vor.u32 %v8031_v11, %v7016_v9  ;;  %v7145_v28 = vor.u32 %v8063_v14, %v7144_v12  ;;  %v7112_v44 = vld [vmem:[%s8283_s28 + $0xf88] sm:$0xf]  ;;  %v8051_v6 = vld [vmem:[%s8283_s28 + $0xf74] sm:$0xf0] }
 0x195   : > { %4320 = vmatpush.bf16.msrb.mxu0 %v6169_v30  ;;  %v7000_v30 = vld [vmem:[%s8283_s28 + $0xea8] sm:$0xf]  ;;  %v7951_v11 = vld [vmem:[%s8283_s28 + $0xc54] sm:$0xf0] }
 0x196   : > { %4333 = vmatpush.bf16.msrb.mxu1 %v6297_v34  ;;  %v8059_v34 = vld [vmem:[%s8283_s28 + $0xfb4] sm:$0xf0]  ;;  %v7001_v35 = vor.u32 %v8027_v31, %v7000_v30  ;;  %v6840_v57 = vld [vmem:[%s8283_s28 + $0xd68] sm:$0xf] }
 0x197   : > { %4346 = vmatpush.bf16.msrb.mxu2 %v6425_v33  ;;  %v6745_v33 = vor.u32 %v7963_v0, %v6744_v25  ;;  %v7129_v39 = vor.u32 %v8059_v34, %v7128_v32  ;;  %v7096_v4 = vld [vmem:[%s8283_s28 + $0xf68] sm:$0xf]  ;;  %v8015_v25 = vld [vmem:[%s8283_s28 + $0xe54] sm:$0xf0] }
 0x198   : > { %4359 = vmatpush.bf16.msrb.mxu3 %v6553_v37  ;;  %v7959_v37 = vld [vmem:[%s8283_s28 + $0xc94] sm:$0xf0]  ;;  %v6696_v9 = vld [vmem:[%s8283_s28 + $0xc48] sm:$0xf]  ;;  %v7097_v14 = vor.u32 %v8051_v6, %v7096_v4 }
 0x199   : > { %4321 = vmatpush.bf16.msrb.mxu0 %v6153_v46  ;;  %v4115_v60 = vpop.f32.mrf.mxu0  ;;  %v6729_v51 = vor.u32 %v7959_v37, %v6728_v36  ;;  %v6824_v12 = vld [vmem:[%s8283_s28 + $0xd48] sm:$0xf]  ;;  %v8047_v29 = vld [vmem:[%s8283_s28 + $0xf54] sm:$0xf0]  ;;  %v6697_v31 = vor.u32 %v7951_v11, %v6696_v9  ;;  %v5242_v9 = vld [vmem:[%s8283_s28 + $0xf8] sm:$0xf0] }
 0x19a   : > { %4334 = vmatpush.bf16.msrb.mxu1 %v6281_v54  ;;  %v4116_v46 = vadd.f32 %v4115_v60, %v9133_v10  ;;  %v4128_v52 = vpop.f32.mrf.mxu1  ;;  %v6985_v54 = vor.u32 %v8023_v43, %v6984_v42  ;;  %v8019_v10 = vld [vmem:[%s8283_s28 + $0xe74] sm:$0xf0]  ;;  %v6808_v37 = vld [vmem:[%s8283_s28 + $0xd28] sm:$0xf] }
 0x19b   : > { %4347 = vmatpush.bf16.msrb.mxu2 %v6409_v55  ;;  %v6712_v55 = vld [vmem:[%s8283_s28 + $0xc68] sm:$0xf]  ;;  %v7947_v36 = vld [vmem:[%s8283_s28 + $0xc34] sm:$0xf0] }
 0x19c   : > { %4360 = vmatpush.bf16.msrb.mxu3 %v6537_v58  ;;  %4322 = vmatmul.bf16.vlgmr.msrb.gmra.mxu0 %v8518_v13  ;;  %v7113_v58 = vor.u32 %v8055_v45, %v7112_v44  ;;  %v6713_v15 = vor.u32 %v7955_v56, %v6712_v55  ;;  %v6936_v40 = vld [vmem:[%s8283_s28 + $0xe28] sm:$0xf]  ;;  %v8011_v42 = vld [vmem:[%s8283_s28 + $0xe34] sm:$0xf0] }
 0x19d   : > { %4366 = vmatpush.bf16.msra.mxu0 %v6777_v59  ;;  %4335 = vmatmul.bf16.vlgmr.msrb.gmra.mxu1 %v8524_v17  ;;  %v4129_v59 = vadd.f32 %v4128_v52, %v4116_v46  ;;  %v7064_v43 = vld [vmem:[%s8283_s28 + $0xf28] sm:$0xf]  ;;  %v8043_v60 = vld [vmem:[%s8283_s28 + $0xf34] sm:$0xf0]  ;;  %v6937_v52 = vor.u32 %v8011_v42, %v6936_v40 }
 0x19e   : > { %4379 = vmatpush.bf16.msra.mxu1 %v6905_v62  ;;  %4348 = vmatmul.bf16.vlgmr.msrb.gmra.mxu2 %v8522_v16  ;;  %v7987_v62 = vld [vmem:[%s8283_s28 + $0xd74] sm:$0xf0]  ;;  %v6664_v45 = vld [vmem:[%s8283_s28 + $0xc08] sm:$0xf]  ;;  %v7065_v56 = vor.u32 %v8043_v60, %v7064_v43 }
 0x19f   : > { %4392 = vmatpush.bf16.msra.mxu2 %v7033_v63  ;;  %4361 = vmatmul.bf16.vlgmr.msrb.gmra.mxu3 %v8526_v18  ;;  %v6968_v63 = vld [vmem:[%s8283_s28 + $0xe68] sm:$0xf]  ;;  %v7943_v46 = vld [vmem:[%s8283_s28 + $0xc14] sm:$0xf0] }
 0x1a0   : > { %4405 = vmatpush.bf16.msra.mxu3 %v7161_v7  ;;  %v6841_v7 = vor.u32 %v7987_v62, %v6840_v57  ;;  %v6969_v8 = vor.u32 %v8019_v10, %v6968_v63  ;;  %v6920_v55 = vld [vmem:[%s8283_s28 + $0xe08] sm:$0xf]  ;;  %v8007_v57 = vld [vmem:[%s8283_s28 + $0xe14] sm:$0xf0] }
 0x1a1   : > { %4367 = vmatpush.bf16.msra.mxu0 %v6761_v19  ;;  %v4141_v19 = vpop.f32.mrf.mxu2  ;;  %v4117_v30 = vpop.f32.mrf.mxu0  ;;  %v7288_v63 = vld [vmem:[%s8283_s28 + $0x10e8] sm:$0xf]  ;;  %v8099_v10 = vld [vmem:[%s8283_s28 + $0x10f4] sm:$0xf0] }
 0x1a2   : > { %4380 = vmatpush.bf16.msra.mxu1 %v6889_v20  ;;  %v7983_v20 = vld [vmem:[%s8283_s28 + $0xd54] sm:$0xf0]  ;;  %v4142_v0 = vadd.f32 %v4141_v19, %v4129_v59  ;;  %v4154_v26 = vpop.f32.mrf.mxu3  ;;  %v4130_v32 = vpop.f32.mrf.mxu1  ;;  %v7416_v4 = vld [vmem:[%s8283_s28 + $0x11e8] sm:$0xf]  ;;  %v5370_v19 = vld [vmem:[%s8283_s28 + $0x1f8] sm:$0xf0] }
 0x1a3   : > { %4393 = vmatpush.bf16.msra.mxu2 %v7017_v24  ;;  %v6952_v24 = vld [vmem:[%s8283_s28 + $0xe48] sm:$0xf]  ;;  %v8039_v59 = vld [vmem:[%s8283_s28 + $0xf14] sm:$0xf0]  ;;  %v7581_v32 = vld [vmem:[%s8283_s28 + $0xcc] sm:$0xf] }
 0x1a4   : > { %4406 = vmatpush.bf16.msra.mxu3 %v7145_v28  ;;  %v7080_v28 = vld [vmem:[%s8283_s28 + $0xf48] sm:$0xf]  ;;  %v9204_v34 = vadd.f32 %v4154_v26, %v4142_v0  ;;  %v8091_v40 = vld [vmem:[%s8283_s28 + $0x10b4] sm:$0xf0] }
 0x1a5   : > { %4368 = vmatpush.bf16.msra.mxu0 %v6745_v33  ;;  %v6825_v33 = vor.u32 %v7983_v20, %v6824_v12  ;;  %v7081_v38 = vor.u32 %v8047_v29, %v7080_v28  ;;  %v6921_v12 = vor.u32 %v8007_v57, %v6920_v55  ;;  %v7272_v26 = vld [vmem:[%s8283_s28 + $0x10c8] sm:$0xf]  ;;  %v8095_v28 = vld [vmem:[%s8283_s28 + $0x10d4] sm:$0xf0] }
 0x1a6   : > { %4381 = vmatpush.bf16.msra.mxu1 %v6873_v41  ;;  %v6953_v41 = vor.u32 %v8015_v25, %v6952_v24  ;;  %v7289_v24 = vor.u32 %v8099_v10, %v7288_v63  ;;  %v7400_v29 = vld [vmem:[%s8283_s28 + $0x11c8] sm:$0xf]  ;;  %v8123_v60 = vld [vmem:[%s8283_s28 + $0x11b4] sm:$0xf0]  ;;  %v5194_v63 = vld [vmem:[%s8283_s28 + $0x98] sm:$0xf0] }
 0x1a7   : > { %4394 = vmatpush.bf16.msra.mxu2 %v7001_v35  ;;  %v6680_v35 = vld [vmem:[%s8283_s28 + $0xc28] sm:$0xf] }
 0x1a8   : > { %4407 = vmatpush.bf16.msra.mxu3 %v7129_v39  ;;  %v7979_v39 = vld [vmem:[%s8283_s28 + $0xd34] sm:$0xf0]  ;;  %v6681_v44 = vor.u32 %v7947_v36, %v6680_v35  ;;  %v5354_v35 = vld [vmem:[%s8283_s28 + $0x1d8] sm:$0xf0]  ;;  %v7273_v36 = vor.u32 %v8095_v28, %v7272_v26  ;;  %v7384_v42 = vld [vmem:[%s8283_s28 + $0x11a8] sm:$0xf] }
 0x1a9   : > { %4369 = vmatpush.bf16.msra.mxu0 %v6729_v51  ;;  %v6809_v51 = vor.u32 %v7979_v39, %v6808_v37  ;;  %v4143_v62 = vpop.f32.mrf.mxu2  ;;  %v7256_v39 = vld [vmem:[%s8283_s28 + $0x10a8] sm:$0xf]  ;;  %v7601_v26 = vld [vmem:[%s8283_s28 + $0x16c] sm:$0xf]  ;;  %v5306_v28 = vld [vmem:[%s8283_s28 + $0x178] sm:$0xf0] }
 0x1aa   : > { %4382 = vmatpush.bf16.msra.mxu1 %v6857_v53  ;;  %v6792_v53 = vld [vmem:[%s8283_s28 + $0xd08] sm:$0xf]  ;;  %v4156_v6 = vpop.f32.mrf.mxu3  ;;  %v7573_v62 = vld [vmem:[%s8283_s28 + $0x8c] sm:$0xf] }
 0x1ab   : > { %4395 = vmatpush.bf16.msra.mxu2 %v6985_v54  ;;  %v7975_v54 = vld [vmem:[%s8283_s28 + $0xd14] sm:$0xf0]  ;;  %v7240_v55 = vld [vmem:[%s8283_s28 + $0x1088] sm:$0xf]  ;;  %v5322_v6 = vld [vmem:[%s8283_s28 + $0x198] sm:$0xf0] }
 0x1ac   : > { %4408 = vmatpush.bf16.msra.mxu3 %v7113_v58  ;;  %v7048_v58 = vld [vmem:[%s8283_s28 + $0xf08] sm:$0xf]  ;;  %v6793_v11 = vor.u32 %v7975_v54, %v6792_v53  ;;  %v7385_v53 = vor.u32 %v8123_v60, %v7384_v42  ;;  %v5290_v60 = vld [vmem:[%s8283_s28 + $0x158] sm:$0xf0] }
 0x1ad   : > { %4370 = vmatpush.bf16.msra.mxu0 %v6713_v15  ;;  %v6665_v15 = vor.u32 %v7943_v46, %v6664_v45  ;;  %v7049_v20 = vor.u32 %v8039_v59, %v7048_v58  ;;  %v5210_v45 = vld [vmem:[%s8283_s28 + $0xb8] sm:$0xf0]  ;;  %v7609_v46 = vld [vmem:[%s8283_s28 + $0x1ac] sm:$0xf]  ;;  %v7368_v57 = vld [vmem:[%s8283_s28 + $0x1188] sm:$0xf] }
 0x1ae   : > { %4383 = vmatpush.bf16.msra.mxu1 %v6841_v7  ;;  %v8131_v7 = vld [vmem:[%s8283_s28 + $0x11f4] sm:$0xf0] }
 0x1af   : > { %4396 = vmatpush.bf16.msra.mxu2 %v6969_v8  ;;  %v7585_v8 = vld [vmem:[%s8283_s28 + $0xec] sm:$0xf]  ;;  %v7417_v25 = vor.u32 %v8131_v7, %v7416_v4  ;;  %v8119_v59 = vld [vmem:[%s8283_s28 + $0x1194] sm:$0xf0] }
 0x1b0   : > { %4409 = vmatpush.bf16.msra.mxu3 %v7097_v14  ;;  %v7617_v14 = vld [vmem:[%s8283_s28 + $0x1ec] sm:$0xf]  ;;  %v5245_v0 = vor.u32 %v7585_v8, %v5242_v9  ;;  %v7369_v9 = vor.u32 %v8119_v59, %v7368_v57 }
 0x1b1   : > { %4371 = vmatpush.bf16.msra.mxu0 %v6697_v31  ;;  %v5373_v30 = vor.u32 %v7617_v14, %v5370_v19  ;;  %v8127_v31 = vld [vmem:[%s8283_s28 + $0x11d4] sm:$0xf0]  ;;  %v7605_v4 = vld [vmem:[%s8283_s28 + $0x18c] sm:$0xf]  ;;  %v7352_v19 = vld [vmem:[%s8283_s28 + $0x1168] sm:$0xf] }
 0x1b2   : > { %4384 = vmatpush.bf16.msra.mxu1 %v6825_v33  ;;  %v5226_v33 = vld [vmem:[%s8283_s28 + $0xd8] sm:$0xf0]  ;;  %v7401_v37 = vor.u32 %v8127_v31, %v7400_v29  ;;  %v8083_v14 = vld [vmem:[%s8283_s28 + $0x1074] sm:$0xf0]  ;;  %v7561_v59 = vld [vmem:[%s8283_s28 + $0x2c] sm:$0xf] }
 0x1b3   : > { %4397 = vmatpush.bf16.msra.mxu2 %v6953_v41  ;;  %v7613_v41 = vld [vmem:[%s8283_s28 + $0x1cc] sm:$0xf] }
 0x1b4   : > { %4410 = vmatpush.bf16.msra.mxu3 %v7081_v38  ;;  %v5229_v38 = vor.u32 %v7581_v32, %v5226_v33  ;;  %v5357_v43 = vor.u32 %v7613_v41, %v5354_v35  ;;  %v7208_v32 = vld [vmem:[%s8283_s28 + $0x1048] sm:$0xf]  ;;  %v8079_v33 = vld [vmem:[%s8283_s28 + $0x1054] sm:$0xf0]  ;;  %v5309_v35 = vor.u32 %v7601_v26, %v5306_v28  ;;  %v5498_v26 = vld [vmem:[%s8283_s28 + $0x2f8] sm:$0xf0] }
 0x1b5   : > { %4372 = vmatpush.bf16.msra.mxu0 %v6681_v44  ;;  %v7577_v44 = vld [vmem:[%s8283_s28 + $0xac] sm:$0xf]  ;;  %v7336_v41 = vld [vmem:[%s8283_s28 + $0x1148] sm:$0xf] }
 0x1b6   : > { %4385 = vmatpush.bf16.msra.mxu1 %v6809_v51  ;;  %v5338_v51 = vld [vmem:[%s8283_s28 + $0x1b8] sm:$0xf0]  ;;  %v5213_v54 = vor.u32 %v7577_v44, %v5210_v45  ;;  %v7209_v45 = vor.u32 %v8079_v33, %v7208_v32  ;;  %v7681_v28 = vld [vmem:[%s8283_s28 + $0x3ec] sm:$0xf] }
 0x1b7   : > { %4398 = vmatpush.bf16.msra.mxu2 %v6937_v52  ;;  %v7257_v52 = vor.u32 %v8091_v40, %v7256_v39  ;;  %v5341_v58 = vor.u32 %v7609_v46, %v5338_v51  ;;  %v5162_v39 = vld [vmem:[%s8283_s28 + $0x58] sm:$0xf0]  ;;  %v7713_v32 = vld [vmem:[%s8283_s28 + $0x4ec] sm:$0xf] }
 0x1b8   : > { %4411 = vmatpush.bf16.msra.mxu3 %v7065_v56  ;;  %v8087_v56 = vld [vmem:[%s8283_s28 + $0x1094] sm:$0xf0]  ;;  %v5754_v33 = vld [vmem:[%s8283_s28 + $0x4f8] sm:$0xf0] }
 0x1b9   : > { %4373 = vmatpush.bf16.msra.mxu0 %v6665_v15  ;;  %v4167_v10 = vpop.f32.mrf.mxu0  ;;  %v7241_v7 = vor.u32 %v8087_v56, %v7240_v55  ;;  %v8075_v55 = vld [vmem:[%s8283_s28 + $0x1034] sm:$0xf0]  ;;  %v7320_v56 = vld [vmem:[%s8283_s28 + $0x1128] sm:$0xf] }
 0x1ba   : > { %4386 = vmatpush.bf16.msra.mxu1 %v6793_v11  ;;  %v4168_v15 = vadd.f32 %v4167_v10, %v9204_v34  ;;  %v4180_v8 = vpop.f32.mrf.mxu1  ;;  %v5197_v11 = vor.u32 %v7573_v62, %v5194_v63  ;;  %v5178_v34 = vld [vmem:[%s8283_s28 + $0x78] sm:$0xf0]  ;;  %v7593_v10 = vld [vmem:[%s8283_s28 + $0x12c] sm:$0xf] }
 0x1bb   : > { %4399 = vmatpush.bf16.msra.mxu2 %v6921_v12  ;;  %v7224_v12 = vld [vmem:[%s8283_s28 + $0x1068] sm:$0xf]  ;;  %v5146_v62 = vld [vmem:[%s8283_s28 + $0x38] sm:$0xf0] }
 0x1bc   : > { %4412 = vmatpush.bf16.msra.mxu3 %v7049_v20  ;;  %4374 = vmatmul.bf16.vlgmr.msra.gmra.mxu0 %v8584_v47  ;;  %v5325_v20 = vor.u32 %v7605_v4, %v5322_v6  ;;  %v7225_v29 = vor.u32 %v8083_v14, %v7224_v12  ;;  %v5274_v4 = vld [vmem:[%s8283_s28 + $0x138] sm:$0xf0]  ;;  %v7304_v12 = vld [vmem:[%s8283_s28 + $0x1108] sm:$0xf]  ;;  %v8103_v14 = vld [vmem:[%s8283_s28 + $0x1114] sm:$0xf0] }
 0x1bd   : > { %4418 = vmatpush.bf16.msrb.mxu0 %v7289_v24  ;;  %4387 = vmatmul.bf16.vlgmr.msra.gmra.mxu1 %v8588_v49  ;;  %v4181_v24 = vadd.f32 %v4180_v8, %v4168_v15  ;;  %v7176_v15 = vld [vmem:[%s8283_s28 + $0x1008] sm:$0xf] }
 0x1be   : > { %4431 = vmatpush.bf16.msrb.mxu1 %v7417_v25  ;;  %4400 = vmatmul.bf16.vlgmr.msra.gmra.mxu2 %v8586_v48  ;;  %v8115_v25 = vld [vmem:[%s8283_s28 + $0x1174] sm:$0xf0] }
 0x1bf   : > { %4444 = vmatpush.bf16.msrb.mxu2 %v5245_v0  ;;  %4413 = vmatmul.bf16.vlgmr.msra.gmra.mxu3 %v8590_v50  ;;  %v7569_v0 = vld [vmem:[%s8283_s28 + $0x6c] sm:$0xf] }
 0x1c0   : > { %4457 = vmatpush.bf16.msrb.mxu3 %v5373_v30  ;;  %v7353_v30 = vor.u32 %v8115_v25, %v7352_v19  ;;  %v5181_v31 = vor.u32 %v7569_v0, %v5178_v34  ;;  %v7557_v19 = vld [vmem:[%s8283_s28 + $0xc] sm:$0xf]  ;;  %v5258_v0 = vld [vmem:[%s8283_s28 + $0x118] sm:$0xf0] }
 0x1c1   : > { %4419 = vmatpush.bf16.msrb.mxu0 %v7273_v36  ;;  %v4193_v36 = vpop.f32.mrf.mxu2  ;;  %v4169_v44 = vpop.f32.mrf.mxu0  ;;  %v7589_v25 = vld [vmem:[%s8283_s28 + $0x10c] sm:$0xf] }
 0x1c2   : > { %4432 = vmatpush.bf16.msrb.mxu1 %v7401_v37  ;;  %v8111_v37 = vld [vmem:[%s8283_s28 + $0x1154] sm:$0xf0]  ;;  %v4194_v40 = vadd.f32 %v4193_v36, %v4181_v24  ;;  %v4206_v42 = vpop.f32.mrf.mxu3  ;;  %v4182_v46 = vpop.f32.mrf.mxu1  ;;  %v5130_v24 = vld [vmem:[%s8283_s28 + $0x18] sm:$0xf0]  ;;  %v7649_v34 = vld [vmem:[%s8283_s28 + $0x2ec] sm:$0xf] }
 0x1c3   : > { %4445 = vmatpush.bf16.msrb.mxu2 %v5229_v38  ;;  %v7565_v38 = vld [vmem:[%s8283_s28 + $0x4c] sm:$0xf]  ;;  %v5610_v46 = vld [vmem:[%s8283_s28 + $0x3d8] sm:$0xf0] }
 0x1c4   : > { %4458 = vmatpush.bf16.msrb.mxu3 %v5357_v43  ;;  %v7597_v43 = vld [vmem:[%s8283_s28 + $0x14c] sm:$0xf]  ;;  %v4207_v51 = vadd.f32 %v4206_v42, %v4194_v40  ;;  %v5757_v42 = vor.u32 %v7713_v32, %v5754_v33  ;;  %v5434_v33 = vld [vmem:[%s8283_s28 + $0x278] sm:$0xf0] }
 0x1c5   : > { %4420 = vmatpush.bf16.msrb.mxu0 %v7257_v52  ;;  %v7337_v52 = vor.u32 %v8111_v37, %v7336_v41  ;;  %v5293_v57 = vor.u32 %v7597_v43, %v5290_v60  ;;  %v7305_v41 = vor.u32 %v8103_v14, %v7304_v12  ;;  %v7745_v36 = vld [vmem:[%s8283_s28 + $0x5ec] sm:$0xf]  ;;  %v5882_v37 = vld [vmem:[%s8283_s28 + $0x5f8] sm:$0xf0] }
 0x1c6   : > { %4433 = vmatpush.bf16.msrb.mxu1 %v7385_v53  ;;  %v5165_v53 = vor.u32 %v7565_v38, %v5162_v39  ;;  %v4682_v63 = vrot.slane %v4207_v51, 6  ;;  %v5261_v38 = vor.u32 %v7589_v25, %v5258_v0  ;;  %v5501_v39 = vor.u32 %v7649_v34, %v5498_v26  ;;  %v7645_v43 = vld [vmem:[%s8283_s28 + $0x2cc] sm:$0xf]  ;;  %v5482_v60 = vld [vmem:[%s8283_s28 + $0x2d8] sm:$0xf0] }
 0x1c7   : > { %4446 = vmatpush.bf16.msrb.mxu2 %v5213_v54  ;;  %v7192_v54 = vld [vmem:[%s8283_s28 + $0x1028] sm:$0xf]  ;;  %v7677_v44 = vld [vmem:[%s8283_s28 + $0x3cc] sm:$0xf]  ;;  %v5706_v34 = vld [vmem:[%s8283_s28 + $0x498] sm:$0xf0] }
 0x1c8   : > { %4459 = vmatpush.bf16.msrb.mxu3 %v5341_v58  ;;  %v8107_v58 = vld [vmem:[%s8283_s28 + $0x1134] sm:$0xf0]  ;;  %v7193_v6 = vor.u32 %v8075_v55, %v7192_v54  ;;  %v9287_v8 = vsel %vm4685_vm0, %v8976_v5, %v4682_v63  ;;  %v7709_v51 = vld [vmem:[%s8283_s28 + $0x4cc] sm:$0xf]  ;;  %v5866_v54 = vld [vmem:[%s8283_s28 + $0x5d8] sm:$0xf0]  ;;  %v5485_v55 = vor.u32 %v7645_v43, %v5482_v60 }
 0x1c9   : > { %4421 = vmatpush.bf16.msrb.mxu0 %v7241_v7  ;;  %v8071_v7 = vld [vmem:[%s8283_s28 + $0x1014] sm:$0xf0]  ;;  %v4195_v5 = vpop.f32.mrf.mxu2  ;;  %v8182_v63 = vld [vmem:[#allocation1] sm:$0xff]  ;;  %v7669_v25 = vld [vmem:[%s8283_s28 + $0x38c] sm:$0xf] }
 0x1ca   : > { %4434 = vmatpush.bf16.msrb.mxu1 %v7369_v9  ;;  %v7321_v9 = vor.u32 %v8107_v58, %v7320_v56  ;;  %v5613_v56 = vor.u32 %v7677_v44, %v5610_v46  ;;  %v7641_v58 = vld [vmem:[%s8283_s28 + $0x2ac] sm:$0xf]  ;;  %v5578_v5 = vld [vmem:[%s8283_s28 + $0x398] sm:$0xf0] }
 0x1cb   : > { %4447 = vmatpush.bf16.msrb.mxu2 %v5197_v11  ;;  %v5149_v11 = vor.u32 %v7561_v59, %v5146_v62  ;;  %v5466_v59 = vld [vmem:[%s8283_s28 + $0x2b8] sm:$0xf0]  ;;  %v7673_v62 = vld [vmem:[%s8283_s28 + $0x3ac] sm:$0xf] }
 0x1cc   : > { %4460 = vmatpush.bf16.msrb.mxu3 %v5325_v20  ;;  %v5277_v20 = vor.u32 %v7593_v10, %v5274_v4  ;;  %v5594_v4 = vld [vmem:[%s8283_s28 + $0x3b8] sm:$0xf0]  ;;  %v5469_v12 = vor.u32 %v7641_v58, %v5466_v59  ;;  %v7733_v26 = vld [vmem:[%s8283_s28 + $0x58c] sm:$0xf] }
 0x1cd   : > { %4422 = vmatpush.bf16.msrb.mxu0 %v7225_v29  ;;  %v4208_v29 = vpop.f32.mrf.mxu3  ;;  %v5597_v14 = vor.u32 %v7673_v62, %v5594_v4  ;;  %v7633_v32 = vld [vmem:[%s8283_s28 + $0x26c] sm:$0xf]  ;;  %v5818_v43 = vld [vmem:[%s8283_s28 + $0x578] sm:$0xf0] }
 0x1ce   : > { %4435 = vmatpush.bf16.msrb.mxu1 %v7353_v30  ;;  %v7177_v30 = vor.u32 %v8071_v7, %v7176_v15  ;;  %v5722_v15 = vld [vmem:[%s8283_s28 + $0x4b8] sm:$0xf0]  ;;  %v8183_v7 = vld [vmem:[#allocation1 + $0x9] sm:$0xff]  ;;  %v5437_v60 = vor.u32 %v7633_v32, %v5434_v33 }
 0x1cf   : > { %4448 = vmatpush.bf16.msrb.mxu2 %v5181_v31  ;;  %v5626_v31 = vld [vmem:[%s8283_s28 + $0x3f8] sm:$0xf0]  ;;  %v7629_v46 = vld [vmem:[%s8283_s28 + $0x24c] sm:$0xf] }
 0x1d0   : > { %4461 = vmatpush.bf16.msrb.mxu3 %v5309_v35  ;;  %v5133_v35 = vor.u32 %v7557_v19, %v5130_v24  ;;  %v5629_v40 = vor.u32 %v7681_v28, %v5626_v31  ;;  %v5450_v24 = vld [vmem:[%s8283_s28 + $0x298] sm:$0xf0]  ;;  %v7725_v62 = vld [vmem:[%s8283_s28 + $0x54c] sm:$0xf] }
 0x1d1   : > { %4423 = vmatpush.bf16.msrb.mxu0 %v7209_v45  ;;  %v5885_v45 = vor.u32 %v7745_v36, %v5882_v37  ;;  %v5834_v28 = vld [vmem:[%s8283_s28 + $0x598] sm:$0xf0] }
 0x1d2   : > { %4436 = vmatpush.bf16.msrb.mxu1 %v7337_v52  ;;  %v5738_v52 = vld [vmem:[%s8283_s28 + $0x4d8] sm:$0xf0]  ;;  %v5837_v36 = vor.u32 %v7733_v26, %v5834_v28 }
 0x1d3   : > { %4449 = vmatpush.bf16.msrb.mxu2 %v5165_v53  ;;  %v7741_v53 = vld [vmem:[%s8283_s28 + $0x5cc] sm:$0xf]  ;;  %v5562_v37 = vld [vmem:[%s8283_s28 + $0x378] sm:$0xf0] }
 0x1d4   : > { %4462 = vmatpush.bf16.msrb.mxu3 %v5293_v57  ;;  %v5741_v57 = vor.u32 %v7709_v51, %v5738_v52  ;;  %v5869_v10 = vor.u32 %v7741_v53, %v5866_v54  ;;  %v5418_v51 = vld [vmem:[%s8283_s28 + $0x258] sm:$0xf0]  ;;  %v7661_v52 = vld [vmem:[%s8283_s28 + $0x34c] sm:$0xf] }
 0x1d5   : > { %4424 = vmatpush.bf16.msrb.mxu0 %v7193_v6  ;;  %v7705_v6 = vld [vmem:[%s8283_s28 + $0x4ac] sm:$0xf]  ;;  %v5386_v26 = vld [vmem:[%s8283_s28 + $0x218] sm:$0xf0] }
 0x1d6   : > { %4437 = vmatpush.bf16.msrb.mxu1 %v7321_v9  ;;  %v7737_v9 = vld [vmem:[%s8283_s28 + $0x5ac] sm:$0xf]  ;;  %v5725_v19 = vor.u32 %v7705_v6, %v5722_v15 }
 0x1d7   : > { %4450 = vmatpush.bf16.msrb.mxu2 %v5149_v11  ;;  %v5850_v11 = vld [vmem:[%s8283_s28 + $0x5b8] sm:$0xf0] }
 0x1d8   : > { %4463 = vmatpush.bf16.msrb.mxu3 %v5277_v20  ;;  %v7637_v20 = vld [vmem:[%s8283_s28 + $0x28c] sm:$0xf]  ;;  %v5853_v0 = vor.u32 %v7737_v9, %v5850_v11  ;;  %v5402_v11 = vld [vmem:[%s8283_s28 + $0x238] sm:$0xf0] }
 0x1d9   : > { %4425 = vmatpush.bf16.msrb.mxu0 %v7177_v30  ;;  %v4219_v29 = vpop.f32.mrf.mxu0  ;;  %v5581_v30 = vor.u32 %v7669_v25, %v5578_v5  ;;  %v7625_v9 = vld [vmem:[%s8283_s28 + $0x22c] sm:$0xf]  ;;  %v5658_v25 = vld [vmem:[%s8283_s28 + $0x438] sm:$0xf0] }
 0x1da   : > { %4438 = vmatpush.bf16.msrb.mxu1 %v7305_v41  ;;  %v7665_v41 = vld [vmem:[%s8283_s28 + $0x36c] sm:$0xf]  ;;  %v5786_v5 = vld [vmem:[%s8283_s28 + $0x538] sm:$0xf0] }
 0x1db   : > { %4451 = vmatpush.bf16.msrb.mxu2 %v5133_v35  ;;  %v4232_v35 = vpop.f32.mrf.mxu1  ;;  %v5565_v44 = vor.u32 %v7665_v41, %v5562_v37  ;;  %v5642_v41 = vld [vmem:[%s8283_s28 + $0x418] sm:$0xf0] }
 0x1dc   : > { %4464 = vmatpush.bf16.msrb.mxu3 %v5261_v38  ;;  %4426 = vmatmul.bf16.vlgmr.msrb.gmra.mxu0 %v8182_v63  ;;  %v7697_v38 = vld [vmem:[%s8283_s28 + $0x46c] sm:$0xf]  ;;  %v5802_v63 = vld [vmem:[%s8283_s28 + $0x558] sm:$0xf0] }
 0x1dd   : > { %4470 = vmatpush.bf16.msra.mxu0 %v5501_v39  ;;  %4439 = vmatmul.bf16.vlgmr.msrb.gmra.mxu1 %v8183_v7  ;;  %v5690_v39 = vld [vmem:[%s8283_s28 + $0x478] sm:$0xf0] }
 0x1de   : > { %4483 = vmatpush.bf16.msra.mxu1 %v5629_v40  ;;  %4452 = vmatmul.bf16.vlgmr.msrb.gmra.mxu2 %v8389_v22  ;;  %v7701_v22 = vld [vmem:[%s8283_s28 + $0x48c] sm:$0xf]  ;;  %v4233_v40 = vadd.f32 %v4232_v35, %v4219_v29 }
 0x1df   : > { %4496 = vmatpush.bf16.msra.mxu2 %v5757_v42  ;;  %4465 = vmatmul.bf16.vlgmr.msrb.gmra.mxu3 %v8396_v27  ;;  %v5453_v27 = vor.u32 %v7637_v20, %v5450_v24  ;;  %v5709_v31 = vor.u32 %v7701_v22, %v5706_v34  ;;  %v7729_v42 = vld [vmem:[%s8283_s28 + $0x56c] sm:$0xf]  ;;  %v5530_v20 = vld [vmem:[%s8283_s28 + $0x338] sm:$0xf0]  ;;  %v5405_v22 = vor.u32 %v7625_v9, %v5402_v11 }
 0x1e0   : > { %4509 = vmatpush.bf16.msra.mxu3 %v5885_v45  ;;  %v5693_v45 = vor.u32 %v7697_v38, %v5690_v39  ;;  %v5821_v54 = vor.u32 %v7729_v42, %v5818_v43  ;;  %v7689_v24 = vld [vmem:[%s8283_s28 + $0x42c] sm:$0xf]  ;;  %v6010_v39 = vld [vmem:[%s8283_s28 + $0x6f8] sm:$0xf0] }
 0x1e1   : > { %4471 = vmatpush.bf16.msra.mxu0 %v5485_v55  ;;  %v4245_v53 = vpop.f32.mrf.mxu2  ;;  %v5546_v55 = vld [vmem:[%s8283_s28 + $0x358] sm:$0xf0]  ;;  %v4221_v6 = vpop.f32.mrf.mxu0  ;;  %v7621_v34 = vld [vmem:[%s8283_s28 + $0x20c] sm:$0xf] }
 0x1e2   : > { %4484 = vmatpush.bf16.msra.mxu1 %v5613_v56  ;;  %v7693_v56 = vld [vmem:[%s8283_s28 + $0x44c] sm:$0xf]  ;;  %v4246_v58 = vadd.f32 %v4245_v53, %v4233_v40  ;;  %v4258_v59 = vpop.f32.mrf.mxu3  ;;  %v5549_v15 = vor.u32 %v7661_v52, %v5546_v55  ;;  %v5389_v42 = vor.u32 %v7621_v34, %v5386_v26  ;;  %v6138_v43 = vld [vmem:[%s8283_s28 + $0x7f8] sm:$0xf0] }
 0x1e3   : > { %4497 = vmatpush.bf16.msra.mxu2 %v5741_v57  ;;  %v5674_v57 = vld [vmem:[%s8283_s28 + $0x458] sm:$0xf0]  ;;  %v7653_v29 = vld [vmem:[%s8283_s28 + $0x30c] sm:$0xf] }
 0x1e4   : > { %4510 = vmatpush.bf16.msra.mxu3 %v5869_v10  ;;  %v5421_v10 = vor.u32 %v7629_v46, %v5418_v51  ;;  %v9345_v4 = vadd.f32 %v4258_v59, %v4246_v58  ;;  %v5677_v7 = vor.u32 %v7693_v56, %v5674_v57  ;;  %v7717_v35 = vld [vmem:[%s8283_s28 + $0x50c] sm:$0xf]  ;;  %v6394_v52 = vld [vmem:[%s8283_s28 + $0x9f8] sm:$0xf0] }
 0x1e5   : > { %4472 = vmatpush.bf16.msra.mxu0 %v5469_v12  ;;  %v7657_v12 = vld [vmem:[%s8283_s28 + $0x32c] sm:$0xf]  ;;  %v5994_v58 = vld [vmem:[%s8283_s28 + $0x6d8] sm:$0xf0] }
 0x1e6   : > { %4485 = vmatpush.bf16.msra.mxu1 %v5597_v14  ;;  %v4234_v14 = vpop.f32.mrf.mxu1  ;;  %v5533_v28 = vor.u32 %v7657_v12, %v5530_v20  ;;  %v7777_v38 = vld [vmem:[%s8283_s28 + $0x6ec] sm:$0xf]  ;;  %v6250_v6 = vld [vmem:[%s8283_s28 + $0x8d8] sm:$0xf0] }
 0x1e7   : > { %4498 = vmatpush.bf16.msra.mxu2 %v5725_v19  ;;  %v5805_v19 = vor.u32 %v7725_v62, %v5802_v63  ;;  %v7809_v40 = vld [vmem:[%s8283_s28 + $0x7ec] sm:$0xf]  ;;  %v6122_v63 = vld [vmem:[%s8283_s28 + $0x7d8] sm:$0xf0] }
 0x1e8   : > { %4511 = vmatpush.bf16.msra.mxu3 %v5853_v0  ;;  %v7721_v0 = vld [vmem:[%s8283_s28 + $0x52c] sm:$0xf]  ;;  %v6141_v55 = vor.u32 %v7809_v40, %v6138_v43  ;;  %v6362_v34 = vld [vmem:[%s8283_s28 + $0x9b8] sm:$0xf0] }
 0x1e9   : > { %4473 = vmatpush.bf16.msra.mxu0 %v5453_v27  ;;  %v5661_v27 = vor.u32 %v7689_v24, %v5658_v25  ;;  %v4247_v32 = vpop.f32.mrf.mxu2  ;;  %v5789_v33 = vor.u32 %v7721_v0, %v5786_v5  ;;  %v7873_v51 = vld [vmem:[%s8283_s28 + $0x9ec] sm:$0xf]  ;;  %v6106_v25 = vld [vmem:[%s8283_s28 + $0x7b8] sm:$0xf0] }
 0x1ea   : > { %4486 = vmatpush.bf16.msra.mxu1 %v5581_v30  ;;  %v5514_v30 = vld [vmem:[%s8283_s28 + $0x318] sm:$0xf0]  ;;  %v4260_v37 = vpop.f32.mrf.mxu3  ;;  %v7773_v57 = vld [vmem:[%s8283_s28 + $0x6cc] sm:$0xf]  ;;  %v6397_v62 = vor.u32 %v7873_v51, %v6394_v52 }
 0x1eb   : > { %4499 = vmatpush.bf16.msra.mxu2 %v5709_v31  ;;  %v7685_v31 = vld [vmem:[%s8283_s28 + $0x40c] sm:$0xf]  ;;  %v5997_v9 = vor.u32 %v7773_v57, %v5994_v58  ;;  %v6234_v5 = vld [vmem:[%s8283_s28 + $0x8b8] sm:$0xf0] }
 0x1ec   : > { %4512 = vmatpush.bf16.msra.mxu3 %v5837_v36  ;;  %v5770_v36 = vld [vmem:[%s8283_s28 + $0x518] sm:$0xf0]  ;;  %v5645_v46 = vor.u32 %v7685_v31, %v5642_v41  ;;  %v7805_v59 = vld [vmem:[%s8283_s28 + $0x7cc] sm:$0xf] }
 0x1ed   : > { %4474 = vmatpush.bf16.msra.mxu0 %v5437_v60  ;;  %v7841_v60 = vld [vmem:[%s8283_s28 + $0x8ec] sm:$0xf]  ;;  %v5773_v53 = vor.u32 %v7717_v35, %v5770_v36  ;;  %v6125_v11 = vor.u32 %v7805_v59, %v6122_v63  ;;  %v6218_v32 = vld [vmem:[%s8283_s28 + $0x898] sm:$0xf0] }
 0x1ee   : > { %4487 = vmatpush.bf16.msra.mxu1 %v5565_v44  ;;  %v6266_v44 = vld [vmem:[%s8283_s28 + $0x8f8] sm:$0xf0]  ;;  %v7769_v14 = vld [vmem:[%s8283_s28 + $0x6ac] sm:$0xf] }
 0x1ef   : > { %4500 = vmatpush.bf16.msra.mxu2 %v5693_v45  ;;  %v5517_v45 = vor.u32 %v7653_v29, %v5514_v30  ;;  %v6269_v56 = vor.u32 %v7841_v60, %v6266_v44  ;;  %v7801_v20 = vld [vmem:[%s8283_s28 + $0x7ac] sm:$0xf]  ;;  %v5962_v29 = vld [vmem:[%s8283_s28 + $0x698] sm:$0xf0] }
 0x1f0   : > { %4513 = vmatpush.bf16.msra.mxu3 %v5821_v54  ;;  %v6013_v54 = vor.u32 %v7777_v38, %v6010_v39  ;;  %v7833_v0 = vld [vmem:[%s8283_s28 + $0x8ac] sm:$0xf]  ;;  %v6090_v30 = vld [vmem:[%s8283_s28 + $0x798] sm:$0xf0] }
 0x1f1   : > { %4475 = vmatpush.bf16.msra.mxu0 %v5421_v10  ;;  %v7837_v10 = vld [vmem:[%s8283_s28 + $0x8cc] sm:$0xf]  ;;  %v6346_v41 = vld [vmem:[%s8283_s28 + $0x998] sm:$0xf0] }
 0x1f2   : > { %4488 = vmatpush.bf16.msra.mxu1 %v5549_v15  ;;  %v7869_v15 = vld [vmem:[%s8283_s28 + $0x9cc] sm:$0xf]  ;;  %v6253_v12 = vor.u32 %v7837_v10, %v6250_v6  ;;  %v5946_v39 = vld [vmem:[%s8283_s28 + $0x678] sm:$0xf0] }
 0x1f3   : > { %4501 = vmatpush.bf16.msra.mxu2 %v5677_v7  ;;  %v6378_v7 = vld [vmem:[%s8283_s28 + $0x9d8] sm:$0xf0]  ;;  %v7829_v31 = vld [vmem:[%s8283_s28 + $0x88c] sm:$0xf] }
 0x1f4   : > { %4514 = vmatpush.bf16.msra.mxu3 %v5805_v19  ;;  %v5978_v19 = vld [vmem:[%s8283_s28 + $0x6b8] sm:$0xf0]  ;;  %v6381_v24 = vor.u32 %v7869_v15, %v6378_v7  ;;  %v6221_v37 = vor.u32 %v7829_v31, %v6218_v32  ;;  %v7761_v38 = vld [vmem:[%s8283_s28 + $0x66c] sm:$0xf] }
 0x1f5   : > { %4476 = vmatpush.bf16.msra.mxu0 %v5405_v22  ;;  %v7865_v22 = vld [vmem:[%s8283_s28 + $0x9ac] sm:$0xf]  ;;  %v5981_v26 = vor.u32 %v7769_v14, %v5978_v19  ;;  %v6074_v44 = vld [vmem:[%s8283_s28 + $0x778] sm:$0xf0] }
 0x1f6   : > { %4489 = vmatpush.bf16.msra.mxu1 %v5533_v28  ;;  %v6237_v28 = vor.u32 %v7833_v0, %v6234_v5  ;;  %v7793_v40 = vld [vmem:[%s8283_s28 + $0x76c] sm:$0xf]  ;;  %v6330_v52 = vld [vmem:[%s8283_s28 + $0x978] sm:$0xf0] }
 0x1f7   : > { %4502 = vmatpush.bf16.msra.mxu2 %v5661_v27  ;;  %v7765_v27 = vld [vmem:[%s8283_s28 + $0x68c] sm:$0xf]  ;;  %v5930_v57 = vld [vmem:[%s8283_s28 + $0x658] sm:$0xf0] }
 0x1f8   : > { %4515 = vmatpush.bf16.msra.mxu3 %v5789_v33  ;;  %v7861_v33 = vld [vmem:[%s8283_s28 + $0x98c] sm:$0xf]  ;;  %v6058_v63 = vld [vmem:[%s8283_s28 + $0x758] sm:$0xf0] }
 0x1f9   : > { %4477 = vmatpush.bf16.msra.mxu0 %v5389_v42  ;;  %v4271_v35 = vpop.f32.mrf.mxu0  ;;  %v6349_v60 = vor.u32 %v7861_v33, %v6346_v41  ;;  %v7857_v51 = vld [vmem:[%s8283_s28 + $0x96c] sm:$0xf]  ;;  %v6186_v6 = vld [vmem:[%s8283_s28 + $0x858] sm:$0xf0] }
 0x1fa   : > { %4490 = vmatpush.bf16.msra.mxu1 %v5517_v45  ;;  %v4272_v42 = vadd.f32 %v4271_v35, %v9345_v4  ;;  %v4284_v43 = vpop.f32.mrf.mxu1  ;;  %v7825_v45 = vld [vmem:[%s8283_s28 + $0x86c] sm:$0xf]  ;;  %v6077_v4 = vor.u32 %v7793_v40, %v6074_v44  ;;  %v5914_v0 = vld [vmem:[%s8283_s28 + $0x638] sm:$0xf0] }
 0x1fb   : > { %4503 = vmatpush.bf16.msra.mxu2 %v5645_v46  ;;  %v6202_v46 = vld [vmem:[%s8283_s28 + $0x878] sm:$0xf0]  ;;  %v7789_v58 = vld [vmem:[%s8283_s28 + $0x74c] sm:$0xf] }
 0x1fc   : > { %4516 = vmatpush.bf16.msra.mxu3 %v5773_v53  ;;  %4478 = vmatmul.bf16.vlgmr.msra.gmra.mxu0 %v8387_v21  ;;  %v7797_v21 = vld [vmem:[%s8283_s28 + $0x78c] sm:$0xf]  ;;  %v4285_v53 = vadd.f32 %v4284_v43, %v4272_v42  ;;  %v6026_v41 = vld [vmem:[%s8283_s28 + $0x718] sm:$0xf0] }
 0x1fd   : > { %4522 = vmatpush.bf16.msrb.mxu0 %v6013_v54  ;;  %4491 = vmatmul.bf16.vlgmr.msra.gmra.mxu1 %v8391_v23  ;;  %v5965_v23 = vor.u32 %v7765_v27, %v5962_v29  ;;  %v6093_v36 = vor.u32 %v7797_v21, %v6090_v30  ;;  %v5949_v54 = vor.u32 %v7761_v38, %v5946_v39  ;;  %v7821_v10 = vld [vmem:[%s8283_s28 + $0x84c] sm:$0xf]  ;;  %v6298_v29 = vld [vmem:[%s8283_s28 + $0x938] sm:$0xf0] }
 0x1fe   : > { %4535 = vmatpush.bf16.msrb.mxu1 %v6141_v55  ;;  %4504 = vmatmul.bf16.vlgmr.msra.gmra.mxu2 %v8428_v1  ;;  %v6109_v1 = vor.u32 %v7801_v20, %v6106_v25  ;;  %v6205_v55 = vor.u32 %v7825_v45, %v6202_v46  ;;  %v6061_v20 = vor.u32 %v7789_v58, %v6058_v63  ;;  %v7753_v25 = vld [vmem:[%s8283_s28 + $0x62c] sm:$0xf]  ;;  %v5898_v30 = vld [vmem:[%s8283_s28 + $0x618] sm:$0xf0] }
 0x1ff   : > { %4548 = vmatpush.bf16.msrb.mxu2 %v6269_v56  ;;  %4517 = vmatmul.bf16.vlgmr.msra.gmra.mxu3 %v8432_v3  ;;  %v6365_v3 = vor.u32 %v7865_v22, %v6362_v34  ;;  %v7757_v56 = vld [vmem:[%s8283_s28 + $0x64c] sm:$0xf]  ;;  %v5917_v21 = vor.u32 %v7753_v25, %v5914_v0  ;;  %v6282_v39 = vld [vmem:[%s8283_s28 + $0x918] sm:$0xf0] }
 0x200   : > { %4561 = vmatpush.bf16.msrb.mxu3 %v6397_v62  ;;  %v6333_v62 = vor.u32 %v7857_v51, %v6330_v52  ;;  %v7785_v5 = vld [vmem:[%s8283_s28 + $0x72c] sm:$0xf]  ;;  %v6522_v43 = vld [vmem:[%s8283_s28 + $0xaf8] sm:$0xf0] }
 0x201   : > { %4523 = vmatpush.bf16.msrb.mxu0 %v5997_v9  ;;  %v4297_v59 = vpop.f32.mrf.mxu2  ;;  %v7853_v9 = vld [vmem:[%s8283_s28 + $0x94c] sm:$0xf]  ;;  %v4273_v19 = vpop.f32.mrf.mxu0  ;;  %v6650_v45 = vld [vmem:[%s8283_s28 + $0xbf8] sm:$0xf0] }
 0x202   : > { %4536 = vmatpush.bf16.msrb.mxu1 %v6125_v11  ;;  %v4298_v15 = vadd.f32 %v4297_v59, %v4285_v53  ;;  %v4310_v7 = vpop.f32.mrf.mxu3  ;;  %v6314_v11 = vld [vmem:[%s8283_s28 + $0x958] sm:$0xf0]  ;;  %v4286_v22 = vpop.f32.mrf.mxu1  ;;  %v7849_v27 = vld [vmem:[%s8283_s28 + $0x92c] sm:$0xf] }
 0x203   : > { %4549 = vmatpush.bf16.msrb.mxu2 %v6253_v12  ;;  %v5933_v12 = vor.u32 %v7757_v56, %v5930_v57  ;;  %v6317_v34 = vor.u32 %v7853_v9, %v6314_v11  ;;  %v7781_v33 = vld [vmem:[%s8283_s28 + $0x70c] sm:$0xf]  ;;  %v6778_v51 = vld [vmem:[%s8283_s28 + $0xcf8] sm:$0xf0] }
 0x204   : > { %4562 = vmatpush.bf16.msrb.mxu3 %v6381_v24  ;;  %v9416_v14 = vadd.f32 %v4310_v7, %v4298_v15  ;;  %v6189_v24 = vor.u32 %v7821_v10, %v6186_v6  ;;  %v7845_v38 = vld [vmem:[%s8283_s28 + $0x90c] sm:$0xf]  ;;  %v6029_v52 = vor.u32 %v7781_v33, %v6026_v41  ;;  %v6634_v6 = vld [vmem:[%s8283_s28 + $0xbd8] sm:$0xf0] }
 0x205   : > { %4524 = vmatpush.bf16.msrb.mxu0 %v5981_v26  ;;  %v6042_v26 = vld [vmem:[%s8283_s28 + $0x738] sm:$0xf0]  ;;  %v7905_v42 = vld [vmem:[%s8283_s28 + $0xaec] sm:$0xf] }
 0x206   : > { %4537 = vmatpush.bf16.msrb.mxu1 %v6109_v1  ;;  %v7817_v1 = vld [vmem:[%s8283_s28 + $0x82c] sm:$0xf]  ;;  %v6045_v31 = vor.u32 %v7785_v5, %v6042_v26  ;;  %v6525_v56 = vor.u32 %v7905_v42, %v6522_v43  ;;  %v6762_v7 = vld [vmem:[%s8283_s28 + $0xcd8] sm:$0xf0] }
 0x207   : > { %4550 = vmatpush.bf16.msrb.mxu2 %v6237_v28  ;;  %v6170_v28 = vld [vmem:[%s8283_s28 + $0x838] sm:$0xf0]  ;;  %v7969_v46 = vld [vmem:[%s8283_s28 + $0xcec] sm:$0xf] }
 0x208   : > { %4563 = vmatpush.bf16.msrb.mxu3 %v6365_v3  ;;  %v7749_v3 = vld [vmem:[%s8283_s28 + $0x60c] sm:$0xf]  ;;  %v6173_v32 = vor.u32 %v7817_v1, %v6170_v28  ;;  %v6781_v58 = vor.u32 %v7969_v46, %v6778_v51  ;;  %v6890_v11 = vld [vmem:[%s8283_s28 + $0xdd8] sm:$0xf0] }
 0x209   : > { %4525 = vmatpush.bf16.msrb.mxu0 %v5965_v23  ;;  %v7813_v23 = vld [vmem:[%s8283_s28 + $0x80c] sm:$0xf]  ;;  %v4299_v35 = vpop.f32.mrf.mxu2  ;;  %v5901_v44 = vor.u32 %v7749_v3, %v5898_v30  ;;  %v6490_v25 = vld [vmem:[%s8283_s28 + $0xab8] sm:$0xf0] }
 0x20a   : > { %4538 = vmatpush.bf16.msrb.mxu1 %v6093_v36  ;;  %v6301_v36 = vor.u32 %v7849_v27, %v6298_v29  ;;  %v4312_v40 = vpop.f32.mrf.mxu3  ;;  %v7901_v59 = vld [vmem:[%s8283_s28 + $0xacc] sm:$0xf]  ;;  %v6618_v22 = vld [vmem:[%s8283_s28 + $0xbb8] sm:$0xf0] }
 0x20b   : > { %4551 = vmatpush.bf16.msrb.mxu2 %v6221_v37  ;;  %v6154_v37 = vld [vmem:[%s8283_s28 + $0x818] sm:$0xf0]  ;;  %v7933_v63 = vld [vmem:[%s8283_s28 + $0xbcc] sm:$0xf] }
 0x20c   : > { %4564 = vmatpush.bf16.msrb.mxu3 %v6349_v60  ;;  %v7937_v60 = vld [vmem:[%s8283_s28 + $0xbec] sm:$0xf]  ;;  %v6157_v53 = vor.u32 %v7813_v23, %v6154_v37  ;;  %v6637_v19 = vor.u32 %v7933_v63, %v6634_v6  ;;  %v6746_v26 = vld [vmem:[%s8283_s28 + $0xcb8] sm:$0xf0] }
 0x20d   : > { %4526 = vmatpush.bf16.msrb.mxu0 %v5949_v54  ;;  %v8001_v54 = vld [vmem:[%s8283_s28 + $0xdec] sm:$0xf]  ;;  %v6653_v57 = vor.u32 %v7937_v60, %v6650_v45  ;;  %v6874_v28 = vld [vmem:[%s8283_s28 + $0xdb8] sm:$0xf0] }
 0x20e   : > { %4539 = vmatpush.bf16.msrb.mxu1 %v6077_v4  ;;  %v6906_v4 = vld [vmem:[%s8283_s28 + $0xdf8] sm:$0xf0]  ;;  %v7965_v15 = vld [vmem:[%s8283_s28 + $0xccc] sm:$0xf] }
 0x20f   : > { %4552 = vmatpush.bf16.msrb.mxu2 %v6205_v55  ;;  %v6285_v55 = vor.u32 %v7845_v38, %v6282_v39  ;;  %v6909_v10 = vor.u32 %v8001_v54, %v6906_v4  ;;  %v7997_v9 = vld [vmem:[%s8283_s28 + $0xdcc] sm:$0xf]  ;;  %v6474_v3 = vld [vmem:[%s8283_s28 + $0xa98] sm:$0xf0] }
 0x210   : > { %4565 = vmatpush.bf16.msrb.mxu3 %v6333_v62  ;;  %v6506_v62 = vld [vmem:[%s8283_s28 + $0xad8] sm:$0xf0]  ;;  %v7929_v0 = vld [vmem:[%s8283_s28 + $0xbac] sm:$0xf]  ;;  %v6893_v5 = vor.u32 %v7997_v9, %v6890_v11 }
 0x211   : > { %4527 = vmatpush.bf16.msrb.mxu0 %v5933_v12  ;;  %v6509_v12 = vor.u32 %v7901_v59, %v6506_v62  ;;  %v7993_v1 = vld [vmem:[%s8283_s28 + $0xdac] sm:$0xf]  ;;  %v6621_v27 = vor.u32 %v7929_v0, %v6618_v22  ;;  %v6602_v30 = vld [vmem:[%s8283_s28 + $0xb98] sm:$0xf0] }
 0x212   : > { %4540 = vmatpush.bf16.msrb.mxu1 %v6061_v20  ;;  %v6765_v20 = vor.u32 %v7965_v15, %v6762_v7  ;;  %v7989_v33 = vld [vmem:[%s8283_s28 + $0xd8c] sm:$0xf]  ;;  %v6858_v41 = vld [vmem:[%s8283_s28 + $0xd98] sm:$0xf0] }
 0x213   : > { %4553 = vmatpush.bf16.msrb.mxu2 %v6189_v24  ;;  %v7897_v24 = vld [vmem:[%s8283_s28 + $0xaac] sm:$0xf]  ;;  %v6458_v40 = vld [vmem:[%s8283_s28 + $0xa78] sm:$0xf0]  ;;  %v6861_v43 = vor.u32 %v7989_v33, %v6858_v41 }
 0x214   : > { %4566 = vmatpush.bf16.msrb.mxu3 %v6317_v34  ;;  %v7961_v34 = vld [vmem:[%s8283_s28 + $0xcac] sm:$0xf]  ;;  %v6842_v51 = vld [vmem:[%s8283_s28 + $0xd78] sm:$0xf0] }
 0x215   : > { %4528 = vmatpush.bf16.msrb.mxu0 %v5917_v21  ;;  %v6749_v29 = vor.u32 %v7961_v34, %v6746_v26  ;;  %v7893_v21 = vld [vmem:[%s8283_s28 + $0xa8c] sm:$0xf]  ;;  %v6570_v59 = vld [vmem:[%s8283_s28 + $0xb58] sm:$0xf0] }
 0x216   : > { %4541 = vmatpush.bf16.msrb.mxu1 %v6045_v31  ;;  %v7957_v31 = vld [vmem:[%s8283_s28 + $0xc8c] sm:$0xf]  ;;  %v6477_v35 = vor.u32 %v7893_v21, %v6474_v3  ;;  %v6698_v63 = vld [vmem:[%s8283_s28 + $0xc58] sm:$0xf0] }
 0x217   : > { %4554 = vmatpush.bf16.msrb.mxu2 %v6173_v32  ;;  %v6730_v32 = vld [vmem:[%s8283_s28 + $0xc98] sm:$0xf0]  ;;  %v7889_v39 = vld [vmem:[%s8283_s28 + $0xa6c] sm:$0xf] }
 0x218   : > { %4567 = vmatpush.bf16.msrb.mxu3 %v6301_v36  ;;  %v6733_v38 = vor.u32 %v7957_v31, %v6730_v32  ;;  %v7921_v42 = vld [vmem:[%s8283_s28 + $0xb6c] sm:$0xf]  ;;  %v6826_v7 = vld [vmem:[%s8283_s28 + $0xd58] sm:$0xf0] }
 0x219   : > { %4529 = vmatpush.bf16.msrb.mxu0 %v5901_v44  ;;  %v6586_v44 = vld [vmem:[%s8283_s28 + $0xb78] sm:$0xf0]  ;;  %v7953_v45 = vld [vmem:[%s8283_s28 + $0xc6c] sm:$0xf] }
 0x21a   : > { %4542 = vmatpush.bf16.msrb.mxu1 %v6029_v52  ;;  %v4336_v36 = vpop.f32.mrf.mxu1  ;;  %v7985_v46 = vld [vmem:[%s8283_s28 + $0xd6c] sm:$0xf]  ;;  %v6461_v52 = vor.u32 %v7889_v39, %v6458_v40  ;;  %v6426_v0 = vld [vmem:[%s8283_s28 + $0xa38] sm:$0xf0] }
 0x21b   : > { %4555 = vmatpush.bf16.msrb.mxu2 %v6157_v53  ;;  %v6589_v53 = vor.u32 %v7921_v42, %v6586_v44  ;;  %v7885_v4 = vld [vmem:[%s8283_s28 + $0xa4c] sm:$0xf]  ;;  %v6554_v34 = vld [vmem:[%s8283_s28 + $0xb38] sm:$0xf0] }
 0x21c   : > { %4568 = vmatpush.bf16.msrb.mxu3 %v6285_v55  ;;  %4530 = vmatmul.bf16.vlgmr.msrb.gmra.mxu0 %v8425_v61  ;;  %v6493_v61 = vor.u32 %v7897_v24, %v6490_v25  ;;  %v6442_v55 = vld [vmem:[%s8283_s28 + $0xa58] sm:$0xf0]  ;;  %v7949_v62 = vld [vmem:[%s8283_s28 + $0xc4c] sm:$0xf] }
 0x21d   : > { %4574 = vmatpush.bf16.msra.mxu0 %v6525_v56  ;;  %4543 = vmatmul.bf16.vlgmr.msrb.gmra.mxu1 %v8430_v2  ;;  %v6877_v2 = vor.u32 %v7993_v1, %v6874_v28  ;;  %v7917_v56 = vld [vmem:[%s8283_s28 + $0xb4c] sm:$0xf]  ;;  %v6445_v11 = vor.u32 %v7885_v4, %v6442_v55  ;;  %v6701_v24 = vor.u32 %v7949_v62, %v6698_v63  ;;  %v6682_v1 = vld [vmem:[%s8283_s28 + $0xc38] sm:$0xf0] }
 0x21e   : > { %4587 = vmatpush.bf16.msra.mxu1 %v6653_v57  ;;  %4556 = vmatmul.bf16.vlgmr.msrb.gmra.mxu2 %v8518_v13  ;;  %v7925_v13 = vld [vmem:[%s8283_s28 + $0xb8c] sm:$0xf]  ;;  %v6845_v57 = vor.u32 %v7985_v46, %v6842_v51  ;;  %v6410_v21 = vld [vmem:[%s8283_s28 + $0xa18] sm:$0xf0] }
 0x21f   : > { %4600 = vmatpush.bf16.msra.mxu2 %v6781_v58  ;;  %4569 = vmatmul.bf16.vlgmr.msrb.gmra.mxu3 %v8524_v17  ;;  %v4323_v17 = vpop.f32.mrf.mxu0  ;;  %v6605_v37 = vor.u32 %v7925_v13, %v6602_v30  ;;  %v7981_v15 = vld [vmem:[%s8283_s28 + $0xd4c] sm:$0xf]  ;;  %v6538_v30 = vld [vmem:[%s8283_s28 + $0xb18] sm:$0xf0] }
 0x220   : > { %4613 = vmatpush.bf16.msra.mxu3 %v6909_v10  ;;  %v4324_v23 = vadd.f32 %v4323_v17, %v9416_v14  ;;  %v6714_v14 = vld [vmem:[%s8283_s28 + $0xc78] sm:$0xf0]  ;;  %v7881_v25 = vld [vmem:[%s8283_s28 + $0xa2c] sm:$0xf]  ;;  %v6829_v22 = vor.u32 %v7981_v15, %v6826_v7 }
 0x221   : > { %4575 = vmatpush.bf16.msra.mxu0 %v6509_v12  ;;  %v6717_v54 = vor.u32 %v7953_v45, %v6714_v14  ;;  %v4349_v58 = vpop.f32.mrf.mxu2  ;;  %v7945_v26 = vld [vmem:[%s8283_s28 + $0xc2c] sm:$0xf]  ;;  %v6666_v17 = vld [vmem:[%s8283_s28 + $0xc18] sm:$0xf0] }
 0x222   : > { %4588 = vmatpush.bf16.msra.mxu1 %v6637_v19  ;;  %v4337_v60 = vadd.f32 %v4336_v36, %v4324_v23  ;;  %v4362_v6 = vpop.f32.mrf.mxu3  ;;  %v4338_v12 = vpop.f32.mrf.mxu1  ;;  %v7977_v28 = vld [vmem:[%s8283_s28 + $0xd2c] sm:$0xf]  ;;  %v6685_v13 = vor.u32 %v7945_v26, %v6682_v1  ;;  %v6794_v41 = vld [vmem:[%s8283_s28 + $0xd18] sm:$0xf0] }
 0x223   : > { %4601 = vmatpush.bf16.msra.mxu2 %v6765_v20  ;;  %v6573_v20 = vor.u32 %v7917_v56, %v6570_v59  ;;  %v7941_v31 = vld [vmem:[%s8283_s28 + $0xc0c] sm:$0xf]  ;;  %v7034_v36 = vld [vmem:[%s8283_s28 + $0xef8] sm:$0xf0] }
 0x224   : > { %4614 = vmatpush.bf16.msra.mxu3 %v6893_v5  ;;  %v4350_v10 = vadd.f32 %v4349_v58, %v4337_v60  ;;  %v7913_v5 = vld [vmem:[%s8283_s28 + $0xb2c] sm:$0xf]  ;;  %v7162_v40 = vld [vmem:[%s8283_s28 + $0xff8] sm:$0xf0]  ;;  %v6669_v44 = vor.u32 %v7941_v31, %v6666_v17 }
 0x225   : > { %4576 = vmatpush.bf16.msra.mxu0 %v6493_v61  ;;  %v6810_v61 = vld [vmem:[%s8283_s28 + $0xd38] sm:$0xf0]  ;;  %v6557_v3 = vor.u32 %v7913_v5, %v6554_v34  ;;  %v7973_v33 = vld [vmem:[%s8283_s28 + $0xd0c] sm:$0xf] }
 0x226   : > { %4589 = vmatpush.bf16.msra.mxu1 %v6621_v27  ;;  %v9487_v19 = vadd.f32 %v4362_v6, %v4350_v10  ;;  %v6429_v27 = vor.u32 %v7881_v25, %v6426_v0  ;;  %v6813_v32 = vor.u32 %v7977_v28, %v6810_v61  ;;  %v8097_v42 = vld [vmem:[%s8283_s28 + $0x10ec] sm:$0xf]  ;;  %v7418_v14 = vld [vmem:[%s8283_s28 + $0x11f8] sm:$0xf0]  ;;  %v6797_v46 = vor.u32 %v7973_v33, %v6794_v41 }
 0x227   : > { %4602 = vmatpush.bf16.msra.mxu2 %v6749_v29  ;;  %v4325_v9 = vpop.f32.mrf.mxu0  ;;  %v7877_v29 = vld [vmem:[%s8283_s28 + $0xa0c] sm:$0xf]  ;;  %v7018_v4 = vld [vmem:[%s8283_s28 + $0xed8] sm:$0xf0] }
 0x228   : > { %4615 = vmatpush.bf16.msra.mxu3 %v6877_v2  ;;  %v7909_v2 = vld [vmem:[%s8283_s28 + $0xb0c] sm:$0xf]  ;;  %v6413_v39 = vor.u32 %v7877_v29, %v6410_v21  ;;  %v7274_v59 = vld [vmem:[%s8283_s28 + $0x10d8] sm:$0xf0] }
 0x229   : > { %4577 = vmatpush.bf16.msra.mxu0 %v6477_v35  ;;  %v4351_v23 = vpop.f32.mrf.mxu2  ;;  %v8033_v35 = vld [vmem:[%s8283_s28 + $0xeec] sm:$0xf]  ;;  %v6541_v60 = vor.u32 %v7909_v2, %v6538_v30  ;;  %v7402_v63 = vld [vmem:[%s8283_s28 + $0x11d8] sm:$0xf0] }
 0x22a   : > { %4590 = vmatpush.bf16.msra.mxu1 %v6605_v37  ;;  %v8065_v37 = vld [vmem:[%s8283_s28 + $0xfec] sm:$0xf]  ;;  %v7037_v51 = vor.u32 %v8033_v35, %v7034_v36  ;;  %v7002_v9 = vld [vmem:[%s8283_s28 + $0xeb8] sm:$0xf0] }
 0x22b   : > { %4603 = vmatpush.bf16.msra.mxu2 %v6733_v38  ;;  %v4364_v38 = vpop.f32.mrf.mxu3  ;;  %v8129_v45 = vld [vmem:[%s8283_s28 + $0x11ec] sm:$0xf]  ;;  %v7258_v25 = vld [vmem:[%s8283_s28 + $0x10b8] sm:$0xf0] }
 0x22c   : > { %4616 = vmatpush.bf16.msra.mxu3 %v6861_v43  ;;  %v7290_v43 = vld [vmem:[%s8283_s28 + $0x10f8] sm:$0xf0]  ;;  %v8061_v55 = vld [vmem:[%s8283_s28 + $0xfcc] sm:$0xf]  ;;  %v7421_v56 = vor.u32 %v8129_v45, %v7418_v14 }
 0x22d   : > { %4578 = vmatpush.bf16.msra.mxu0 %v6461_v52  ;;  %v7165_v52 = vor.u32 %v8065_v37, %v7162_v40  ;;  %v8093_v58 = vld [vmem:[%s8283_s28 + $0x10cc] sm:$0xf]  ;;  %v7386_v5 = vld [vmem:[%s8283_s28 + $0x11b8] sm:$0xf0] }
 0x22e   : > { %4591 = vmatpush.bf16.msra.mxu1 %v6589_v53  ;;  %v7293_v53 = vor.u32 %v8097_v42, %v7290_v43  ;;  %v8125_v62 = vld [vmem:[%s8283_s28 + $0x11cc] sm:$0xf]  ;;  %v7277_v15 = vor.u32 %v8093_v58, %v7274_v59  ;;  %v6986_v1 = vld [vmem:[%s8283_s28 + $0xe98] sm:$0xf0] }
 0x22f   : > { %4604 = vmatpush.bf16.msra.mxu2 %v6717_v54  ;;  %v8029_v54 = vld [vmem:[%s8283_s28 + $0xecc] sm:$0xf]  ;;  %v7405_v12 = vor.u32 %v8125_v62, %v7402_v63  ;;  %v7114_v28 = vld [vmem:[%s8283_s28 + $0xf98] sm:$0xf0] }
 0x230   : > { %4617 = vmatpush.bf16.msra.mxu3 %v6845_v57  ;;  %v7146_v57 = vld [vmem:[%s8283_s28 + $0xfd8] sm:$0xf0]  ;;  %v7021_v10 = vor.u32 %v8029_v54, %v7018_v4  ;;  %v8025_v7 = vld [vmem:[%s8283_s28 + $0xeac] sm:$0xf] }
 0x231   : > { %4579 = vmatpush.bf16.msra.mxu0 %v6445_v11  ;;  %v7149_v6 = vor.u32 %v8061_v55, %v7146_v57  ;;  %v8057_v11 = vld [vmem:[%s8283_s28 + $0xfac] sm:$0xf]  ;;  %v7370_v21 = vld [vmem:[%s8283_s28 + $0x1198] sm:$0xf0] }
 0x232   : > { %4592 = vmatpush.bf16.msra.mxu1 %v6573_v20  ;;  %v7130_v20 = vld [vmem:[%s8283_s28 + $0xfb8] sm:$0xf0]  ;;  %v8121_v0 = vld [vmem:[%s8283_s28 + $0x11ac] sm:$0xf] }
 0x233   : > { %4605 = vmatpush.bf16.msra.mxu2 %v6701_v24  ;;  %v8089_v24 = vld [vmem:[%s8283_s28 + $0x10ac] sm:$0xf]  ;;  %v6970_v17 = vld [vmem:[%s8283_s28 + $0xe78] sm:$0xf0] }
 0x234   : > { %4618 = vmatpush.bf16.msra.mxu3 %v6829_v22  ;;  %v7133_v22 = vor.u32 %v8057_v11, %v7130_v20  ;;  %v7261_v34 = vor.u32 %v8089_v24, %v7258_v25  ;;  %v8021_v26 = vld [vmem:[%s8283_s28 + $0xe8c] sm:$0xf]  ;;  %v7098_v35 = vld [vmem:[%s8283_s28 + $0xf78] sm:$0xf0] }
 0x235   : > { %4580 = vmatpush.bf16.msra.mxu0 %v6429_v27  ;;  %v8085_v61 = vld [vmem:[%s8283_s28 + $0x108c] sm:$0xf]  ;;  %v7242_v27 = vld [vmem:[%s8283_s28 + $0x1098] sm:$0xf0] }
 0x236   : > { %4593 = vmatpush.bf16.msra.mxu1 %v6557_v3  ;;  %v8117_v29 = vld [vmem:[%s8283_s28 + $0x118c] sm:$0xf]  ;;  %v7245_v31 = vor.u32 %v8085_v61, %v7242_v27  ;;  %v7354_v38 = vld [vmem:[%s8283_s28 + $0x1178] sm:$0xf0] }
 0x237   : > { %4606 = vmatpush.bf16.msra.mxu2 %v6685_v13  ;;  %v6989_v13 = vor.u32 %v8021_v26, %v6986_v1  ;;  %v8049_v33 = vld [vmem:[%s8283_s28 + $0xf6c] sm:$0xf]  ;;  %v7373_v41 = vor.u32 %v8117_v29, %v7370_v21  ;;  %v7338_v55 = vld [vmem:[%s8283_s28 + $0x1158] sm:$0xf0] }
 0x238   : > { %4619 = vmatpush.bf16.msra.mxu3 %v6813_v32  ;;  %v8017_v32 = vld [vmem:[%s8283_s28 + $0xe6c] sm:$0xf]  ;;  %v7101_v40 = vor.u32 %v8049_v33, %v7098_v35  ;;  %v7322_v24 = vld [vmem:[%s8283_s28 + $0x1138] sm:$0xf0] }
 0x239   : > { %4581 = vmatpush.bf16.msra.mxu0 %v6413_v39  ;;  %v8081_v36 = vld [vmem:[%s8283_s28 + $0x106c] sm:$0xf]  ;;  %v6973_v39 = vor.u32 %v8017_v32, %v6970_v17  ;;  %v7050_v1 = vld [vmem:[%s8283_s28 + $0xf18] sm:$0xf0] }
 0x23a   : > { %4594 = vmatpush.bf16.msra.mxu1 %v6541_v60  ;;  %v4388_v2 = vpop.f32.mrf.mxu1  ;;  %v8113_v37 = vld [vmem:[%s8283_s28 + $0x116c] sm:$0xf]  ;;  %v6954_v60 = vld [vmem:[%s8283_s28 + $0xe58] sm:$0xf0] }
 0x23b   : > { %4607 = vmatpush.bf16.msra.mxu2 %v6669_v44  ;;  %v8013_v43 = vld [vmem:[%s8283_s28 + $0xe4c] sm:$0xf]  ;;  %v7357_v45 = vor.u32 %v8113_v37, %v7354_v38  ;;  %v7306_v27 = vld [vmem:[%s8283_s28 + $0x1118] sm:$0xf0] }
 0x23c   : > { %4620 = vmatpush.bf16.msra.mxu3 %v6797_v46  ;;  %4582 = vmatmul.bf16.vlgmr.msra.gmra.mxu0 %v8522_v16  ;;  %v7005_v16 = vor.u32 %v8025_v7, %v7002_v9  ;;  %v8045_v44 = vld [vmem:[%s8283_s28 + $0xf4c] sm:$0xf]  ;;  %v7082_v46 = vld [vmem:[%s8283_s28 + $0xf58] sm:$0xf0]  ;;  %v6957_v57 = vor.u32 %v8013_v43, %v6954_v60 }
 0x23d   : > { %4626 = vmatpush.bf16.msrb.mxu0 %v7037_v51  ;;  %4595 = vmatmul.bf16.vlgmr.msra.gmra.mxu1 %v8526_v18  ;;  %v7389_v18 = vor.u32 %v8121_v0, %v7386_v5  ;;  %v8077_v51 = vld [vmem:[%s8283_s28 + $0x104c] sm:$0xf]  ;;  %v7085_v62 = vor.u32 %v8045_v44, %v7082_v46  ;;  %v7066_v9 = vld [vmem:[%s8283_s28 + $0xf38] sm:$0xf0] }
 0x23e   : > { %4639 = vmatpush.bf16.msrb.mxu1 %v7165_v52  ;;  %4608 = vmatmul.bf16.vlgmr.msra.gmra.mxu2 %v8584_v47  ;;  %v8053_v47 = vld [vmem:[%s8283_s28 + $0xf8c] sm:$0xf]  ;;  %v7210_v52 = vld [vmem:[%s8283_s28 + $0x1058] sm:$0xf0] }
 0x23f   : > { %4652 = vmatpush.bf16.msrb.mxu2 %v7293_v53  ;;  %4621 = vmatmul.bf16.vlgmr.msra.gmra.mxu3 %v8588_v49  ;;  %v4375_v49 = vpop.f32.mrf.mxu0  ;;  %v7117_v30 = vor.u32 %v8053_v47, %v7114_v28  ;;  %v8109_v4 = vld [vmem:[%s8283_s28 + $0x114c] sm:$0xf]  ;;  %v7213_v63 = vor.u32 %v8077_v51, %v7210_v52 }
 0x240   : > { %4665 = vmatpush.bf16.msrb.mxu3 %v7421_v56  ;;  %v4376_v3 = vadd.f32 %v4375_v49, %v9487_v19  ;;  %v7226_v19 = vld [vmem:[%s8283_s28 + $0x1078] sm:$0xf0]  ;;  %v7341_v7 = vor.u32 %v8109_v4, %v7338_v55  ;;  %v8073_v11 = vld [vmem:[%s8283_s28 + $0x102c] sm:$0xf] }
 0x241   : > { %4627 = vmatpush.bf16.msrb.mxu0 %v7021_v10  ;;  %v7229_v42 = vor.u32 %v8081_v36, %v7226_v19  ;;  %v4401_v14 = vpop.f32.mrf.mxu2  ;;  %v8009_v10 = vld [vmem:[%s8283_s28 + $0xe2c] sm:$0xf] }
 0x242   : > { %4640 = vmatpush.bf16.msrb.mxu1 %v7149_v6  ;;  %v4389_v23 = vadd.f32 %v4388_v2, %v4376_v3  ;;  %v4414_v54 = vpop.f32.mrf.mxu3  ;;  %v4390_v58 = vpop.f32.mrf.mxu1  ;;  %v6938_v6 = vld [vmem:[%s8283_s28 + $0xe38] sm:$0xf0]  ;;  %v8105_v20 = vld [vmem:[%s8283_s28 + $0x112c] sm:$0xf]  ;;  %v8184_v2 = vld [vmem:[#allocation1] sm:$0xff] }
 0x243   : > { %4653 = vmatpush.bf16.msrb.mxu2 %v7277_v15  ;;  %v8041_v15 = vld [vmem:[%s8283_s28 + $0xf2c] sm:$0xf]  ;;  %v6941_v25 = vor.u32 %v8009_v10, %v6938_v6  ;;  %v7325_v26 = vor.u32 %v8105_v20, %v7322_v24 }
 0x244   : > { %4666 = vmatpush.bf16.msrb.mxu3 %v7405_v12  ;;  %v4402_v53 = vadd.f32 %v4401_v14, %v4389_v23  ;;  %v7194_v12 = vld [vmem:[%s8283_s28 + $0x1038] sm:$0xf0]  ;;  %v7069_v0 = vor.u32 %v8041_v15, %v7066_v9  ;;  %v8069_v47 = vld [vmem:[%s8283_s28 + $0x100c] sm:$0xf] }
 0x245   : > { %4628 = vmatpush.bf16.msrb.mxu0 %v7005_v16  ;;  %v7197_v5 = vor.u32 %v8073_v11, %v7194_v12  ;;  %v8005_v16 = vld [vmem:[%s8283_s28 + $0xe0c] sm:$0xf] }
 0x246   : > { %4641 = vmatpush.bf16.msrb.mxu1 %v7133_v22  ;;  %v4415_v59 = vadd.f32 %v4414_v54, %v4402_v53  ;;  %v6922_v22 = vld [vmem:[%s8283_s28 + $0xe18] sm:$0xf0]  ;;  %v8101_v61 = vld [vmem:[%s8283_s28 + $0x110c] sm:$0xf] }
 0x247   : > { %4654 = vmatpush.bf16.msrb.mxu2 %v7261_v34  ;;  %v4377_v56 = vpop.f32.mrf.mxu0  ;;  %v8037_v34 = vld [vmem:[%s8283_s28 + $0xf0c] sm:$0xf]  ;;  %v6925_v29 = vor.u32 %v8005_v16, %v6922_v22 }
 0x248   : > { %4667 = vmatpush.bf16.msrb.mxu3 %v7389_v18  ;;  %v7178_v18 = vld [vmem:[%s8283_s28 + $0x1018] sm:$0xf0]  ;;  %v7053_v21 = vor.u32 %v8037_v34, %v7050_v1 }
 0x249   : > { %4629 = vmatpush.bf16.msrb.mxu0 %v6989_v13  ;;  %v4403_v28 = vpop.f32.mrf.mxu2  ;;  %v7181_v3 = vor.u32 %v8069_v47, %v7178_v18  ;;  %v7309_v13 = vor.u32 %v8101_v61, %v7306_v27 }
 0x24a   : > { %4642 = vmatpush.bf16.msrb.mxu1 %v7117_v30  ;;  %v4416_v49 = vpop.f32.mrf.mxu3  ;;  %v8185_v30 = vld [vmem:[#allocation1 + $0x9] sm:$0xff] }
 0x24b   : > { %4655 = vmatpush.bf16.msrb.mxu2 %v7245_v31 }
 0x24c   : > { %4668 = vmatpush.bf16.msrb.mxu3 %v7373_v41 }
 0x24d   : > { %4630 = vmatpush.bf16.msrb.mxu0 %v6973_v39 }
 0x24e   : > { %4643 = vmatpush.bf16.msrb.mxu1 %v7101_v40 }
 0x24f   : > { %4656 = vmatpush.bf16.msrb.mxu2 %v7229_v42 }
 0x250   : > { %4669 = vmatpush.bf16.msrb.mxu3 %v7357_v45 }
 0x251   : > { %4631 = vmatpush.bf16.msrb.mxu0 %v6957_v57 }
 0x252   : > { %4644 = vmatpush.bf16.msrb.mxu1 %v7085_v62 }
 0x253   : > { %4657 = vmatpush.bf16.msrb.mxu2 %v7213_v63 }
 0x254   : > { %4670 = vmatpush.bf16.msrb.mxu3 %v7341_v7 }
 0x255   : > { %4632 = vmatpush.bf16.msrb.mxu0 %v6941_v25 }
 0x256   : > { %4645 = vmatpush.bf16.msrb.mxu1 %v7069_v0 }
 0x257   : > { %4658 = vmatpush.bf16.msrb.mxu2 %v7197_v5 }
 0x258   : > { %4671 = vmatpush.bf16.msrb.mxu3 %v7325_v26 }
 0x259   : > { %4633 = vmatpush.bf16.msrb.mxu0 %v6925_v29  ;;  %v4427_v31 = vpop.f32.mrf.mxu0 }
 0x25a   : > { %4646 = vmatpush.bf16.msrb.mxu1 %v7053_v21  ;;  %v4428_v32 = vadd.f32 %v4427_v31, %v4415_v59  ;;  %v4440_v17 = vpop.f32.mrf.mxu1 }
 0x25b   : > { %4659 = vmatpush.bf16.msrb.mxu2 %v7181_v3  ;;  %v240_v3 = vld [vmem:[#allocation2] sm:$0xff] }
 0x25c   : > { %4672 = vmatpush.bf16.msrb.mxu3 %v7309_v13  ;;  %4634 = vmatmul.bf16.vlgmr.msrb.gmra.mxu0 %v8586_v48  ;;  %v4441_v33 = vadd.f32 %v4440_v17, %v4428_v32 }
 0x25d   : > { %4647 = vmatmul.bf16.vlgmr.msrb.gmra.mxu1 %v8590_v50 }
 0x25e   : > { %4660 = vmatmul.bf16.vlgmr.msrb.gmra.mxu2 %v8184_v2  ;;  %v4683_v29 = vrot.slane %v4441_v33, 4 }
 0x25f   : > { %4673 = vmatmul.bf16.vlgmr.msrb.gmra.mxu3 %v8185_v30 }
 0x261   : > { %v4453_v41 = vpop.f32.mrf.mxu2  ;;  %v4429_v35 = vpop.f32.mrf.mxu0 }
 0x262   : > { %v4466_v23 = vpop.f32.mrf.mxu3  ;;  %v4442_v19 = vpop.f32.mrf.mxu1 }
 0x263   : > { %v4467_v36 = vadd.f32 %v4466_v23, %v4453_v41 }
 0x269   : > { %v4455_v37 = vpop.f32.mrf.mxu2 }
 0x26a   : > { %v4468_v38 = vpop.f32.mrf.mxu3 }
 0x279   : > { %v4479_v39 = vpop.f32.mrf.mxu0 }
 0x27a   : > { %v4480_v40 = vadd.f32 %v4479_v39, %v4467_v36  ;;  %v4492_v48 = vpop.f32.mrf.mxu1 }
 0x27c   : > { %v4493_v42 = vadd.f32 %v4492_v48, %v4480_v40 }
 0x281   : > { %v4505_v50 = vpop.f32.mrf.mxu2  ;;  %v4481_v45 = vpop.f32.mrf.mxu0 }
 0x282   : > { %v4506_v43 = vadd.f32 %v4505_v50, %v4493_v42  ;;  %v4518_v60 = vpop.f32.mrf.mxu3  ;;  %v4494_v14 = vpop.f32.mrf.mxu1 }
 0x284   : > { %v4519_v44 = vadd.f32 %v4518_v60, %v4506_v43 }
 0x289   : > { %v4507_v46 = vpop.f32.mrf.mxu2 }
 0x28a   : > { %v4520_v51 = vpop.f32.mrf.mxu3 }
 0x299   : > { %v4531_v52 = vpop.f32.mrf.mxu0 }
 0x29a   : > { %v4544_v53 = vpop.f32.mrf.mxu1  ;;  %v4532_v63 = vadd.f32 %v4531_v52, %v4519_v44 }
 0x29c   : > { %v4545_v9 = vadd.f32 %v4544_v53, %v4532_v63 }
 0x2a1   : > { %v4557_v54 = vpop.f32.mrf.mxu2  ;;  %v4533_v55 = vpop.f32.mrf.mxu0 }
 0x2a2   : > { %v4570_v4 = vpop.f32.mrf.mxu3  ;;  %v4546_v56 = vpop.f32.mrf.mxu1  ;;  %v4558_v11 = vadd.f32 %v4557_v54, %v4545_v9 }
 0x2a4   : > { %v4571_v24 = vadd.f32 %v4570_v4, %v4558_v11 }
 0x2a9   : > { %v4559_v57 = vpop.f32.mrf.mxu2 }
 0x2aa   : > { %v4572_v58 = vpop.f32.mrf.mxu3 }
 0x2b9   : > { %v4583_v59 = vpop.f32.mrf.mxu0 }
 0x2ba   : > { %v4596_v62 = vpop.f32.mrf.mxu1  ;;  %v4584_v25 = vadd.f32 %v4583_v59, %v4571_v24 }
 0x2bc   : > { %v4597_v0 = vadd.f32 %v4596_v62, %v4584_v25 }
 0x2c1   : > { %v4609_v10 = vpop.f32.mrf.mxu2  ;;  %v4585_v15 = vpop.f32.mrf.mxu0 }
 0x2c2   : > { %v4622_v6 = vpop.f32.mrf.mxu3  ;;  %v4598_v7 = vpop.f32.mrf.mxu1  ;;  %v4610_v5 = vadd.f32 %v4609_v10, %v4597_v0 }
 0x2c4   : > { %v4623_v16 = vadd.f32 %v4622_v6, %v4610_v5 }
 0x2c9   : > { %v4611_v12 = vpop.f32.mrf.mxu2 }
 0x2ca   : > { %v4624_v20 = vpop.f32.mrf.mxu3 }
 0x2d9   : > { %v4635_v22 = vpop.f32.mrf.mxu0 }
 0x2da   : > { %v4648_v34 = vpop.f32.mrf.mxu1  ;;  %v4636_v26 = vadd.f32 %v4635_v22, %v4623_v16 }
 0x2dc   : > { %v4649_v1 = vadd.f32 %v4648_v34, %v4636_v26 }
 0x2e1   : > { %v4661_v47 = vpop.f32.mrf.mxu2  ;;  %v4637_v61 = vpop.f32.mrf.mxu0 }
 0x2e2   : > { %v4662_v18 = vadd.f32 %v4661_v47, %v4649_v1  ;;  %v4674_v28 = vpop.f32.mrf.mxu3  ;;  %v4650_v27 = vpop.f32.mrf.mxu1 }
 0x2e4   : > { %v4675_v49 = vadd.f32 %v4674_v28, %v4662_v18 }
 0x2e6   : > { %v4684_v21 = vrot.slane %v4675_v49, 2 }
 0x2e8   : > { %v4688_v13 = vsel %vm4687_vm1, %v4683_v29, %v4684_v21  ;;  %4697 = sbr.rel (%p7422_p6) target bundleno = 1176 (0x498), region = 48 }
 0x2e9   : > { %v4690_v2 = vsel %vm4689_vm2, %v9287_v8, %v4688_v13  ;;  %v4663_v30 = vpop.f32.mrf.mxu2 }
 0x2ea   : > { %v4692_v31 = vadd.f32 %v4690_v2, %v240_v3  ;;  %v4676_v32 = vpop.f32.mrf.mxu3 }
 0x2ec   : > { %4693 = vst [vmem:[#allocation2] sm:$0xff] %v4692_v31 }
 0x2ed   : > { %v8139_v17 = vld [vmem:[%s9698_s3 + $0x38] sm:$0xff]  ;;  %v8138_v23 = vld [vmem:[%s9698_s3 + $0x30] sm:$0xff]  ;;  %v8137_v37 = vld [vmem:[%s9698_s3 + $0x28] sm:$0xff]  ;;  %vm5040_vm3 = vcmask 74752  }
 0x2ee   : > { %v8147_v33 = vld [vmem:[%s9698_s3 + $0x78] sm:$0xff]  ;;  %4988 = vmatpush.bf16.msra.mxu0 %v8139_v17  ;;  %v8146_v35 = vld [vmem:[%s9698_s3 + $0x70] sm:$0xff]  ;;  %v8145_v38 = vld [vmem:[%s9698_s3 + $0x68] sm:$0xff] }
 0x2ef   : > { %v8155_v41 = vld [vmem:[%s9698_s3 + $0xb8] sm:$0xff]  ;;  %5001 = vmatpush.bf16.msra.mxu1 %v8147_v33  ;;  %v8154_v36 = vld [vmem:[%s9698_s3 + $0xb0] sm:$0xff]  ;;  %v8153_v39 = vld [vmem:[%s9698_s3 + $0xa8] sm:$0xff] }
 0x2f0   : > { %v8163_v8 = vld [vmem:[%s9698_s3 + $0xf8] sm:$0xff]  ;;  %5014 = vmatpush.bf16.msra.mxu2 %v8155_v41  ;;  %v8162_v19 = vld [vmem:[%s9698_s3 + $0xf0] sm:$0xff]  ;;  %v8161_v40 = vld [vmem:[%s9698_s3 + $0xe8] sm:$0xff] }
 0x2f1   : > { %5027 = vmatpush.bf16.msra.mxu3 %v8163_v8  ;;  %v8136_v48 = vld [vmem:[%s9698_s3 + $0x20] sm:$0xff]  ;;  %v8135_v51 = vld [vmem:[%s9698_s3 + $0x18] sm:$0xff]  ;;  %v8134_v63 = vld [vmem:[%s9698_s3 + $0x10] sm:$0xff] }
 0x2f2   : > { %4989 = vmatpush.bf16.msra.mxu0 %v8138_v23  ;;  %v8144_v42 = vld [vmem:[%s9698_s3 + $0x60] sm:$0xff]  ;;  %v8143_v52 = vld [vmem:[%s9698_s3 + $0x58] sm:$0xff]  ;;  %v8142_v10 = vld [vmem:[%s9698_s3 + $0x50] sm:$0xff] }
 0x2f3   : > { %5002 = vmatpush.bf16.msra.mxu1 %v8146_v35  ;;  %v8152_v50 = vld [vmem:[%s9698_s3 + $0xa0] sm:$0xff]  ;;  %v8151_v55 = vld [vmem:[%s9698_s3 + $0x98] sm:$0xff]  ;;  %v4698_v57 = vld [vmem:[#allocation2] sm:$0xff] }
 0x2f4   : > { %5015 = vmatpush.bf16.msra.mxu2 %v8154_v36  ;;  %v8160_v43 = vld [vmem:[%s9698_s3 + $0xe0] sm:$0xff]  ;;  %v8159_v56 = vld [vmem:[%s9698_s3 + $0xd8] sm:$0xff]  ;;  %v8150_v15 = vld [vmem:[%s9698_s3 + $0x90] sm:$0xff] }
 0x2f5   : > { %5028 = vmatpush.bf16.msra.mxu3 %v8162_v19  ;;  %v4699_v60 = vld [vmem:[%s9697_s2] sm:$0xf]  ;;  %v8158_v7 = vld [vmem:[%s9698_s3 + $0xd0] sm:$0xff]  ;;  %v8133_v11 = vld [vmem:[%s9698_s3 + $0x8] sm:$0xff] }
 0x2f6   : > { %4990 = vmatpush.bf16.msra.mxu0 %v8137_v37  ;;  %v4701_v44 = vperm.slane %v4699_v60, 0  ;;  %v4702_v45 = vperm.slane %v4699_v60, 1  ;;  %v4703_v14 = vperm.slane %v4699_v60, 2  ;;  %v4704_v46 = vperm.slane %v4699_v60, 3  ;;  %v8141_v12 = vld [vmem:[%s9698_s3 + $0x48] sm:$0xff]  ;;  %v8132_v25 = vld [vmem:[%s9698_s3] sm:$0xff] }
 0x2f7   : > { %5003 = vmatpush.bf16.msra.mxu1 %v8145_v38  ;;  %v8149_v20 = vld [vmem:[%s9698_s3 + $0x88] sm:$0xff]  ;;  %v8140_v0 = vld [vmem:[%s9698_s3 + $0x40] sm:$0xff] }
 0x2f8   : > { %5016 = vmatpush.bf16.msra.mxu2 %v8153_v39  ;;  %v4705_v53 = vrot.slane %v4702_v45, 6  ;;  %v4706_v54 = vrot.slane %v4703_v14, 4  ;;  %v4707_v4 = vrot.slane %v4704_v46, 2  ;;  %v8157_v24 = vld [vmem:[%s9698_s3 + $0xc8] sm:$0xff]  ;;  %v8148_v5 = vld [vmem:[%s9698_s3 + $0x80] sm:$0xff] }
 0x2f9   : > { %5029 = vmatpush.bf16.msra.mxu3 %v8161_v40  ;;  %v8156_v16 = vld [vmem:[%s9698_s3 + $0xc0] sm:$0xff] }
 0x2fa   : > { %4991 = vmatpush.bf16.msra.mxu0 %v8136_v48  ;;  %v4708_v58 = vsel %vm4685_vm0, %v4701_v44, %v4705_v53  ;;  %v4709_v59 = vsel %vm4687_vm1, %v4706_v54, %v4707_v4  ;;  %v8186_v27 = vld [vmem:[%s9699_s4] ss:$0 sm:$0xff] }
 0x2fb   : > { %5004 = vmatpush.bf16.msra.mxu1 %v8144_v42  ;;  %v4710_v62 = vsel %vm4689_vm2, %v4708_v58, %v4709_v59 }
 0x2fc   : > { %5017 = vmatpush.bf16.msra.mxu2 %v8152_v50  ;;  %v4712_v6 = vadd.f32 %v4710_v62, %v4698_v57 }
 0x2fd   : > { %5030 = vmatpush.bf16.msra.mxu3 %v8160_v43 }
 0x2fe   : > { %4992 = vmatpush.bf16.msra.mxu0 %v8135_v51  ;;  %v4713_v9 = vmax.f32 %v4712_v6, 0.0 }
 0x2ff   : > { %5005 = vmatpush.bf16.msra.mxu1 %v8143_v52 }
 0x300   : > { %5018 = vmatpush.bf16.msra.mxu2 %v8151_v55  ;;  %4715 = vst [vmem:[#allocation1] ss:$4 sm:$0xff] %v4713_v9 }
 0x301   : > { %5031 = vmatpush.bf16.msra.mxu3 %v8159_v56 }
 0x302   : > { %4993 = vmatpush.bf16.msra.mxu0 %v8134_v63 }
 0x303   : > { %5006 = vmatpush.bf16.msra.mxu1 %v8142_v10 }
 0x304   : > { %5019 = vmatpush.bf16.msra.mxu2 %v8150_v15 }
 0x305   : > { %5032 = vmatpush.bf16.msra.mxu3 %v8158_v7 }
 0x306   : > { %4994 = vmatpush.bf16.msra.mxu0 %v8133_v11 }
 0x307   : > { %5007 = vmatpush.bf16.msra.mxu1 %v8141_v12  ;;  %v4716_v22 = vld.sshfl [vmem:[#allocation1] sm:$0xff pattern:$0x73625140]  ;;  %v4717_v34 = vld.sshfl [vmem:[#allocation1 + $0x8] sm:$0xff pattern:$0x73625140] }
 0x308   : > { %5020 = vmatpush.bf16.msra.mxu2 %v8149_v20  ;;  %v4724_v26 = vpack.c.bf16 %v4716_v22, %v4716_v22  ;;  %v4725_v1 = vpack.c.bf16 %v4717_v34, %v4717_v34  ;;  %v4718_v47 = vld.sshfl [vmem:[#allocation1 + $0x10] sm:$0xff pattern:$0x73625140]  ;;  %v4719_v18 = vld.sshfl [vmem:[#allocation1 + $0x18] sm:$0xff pattern:$0x73625140] }
 0x309   : > { %5033 = vmatpush.bf16.msra.mxu3 %v8157_v24  ;;  %v4726_v28 = vpack.c.bf16 %v4718_v47, %v4718_v47  ;;  %v4727_v61 = vpack.c.bf16 %v4719_v18, %v4719_v18 }
 0x30a   : > { %4995 = vmatpush.bf16.msra.mxu0 %v8132_v25 }
 0x30b   : > { %5008 = vmatpush.bf16.msra.mxu1 %v8140_v0 }
 0x30c   : > { %5021 = vmatpush.bf16.msra.mxu2 %v8148_v5 }
 0x30d   : > { %5034 = vmatpush.bf16.msra.mxu3 %v8156_v16  ;;  %4996 = vmatmul.bf16.vlgmr.msra.gmra.mxu0 %v4724_v26 }
 0x30e   : > { %5009 = vmatmul.bf16.vlgmr.msra.gmra.mxu1 %v4725_v1 }
 0x30f   : > { %5022 = vmatmul.bf16.vlgmr.msra.gmra.mxu2 %v4726_v28 }
 0x310   : > { %5035 = vmatmul.bf16.vlgmr.msra.gmra.mxu3 %v4727_v61 }
 0x38a   : > { %v4997_v49 = vpop.f32.mrf.mxu0 }
 0x38b   : > { %v5010_v29 = vpop.f32.mrf.mxu1  ;;  %v4998_v21 = vadd.f32 %v8186_v27, %v4997_v49 }
 0x38d   : > { %v5011_v3 = vadd.f32 %v5010_v29, %v4998_v21 }
 0x392   : > { %v5023_v13 = vpop.f32.mrf.mxu2  ;;  %v4999_v31 = vpop.f32.mrf.mxu0 }
 0x393   : > { %v5036_v2 = vpop.f32.mrf.mxu3  ;;  %v5024_v30 = vadd.f32 %v5023_v13, %v5011_v3  ;;  %v5012_v32 = vpop.f32.mrf.mxu1 }
 0x395   : > { %v5037_v17 = vadd.f32 %v5036_v2, %v5024_v30 }
 0x397   : > { %v5041_v33 = vsel %vm5040_vm3, %v5037_v17, -inf }
 0x398   : > { %5042 = vmax.xlane.f32.xlu0 %v5041_v33 }
 0x39a   : > { %v5025_v41 = vpop.f32.mrf.mxu2 }
 0x39b   : > { %v5038_v8 = vpop.f32.mrf.mxu3 }
 0x40b   : > { %v5043_v23 = vpop.xlane.xlu0 %5042 }
 0x40c   : > { %v5044_v35 = vsub.f32 %v5037_v17, %v5043_v23 }
 0x40e   : > { %v5045_v36 = vmul.f32 1.442695, %v5044_v35 }
 0x410   : > { %8187 = vpow2.f32 %v5045_v36 }
 0x416   : > { %v8188_v19 = vpop.eup %8187 }
 0x417   : > { %v5047_v37 = vsel %vm5040_vm3, %v8188_v19, 0.0 }
 0x418   : > { %5048 = vadd.xlane.f32.xlu0 %v5047_v37 }
 0x48b   : > { %v5049_v38 = vpop.xlane.xlu0 %5048 }
 0x48c   : > { %8189 = vlog2.f32 %v5049_v38 }
 0x492   : > { %v8190_v39 = vpop.eup %8189 }
 0x493   : > { %v5051_v40 = vmul.f32 0.6931472, %v8190_v39 }
 0x495   : > { %v5052_v48 = vsub.f32 %v5044_v35, %v5051_v40 }
 0x497   : > { %5053 = vst.msk [vmem:[#allocation3] sm:$0x3] %vm5040_vm3, %v5052_v48 }
 0x498 PF: > { %p8168_p7 = scmp.eq.s32.totalorder %s8269_s19, 3  ;;  %s8232_s28 = smov [#allocation3]  }
 0x499   : > { %s5060_s29 = sshll.u32 %s8232_s28, 4  ;;  %s5062_s7 = sshll.u32 %s9700_s5, 4  ;;  %s5061_s29 = int_to_ptr.vmem [resolvable:$true] %s5060_s29  ;;  %s5063_s7 = int_to_ptr.hbm [resolvable:$true] %s5062_s7 }
 0x49a   : > { %8165 = dma.vmem_to_hbm [thread:$0]  (%p8168_p7), %s5061_s29, 32, %s5063_s7, [#allocation4]  }
 0x49b   : > { %8224 = dma.done.wait (%p8168_p7), [#allocation4], 32  }
 0x49c   : > { %8226 = vsyncadd (%p8168_p7), [#allocation4], 4294967264 }
 0x49d PF: > { %s16_s18 = sadd.s32 1, %s8229_s18  }
 0x49e   : > { %p13_p8 = scmp.ge.s32.totalorder %s16_s18, 6  }
 0x4a0   :  { %15 = sbr.rel (!%p13_p8) target bundleno = 1 (0x1), region = 78 }
 0x4a5   :  { %5076 = vsyncpa [#allocation4], 1 }
 0x4a6   :  { %5078 = vsyncpa [#allocation4 + $0x1], 1 }

</bundles_post_ra>
